<compile_context>
chip_gen: v7x
topology: tpu7x:2x2x1
jax: 0.10.0
libtpu: 0.0.40
codegen_flags: <defaults>
</compile_context>

<pallas_src>
import functools

import jax
import jax.numpy as jnp
from jax import lax
from jax.experimental import pallas as pl
from jax.experimental.pallas import tpu as pltpu

Q_MAX_16 = 2.0 ** 15 - 1
Q_MIN_16 = -2.0 ** 15
Q_MAX_8 = 2.0 ** 7 - 1
Q_MIN_8 = -2.0 ** 7

VMEM_LIMIT_BYTES = 48 * 1024 * 1024   # < v7x 64 MiB physical, > 32 MiB default scoped


def _quant(x, scale, qmin, qmax):
    # torch: round -> Hardtanh(qmin, qmax) -> * scale (round half-to-even, same as jnp)
    q = jnp.round(x / scale)
    q = jnp.clip(q, qmin, qmax)
    return q * scale


def _pad_to(n, m):
    return (n + m - 1) // m * m


def _pad2(x, rows, cols):
    r, c = x.shape
    if r == rows and c == cols:
        return x
    return jnp.pad(x, ((0, rows - r), (0, cols - c)))


def _choose_k_tiling(K):
    """Pick (tk, Kp). Prefer wide K tiles (MXU is 256-wide on v6e/v7x) unless
    the zero-pad waste over the minimal 128-multiple exceeds ~25%."""
    kp128 = _pad_to(K, 128)
    for tk in (512, 256):
        kp = _pad_to(K, tk)
        if kp * 4 <= kp128 * 5:
            return tk, kp
    return 128, kp128


def _mm_tiles(M, Kp, tk):
    """M tiling: 512-row tiles at real sizes, a single 8-aligned tile when tiny."""
    tm = 512 if M >= 512 else _pad_to(max(M, 8), 8)
    Mp = _pad_to(M, tm)
    return tm, Mp, (Mp // tm, Kp // tk)


# ----------------------------- Pallas kernels ------------------------------

def _mm_quant_kernel(a_ref, w_ref, b_ref, o_ref, acc_ref, *, c_s, x_s, relu):
    """Tiled bf16 matmul, f32 accumulate, fused quant_16 -> +bias -> quant_8 -> (relu)."""
    k = pl.program_id(1)

    @pl.when(k == 0)
    def _():
        acc_ref[...] = jnp.zeros_like(acc_ref)

    acc_ref[...] += jnp.dot(a_ref[...], w_ref[...],
                            preferred_element_type=jnp.float32)

    @pl.when(k == pl.num_programs(1) - 1)
    def _():
        c = _quant(acc_ref[...], c_s, Q_MIN_16, Q_MAX_16)   # quant_16(x - bias, C_s)
        x = c + b_ref[...]                                  # + bias
        x = _quant(x, x_s, Q_MIN_8, Q_MAX_8)                # quant_8(x, X_s)
        if relu:
            x = jnp.maximum(x, 0.0)
        o_ref[...] = x.astype(o_ref.dtype)


def _mm_quant_res_kernel(a_ref, w_ref, b_ref, id_ref, bnx_ref, bny_ref,
                         o_ref, acc_ref, *, c_s, x_s, a_s):
    """Same matmul + conv-quant epilogue, then fused residual merge:
    out*bn_x + id*bn_y -> quant_8(A_s) -> relu."""
    k = pl.program_id(1)

    @pl.when(k == 0)
    def _():
        acc_ref[...] = jnp.zeros_like(acc_ref)

    acc_ref[...] += jnp.dot(a_ref[...], w_ref[...],
                            preferred_element_type=jnp.float32)

    @pl.when(k == pl.num_programs(1) - 1)
    def _():
        c = _quant(acc_ref[...], c_s, Q_MIN_16, Q_MAX_16)
        x = c + b_ref[...]
        x = _quant(x, x_s, Q_MIN_8, Q_MAX_8)                # conv2 quantized output
        v = x * bnx_ref[...] + id_ref[...].astype(jnp.float32) * bny_ref[...]
        v = _quant(v, a_s, Q_MIN_8, Q_MAX_8)                # quant_8(out, A_s)
        o_ref[...] = jnp.maximum(v, 0.0).astype(o_ref.dtype)   # relu


# ----------------------------- kernel wrappers ------------------------------

def matmul_quant(a, p, relu, out_dtype=jnp.bfloat16):
    """a: (M, K) activation patches (bf16); p: prepared conv/fc params."""
    w, b, tk = p["w"], p["b"], p["tk"]
    Kp, Np = w.shape
    M = a.shape[0]
    tm, Mp, grid = _mm_tiles(M, Kp, tk)
    a_p = _pad2(a.astype(jnp.bfloat16), Mp, Kp)
    kernel = functools.partial(_mm_quant_kernel, c_s=float(p["c_s"]),
                               x_s=float(p["x_s"]), relu=bool(relu))
    out = pl.pallas_call(
        kernel,
        out_shape=jax.ShapeDtypeStruct((Mp, Np), out_dtype),
        grid_spec=pltpu.PrefetchScalarGridSpec(
            num_scalar_prefetch=0,
            grid=grid,
            in_specs=[
                pl.BlockSpec((tm, tk), lambda i, k: (i, k)),
                pl.BlockSpec((tk, Np), lambda i, k: (k, 0)),
                pl.BlockSpec((1, Np), lambda i, k: (0, 0)),
            ],
            out_specs=pl.BlockSpec((tm, Np), lambda i, k: (i, 0)),
            scratch_shapes=[pltpu.VMEM((tm, Np), jnp.float32)],
        ),
        compiler_params=pltpu.CompilerParams(
            dimension_semantics=("parallel", "arbitrary"),
            vmem_limit_bytes=VMEM_LIMIT_BYTES),
    )(a_p, w, b)
    return out[:M, :]


def matmul_quant_residual(a, p, id2d, bn_x, bn_y, a_s, out_dtype=jnp.bfloat16):
    """Conv matmul with the residual merge fused into the epilogue."""
    w, b, tk = p["w"], p["b"], p["tk"]
    Kp, Np = w.shape
    M = a.shape[0]
    tm, Mp, grid = _mm_tiles(M, Kp, tk)
    a_p = _pad2(a.astype(jnp.bfloat16), Mp, Kp)
    id_p = _pad2(id2d.astype(jnp.bfloat16), Mp, Np)
    kernel = functools.partial(_mm_quant_res_kernel, c_s=float(p["c_s"]),
                               x_s=float(p["x_s"]), a_s=float(a_s))
    out = pl.pallas_call(
        kernel,
        out_shape=jax.ShapeDtypeStruct((Mp, Np), out_dtype),
        grid_spec=pltpu.PrefetchScalarGridSpec(
            num_scalar_prefetch=0,
            grid=grid,
            in_specs=[
                pl.BlockSpec((tm, tk), lambda i, k: (i, k)),
                pl.BlockSpec((tk, Np), lambda i, k: (k, 0)),
                pl.BlockSpec((1, Np), lambda i, k: (0, 0)),
                pl.BlockSpec((tm, Np), lambda i, k: (i, 0)),
                pl.BlockSpec((1, Np), lambda i, k: (0, 0)),
                pl.BlockSpec((1, Np), lambda i, k: (0, 0)),
            ],
            out_specs=pl.BlockSpec((tm, Np), lambda i, k: (i, 0)),
            scratch_shapes=[pltpu.VMEM((tm, Np), jnp.float32)],
        ),
        compiler_params=pltpu.CompilerParams(
            dimension_semantics=("parallel", "arbitrary"),
            vmem_limit_bytes=VMEM_LIMIT_BYTES),
    )(a_p, w, b, id_p, bn_x, bn_y)
    return out[:M, :]


# ------------------------------ JAX glue ops --------------------------------

def _im2col(x, kh, kw, stride, pad):
    """x: (N, H, W, C) -> patches (N*Ho*Wo, kh*kw*C), ordered (kh, kw, Cin)."""
    N, H, W, C = x.shape
    xp = jnp.pad(x, ((0, 0), (pad, pad), (pad, pad), (0, 0)))
    Ho = (H + 2 * pad - kh) // stride + 1
    Wo = (W + 2 * pad - kw) // stride + 1
    cols = []
    for i in range(kh):
        for j in range(kw):
            cols.append(xp[:, i:i + stride * Ho:stride, j:j + stride * Wo:stride, :])
    patches = jnp.stack(cols, axis=3)                    # (N, Ho, Wo, kh*kw, C)
    return patches.reshape(N * Ho * Wo, kh * kw * C), (N, Ho, Wo)


def conv2d_quant(x, p, stride, pad, relu):
    patches, (N, Ho, Wo) = _im2col(x, p["kh"], p["kw"], stride, pad)
    y = matmul_quant(patches, p, relu)
    return y[:, :p["cout"]].reshape(N, Ho, Wo, p["cout"])


def conv2d_quant_residual(x, p, identity, bn_x, bn_y, a_s):
    """3x3 s1 p1 conv with fused residual merge (identity has same NHWC shape)."""
    patches, (N, Ho, Wo) = _im2col(x, p["kh"], p["kw"], 1, 1)
    cout = p["cout"]
    id2d = identity.reshape(N * Ho * Wo, cout)
    y = matmul_quant_residual(patches, p, id2d, bn_x, bn_y, a_s)
    return y[:, :cout].reshape(N, Ho, Wo, cout)


def max_pool_3x3_s2(x):
    neg_inf = jnp.array(-jnp.inf, dtype=x.dtype)
    return lax.reduce_window(x, neg_inf, lax.max,
                             window_dimensions=(1, 3, 3, 1),
                             window_strides=(1, 2, 2, 1),
                             padding=((0, 0), (1, 1), (1, 1), (0, 0)))


# ------------------------------ model blocks --------------------------------

def basic_block(x, p):
    out = conv2d_quant(x, p["conv1"], stride=1, pad=1, relu=True)   # conv1 + relu
    # conv2 + bn-merge with identity=x + quant_8(A_s) + relu, all in one kernel
    return conv2d_quant_residual(out, p["conv2"], x, p["bn_x"], p["bn_y"], p["a_s"])


def res_block(x, p):
    out = conv2d_quant(x, p["conv1"], stride=2, pad=1, relu=True)        # conv1 + relu
    identity = conv2d_quant(x, p["downsample"], stride=2, pad=0, relu=False)
    return conv2d_quant_residual(out, p["conv2"], identity,
                                 p["bn_x"], p["bn_y"], p["a_s"])


def resnet_forward(x_nchw, params):
    x = jnp.transpose(x_nchw, (0, 2, 3, 1)).astype(jnp.bfloat16)   # NCHW -> NHWC
    # FirstConv2d (7x7, s2, p3) + outer relu fused into the epilogue
    x = conv2d_quant(x, params["conv1"], stride=2, pad=3, relu=True)
    x = max_pool_3x3_s2(x)
    for blk in params["layer1"]:
        x = basic_block(x, blk)
    for name in ("layer2", "layer3", "layer4"):
        x = res_block(x, params[name][0])
        x = basic_block(x, params[name][1])
    x = jnp.mean(x.astype(jnp.float32), axis=(1, 2)).astype(jnp.bfloat16)  # AdaptiveAvgPool2d((1,1))
    fc = params["fc"]
    logits = matmul_quant(x, fc, relu=False, out_dtype=jnp.float32)
    return logits[:, :fc["cout"]]


# ------------------------------ parameters ----------------------------------

def init_params(key):
    """Raw params in the torch layouts (Cout, Cin, kh, kw) / (out, in)."""
    keys = list(jax.random.split(key, 64))
    kit = iter(keys)
    C_S, X_S, A_S = 2.0 ** -10, 2.0 ** -4, 2.0 ** -4   # synthetic power-of-two scales

    def conv_p(cin, cout, kh, kw):
        k1, k2 = jax.random.split(next(kit))
        fan_in = cin * kh * kw
        w = jax.random.normal(k1, (cout, cin, kh, kw), jnp.float32) / jnp.sqrt(float(fan_in))
        b = jax.random.normal(k2, (cout,), jnp.float32) * 0.1
        return {"w": w, "b": b, "c_s": C_S, "x_s": X_S}

    def bn_pair(c):
        k = next(kit)
        bx = jax.random.uniform(k, (c,), jnp.float32, 0.5, 1.5)
        by = jax.random.uniform(jax.random.fold_in(k, 1), (c,), jnp.float32, 0.5, 1.5)
        return bx, by

    def basic_block_p(cin, cout):
        bx, by = bn_pair(cout)
        return {"conv1": conv_p(cin, cout, 3, 3),
                "conv2": conv_p(cout, cout, 3, 3),
                "bn_x": bx, "bn_y": by, "a_s": A_S}

    def res_block_p(cin, cout):
        bx, by = bn_pair(cout)
        return {"conv1": conv_p(cin, cout, 3, 3),
                "downsample": conv_p(cin, cout, 1, 1),
                "conv2": conv_p(cout, cout, 3, 3),
                "bn_x": bx, "bn_y": by, "a_s": A_S}

    params = {
        "conv1": conv_p(3, 64, 7, 7),
        "layer1": [basic_block_p(64, 64), basic_block_p(64, 64)],
        "layer2": [res_block_p(64, 128), basic_block_p(128, 128)],
        "layer3": [res_block_p(128, 256), basic_block_p(256, 256)],
        "layer4": [res_block_p(256, 512), basic_block_p(512, 512)],
    }
    kw_, kb_ = jax.random.split(next(kit))
    params["fc"] = {
        "w": jax.random.normal(kw_, (100, 512), jnp.float32) / jnp.sqrt(512.0),
        "b": jax.random.normal(kb_, (100,), jnp.float32) * 0.1,
        "c_s": 2.0 ** -10, "x_s": 2.0 ** -6,
    }
    return params


def prepare_params(raw):
    """One-time hoist of all layout work: transpose to (kh*kw*Cin, Cout),
    pad K/N to tile multiples, cast weights to bf16, pad bias/bn rows."""

    def prep_conv(p):
        w, b = p["w"], p["b"]
        Cout, Cin, kh, kw = w.shape
        K = kh * kw * Cin
        tk, Kp = _choose_k_tiling(K)
        Np = _pad_to(Cout, 128)
        w2 = jnp.transpose(w, (2, 3, 1, 0)).reshape(K, Cout).astype(jnp.bfloat16)
        w_p = jnp.zeros((Kp, Np), jnp.bfloat16).at[:K, :Cout].set(w2)
        b_p = jnp.zeros((1, Np), jnp.float32).at[0, :Cout].set(b)
        return {"w": w_p, "b": b_p, "tk": tk, "kh": kh, "kw": kw,
                "cout": Cout, "c_s": p["c_s"], "x_s": p["x_s"]}

    def prep_bn(v, np_):
        return jnp.zeros((1, np_), jnp.float32).at[0, :v.shape[0]].set(v)

    def prep_block(p, has_down):
        c1 = prep_conv(p["conv1"])
        np_ = _pad_to(c1["cout"], 128)
        out = {"conv1": c1, "conv2": prep_conv(p["conv2"]),
               "bn_x": prep_bn(p["bn_x"], np_), "bn_y": prep_bn(p["bn_y"], np_),
               "a_s": p["a_s"]}
        if has_down:
            out["downsample"] = prep_conv(p["downsample"])
        return out

    def prep_fc(p):
        w, b = p["w"], p["b"]
        Cout, K = w.shape
        tk, Kp = _choose_k_tiling(K)
        Np = _pad_to(Cout, 128)
        w_p = jnp.zeros((Kp, Np), jnp.bfloat16).at[:K, :Cout].set(
            jnp.transpose(w).astype(jnp.bfloat16))
        b_p = jnp.zeros((1, Np), jnp.float32).at[0, :Cout].set(b)
        return {"w": w_p, "b": b_p, "tk": tk, "cout": Cout,
                "c_s": p["c_s"], "x_s": p["x_s"]}

    out = {"conv1": prep_conv(raw["conv1"]),
           "layer1": [prep_block(b, False) for b in raw["layer1"]],
           "fc": prep_fc(raw["fc"])}
    for name in ("layer2", "layer3", "layer4"):
        out[name] = [prep_block(raw[name][0], True),
                     prep_block(raw[name][1], False)]
    return out


if __name__ == "__main__":
    key = jax.random.PRNGKey(0)
    raw_params = init_params(key)
    params = prepare_params(raw_params)
    x = jax.random.normal(jax.random.fold_in(key, 999), (2, 3, 32, 32), jnp.float32)

    # Close over params so quant scales stay Python floats (trace-time constants).
    fwd = jax.jit(lambda inp: resnet_forward(inp, params))
    out = jax.block_until_ready(fwd(x))
    assert out.shape == (2, 100), out.shape
    assert bool(jnp.all(jnp.isfinite(out)))
    print("KERNEL_OK")
</pallas_src>

<mosaic_0001>
module attributes {stable_mosaic.version = 11 : i64} {
  func.func @_mm_quant_kernel(%arg0: i32, %arg1: i32, %arg2: memref<512x256xbf16, #tpu.memory_space<vmem>>, %arg3: memref<256x128xbf16, #tpu.memory_space<vmem>>, %arg4: memref<1x128xf32, #tpu.memory_space<vmem>>, %arg5: memref<512x128xbf16, #tpu.memory_space<vmem>>, %arg6: memref<512x128xf32, #tpu.memory_space<vmem>>) attributes {dimension_semantics = [#tpu.dimension_semantics<parallel>, #tpu.dimension_semantics<arbitrary>], iteration_bounds = array<i64: 1, 1>, scalar_prefetch = 0 : i64, scratch_operands = 1 : i64, tpu.core_type = #tpu.core_type<tc>, window_params = [{transform_indices = @transform_0, window_bounds = array<i64: 512, 256>}, {transform_indices = @transform_1, window_bounds = array<i64: 256, 128>}, {pipeline_mode = #tpu.pipeline_mode<synchronous>, transform_indices = @transform_2, window_bounds = array<i64: 1, 128>}, {transform_indices = @transform_3, window_bounds = array<i64: 512, 128>}]} {
    %c0_i32 = arith.constant 0 : i32
    %0 = arith.cmpi eq, %arg1, %c0_i32 : i32
    %1 = arith.extui %0 : i1 to i32
    %c0_i32_0 = arith.constant 0 : i32
    %2 = arith.cmpi ne, %1, %c0_i32_0 : i32
    scf.if %2 {
      %cst_10 = arith.constant 0.000000e+00 : f32
      %12 = vector.broadcast %cst_10 : f32 to vector<512x128xf32>
      %c0_11 = arith.constant 0 : index
      %c0_12 = arith.constant 0 : index
      %13 = vector.load %arg6[%c0_11, %c0_12] : memref<512x128xf32, #tpu.memory_space<vmem>>, vector<512x128xf32>
      tpu.vector_store %arg6[%c0_11, %c0_12], %12 {strides = array<i32>} : memref<512x128xf32, #tpu.memory_space<vmem>>, vector<512x128xf32>,
    } else {
    }
    %c0 = arith.constant 0 : index
    %c0_1 = arith.constant 0 : index
    %3 = vector.load %arg6[%c0, %c0_1] : memref<512x128xf32, #tpu.memory_space<vmem>>, vector<512x128xf32>
    %c0_2 = arith.constant 0 : index
    %c0_3 = arith.constant 0 : index
    %4 = vector.load %arg2[%c0_2, %c0_3] : memref<512x256xbf16, #tpu.memory_space<vmem>>, vector<512x256xbf16>
    %c0_4 = arith.constant 0 : index
    %c0_5 = arith.constant 0 : index
    %5 = vector.load %arg3[%c0_4, %c0_5] : memref<256x128xbf16, #tpu.memory_space<vmem>>, vector<256x128xbf16>
    %cst = arith.constant dense<0.000000e+00> : vector<512x128xf32>
    %6 = tpu.matmul %4, %5, %cst {dimension_numbers = #tpu.dot_dimension_numbers<[1], [0], [0], [1], [0, 0, 1, 1], [], []>} : vector<512x256xbf16>, vector<256x128xbf16>, vector<512x128xf32> -> vector<512x128xf32>
    %7 = arith.addf %3, %6 : vector<512x128xf32>
    %c0_6 = arith.constant 0 : index
    %c0_7 = arith.constant 0 : index
    %8 = vector.load %arg6[%c0_6, %c0_7] : memref<512x128xf32, #tpu.memory_space<vmem>>, vector<512x128xf32>
    tpu.vector_store %arg6[%c0_6, %c0_7], %7 {strides = array<i32>} : memref<512x128xf32, #tpu.memory_space<vmem>>, vector<512x128xf32>,
    %c0_i32_8 = arith.constant 0 : i32
    %9 = arith.cmpi eq, %arg1, %c0_i32_8 : i32
    %10 = arith.extui %9 : i1 to i32
    %c0_i32_9 = arith.constant 0 : i32
    %11 = arith.cmpi ne, %10, %c0_i32_9 : i32
    scf.if %11 {
      %c0_10 = arith.constant 0 : index
      %c0_11 = arith.constant 0 : index
      %12 = vector.load %arg6[%c0_10, %c0_11] : memref<512x128xf32, #tpu.memory_space<vmem>>, vector<512x128xf32>
      %cst_12 = arith.constant 9.765625E-4 : f32
      %13 = vector.broadcast %cst_12 : f32 to vector<512x128xf32>
      %14 = arith.divf %12, %13 : vector<512x128xf32>
      %15 = math.roundeven %14 : vector<512x128xf32>
      %cst_13 = arith.constant -3.276800e+04 : f32
      %cst_14 = arith.constant 3.276700e+04 : f32
      %16 = vector.broadcast %cst_13 : f32 to vector<512x128xf32>
      %17 = arith.maximumf %16, %15 : vector<512x128xf32>
      %18 = vector.broadcast %cst_14 : f32 to vector<512x128xf32>
      %19 = arith.minimumf %18, %17 : vector<512x128xf32>
      %cst_15 = arith.constant 9.765625E-4 : f32
      %20 = vector.broadcast %cst_15 : f32 to vector<512x128xf32>
      %21 = arith.mulf %19, %20 : vector<512x128xf32>
      %c0_16 = arith.constant 0 : index
      %c0_17 = arith.constant 0 : index
      %22 = vector.load %arg4[%c0_16, %c0_17] : memref<1x128xf32, #tpu.memory_space<vmem>>, vector<1x128xf32>
      %23 = vector.broadcast %22 : vector<1x128xf32> to vector<512x128xf32>
      %24 = arith.addf %21, %23 : vector<512x128xf32>
      %cst_18 = arith.constant 6.250000e-02 : f32
      %25 = vector.broadcast %cst_18 : f32 to vector<512x128xf32>
      %26 = arith.divf %24, %25 : vector<512x128xf32>
      %27 = math.roundeven %26 : vector<512x128xf32>
      %cst_19 = arith.constant -1.280000e+02 : f32
      %cst_20 = arith.constant 1.270000e+02 : f32
      %28 = vector.broadcast %cst_19 : f32 to vector<512x128xf32>
      %29 = arith.maximumf %28, %27 : vector<512x128xf32>
      %30 = vector.broadcast %cst_20 : f32 to vector<512x128xf32>
      %31 = arith.minimumf %30, %29 : vector<512x128xf32>
      %cst_21 = arith.constant 6.250000e-02 : f32
      %32 = vector.broadcast %cst_21 : f32 to vector<512x128xf32>
      %33 = arith.mulf %31, %32 : vector<512x128xf32>
      %cst_22 = arith.constant 0.000000e+00 : f32
      %34 = vector.broadcast %cst_22 : f32 to vector<512x128xf32>
      %35 = arith.maximumf %33, %34 : vector<512x128xf32>
      %36 = arith.truncf %35 : vector<512x128xf32> to vector<512x128xbf16>
      %c0_23 = arith.constant 0 : index
      %c0_24 = arith.constant 0 : index
      %37 = vector.load %arg5[%c0_23, %c0_24] : memref<512x128xbf16, #tpu.memory_space<vmem>>, vector<512x128xbf16>
      tpu.vector_store %arg5[%c0_23, %c0_24], %36 {strides = array<i32>} : memref<512x128xbf16, #tpu.memory_space<vmem>>, vector<512x128xbf16>,
    } else {
    }
    return
  }
  func.func @transform_0(%arg0: i32, %arg1: i32) -> (i32, i32) {
    %c0_i32 = arith.constant 0 : i32
    return %arg0, %arg1 : i32, i32
  }
  func.func @transform_1(%arg0: i32, %arg1: i32) -> (i32, i32) {
    %c0_i32 = arith.constant 0 : i32
    %c0_i32_0 = arith.constant 0 : i32
    return %arg1, %c0_i32 : i32, i32
  }
  func.func @transform_2(%arg0: i32, %arg1: i32) -> (i32, i32) {
    %c0_i32 = arith.constant 0 : i32
    %c0_i32_0 = arith.constant 0 : i32
    %c0_i32_1 = arith.constant 0 : i32
    return %c0_i32, %c0_i32_0 : i32, i32
  }
  func.func @transform_3(%arg0: i32, %arg1: i32) -> (i32, i32) {
    %c0_i32 = arith.constant 0 : i32
    %c0_i32_0 = arith.constant 0 : i32
    return %arg0, %c0_i32 : i32, i32
  }
}

module attributes {stable_mosaic.version = 11 : i64} {
  func.func @_mm_quant_kernel(%arg0: i32, %arg1: i32, %arg2: memref<128x256xbf16, #tpu.memory_space<vmem>>, %arg3: memref<256x128xbf16, #tpu.memory_space<vmem>>, %arg4: memref<1x128xf32, #tpu.memory_space<vmem>>, %arg5: memref<128x128xbf16, #tpu.memory_space<vmem>>, %arg6: memref<128x128xf32, #tpu.memory_space<vmem>>) attributes {dimension_semantics = [#tpu.dimension_semantics<parallel>, #tpu.dimension_semantics<arbitrary>], iteration_bounds = array<i64: 1, 3>, scalar_prefetch = 0 : i64, scratch_operands = 1 : i64, tpu.core_type = #tpu.core_type<tc>, window_params = [{transform_indices = @transform_0, window_bounds = array<i64: 128, 256>}, {transform_indices = @transform_1, window_bounds = array<i64: 256, 128>}, {pipeline_mode = #tpu.pipeline_mode<synchronous>, transform_indices = @transform_2, window_bounds = array<i64: 1, 128>}, {transform_indices = @transform_3, window_bounds = array<i64: 128, 128>}]} {
    %c0_i32 = arith.constant 0 : i32
    %0 = arith.cmpi eq, %arg1, %c0_i32 : i32
    %1 = arith.extui %0 : i1 to i32
    %c0_i32_0 = arith.constant 0 : i32
    %2 = arith.cmpi ne, %1, %c0_i32_0 : i32
    scf.if %2 {
      %cst_9 = arith.constant 0.000000e+00 : f32
      %12 = vector.broadcast %cst_9 : f32 to vector<128x128xf32>
      %c0_10 = arith.constant 0 : index
      %c0_11 = arith.constant 0 : index
      %13 = vector.load %arg6[%c0_10, %c0_11] : memref<128x128xf32, #tpu.memory_space<vmem>>, vector<128x128xf32>
      tpu.vector_store %arg6[%c0_10, %c0_11], %12 {strides = array<i32>} : memref<128x128xf32, #tpu.memory_space<vmem>>, vector<128x128xf32>,
    } else {
    }
    %c0 = arith.constant 0 : index
    %c0_1 = arith.constant 0 : index
    %3 = vector.load %arg6[%c0, %c0_1] : memref<128x128xf32, #tpu.memory_space<vmem>>, vector<128x128xf32>
    %c0_2 = arith.constant 0 : index
    %c0_3 = arith.constant 0 : index
    %4 = vector.load %arg2[%c0_2, %c0_3] : memref<128x256xbf16, #tpu.memory_space<vmem>>, vector<128x256xbf16>
    %c0_4 = arith.constant 0 : index
    %c0_5 = arith.constant 0 : index
    %5 = vector.load %arg3[%c0_4, %c0_5] : memref<256x128xbf16, #tpu.memory_space<vmem>>, vector<256x128xbf16>
    %cst = arith.constant dense<0.000000e+00> : vector<128x128xf32>
    %6 = tpu.matmul %4, %5, %cst {dimension_numbers = #tpu.dot_dimension_numbers<[1], [0], [0], [1], [0, 0, 1, 1], [], []>} : vector<128x256xbf16>, vector<256x128xbf16>, vector<128x128xf32> -> vector<128x128xf32>
    %7 = arith.addf %3, %6 : vector<128x128xf32>
    %c0_6 = arith.constant 0 : index
    %c0_7 = arith.constant 0 : index
    %8 = vector.load %arg6[%c0_6, %c0_7] : memref<128x128xf32, #tpu.memory_space<vmem>>, vector<128x128xf32>
    tpu.vector_store %arg6[%c0_6, %c0_7], %7 {strides = array<i32>} : memref<128x128xf32, #tpu.memory_space<vmem>>, vector<128x128xf32>,
    %c2_i32 = arith.constant 2 : i32
    %9 = arith.cmpi eq, %arg1, %c2_i32 : i32
    %10 = arith.extui %9 : i1 to i32
    %c0_i32_8 = arith.constant 0 : i32
    %11 = arith.cmpi ne, %10, %c0_i32_8 : i32
    scf.if %11 {
      %c0_9 = arith.constant 0 : index
      %c0_10 = arith.constant 0 : index
      %12 = vector.load %arg6[%c0_9, %c0_10] : memref<128x128xf32, #tpu.memory_space<vmem>>, vector<128x128xf32>
      %cst_11 = arith.constant 9.765625E-4 : f32
      %13 = vector.broadcast %cst_11 : f32 to vector<128x128xf32>
      %14 = arith.divf %12, %13 : vector<128x128xf32>
      %15 = math.roundeven %14 : vector<128x128xf32>
      %cst_12 = arith.constant -3.276800e+04 : f32
      %cst_13 = arith.constant 3.276700e+04 : f32
      %16 = vector.broadcast %cst_12 : f32 to vector<128x128xf32>
      %17 = arith.maximumf %16, %15 : vector<128x128xf32>
      %18 = vector.broadcast %cst_13 : f32 to vector<128x128xf32>
      %19 = arith.minimumf %18, %17 : vector<128x128xf32>
      %cst_14 = arith.constant 9.765625E-4 : f32
      %20 = vector.broadcast %cst_14 : f32 to vector<128x128xf32>
      %21 = arith.mulf %19, %20 : vector<128x128xf32>
      %c0_15 = arith.constant 0 : index
      %c0_16 = arith.constant 0 : index
      %22 = vector.load %arg4[%c0_15, %c0_16] : memref<1x128xf32, #tpu.memory_space<vmem>>, vector<1x128xf32>
      %23 = vector.broadcast %22 : vector<1x128xf32> to vector<128x128xf32>
      %24 = arith.addf %21, %23 : vector<128x128xf32>
      %cst_17 = arith.constant 6.250000e-02 : f32
      %25 = vector.broadcast %cst_17 : f32 to vector<128x128xf32>
      %26 = arith.divf %24, %25 : vector<128x128xf32>
      %27 = math.roundeven %26 : vector<128x128xf32>
      %cst_18 = arith.constant -1.280000e+02 : f32
      %cst_19 = arith.constant 1.270000e+02 : f32
      %28 = vector.broadcast %cst_18 : f32 to vector<128x128xf32>
      %29 = arith.maximumf %28, %27 : vector<128x128xf32>
      %30 = vector.broadcast %cst_19 : f32 to vector<128x128xf32>
      %31 = arith.minimumf %30, %29 : vector<128x128xf32>
      %cst_20 = arith.constant 6.250000e-02 : f32
      %32 = vector.broadcast %cst_20 : f32 to vector<128x128xf32>
      %33 = arith.mulf %31, %32 : vector<128x128xf32>
      %cst_21 = arith.constant 0.000000e+00 : f32
      %34 = vector.broadcast %cst_21 : f32 to vector<128x128xf32>
      %35 = arith.maximumf %33, %34 : vector<128x128xf32>
      %36 = arith.truncf %35 : vector<128x128xf32> to vector<128x128xbf16>
      %c0_22 = arith.constant 0 : index
      %c0_23 = arith.constant 0 : index
      %37 = vector.load %arg5[%c0_22, %c0_23] : memref<128x128xbf16, #tpu.memory_space<vmem>>, vector<128x128xbf16>
      tpu.vector_store %arg5[%c0_22, %c0_23], %36 {strides = array<i32>} : memref<128x128xbf16, #tpu.memory_space<vmem>>, vector<128x128xbf16>,
    } else {
    }
    return
  }
  func.func @transform_0(%arg0: i32, %arg1: i32) -> (i32, i32) {
    %c0_i32 = arith.constant 0 : i32
    return %arg0, %arg1 : i32, i32
  }
  func.func @transform_1(%arg0: i32, %arg1: i32) -> (i32, i32) {
    %c0_i32 = arith.constant 0 : i32
    %c0_i32_0 = arith.constant 0 : i32
    return %arg1, %c0_i32 : i32, i32
  }
  func.func @transform_2(%arg0: i32, %arg1: i32) -> (i32, i32) {
    %c0_i32 = arith.constant 0 : i32
    %c0_i32_0 = arith.constant 0 : i32
    %c0_i32_1 = arith.constant 0 : i32
    return %c0_i32, %c0_i32_0 : i32, i32
  }
  func.func @transform_3(%arg0: i32, %arg1: i32) -> (i32, i32) {
    %c0_i32 = arith.constant 0 : i32
    %c0_i32_0 = arith.constant 0 : i32
    return %arg0, %c0_i32 : i32, i32
  }
}

module attributes {stable_mosaic.version = 11 : i64} {
  func.func @_mm_quant_res_kernel(%arg0: i32, %arg1: i32, %arg2: memref<128x256xbf16, #tpu.memory_space<vmem>>, %arg3: memref<256x128xbf16, #tpu.memory_space<vmem>>, %arg4: memref<1x128xf32, #tpu.memory_space<vmem>>, %arg5: memref<128x128xbf16, #tpu.memory_space<vmem>>, %arg6: memref<1x128xf32, #tpu.memory_space<vmem>>, %arg7: memref<1x128xf32, #tpu.memory_space<vmem>>, %arg8: memref<128x128xbf16, #tpu.memory_space<vmem>>, %arg9: memref<128x128xf32, #tpu.memory_space<vmem>>) attributes {dimension_semantics = [#tpu.dimension_semantics<parallel>, #tpu.dimension_semantics<arbitrary>], iteration_bounds = array<i64: 1, 3>, scalar_prefetch = 0 : i64, scratch_operands = 1 : i64, tpu.core_type = #tpu.core_type<tc>, window_params = [{transform_indices = @transform_0, window_bounds = array<i64: 128, 256>}, {transform_indices = @transform_1, window_bounds = array<i64: 256, 128>}, {pipeline_mode = #tpu.pipeline_mode<synchronous>, transform_indices = @transform_2, window_bounds = array<i64: 1, 128>}, {transform_indices = @transform_3, window_bounds = array<i64: 128, 128>}, {pipeline_mode = #tpu.pipeline_mode<synchronous>, transform_indices = @transform_4, window_bounds = array<i64: 1, 128>}, {pipeline_mode = #tpu.pipeline_mode<synchronous>, transform_indices = @transform_5, window_bounds = array<i64: 1, 128>}, {transform_indices = @transform_6, window_bounds = array<i64: 128, 128>}]} {
    %c0_i32 = arith.constant 0 : i32
    %0 = arith.cmpi eq, %arg1, %c0_i32 : i32
    %1 = arith.extui %0 : i1 to i32
    %c0_i32_0 = arith.constant 0 : i32
    %2 = arith.cmpi ne, %1, %c0_i32_0 : i32
    scf.if %2 {
      %cst_9 = arith.constant 0.000000e+00 : f32
      %12 = vector.broadcast %cst_9 : f32 to vector<128x128xf32>
      %c0_10 = arith.constant 0 : index
      %c0_11 = arith.constant 0 : index
      %13 = vector.load %arg9[%c0_10, %c0_11] : memref<128x128xf32, #tpu.memory_space<vmem>>, vector<128x128xf32>
      tpu.vector_store %arg9[%c0_10, %c0_11], %12 {strides = array<i32>} : memref<128x128xf32, #tpu.memory_space<vmem>>, vector<128x128xf32>,
    } else {
    }
    %c0 = arith.constant 0 : index
    %c0_1 = arith.constant 0 : index
    %3 = vector.load %arg9[%c0, %c0_1] : memref<128x128xf32, #tpu.memory_space<vmem>>, vector<128x128xf32>
    %c0_2 = arith.constant 0 : index
    %c0_3 = arith.constant 0 : index
    %4 = vector.load %arg2[%c0_2, %c0_3] : memref<128x256xbf16, #tpu.memory_space<vmem>>, vector<128x256xbf16>
    %c0_4 = arith.constant 0 : index
    %c0_5 = arith.constant 0 : index
    %5 = vector.load %arg3[%c0_4, %c0_5] : memref<256x128xbf16, #tpu.memory_space<vmem>>, vector<256x128xbf16>
    %cst = arith.constant dense<0.000000e+00> : vector<128x128xf32>
    %6 = tpu.matmul %4, %5, %cst {dimension_numbers = #tpu.dot_dimension_numbers<[1], [0], [0], [1], [0, 0, 1, 1], [], []>} : vector<128x256xbf16>, vector<256x128xbf16>, vector<128x128xf32> -> vector<128x128xf32>
    %7 = arith.addf %3, %6 : vector<128x128xf32>
    %c0_6 = arith.constant 0 : index
    %c0_7 = arith.constant 0 : index
    %8 = vector.load %arg9[%c0_6, %c0_7] : memref<128x128xf32, #tpu.memory_space<vmem>>, vector<128x128xf32>
    tpu.vector_store %arg9[%c0_6, %c0_7], %7 {strides = array<i32>} : memref<128x128xf32, #tpu.memory_space<vmem>>, vector<128x128xf32>,
    %c2_i32 = arith.constant 2 : i32
    %9 = arith.cmpi eq, %arg1, %c2_i32 : i32
    %10 = arith.extui %9 : i1 to i32
    %c0_i32_8 = arith.constant 0 : i32
    %11 = arith.cmpi ne, %10, %c0_i32_8 : i32
    scf.if %11 {
      %c0_9 = arith.constant 0 : index
      %c0_10 = arith.constant 0 : index
      %12 = vector.load %arg9[%c0_9, %c0_10] : memref<128x128xf32, #tpu.memory_space<vmem>>, vector<128x128xf32>
      %cst_11 = arith.constant 9.765625E-4 : f32
      %13 = vector.broadcast %cst_11 : f32 to vector<128x128xf32>
      %14 = arith.divf %12, %13 : vector<128x128xf32>
      %15 = math.roundeven %14 : vector<128x128xf32>
      %cst_12 = arith.constant -3.276800e+04 : f32
      %cst_13 = arith.constant 3.276700e+04 : f32
      %16 = vector.broadcast %cst_12 : f32 to vector<128x128xf32>
      %17 = arith.maximumf %16, %15 : vector<128x128xf32>
      %18 = vector.broadcast %cst_13 : f32 to vector<128x128xf32>
      %19 = arith.minimumf %18, %17 : vector<128x128xf32>
      %cst_14 = arith.constant 9.765625E-4 : f32
      %20 = vector.broadcast %cst_14 : f32 to vector<128x128xf32>
      %21 = arith.mulf %19, %20 : vector<128x128xf32>
      %c0_15 = arith.constant 0 : index
      %c0_16 = arith.constant 0 : index
      %22 = vector.load %arg4[%c0_15, %c0_16] : memref<1x128xf32, #tpu.memory_space<vmem>>, vector<1x128xf32>
      %23 = vector.broadcast %22 : vector<1x128xf32> to vector<128x128xf32>
      %24 = arith.addf %21, %23 : vector<128x128xf32>
      %cst_17 = arith.constant 6.250000e-02 : f32
      %25 = vector.broadcast %cst_17 : f32 to vector<128x128xf32>
      %26 = arith.divf %24, %25 : vector<128x128xf32>
      %27 = math.roundeven %26 : vector<128x128xf32>
      %cst_18 = arith.constant -1.280000e+02 : f32
      %cst_19 = arith.constant 1.270000e+02 : f32
      %28 = vector.broadcast %cst_18 : f32 to vector<128x128xf32>
      %29 = arith.maximumf %28, %27 : vector<128x128xf32>
      %30 = vector.broadcast %cst_19 : f32 to vector<128x128xf32>
      %31 = arith.minimumf %30, %29 : vector<128x128xf32>
      %cst_20 = arith.constant 6.250000e-02 : f32
      %32 = vector.broadcast %cst_20 : f32 to vector<128x128xf32>
      %33 = arith.mulf %31, %32 : vector<128x128xf32>
      %c0_21 = arith.constant 0 : index
      %c0_22 = arith.constant 0 : index
      %34 = vector.load %arg6[%c0_21, %c0_22] : memref<1x128xf32, #tpu.memory_space<vmem>>, vector<1x128xf32>
      %35 = vector.broadcast %34 : vector<1x128xf32> to vector<128x128xf32>
      %36 = arith.mulf %33, %35 : vector<128x128xf32>
      %c0_23 = arith.constant 0 : index
      %c0_24 = arith.constant 0 : index
      %37 = vector.load %arg5[%c0_23, %c0_24] : memref<128x128xbf16, #tpu.memory_space<vmem>>, vector<128x128xbf16>
      %38 = arith.extf %37 : vector<128x128xbf16> to vector<128x128xf32>
      %c0_25 = arith.constant 0 : index
      %c0_26 = arith.constant 0 : index
      %39 = vector.load %arg7[%c0_25, %c0_26] : memref<1x128xf32, #tpu.memory_space<vmem>>, vector<1x128xf32>
      %40 = vector.broadcast %39 : vector<1x128xf32> to vector<128x128xf32>
      %41 = arith.mulf %38, %40 : vector<128x128xf32>
      %42 = arith.addf %36, %41 : vector<128x128xf32>
      %cst_27 = arith.constant 6.250000e-02 : f32
      %43 = vector.broadcast %cst_27 : f32 to vector<128x128xf32>
      %44 = arith.divf %42, %43 : vector<128x128xf32>
      %45 = math.roundeven %44 : vector<128x128xf32>
      %cst_28 = arith.constant -1.280000e+02 : f32
      %cst_29 = arith.constant 1.270000e+02 : f32
      %46 = vector.broadcast %cst_28 : f32 to vector<128x128xf32>
      %47 = arith.maximumf %46, %45 : vector<128x128xf32>
      %48 = vector.broadcast %cst_29 : f32 to vector<128x128xf32>
      %49 = arith.minimumf %48, %47 : vector<128x128xf32>
      %cst_30 = arith.constant 6.250000e-02 : f32
      %50 = vector.broadcast %cst_30 : f32 to vector<128x128xf32>
      %51 = arith.mulf %49, %50 : vector<128x128xf32>
      %cst_31 = arith.constant 0.000000e+00 : f32
      %52 = vector.broadcast %cst_31 : f32 to vector<128x128xf32>
      %53 = arith.maximumf %51, %52 : vector<128x128xf32>
      %54 = arith.truncf %53 : vector<128x128xf32> to vector<128x128xbf16>
      %c0_32 = arith.constant 0 : index
      %c0_33 = arith.constant 0 : index
      %55 = vector.load %arg8[%c0_32, %c0_33] : memref<128x128xbf16, #tpu.memory_space<vmem>>, vector<128x128xbf16>
      tpu.vector_store %arg8[%c0_32, %c0_33], %54 {strides = array<i32>} : memref<128x128xbf16, #tpu.memory_space<vmem>>, vector<128x128xbf16>,
    } else {
    }
    return
  }
  func.func @transform_0(%arg0: i32, %arg1: i32) -> (i32, i32) {
    %c0_i32 = arith.constant 0 : i32
    return %arg0, %arg1 : i32, i32
  }
  func.func @transform_1(%arg0: i32, %arg1: i32) -> (i32, i32) {
    %c0_i32 = arith.constant 0 : i32
    %c0_i32_0 = arith.constant 0 : i32
    return %arg1, %c0_i32 : i32, i32
  }
  func.func @transform_2(%arg0: i32, %arg1: i32) -> (i32, i32) {
    %c0_i32 = arith.constant 0 : i32
    %c0_i32_0 = arith.constant 0 : i32
    %c0_i32_1 = arith.constant 0 : i32
    return %c0_i32, %c0_i32_0 : i32, i32
  }
  func.func @transform_3(%arg0: i32, %arg1: i32) -> (i32, i32) {
    %c0_i32 = arith.constant 0 : i32
    %c0_i32_0 = arith.constant 0 : i32
    return %arg0, %c0_i32 : i32, i32
  }
  func.func @transform_4(%arg0: i32, %arg1: i32) -> (i32, i32) {
    %c0_i32 = arith.constant 0 : i32
    %c0_i32_0 = arith.constant 0 : i32
    %c0_i32_1 = arith.constant 0 : i32
    return %c0_i32, %c0_i32_0 : i32, i32
  }
  func.func @transform_5(%arg0: i32, %arg1: i32) -> (i32, i32) {
    %c0_i32 = arith.constant 0 : i32
    %c0_i32_0 = arith.constant 0 : i32
    %c0_i32_1 = arith.constant 0 : i32
    return %c0_i32, %c0_i32_0 : i32, i32
  }
  func.func @transform_6(%arg0: i32, %arg1: i32) -> (i32, i32) {
    %c0_i32 = arith.constant 0 : i32
    %c0_i32_0 = arith.constant 0 : i32
    return %arg0, %c0_i32 : i32, i32
  }
}

module attributes {stable_mosaic.version = 11 : i64} {
  func.func @_mm_quant_kernel(%arg0: i32, %arg1: i32, %arg2: memref<32x256xbf16, #tpu.memory_space<vmem>>, %arg3: memref<256x128xbf16, #tpu.memory_space<vmem>>, %arg4: memref<1x128xf32, #tpu.memory_space<vmem>>, %arg5: memref<32x128xbf16, #tpu.memory_space<vmem>>, %arg6: memref<32x128xf32, #tpu.memory_space<vmem>>) attributes {dimension_semantics = [#tpu.dimension_semantics<parallel>, #tpu.dimension_semantics<arbitrary>], iteration_bounds = array<i64: 1, 3>, scalar_prefetch = 0 : i64, scratch_operands = 1 : i64, tpu.core_type = #tpu.core_type<tc>, window_params = [{transform_indices = @transform_0, window_bounds = array<i64: 32, 256>}, {transform_indices = @transform_1, window_bounds = array<i64: 256, 128>}, {pipeline_mode = #tpu.pipeline_mode<synchronous>, transform_indices = @transform_2, window_bounds = array<i64: 1, 128>}, {transform_indices = @transform_3, window_bounds = array<i64: 32, 128>}]} {
    %c0_i32 = arith.constant 0 : i32
    %0 = arith.cmpi eq, %arg1, %c0_i32 : i32
    %1 = arith.extui %0 : i1 to i32
    %c0_i32_0 = arith.constant 0 : i32
    %2 = arith.cmpi ne, %1, %c0_i32_0 : i32
    scf.if %2 {
      %cst_9 = arith.constant 0.000000e+00 : f32
      %12 = vector.broadcast %cst_9 : f32 to vector<32x128xf32>
      %c0_10 = arith.constant 0 : index
      %c0_11 = arith.constant 0 : index
      %13 = vector.load %arg6[%c0_10, %c0_11] : memref<32x128xf32, #tpu.memory_space<vmem>>, vector<32x128xf32>
      tpu.vector_store %arg6[%c0_10, %c0_11], %12 {strides = array<i32>} : memref<32x128xf32, #tpu.memory_space<vmem>>, vector<32x128xf32>,
    } else {
    }
    %c0 = arith.constant 0 : index
    %c0_1 = arith.constant 0 : index
    %3 = vector.load %arg6[%c0, %c0_1] : memref<32x128xf32, #tpu.memory_space<vmem>>, vector<32x128xf32>
    %c0_2 = arith.constant 0 : index
    %c0_3 = arith.constant 0 : index
    %4 = vector.load %arg2[%c0_2, %c0_3] : memref<32x256xbf16, #tpu.memory_space<vmem>>, vector<32x256xbf16>
    %c0_4 = arith.constant 0 : index
    %c0_5 = arith.constant 0 : index
    %5 = vector.load %arg3[%c0_4, %c0_5] : memref<256x128xbf16, #tpu.memory_space<vmem>>, vector<256x128xbf16>
    %cst = arith.constant dense<0.000000e+00> : vector<32x128xf32>
    %6 = tpu.matmul %4, %5, %cst {dimension_numbers = #tpu.dot_dimension_numbers<[1], [0], [0], [1], [0, 0, 1, 1], [], []>} : vector<32x256xbf16>, vector<256x128xbf16>, vector<32x128xf32> -> vector<32x128xf32>
    %7 = arith.addf %3, %6 : vector<32x128xf32>
    %c0_6 = arith.constant 0 : index
    %c0_7 = arith.constant 0 : index
    %8 = vector.load %arg6[%c0_6, %c0_7] : memref<32x128xf32, #tpu.memory_space<vmem>>, vector<32x128xf32>
    tpu.vector_store %arg6[%c0_6, %c0_7], %7 {strides = array<i32>} : memref<32x128xf32, #tpu.memory_space<vmem>>, vector<32x128xf32>,
    %c2_i32 = arith.constant 2 : i32
    %9 = arith.cmpi eq, %arg1, %c2_i32 : i32
    %10 = arith.extui %9 : i1 to i32
    %c0_i32_8 = arith.constant 0 : i32
    %11 = arith.cmpi ne, %10, %c0_i32_8 : i32
    scf.if %11 {
      %c0_9 = arith.constant 0 : index
      %c0_10 = arith.constant 0 : index
      %12 = vector.load %arg6[%c0_9, %c0_10] : memref<32x128xf32, #tpu.memory_space<vmem>>, vector<32x128xf32>
      %cst_11 = arith.constant 9.765625E-4 : f32
      %13 = vector.broadcast %cst_11 : f32 to vector<32x128xf32>
      %14 = arith.divf %12, %13 : vector<32x128xf32>
      %15 = math.roundeven %14 : vector<32x128xf32>
      %cst_12 = arith.constant -3.276800e+04 : f32
      %cst_13 = arith.constant 3.276700e+04 : f32
      %16 = vector.broadcast %cst_12 : f32 to vector<32x128xf32>
      %17 = arith.maximumf %16, %15 : vector<32x128xf32>
      %18 = vector.broadcast %cst_13 : f32 to vector<32x128xf32>
      %19 = arith.minimumf %18, %17 : vector<32x128xf32>
      %cst_14 = arith.constant 9.765625E-4 : f32
      %20 = vector.broadcast %cst_14 : f32 to vector<32x128xf32>
      %21 = arith.mulf %19, %20 : vector<32x128xf32>
      %c0_15 = arith.constant 0 : index
      %c0_16 = arith.constant 0 : index
      %22 = vector.load %arg4[%c0_15, %c0_16] : memref<1x128xf32, #tpu.memory_space<vmem>>, vector<1x128xf32>
      %23 = vector.broadcast %22 : vector<1x128xf32> to vector<32x128xf32>
      %24 = arith.addf %21, %23 : vector<32x128xf32>
      %cst_17 = arith.constant 6.250000e-02 : f32
      %25 = vector.broadcast %cst_17 : f32 to vector<32x128xf32>
      %26 = arith.divf %24, %25 : vector<32x128xf32>
      %27 = math.roundeven %26 : vector<32x128xf32>
      %cst_18 = arith.constant -1.280000e+02 : f32
      %cst_19 = arith.constant 1.270000e+02 : f32
      %28 = vector.broadcast %cst_18 : f32 to vector<32x128xf32>
      %29 = arith.maximumf %28, %27 : vector<32x128xf32>
      %30 = vector.broadcast %cst_19 : f32 to vector<32x128xf32>
      %31 = arith.minimumf %30, %29 : vector<32x128xf32>
      %cst_20 = arith.constant 6.250000e-02 : f32
      %32 = vector.broadcast %cst_20 : f32 to vector<32x128xf32>
      %33 = arith.mulf %31, %32 : vector<32x128xf32>
      %cst_21 = arith.constant 0.000000e+00 : f32
      %34 = vector.broadcast %cst_21 : f32 to vector<32x128xf32>
      %35 = arith.maximumf %33, %34 : vector<32x128xf32>
      %36 = arith.truncf %35 : vector<32x128xf32> to vector<32x128xbf16>
      %c0_22 = arith.constant 0 : index
      %c0_23 = arith.constant 0 : index
      %37 = vector.load %arg5[%c0_22, %c0_23] : memref<32x128xbf16, #tpu.memory_space<vmem>>, vector<32x128xbf16>
      tpu.vector_store %arg5[%c0_22, %c0_23], %36 {strides = array<i32>} : memref<32x128xbf16, #tpu.memory_space<vmem>>, vector<32x128xbf16>,
    } else {
    }
    return
  }
  func.func @transform_0(%arg0: i32, %arg1: i32) -> (i32, i32) {
    %c0_i32 = arith.constant 0 : i32
    return %arg0, %arg1 : i32, i32
  }
  func.func @transform_1(%arg0: i32, %arg1: i32) -> (i32, i32) {
    %c0_i32 = arith.constant 0 : i32
    %c0_i32_0 = arith.constant 0 : i32
    return %arg1, %c0_i32 : i32, i32
  }
  func.func @transform_2(%arg0: i32, %arg1: i32) -> (i32, i32) {
    %c0_i32 = arith.constant 0 : i32
    %c0_i32_0 = arith.constant 0 : i32
    %c0_i32_1 = arith.constant 0 : i32
    return %c0_i32, %c0_i32_0 : i32, i32
  }
  func.func @transform_3(%arg0: i32, %arg1: i32) -> (i32, i32) {
    %c0_i32 = arith.constant 0 : i32
    %c0_i32_0 = arith.constant 0 : i32
    return %arg0, %c0_i32 : i32, i32
  }
}

module attributes {stable_mosaic.version = 11 : i64} {
  func.func @_mm_quant_kernel(%arg0: i32, %arg1: i32, %arg2: memref<32x128xbf16, #tpu.memory_space<vmem>>, %arg3: memref<128x128xbf16, #tpu.memory_space<vmem>>, %arg4: memref<1x128xf32, #tpu.memory_space<vmem>>, %arg5: memref<32x128xbf16, #tpu.memory_space<vmem>>, %arg6: memref<32x128xf32, #tpu.memory_space<vmem>>) attributes {dimension_semantics = [#tpu.dimension_semantics<parallel>, #tpu.dimension_semantics<arbitrary>], iteration_bounds = array<i64: 1, 1>, scalar_prefetch = 0 : i64, scratch_operands = 1 : i64, tpu.core_type = #tpu.core_type<tc>, window_params = [{transform_indices = @transform_0, window_bounds = array<i64: 32, 128>}, {transform_indices = @transform_1, window_bounds = array<i64: 128, 128>}, {pipeline_mode = #tpu.pipeline_mode<synchronous>, transform_indices = @transform_2, window_bounds = array<i64: 1, 128>}, {transform_indices = @transform_3, window_bounds = array<i64: 32, 128>}]} {
    %c0_i32 = arith.constant 0 : i32
    %0 = arith.cmpi eq, %arg1, %c0_i32 : i32
    %1 = arith.extui %0 : i1 to i32
    %c0_i32_0 = arith.constant 0 : i32
    %2 = arith.cmpi ne, %1, %c0_i32_0 : i32
    scf.if %2 {
      %cst_10 = arith.constant 0.000000e+00 : f32
      %12 = vector.broadcast %cst_10 : f32 to vector<32x128xf32>
      %c0_11 = arith.constant 0 : index
      %c0_12 = arith.constant 0 : index
      %13 = vector.load %arg6[%c0_11, %c0_12] : memref<32x128xf32, #tpu.memory_space<vmem>>, vector<32x128xf32>
      tpu.vector_store %arg6[%c0_11, %c0_12], %12 {strides = array<i32>} : memref<32x128xf32, #tpu.memory_space<vmem>>, vector<32x128xf32>,
    } else {
    }
    %c0 = arith.constant 0 : index
    %c0_1 = arith.constant 0 : index
    %3 = vector.load %arg6[%c0, %c0_1] : memref<32x128xf32, #tpu.memory_space<vmem>>, vector<32x128xf32>
    %c0_2 = arith.constant 0 : index
    %c0_3 = arith.constant 0 : index
    %4 = vector.load %arg2[%c0_2, %c0_3] : memref<32x128xbf16, #tpu.memory_space<vmem>>, vector<32x128xbf16>
    %c0_4 = arith.constant 0 : index
    %c0_5 = arith.constant 0 : index
    %5 = vector.load %arg3[%c0_4, %c0_5] : memref<128x128xbf16, #tpu.memory_space<vmem>>, vector<128x128xbf16>
    %cst = arith.constant dense<0.000000e+00> : vector<32x128xf32>
    %6 = tpu.matmul %4, %5, %cst {dimension_numbers = #tpu.dot_dimension_numbers<[1], [0], [0], [1], [0, 0, 1, 1], [], []>} : vector<32x128xbf16>, vector<128x128xbf16>, vector<32x128xf32> -> vector<32x128xf32>
    %7 = arith.addf %3, %6 : vector<32x128xf32>
    %c0_6 = arith.constant 0 : index
    %c0_7 = arith.constant 0 : index
    %8 = vector.load %arg6[%c0_6, %c0_7] : memref<32x128xf32, #tpu.memory_space<vmem>>, vector<32x128xf32>
    tpu.vector_store %arg6[%c0_6, %c0_7], %7 {strides = array<i32>} : memref<32x128xf32, #tpu.memory_space<vmem>>, vector<32x128xf32>,
    %c0_i32_8 = arith.constant 0 : i32
    %9 = arith.cmpi eq, %arg1, %c0_i32_8 : i32
    %10 = arith.extui %9 : i1 to i32
    %c0_i32_9 = arith.constant 0 : i32
    %11 = arith.cmpi ne, %10, %c0_i32_9 : i32
    scf.if %11 {
      %c0_10 = arith.constant 0 : index
      %c0_11 = arith.constant 0 : index
      %12 = vector.load %arg6[%c0_10, %c0_11] : memref<32x128xf32, #tpu.memory_space<vmem>>, vector<32x128xf32>
      %cst_12 = arith.constant 9.765625E-4 : f32
      %13 = vector.broadcast %cst_12 : f32 to vector<32x128xf32>
      %14 = arith.divf %12, %13 : vector<32x128xf32>
      %15 = math.roundeven %14 : vector<32x128xf32>
      %cst_13 = arith.constant -3.276800e+04 : f32
      %cst_14 = arith.constant 3.276700e+04 : f32
      %16 = vector.broadcast %cst_13 : f32 to vector<32x128xf32>
      %17 = arith.maximumf %16, %15 : vector<32x128xf32>
      %18 = vector.broadcast %cst_14 : f32 to vector<32x128xf32>
      %19 = arith.minimumf %18, %17 : vector<32x128xf32>
      %cst_15 = arith.constant 9.765625E-4 : f32
      %20 = vector.broadcast %cst_15 : f32 to vector<32x128xf32>
      %21 = arith.mulf %19, %20 : vector<32x128xf32>
      %c0_16 = arith.constant 0 : index
      %c0_17 = arith.constant 0 : index
      %22 = vector.load %arg4[%c0_16, %c0_17] : memref<1x128xf32, #tpu.memory_space<vmem>>, vector<1x128xf32>
      %23 = vector.broadcast %22 : vector<1x128xf32> to vector<32x128xf32>
      %24 = arith.addf %21, %23 : vector<32x128xf32>
      %cst_18 = arith.constant 6.250000e-02 : f32
      %25 = vector.broadcast %cst_18 : f32 to vector<32x128xf32>
      %26 = arith.divf %24, %25 : vector<32x128xf32>
      %27 = math.roundeven %26 : vector<32x128xf32>
      %cst_19 = arith.constant -1.280000e+02 : f32
      %cst_20 = arith.constant 1.270000e+02 : f32
      %28 = vector.broadcast %cst_19 : f32 to vector<32x128xf32>
      %29 = arith.maximumf %28, %27 : vector<32x128xf32>
      %30 = vector.broadcast %cst_20 : f32 to vector<32x128xf32>
      %31 = arith.minimumf %30, %29 : vector<32x128xf32>
      %cst_21 = arith.constant 6.250000e-02 : f32
      %32 = vector.broadcast %cst_21 : f32 to vector<32x128xf32>
      %33 = arith.mulf %31, %32 : vector<32x128xf32>
      %34 = arith.truncf %33 : vector<32x128xf32> to vector<32x128xbf16>
      %c0_22 = arith.constant 0 : index
      %c0_23 = arith.constant 0 : index
      %35 = vector.load %arg5[%c0_22, %c0_23] : memref<32x128xbf16, #tpu.memory_space<vmem>>, vector<32x128xbf16>
      tpu.vector_store %arg5[%c0_22, %c0_23], %34 {strides = array<i32>} : memref<32x128xbf16, #tpu.memory_space<vmem>>, vector<32x128xbf16>,
    } else {
    }
    return
  }
  func.func @transform_0(%arg0: i32, %arg1: i32) -> (i32, i32) {
    %c0_i32 = arith.constant 0 : i32
    return %arg0, %arg1 : i32, i32
  }
  func.func @transform_1(%arg0: i32, %arg1: i32) -> (i32, i32) {
    %c0_i32 = arith.constant 0 : i32
    %c0_i32_0 = arith.constant 0 : i32
    return %arg1, %c0_i32 : i32, i32
  }
  func.func @transform_2(%arg0: i32, %arg1: i32) -> (i32, i32) {
    %c0_i32 = arith.constant 0 : i32
    %c0_i32_0 = arith.constant 0 : i32
    %c0_i32_1 = arith.constant 0 : i32
    return %c0_i32, %c0_i32_0 : i32, i32
  }
  func.func @transform_3(%arg0: i32, %arg1: i32) -> (i32, i32) {
    %c0_i32 = arith.constant 0 : i32
    %c0_i32_0 = arith.constant 0 : i32
    return %arg0, %c0_i32 : i32, i32
  }
}

module attributes {stable_mosaic.version = 11 : i64} {
  func.func @_mm_quant_kernel(%arg0: i32, %arg1: i32, %arg2: memref<32x256xbf16, #tpu.memory_space<vmem>>, %arg3: memref<256x128xbf16, #tpu.memory_space<vmem>>, %arg4: memref<1x128xf32, #tpu.memory_space<vmem>>, %arg5: memref<32x128xbf16, #tpu.memory_space<vmem>>, %arg6: memref<32x128xf32, #tpu.memory_space<vmem>>) attributes {dimension_semantics = [#tpu.dimension_semantics<parallel>, #tpu.dimension_semantics<arbitrary>], iteration_bounds = array<i64: 1, 5>, scalar_prefetch = 0 : i64, scratch_operands = 1 : i64, tpu.core_type = #tpu.core_type<tc>, window_params = [{transform_indices = @transform_0, window_bounds = array<i64: 32, 256>}, {transform_indices = @transform_1, window_bounds = array<i64: 256, 128>}, {pipeline_mode = #tpu.pipeline_mode<synchronous>, transform_indices = @transform_2, window_bounds = array<i64: 1, 128>}, {transform_indices = @transform_3, window_bounds = array<i64: 32, 128>}]} {
    %c0_i32 = arith.constant 0 : i32
    %0 = arith.cmpi eq, %arg1, %c0_i32 : i32
    %1 = arith.extui %0 : i1 to i32
    %c0_i32_0 = arith.constant 0 : i32
    %2 = arith.cmpi ne, %1, %c0_i32_0 : i32
    scf.if %2 {
      %cst_9 = arith.constant 0.000000e+00 : f32
      %12 = vector.broadcast %cst_9 : f32 to vector<32x128xf32>
      %c0_10 = arith.constant 0 : index
      %c0_11 = arith.constant 0 : index
      %13 = vector.load %arg6[%c0_10, %c0_11] : memref<32x128xf32, #tpu.memory_space<vmem>>, vector<32x128xf32>
      tpu.vector_store %arg6[%c0_10, %c0_11], %12 {strides = array<i32>} : memref<32x128xf32, #tpu.memory_space<vmem>>, vector<32x128xf32>,
    } else {
    }
    %c0 = arith.constant 0 : index
    %c0_1 = arith.constant 0 : index
    %3 = vector.load %arg6[%c0, %c0_1] : memref<32x128xf32, #tpu.memory_space<vmem>>, vector<32x128xf32>
    %c0_2 = arith.constant 0 : index
    %c0_3 = arith.constant 0 : index
    %4 = vector.load %arg2[%c0_2, %c0_3] : memref<32x256xbf16, #tpu.memory_space<vmem>>, vector<32x256xbf16>
    %c0_4 = arith.constant 0 : index
    %c0_5 = arith.constant 0 : index
    %5 = vector.load %arg3[%c0_4, %c0_5] : memref<256x128xbf16, #tpu.memory_space<vmem>>, vector<256x128xbf16>
    %cst = arith.constant dense<0.000000e+00> : vector<32x128xf32>
    %6 = tpu.matmul %4, %5, %cst {dimension_numbers = #tpu.dot_dimension_numbers<[1], [0], [0], [1], [0, 0, 1, 1], [], []>} : vector<32x256xbf16>, vector<256x128xbf16>, vector<32x128xf32> -> vector<32x128xf32>
    %7 = arith.addf %3, %6 : vector<32x128xf32>
    %c0_6 = arith.constant 0 : index
    %c0_7 = arith.constant 0 : index
    %8 = vector.load %arg6[%c0_6, %c0_7] : memref<32x128xf32, #tpu.memory_space<vmem>>, vector<32x128xf32>
    tpu.vector_store %arg6[%c0_6, %c0_7], %7 {strides = array<i32>} : memref<32x128xf32, #tpu.memory_space<vmem>>, vector<32x128xf32>,
    %c4_i32 = arith.constant 4 : i32
    %9 = arith.cmpi eq, %arg1, %c4_i32 : i32
    %10 = arith.extui %9 : i1 to i32
    %c0_i32_8 = arith.constant 0 : i32
    %11 = arith.cmpi ne, %10, %c0_i32_8 : i32
    scf.if %11 {
      %c0_9 = arith.constant 0 : index
      %c0_10 = arith.constant 0 : index
      %12 = vector.load %arg6[%c0_9, %c0_10] : memref<32x128xf32, #tpu.memory_space<vmem>>, vector<32x128xf32>
      %cst_11 = arith.constant 9.765625E-4 : f32
      %13 = vector.broadcast %cst_11 : f32 to vector<32x128xf32>
      %14 = arith.divf %12, %13 : vector<32x128xf32>
      %15 = math.roundeven %14 : vector<32x128xf32>
      %cst_12 = arith.constant -3.276800e+04 : f32
      %cst_13 = arith.constant 3.276700e+04 : f32
      %16 = vector.broadcast %cst_12 : f32 to vector<32x128xf32>
      %17 = arith.maximumf %16, %15 : vector<32x128xf32>
      %18 = vector.broadcast %cst_13 : f32 to vector<32x128xf32>
      %19 = arith.minimumf %18, %17 : vector<32x128xf32>
      %cst_14 = arith.constant 9.765625E-4 : f32
      %20 = vector.broadcast %cst_14 : f32 to vector<32x128xf32>
      %21 = arith.mulf %19, %20 : vector<32x128xf32>
      %c0_15 = arith.constant 0 : index
      %c0_16 = arith.constant 0 : index
      %22 = vector.load %arg4[%c0_15, %c0_16] : memref<1x128xf32, #tpu.memory_space<vmem>>, vector<1x128xf32>
      %23 = vector.broadcast %22 : vector<1x128xf32> to vector<32x128xf32>
      %24 = arith.addf %21, %23 : vector<32x128xf32>
      %cst_17 = arith.constant 6.250000e-02 : f32
      %25 = vector.broadcast %cst_17 : f32 to vector<32x128xf32>
      %26 = arith.divf %24, %25 : vector<32x128xf32>
      %27 = math.roundeven %26 : vector<32x128xf32>
      %cst_18 = arith.constant -1.280000e+02 : f32
      %cst_19 = arith.constant 1.270000e+02 : f32
      %28 = vector.broadcast %cst_18 : f32 to vector<32x128xf32>
      %29 = arith.maximumf %28, %27 : vector<32x128xf32>
      %30 = vector.broadcast %cst_19 : f32 to vector<32x128xf32>
      %31 = arith.minimumf %30, %29 : vector<32x128xf32>
      %cst_20 = arith.constant 6.250000e-02 : f32
      %32 = vector.broadcast %cst_20 : f32 to vector<32x128xf32>
      %33 = arith.mulf %31, %32 : vector<32x128xf32>
      %cst_21 = arith.constant 0.000000e+00 : f32
      %34 = vector.broadcast %cst_21 : f32 to vector<32x128xf32>
      %35 = arith.maximumf %33, %34 : vector<32x128xf32>
      %36 = arith.truncf %35 : vector<32x128xf32> to vector<32x128xbf16>
      %c0_22 = arith.constant 0 : index
      %c0_23 = arith.constant 0 : index
      %37 = vector.load %arg5[%c0_22, %c0_23] : memref<32x128xbf16, #tpu.memory_space<vmem>>, vector<32x128xbf16>
      tpu.vector_store %arg5[%c0_22, %c0_23], %36 {strides = array<i32>} : memref<32x128xbf16, #tpu.memory_space<vmem>>, vector<32x128xbf16>,
    } else {
    }
    return
  }
  func.func @transform_0(%arg0: i32, %arg1: i32) -> (i32, i32) {
    %c0_i32 = arith.constant 0 : i32
    return %arg0, %arg1 : i32, i32
  }
  func.func @transform_1(%arg0: i32, %arg1: i32) -> (i32, i32) {
    %c0_i32 = arith.constant 0 : i32
    %c0_i32_0 = arith.constant 0 : i32
    return %arg1, %c0_i32 : i32, i32
  }
  func.func @transform_2(%arg0: i32, %arg1: i32) -> (i32, i32) {
    %c0_i32 = arith.constant 0 : i32
    %c0_i32_0 = arith.constant 0 : i32
    %c0_i32_1 = arith.constant 0 : i32
    return %c0_i32, %c0_i32_0 : i32, i32
  }
  func.func @transform_3(%arg0: i32, %arg1: i32) -> (i32, i32) {
    %c0_i32 = arith.constant 0 : i32
    %c0_i32_0 = arith.constant 0 : i32
    return %arg0, %c0_i32 : i32, i32
  }
}

module attributes {stable_mosaic.version = 11 : i64} {
  func.func @_mm_quant_res_kernel(%arg0: i32, %arg1: i32, %arg2: memref<32x256xbf16, #tpu.memory_space<vmem>>, %arg3: memref<256x128xbf16, #tpu.memory_space<vmem>>, %arg4: memref<1x128xf32, #tpu.memory_space<vmem>>, %arg5: memref<32x128xbf16, #tpu.memory_space<vmem>>, %arg6: memref<1x128xf32, #tpu.memory_space<vmem>>, %arg7: memref<1x128xf32, #tpu.memory_space<vmem>>, %arg8: memref<32x128xbf16, #tpu.memory_space<vmem>>, %arg9: memref<32x128xf32, #tpu.memory_space<vmem>>) attributes {dimension_semantics = [#tpu.dimension_semantics<parallel>, #tpu.dimension_semantics<arbitrary>], iteration_bounds = array<i64: 1, 5>, scalar_prefetch = 0 : i64, scratch_operands = 1 : i64, tpu.core_type = #tpu.core_type<tc>, window_params = [{transform_indices = @transform_0, window_bounds = array<i64: 32, 256>}, {transform_indices = @transform_1, window_bounds = array<i64: 256, 128>}, {pipeline_mode = #tpu.pipeline_mode<synchronous>, transform_indices = @transform_2, window_bounds = array<i64: 1, 128>}, {transform_indices = @transform_3, window_bounds = array<i64: 32, 128>}, {pipeline_mode = #tpu.pipeline_mode<synchronous>, transform_indices = @transform_4, window_bounds = array<i64: 1, 128>}, {pipeline_mode = #tpu.pipeline_mode<synchronous>, transform_indices = @transform_5, window_bounds = array<i64: 1, 128>}, {transform_indices = @transform_6, window_bounds = array<i64: 32, 128>}]} {
    %c0_i32 = arith.constant 0 : i32
    %0 = arith.cmpi eq, %arg1, %c0_i32 : i32
    %1 = arith.extui %0 : i1 to i32
    %c0_i32_0 = arith.constant 0 : i32
    %2 = arith.cmpi ne, %1, %c0_i32_0 : i32
    scf.if %2 {
      %cst_9 = arith.constant 0.000000e+00 : f32
      %12 = vector.broadcast %cst_9 : f32 to vector<32x128xf32>
      %c0_10 = arith.constant 0 : index
      %c0_11 = arith.constant 0 : index
      %13 = vector.load %arg9[%c0_10, %c0_11] : memref<32x128xf32, #tpu.memory_space<vmem>>, vector<32x128xf32>
      tpu.vector_store %arg9[%c0_10, %c0_11], %12 {strides = array<i32>} : memref<32x128xf32, #tpu.memory_space<vmem>>, vector<32x128xf32>,
    } else {
    }
    %c0 = arith.constant 0 : index
    %c0_1 = arith.constant 0 : index
    %3 = vector.load %arg9[%c0, %c0_1] : memref<32x128xf32, #tpu.memory_space<vmem>>, vector<32x128xf32>
    %c0_2 = arith.constant 0 : index
    %c0_3 = arith.constant 0 : index
    %4 = vector.load %arg2[%c0_2, %c0_3] : memref<32x256xbf16, #tpu.memory_space<vmem>>, vector<32x256xbf16>
    %c0_4 = arith.constant 0 : index
    %c0_5 = arith.constant 0 : index
    %5 = vector.load %arg3[%c0_4, %c0_5] : memref<256x128xbf16, #tpu.memory_space<vmem>>, vector<256x128xbf16>
    %cst = arith.constant dense<0.000000e+00> : vector<32x128xf32>
    %6 = tpu.matmul %4, %5, %cst {dimension_numbers = #tpu.dot_dimension_numbers<[1], [0], [0], [1], [0, 0, 1, 1], [], []>} : vector<32x256xbf16>, vector<256x128xbf16>, vector<32x128xf32> -> vector<32x128xf32>
    %7 = arith.addf %3, %6 : vector<32x128xf32>
    %c0_6 = arith.constant 0 : index
    %c0_7 = arith.constant 0 : index
    %8 = vector.load %arg9[%c0_6, %c0_7] : memref<32x128xf32, #tpu.memory_space<vmem>>, vector<32x128xf32>
    tpu.vector_store %arg9[%c0_6, %c0_7], %7 {strides = array<i32>} : memref<32x128xf32, #tpu.memory_space<vmem>>, vector<32x128xf32>,
    %c4_i32 = arith.constant 4 : i32
    %9 = arith.cmpi eq, %arg1, %c4_i32 : i32
    %10 = arith.extui %9 : i1 to i32
    %c0_i32_8 = arith.constant 0 : i32
    %11 = arith.cmpi ne, %10, %c0_i32_8 : i32
    scf.if %11 {
      %c0_9 = arith.constant 0 : index
      %c0_10 = arith.constant 0 : index
      %12 = vector.load %arg9[%c0_9, %c0_10] : memref<32x128xf32, #tpu.memory_space<vmem>>, vector<32x128xf32>
      %cst_11 = arith.constant 9.765625E-4 : f32
      %13 = vector.broadcast %cst_11 : f32 to vector<32x128xf32>
      %14 = arith.divf %12, %13 : vector<32x128xf32>
      %15 = math.roundeven %14 : vector<32x128xf32>
      %cst_12 = arith.constant -3.276800e+04 : f32
      %cst_13 = arith.constant 3.276700e+04 : f32
      %16 = vector.broadcast %cst_12 : f32 to vector<32x128xf32>
      %17 = arith.maximumf %16, %15 : vector<32x128xf32>
      %18 = vector.broadcast %cst_13 : f32 to vector<32x128xf32>
      %19 = arith.minimumf %18, %17 : vector<32x128xf32>
      %cst_14 = arith.constant 9.765625E-4 : f32
      %20 = vector.broadcast %cst_14 : f32 to vector<32x128xf32>
      %21 = arith.mulf %19, %20 : vector<32x128xf32>
      %c0_15 = arith.constant 0 : index
      %c0_16 = arith.constant 0 : index
      %22 = vector.load %arg4[%c0_15, %c0_16] : memref<1x128xf32, #tpu.memory_space<vmem>>, vector<1x128xf32>
      %23 = vector.broadcast %22 : vector<1x128xf32> to vector<32x128xf32>
      %24 = arith.addf %21, %23 : vector<32x128xf32>
      %cst_17 = arith.constant 6.250000e-02 : f32
      %25 = vector.broadcast %cst_17 : f32 to vector<32x128xf32>
      %26 = arith.divf %24, %25 : vector<32x128xf32>
      %27 = math.roundeven %26 : vector<32x128xf32>
      %cst_18 = arith.constant -1.280000e+02 : f32
      %cst_19 = arith.constant 1.270000e+02 : f32
      %28 = vector.broadcast %cst_18 : f32 to vector<32x128xf32>
      %29 = arith.maximumf %28, %27 : vector<32x128xf32>
      %30 = vector.broadcast %cst_19 : f32 to vector<32x128xf32>
      %31 = arith.minimumf %30, %29 : vector<32x128xf32>
      %cst_20 = arith.constant 6.250000e-02 : f32
      %32 = vector.broadcast %cst_20 : f32 to vector<32x128xf32>
      %33 = arith.mulf %31, %32 : vector<32x128xf32>
      %c0_21 = arith.constant 0 : index
      %c0_22 = arith.constant 0 : index
      %34 = vector.load %arg6[%c0_21, %c0_22] : memref<1x128xf32, #tpu.memory_space<vmem>>, vector<1x128xf32>
      %35 = vector.broadcast %34 : vector<1x128xf32> to vector<32x128xf32>
      %36 = arith.mulf %33, %35 : vector<32x128xf32>
      %c0_23 = arith.constant 0 : index
      %c0_24 = arith.constant 0 : index
      %37 = vector.load %arg5[%c0_23, %c0_24] : memref<32x128xbf16, #tpu.memory_space<vmem>>, vector<32x128xbf16>
      %38 = arith.extf %37 : vector<32x128xbf16> to vector<32x128xf32>
      %c0_25 = arith.constant 0 : index
      %c0_26 = arith.constant 0 : index
      %39 = vector.load %arg7[%c0_25, %c0_26] : memref<1x128xf32, #tpu.memory_space<vmem>>, vector<1x128xf32>
      %40 = vector.broadcast %39 : vector<1x128xf32> to vector<32x128xf32>
      %41 = arith.mulf %38, %40 : vector<32x128xf32>
      %42 = arith.addf %36, %41 : vector<32x128xf32>
      %cst_27 = arith.constant 6.250000e-02 : f32
      %43 = vector.broadcast %cst_27 : f32 to vector<32x128xf32>
      %44 = arith.divf %42, %43 : vector<32x128xf32>
      %45 = math.roundeven %44 : vector<32x128xf32>
      %cst_28 = arith.constant -1.280000e+02 : f32
      %cst_29 = arith.constant 1.270000e+02 : f32
      %46 = vector.broadcast %cst_28 : f32 to vector<32x128xf32>
      %47 = arith.maximumf %46, %45 : vector<32x128xf32>
      %48 = vector.broadcast %cst_29 : f32 to vector<32x128xf32>
      %49 = arith.minimumf %48, %47 : vector<32x128xf32>
      %cst_30 = arith.constant 6.250000e-02 : f32
      %50 = vector.broadcast %cst_30 : f32 to vector<32x128xf32>
      %51 = arith.mulf %49, %50 : vector<32x128xf32>
      %cst_31 = arith.constant 0.000000e+00 : f32
      %52 = vector.broadcast %cst_31 : f32 to vector<32x128xf32>
      %53 = arith.maximumf %51, %52 : vector<32x128xf32>
      %54 = arith.truncf %53 : vector<32x128xf32> to vector<32x128xbf16>
      %c0_32 = arith.constant 0 : index
      %c0_33 = arith.constant 0 : index
      %55 = vector.load %arg8[%c0_32, %c0_33] : memref<32x128xbf16, #tpu.memory_space<vmem>>, vector<32x128xbf16>
      tpu.vector_store %arg8[%c0_32, %c0_33], %54 {strides = array<i32>} : memref<32x128xbf16, #tpu.memory_space<vmem>>, vector<32x128xbf16>,
    } else {
    }
    return
  }
  func.func @transform_0(%arg0: i32, %arg1: i32) -> (i32, i32) {
    %c0_i32 = arith.constant 0 : i32
    return %arg0, %arg1 : i32, i32
  }
  func.func @transform_1(%arg0: i32, %arg1: i32) -> (i32, i32) {
    %c0_i32 = arith.constant 0 : i32
    %c0_i32_0 = arith.constant 0 : i32
    return %arg1, %c0_i32 : i32, i32
  }
  func.func @transform_2(%arg0: i32, %arg1: i32) -> (i32, i32) {
    %c0_i32 = arith.constant 0 : i32
    %c0_i32_0 = arith.constant 0 : i32
    %c0_i32_1 = arith.constant 0 : i32
    return %c0_i32, %c0_i32_0 : i32, i32
  }
  func.func @transform_3(%arg0: i32, %arg1: i32) -> (i32, i32) {
    %c0_i32 = arith.constant 0 : i32
    %c0_i32_0 = arith.constant 0 : i32
    return %arg0, %c0_i32 : i32, i32
  }
  func.func @transform_4(%arg0: i32, %arg1: i32) -> (i32, i32) {
    %c0_i32 = arith.constant 0 : i32
    %c0_i32_0 = arith.constant 0 : i32
    %c0_i32_1 = arith.constant 0 : i32
    return %c0_i32, %c0_i32_0 : i32, i32
  }
  func.func @transform_5(%arg0: i32, %arg1: i32) -> (i32, i32) {
    %c0_i32 = arith.constant 0 : i32
    %c0_i32_0 = arith.constant 0 : i32
    %c0_i32_1 = arith.constant 0 : i32
    return %c0_i32, %c0_i32_0 : i32, i32
  }
  func.func @transform_6(%arg0: i32, %arg1: i32) -> (i32, i32) {
    %c0_i32 = arith.constant 0 : i32
    %c0_i32_0 = arith.constant 0 : i32
    return %arg0, %c0_i32 : i32, i32
  }
}

module attributes {stable_mosaic.version = 11 : i64} {
  func.func @_mm_quant_kernel(%arg0: i32, %arg1: i32, %arg2: memref<8x256xbf16, #tpu.memory_space<vmem>>, %arg3: memref<256x256xbf16, #tpu.memory_space<vmem>>, %arg4: memref<1x256xf32, #tpu.memory_space<vmem>>, %arg5: memref<8x256xbf16, #tpu.memory_space<vmem>>, %arg6: memref<8x256xf32, #tpu.memory_space<vmem>>) attributes {dimension_semantics = [#tpu.dimension_semantics<parallel>, #tpu.dimension_semantics<arbitrary>], iteration_bounds = array<i64: 1, 5>, scalar_prefetch = 0 : i64, scratch_operands = 1 : i64, tpu.core_type = #tpu.core_type<tc>, window_params = [{transform_indices = @transform_0, window_bounds = array<i64: 8, 256>}, {transform_indices = @transform_1, window_bounds = array<i64: 256, 256>}, {pipeline_mode = #tpu.pipeline_mode<synchronous>, transform_indices = @transform_2, window_bounds = array<i64: 1, 256>}, {transform_indices = @transform_3, window_bounds = array<i64: 8, 256>}]} {
    %c0_i32 = arith.constant 0 : i32
    %0 = arith.cmpi eq, %arg1, %c0_i32 : i32
    %1 = arith.extui %0 : i1 to i32
    %c0_i32_0 = arith.constant 0 : i32
    %2 = arith.cmpi ne, %1, %c0_i32_0 : i32
    scf.if %2 {
      %cst_9 = arith.constant 0.000000e+00 : f32
      %12 = vector.broadcast %cst_9 : f32 to vector<8x256xf32>
      %c0_10 = arith.constant 0 : index
      %c0_11 = arith.constant 0 : index
      %13 = vector.load %arg6[%c0_10, %c0_11] : memref<8x256xf32, #tpu.memory_space<vmem>>, vector<8x256xf32>
      tpu.vector_store %arg6[%c0_10, %c0_11], %12 {strides = array<i32>} : memref<8x256xf32, #tpu.memory_space<vmem>>, vector<8x256xf32>,
    } else {
    }
    %c0 = arith.constant 0 : index
    %c0_1 = arith.constant 0 : index
    %3 = vector.load %arg6[%c0, %c0_1] : memref<8x256xf32, #tpu.memory_space<vmem>>, vector<8x256xf32>
    %c0_2 = arith.constant 0 : index
    %c0_3 = arith.constant 0 : index
    %4 = vector.load %arg2[%c0_2, %c0_3] : memref<8x256xbf16, #tpu.memory_space<vmem>>, vector<8x256xbf16>
    %c0_4 = arith.constant 0 : index
    %c0_5 = arith.constant 0 : index
    %5 = vector.load %arg3[%c0_4, %c0_5] : memref<256x256xbf16, #tpu.memory_space<vmem>>, vector<256x256xbf16>
    %cst = arith.constant dense<0.000000e+00> : vector<8x256xf32>
    %6 = tpu.matmul %4, %5, %cst {dimension_numbers = #tpu.dot_dimension_numbers<[1], [0], [0], [1], [0, 0, 1, 1], [], []>} : vector<8x256xbf16>, vector<256x256xbf16>, vector<8x256xf32> -> vector<8x256xf32>
    %7 = arith.addf %3, %6 : vector<8x256xf32>
    %c0_6 = arith.constant 0 : index
    %c0_7 = arith.constant 0 : index
    %8 = vector.load %arg6[%c0_6, %c0_7] : memref<8x256xf32, #tpu.memory_space<vmem>>, vector<8x256xf32>
    tpu.vector_store %arg6[%c0_6, %c0_7], %7 {strides = array<i32>} : memref<8x256xf32, #tpu.memory_space<vmem>>, vector<8x256xf32>,
    %c4_i32 = arith.constant 4 : i32
    %9 = arith.cmpi eq, %arg1, %c4_i32 : i32
    %10 = arith.extui %9 : i1 to i32
    %c0_i32_8 = arith.constant 0 : i32
    %11 = arith.cmpi ne, %10, %c0_i32_8 : i32
    scf.if %11 {
      %c0_9 = arith.constant 0 : index
      %c0_10 = arith.constant 0 : index
      %12 = vector.load %arg6[%c0_9, %c0_10] : memref<8x256xf32, #tpu.memory_space<vmem>>, vector<8x256xf32>
      %cst_11 = arith.constant 9.765625E-4 : f32
      %13 = vector.broadcast %cst_11 : f32 to vector<8x256xf32>
      %14 = arith.divf %12, %13 : vector<8x256xf32>
      %15 = math.roundeven %14 : vector<8x256xf32>
      %cst_12 = arith.constant -3.276800e+04 : f32
      %cst_13 = arith.constant 3.276700e+04 : f32
      %16 = vector.broadcast %cst_12 : f32 to vector<8x256xf32>
      %17 = arith.maximumf %16, %15 : vector<8x256xf32>
      %18 = vector.broadcast %cst_13 : f32 to vector<8x256xf32>
      %19 = arith.minimumf %18, %17 : vector<8x256xf32>
      %cst_14 = arith.constant 9.765625E-4 : f32
      %20 = vector.broadcast %cst_14 : f32 to vector<8x256xf32>
      %21 = arith.mulf %19, %20 : vector<8x256xf32>
      %c0_15 = arith.constant 0 : index
      %c0_16 = arith.constant 0 : index
      %22 = vector.load %arg4[%c0_15, %c0_16] : memref<1x256xf32, #tpu.memory_space<vmem>>, vector<1x256xf32>
      %23 = vector.broadcast %22 : vector<1x256xf32> to vector<8x256xf32>
      %24 = arith.addf %21, %23 : vector<8x256xf32>
      %cst_17 = arith.constant 6.250000e-02 : f32
      %25 = vector.broadcast %cst_17 : f32 to vector<8x256xf32>
      %26 = arith.divf %24, %25 : vector<8x256xf32>
      %27 = math.roundeven %26 : vector<8x256xf32>
      %cst_18 = arith.constant -1.280000e+02 : f32
      %cst_19 = arith.constant 1.270000e+02 : f32
      %28 = vector.broadcast %cst_18 : f32 to vector<8x256xf32>
      %29 = arith.maximumf %28, %27 : vector<8x256xf32>
      %30 = vector.broadcast %cst_19 : f32 to vector<8x256xf32>
      %31 = arith.minimumf %30, %29 : vector<8x256xf32>
      %cst_20 = arith.constant 6.250000e-02 : f32
      %32 = vector.broadcast %cst_20 : f32 to vector<8x256xf32>
      %33 = arith.mulf %31, %32 : vector<8x256xf32>
      %cst_21 = arith.constant 0.000000e+00 : f32
      %34 = vector.broadcast %cst_21 : f32 to vector<8x256xf32>
      %35 = arith.maximumf %33, %34 : vector<8x256xf32>
      %36 = arith.truncf %35 : vector<8x256xf32> to vector<8x256xbf16>
      %c0_22 = arith.constant 0 : index
      %c0_23 = arith.constant 0 : index
      %37 = vector.load %arg5[%c0_22, %c0_23] : memref<8x256xbf16, #tpu.memory_space<vmem>>, vector<8x256xbf16>
      tpu.vector_store %arg5[%c0_22, %c0_23], %36 {strides = array<i32>} : memref<8x256xbf16, #tpu.memory_space<vmem>>, vector<8x256xbf16>,
    } else {
    }
    return
  }
  func.func @transform_0(%arg0: i32, %arg1: i32) -> (i32, i32) {
    %c0_i32 = arith.constant 0 : i32
    return %arg0, %arg1 : i32, i32
  }
  func.func @transform_1(%arg0: i32, %arg1: i32) -> (i32, i32) {
    %c0_i32 = arith.constant 0 : i32
    %c0_i32_0 = arith.constant 0 : i32
    return %arg1, %c0_i32 : i32, i32
  }
  func.func @transform_2(%arg0: i32, %arg1: i32) -> (i32, i32) {
    %c0_i32 = arith.constant 0 : i32
    %c0_i32_0 = arith.constant 0 : i32
    %c0_i32_1 = arith.constant 0 : i32
    return %c0_i32, %c0_i32_0 : i32, i32
  }
  func.func @transform_3(%arg0: i32, %arg1: i32) -> (i32, i32) {
    %c0_i32 = arith.constant 0 : i32
    %c0_i32_0 = arith.constant 0 : i32
    return %arg0, %c0_i32 : i32, i32
  }
}

module attributes {stable_mosaic.version = 11 : i64} {
  func.func @_mm_quant_kernel(%arg0: i32, %arg1: i32, %arg2: memref<8x128xbf16, #tpu.memory_space<vmem>>, %arg3: memref<128x256xbf16, #tpu.memory_space<vmem>>, %arg4: memref<1x256xf32, #tpu.memory_space<vmem>>, %arg5: memref<8x256xbf16, #tpu.memory_space<vmem>>, %arg6: memref<8x256xf32, #tpu.memory_space<vmem>>) attributes {dimension_semantics = [#tpu.dimension_semantics<parallel>, #tpu.dimension_semantics<arbitrary>], iteration_bounds = array<i64: 1, 1>, scalar_prefetch = 0 : i64, scratch_operands = 1 : i64, tpu.core_type = #tpu.core_type<tc>, window_params = [{transform_indices = @transform_0, window_bounds = array<i64: 8, 128>}, {transform_indices = @transform_1, window_bounds = array<i64: 128, 256>}, {pipeline_mode = #tpu.pipeline_mode<synchronous>, transform_indices = @transform_2, window_bounds = array<i64: 1, 256>}, {transform_indices = @transform_3, window_bounds = array<i64: 8, 256>}]} {
    %c0_i32 = arith.constant 0 : i32
    %0 = arith.cmpi eq, %arg1, %c0_i32 : i32
    %1 = arith.extui %0 : i1 to i32
    %c0_i32_0 = arith.constant 0 : i32
    %2 = arith.cmpi ne, %1, %c0_i32_0 : i32
    scf.if %2 {
      %cst_10 = arith.constant 0.000000e+00 : f32
      %12 = vector.broadcast %cst_10 : f32 to vector<8x256xf32>
      %c0_11 = arith.constant 0 : index
      %c0_12 = arith.constant 0 : index
      %13 = vector.load %arg6[%c0_11, %c0_12] : memref<8x256xf32, #tpu.memory_space<vmem>>, vector<8x256xf32>
      tpu.vector_store %arg6[%c0_11, %c0_12], %12 {strides = array<i32>} : memref<8x256xf32, #tpu.memory_space<vmem>>, vector<8x256xf32>,
    } else {
    }
    %c0 = arith.constant 0 : index
    %c0_1 = arith.constant 0 : index
    %3 = vector.load %arg6[%c0, %c0_1] : memref<8x256xf32, #tpu.memory_space<vmem>>, vector<8x256xf32>
    %c0_2 = arith.constant 0 : index
    %c0_3 = arith.constant 0 : index
    %4 = vector.load %arg2[%c0_2, %c0_3] : memref<8x128xbf16, #tpu.memory_space<vmem>>, vector<8x128xbf16>
    %c0_4 = arith.constant 0 : index
    %c0_5 = arith.constant 0 : index
    %5 = vector.load %arg3[%c0_4, %c0_5] : memref<128x256xbf16, #tpu.memory_space<vmem>>, vector<128x256xbf16>
    %cst = arith.constant dense<0.000000e+00> : vector<8x256xf32>
    %6 = tpu.matmul %4, %5, %cst {dimension_numbers = #tpu.dot_dimension_numbers<[1], [0], [0], [1], [0, 0, 1, 1], [], []>} : vector<8x128xbf16>, vector<128x256xbf16>, vector<8x256xf32> -> vector<8x256xf32>
    %7 = arith.addf %3, %6 : vector<8x256xf32>
    %c0_6 = arith.constant 0 : index
    %c0_7 = arith.constant 0 : index
    %8 = vector.load %arg6[%c0_6, %c0_7] : memref<8x256xf32, #tpu.memory_space<vmem>>, vector<8x256xf32>
    tpu.vector_store %arg6[%c0_6, %c0_7], %7 {strides = array<i32>} : memref<8x256xf32, #tpu.memory_space<vmem>>, vector<8x256xf32>,
    %c0_i32_8 = arith.constant 0 : i32
    %9 = arith.cmpi eq, %arg1, %c0_i32_8 : i32
    %10 = arith.extui %9 : i1 to i32
    %c0_i32_9 = arith.constant 0 : i32
    %11 = arith.cmpi ne, %10, %c0_i32_9 : i32
    scf.if %11 {
      %c0_10 = arith.constant 0 : index
      %c0_11 = arith.constant 0 : index
      %12 = vector.load %arg6[%c0_10, %c0_11] : memref<8x256xf32, #tpu.memory_space<vmem>>, vector<8x256xf32>
      %cst_12 = arith.constant 9.765625E-4 : f32
      %13 = vector.broadcast %cst_12 : f32 to vector<8x256xf32>
      %14 = arith.divf %12, %13 : vector<8x256xf32>
      %15 = math.roundeven %14 : vector<8x256xf32>
      %cst_13 = arith.constant -3.276800e+04 : f32
      %cst_14 = arith.constant 3.276700e+04 : f32
      %16 = vector.broadcast %cst_13 : f32 to vector<8x256xf32>
      %17 = arith.maximumf %16, %15 : vector<8x256xf32>
      %18 = vector.broadcast %cst_14 : f32 to vector<8x256xf32>
      %19 = arith.minimumf %18, %17 : vector<8x256xf32>
      %cst_15 = arith.constant 9.765625E-4 : f32
      %20 = vector.broadcast %cst_15 : f32 to vector<8x256xf32>
      %21 = arith.mulf %19, %20 : vector<8x256xf32>
      %c0_16 = arith.constant 0 : index
      %c0_17 = arith.constant 0 : index
      %22 = vector.load %arg4[%c0_16, %c0_17] : memref<1x256xf32, #tpu.memory_space<vmem>>, vector<1x256xf32>
      %23 = vector.broadcast %22 : vector<1x256xf32> to vector<8x256xf32>
      %24 = arith.addf %21, %23 : vector<8x256xf32>
      %cst_18 = arith.constant 6.250000e-02 : f32
      %25 = vector.broadcast %cst_18 : f32 to vector<8x256xf32>
      %26 = arith.divf %24, %25 : vector<8x256xf32>
      %27 = math.roundeven %26 : vector<8x256xf32>
      %cst_19 = arith.constant -1.280000e+02 : f32
      %cst_20 = arith.constant 1.270000e+02 : f32
      %28 = vector.broadcast %cst_19 : f32 to vector<8x256xf32>
      %29 = arith.maximumf %28, %27 : vector<8x256xf32>
      %30 = vector.broadcast %cst_20 : f32 to vector<8x256xf32>
      %31 = arith.minimumf %30, %29 : vector<8x256xf32>
      %cst_21 = arith.constant 6.250000e-02 : f32
      %32 = vector.broadcast %cst_21 : f32 to vector<8x256xf32>
      %33 = arith.mulf %31, %32 : vector<8x256xf32>
      %34 = arith.truncf %33 : vector<8x256xf32> to vector<8x256xbf16>
      %c0_22 = arith.constant 0 : index
      %c0_23 = arith.constant 0 : index
      %35 = vector.load %arg5[%c0_22, %c0_23] : memref<8x256xbf16, #tpu.memory_space<vmem>>, vector<8x256xbf16>
      tpu.vector_store %arg5[%c0_22, %c0_23], %34 {strides = array<i32>} : memref<8x256xbf16, #tpu.memory_space<vmem>>, vector<8x256xbf16>,
    } else {
    }
    return
  }
  func.func @transform_0(%arg0: i32, %arg1: i32) -> (i32, i32) {
    %c0_i32 = arith.constant 0 : i32
    return %arg0, %arg1 : i32, i32
  }
  func.func @transform_1(%arg0: i32, %arg1: i32) -> (i32, i32) {
    %c0_i32 = arith.constant 0 : i32
    %c0_i32_0 = arith.constant 0 : i32
    return %arg1, %c0_i32 : i32, i32
  }
  func.func @transform_2(%arg0: i32, %arg1: i32) -> (i32, i32) {
    %c0_i32 = arith.constant 0 : i32
    %c0_i32_0 = arith.constant 0 : i32
    %c0_i32_1 = arith.constant 0 : i32
    return %c0_i32, %c0_i32_0 : i32, i32
  }
  func.func @transform_3(%arg0: i32, %arg1: i32) -> (i32, i32) {
    %c0_i32 = arith.constant 0 : i32
    %c0_i32_0 = arith.constant 0 : i32
    return %arg0, %c0_i32 : i32, i32
  }
}

module attributes {stable_mosaic.version = 11 : i64} {
  func.func @_mm_quant_res_kernel(%arg0: i32, %arg1: i32, %arg2: memref<8x512xbf16, #tpu.memory_space<vmem>>, %arg3: memref<512x256xbf16, #tpu.memory_space<vmem>>, %arg4: memref<1x256xf32, #tpu.memory_space<vmem>>, %arg5: memref<8x256xbf16, #tpu.memory_space<vmem>>, %arg6: memref<1x256xf32, #tpu.memory_space<vmem>>, %arg7: memref<1x256xf32, #tpu.memory_space<vmem>>, %arg8: memref<8x256xbf16, #tpu.memory_space<vmem>>, %arg9: memref<8x256xf32, #tpu.memory_space<vmem>>) attributes {dimension_semantics = [#tpu.dimension_semantics<parallel>, #tpu.dimension_semantics<arbitrary>], iteration_bounds = array<i64: 1, 5>, scalar_prefetch = 0 : i64, scratch_operands = 1 : i64, tpu.core_type = #tpu.core_type<tc>, window_params = [{transform_indices = @transform_0, window_bounds = array<i64: 8, 512>}, {transform_indices = @transform_1, window_bounds = array<i64: 512, 256>}, {pipeline_mode = #tpu.pipeline_mode<synchronous>, transform_indices = @transform_2, window_bounds = array<i64: 1, 256>}, {transform_indices = @transform_3, window_bounds = array<i64: 8, 256>}, {pipeline_mode = #tpu.pipeline_mode<synchronous>, transform_indices = @transform_4, window_bounds = array<i64: 1, 256>}, {pipeline_mode = #tpu.pipeline_mode<synchronous>, transform_indices = @transform_5, window_bounds = array<i64: 1, 256>}, {transform_indices = @transform_6, window_bounds = array<i64: 8, 256>}]} {
    %c0_i32 = arith.constant 0 : i32
    %0 = arith.cmpi eq, %arg1, %c0_i32 : i32
    %1 = arith.extui %0 : i1 to i32
    %c0_i32_0 = arith.constant 0 : i32
    %2 = arith.cmpi ne, %1, %c0_i32_0 : i32
    scf.if %2 {
      %cst_9 = arith.constant 0.000000e+00 : f32
      %12 = vector.broadcast %cst_9 : f32 to vector<8x256xf32>
      %c0_10 = arith.constant 0 : index
      %c0_11 = arith.constant 0 : index
      %13 = vector.load %arg9[%c0_10, %c0_11] : memref<8x256xf32, #tpu.memory_space<vmem>>, vector<8x256xf32>
      tpu.vector_store %arg9[%c0_10, %c0_11], %12 {strides = array<i32>} : memref<8x256xf32, #tpu.memory_space<vmem>>, vector<8x256xf32>,
    } else {
    }
    %c0 = arith.constant 0 : index
    %c0_1 = arith.constant 0 : index
    %3 = vector.load %arg9[%c0, %c0_1] : memref<8x256xf32, #tpu.memory_space<vmem>>, vector<8x256xf32>
    %c0_2 = arith.constant 0 : index
    %c0_3 = arith.constant 0 : index
    %4 = vector.load %arg2[%c0_2, %c0_3] : memref<8x512xbf16, #tpu.memory_space<vmem>>, vector<8x512xbf16>
    %c0_4 = arith.constant 0 : index
    %c0_5 = arith.constant 0 : index
    %5 = vector.load %arg3[%c0_4, %c0_5] : memref<512x256xbf16, #tpu.memory_space<vmem>>, vector<512x256xbf16>
    %cst = arith.constant dense<0.000000e+00> : vector<8x256xf32>
    %6 = tpu.matmul %4, %5, %cst {dimension_numbers = #tpu.dot_dimension_numbers<[1], [0], [0], [1], [0, 0, 1, 1], [], []>} : vector<8x512xbf16>, vector<512x256xbf16>, vector<8x256xf32> -> vector<8x256xf32>
    %7 = arith.addf %3, %6 : vector<8x256xf32>
    %c0_6 = arith.constant 0 : index
    %c0_7 = arith.constant 0 : index
    %8 = vector.load %arg9[%c0_6, %c0_7] : memref<8x256xf32, #tpu.memory_space<vmem>>, vector<8x256xf32>
    tpu.vector_store %arg9[%c0_6, %c0_7], %7 {strides = array<i32>} : memref<8x256xf32, #tpu.memory_space<vmem>>, vector<8x256xf32>,
    %c4_i32 = arith.constant 4 : i32
    %9 = arith.cmpi eq, %arg1, %c4_i32 : i32
    %10 = arith.extui %9 : i1 to i32
    %c0_i32_8 = arith.constant 0 : i32
    %11 = arith.cmpi ne, %10, %c0_i32_8 : i32
    scf.if %11 {
      %c0_9 = arith.constant 0 : index
      %c0_10 = arith.constant 0 : index
      %12 = vector.load %arg9[%c0_9, %c0_10] : memref<8x256xf32, #tpu.memory_space<vmem>>, vector<8x256xf32>
      %cst_11 = arith.constant 9.765625E-4 : f32
      %13 = vector.broadcast %cst_11 : f32 to vector<8x256xf32>
      %14 = arith.divf %12, %13 : vector<8x256xf32>
      %15 = math.roundeven %14 : vector<8x256xf32>
      %cst_12 = arith.constant -3.276800e+04 : f32
      %cst_13 = arith.constant 3.276700e+04 : f32
      %16 = vector.broadcast %cst_12 : f32 to vector<8x256xf32>
      %17 = arith.maximumf %16, %15 : vector<8x256xf32>
      %18 = vector.broadcast %cst_13 : f32 to vector<8x256xf32>
      %19 = arith.minimumf %18, %17 : vector<8x256xf32>
      %cst_14 = arith.constant 9.765625E-4 : f32
      %20 = vector.broadcast %cst_14 : f32 to vector<8x256xf32>
      %21 = arith.mulf %19, %20 : vector<8x256xf32>
      %c0_15 = arith.constant 0 : index
      %c0_16 = arith.constant 0 : index
      %22 = vector.load %arg4[%c0_15, %c0_16] : memref<1x256xf32, #tpu.memory_space<vmem>>, vector<1x256xf32>
      %23 = vector.broadcast %22 : vector<1x256xf32> to vector<8x256xf32>
      %24 = arith.addf %21, %23 : vector<8x256xf32>
      %cst_17 = arith.constant 6.250000e-02 : f32
      %25 = vector.broadcast %cst_17 : f32 to vector<8x256xf32>
      %26 = arith.divf %24, %25 : vector<8x256xf32>
      %27 = math.roundeven %26 : vector<8x256xf32>
      %cst_18 = arith.constant -1.280000e+02 : f32
      %cst_19 = arith.constant 1.270000e+02 : f32
      %28 = vector.broadcast %cst_18 : f32 to vector<8x256xf32>
      %29 = arith.maximumf %28, %27 : vector<8x256xf32>
      %30 = vector.broadcast %cst_19 : f32 to vector<8x256xf32>
      %31 = arith.minimumf %30, %29 : vector<8x256xf32>
      %cst_20 = arith.constant 6.250000e-02 : f32
      %32 = vector.broadcast %cst_20 : f32 to vector<8x256xf32>
      %33 = arith.mulf %31, %32 : vector<8x256xf32>
      %c0_21 = arith.constant 0 : index
      %c0_22 = arith.constant 0 : index
      %34 = vector.load %arg6[%c0_21, %c0_22] : memref<1x256xf32, #tpu.memory_space<vmem>>, vector<1x256xf32>
      %35 = vector.broadcast %34 : vector<1x256xf32> to vector<8x256xf32>
      %36 = arith.mulf %33, %35 : vector<8x256xf32>
      %c0_23 = arith.constant 0 : index
      %c0_24 = arith.constant 0 : index
      %37 = vector.load %arg5[%c0_23, %c0_24] : memref<8x256xbf16, #tpu.memory_space<vmem>>, vector<8x256xbf16>
      %38 = arith.extf %37 : vector<8x256xbf16> to vector<8x256xf32>
      %c0_25 = arith.constant 0 : index
      %c0_26 = arith.constant 0 : index
      %39 = vector.load %arg7[%c0_25, %c0_26] : memref<1x256xf32, #tpu.memory_space<vmem>>, vector<1x256xf32>
      %40 = vector.broadcast %39 : vector<1x256xf32> to vector<8x256xf32>
      %41 = arith.mulf %38, %40 : vector<8x256xf32>
      %42 = arith.addf %36, %41 : vector<8x256xf32>
      %cst_27 = arith.constant 6.250000e-02 : f32
      %43 = vector.broadcast %cst_27 : f32 to vector<8x256xf32>
      %44 = arith.divf %42, %43 : vector<8x256xf32>
      %45 = math.roundeven %44 : vector<8x256xf32>
      %cst_28 = arith.constant -1.280000e+02 : f32
      %cst_29 = arith.constant 1.270000e+02 : f32
      %46 = vector.broadcast %cst_28 : f32 to vector<8x256xf32>
      %47 = arith.maximumf %46, %45 : vector<8x256xf32>
      %48 = vector.broadcast %cst_29 : f32 to vector<8x256xf32>
      %49 = arith.minimumf %48, %47 : vector<8x256xf32>
      %cst_30 = arith.constant 6.250000e-02 : f32
      %50 = vector.broadcast %cst_30 : f32 to vector<8x256xf32>
      %51 = arith.mulf %49, %50 : vector<8x256xf32>
      %cst_31 = arith.constant 0.000000e+00 : f32
      %52 = vector.broadcast %cst_31 : f32 to vector<8x256xf32>
      %53 = arith.maximumf %51, %52 : vector<8x256xf32>
      %54 = arith.truncf %53 : vector<8x256xf32> to vector<8x256xbf16>
      %c0_32 = arith.constant 0 : index
      %c0_33 = arith.constant 0 : index
      %55 = vector.load %arg8[%c0_32, %c0_33] : memref<8x256xbf16, #tpu.memory_space<vmem>>, vector<8x256xbf16>
      tpu.vector_store %arg8[%c0_32, %c0_33], %54 {strides = array<i32>} : memref<8x256xbf16, #tpu.memory_space<vmem>>, vector<8x256xbf16>,
    } else {
    }
    return
  }
  func.func @transform_0(%arg0: i32, %arg1: i32) -> (i32, i32) {
    %c0_i32 = arith.constant 0 : i32
    return %arg0, %arg1 : i32, i32
  }
  func.func @transform_1(%arg0: i32, %arg1: i32) -> (i32, i32) {
    %c0_i32 = arith.constant 0 : i32
    %c0_i32_0 = arith.constant 0 : i32
    return %arg1, %c0_i32 : i32, i32
  }
  func.func @transform_2(%arg0: i32, %arg1: i32) -> (i32, i32) {
    %c0_i32 = arith.constant 0 : i32
    %c0_i32_0 = arith.constant 0 : i32
    %c0_i32_1 = arith.constant 0 : i32
    return %c0_i32, %c0_i32_0 : i32, i32
  }
  func.func @transform_3(%arg0: i32, %arg1: i32) -> (i32, i32) {
    %c0_i32 = arith.constant 0 : i32
    %c0_i32_0 = arith.constant 0 : i32
    return %arg0, %c0_i32 : i32, i32
  }
  func.func @transform_4(%arg0: i32, %arg1: i32) -> (i32, i32) {
    %c0_i32 = arith.constant 0 : i32
    %c0_i32_0 = arith.constant 0 : i32
    %c0_i32_1 = arith.constant 0 : i32
    return %c0_i32, %c0_i32_0 : i32, i32
  }
  func.func @transform_5(%arg0: i32, %arg1: i32) -> (i32, i32) {
    %c0_i32 = arith.constant 0 : i32
    %c0_i32_0 = arith.constant 0 : i32
    %c0_i32_1 = arith.constant 0 : i32
    return %c0_i32, %c0_i32_0 : i32, i32
  }
  func.func @transform_6(%arg0: i32, %arg1: i32) -> (i32, i32) {
    %c0_i32 = arith.constant 0 : i32
    %c0_i32_0 = arith.constant 0 : i32
    return %arg0, %c0_i32 : i32, i32
  }
}

module attributes {stable_mosaic.version = 11 : i64} {
  func.func @_mm_quant_kernel(%arg0: i32, %arg1: i32, %arg2: memref<8x512xbf16, #tpu.memory_space<vmem>>, %arg3: memref<512x256xbf16, #tpu.memory_space<vmem>>, %arg4: memref<1x256xf32, #tpu.memory_space<vmem>>, %arg5: memref<8x256xbf16, #tpu.memory_space<vmem>>, %arg6: memref<8x256xf32, #tpu.memory_space<vmem>>) attributes {dimension_semantics = [#tpu.dimension_semantics<parallel>, #tpu.dimension_semantics<arbitrary>], iteration_bounds = array<i64: 1, 5>, scalar_prefetch = 0 : i64, scratch_operands = 1 : i64, tpu.core_type = #tpu.core_type<tc>, window_params = [{transform_indices = @transform_0, window_bounds = array<i64: 8, 512>}, {transform_indices = @transform_1, window_bounds = array<i64: 512, 256>}, {pipeline_mode = #tpu.pipeline_mode<synchronous>, transform_indices = @transform_2, window_bounds = array<i64: 1, 256>}, {transform_indices = @transform_3, window_bounds = array<i64: 8, 256>}]} {
    %c0_i32 = arith.constant 0 : i32
    %0 = arith.cmpi eq, %arg1, %c0_i32 : i32
    %1 = arith.extui %0 : i1 to i32
    %c0_i32_0 = arith.constant 0 : i32
    %2 = arith.cmpi ne, %1, %c0_i32_0 : i32
    scf.if %2 {
      %cst_9 = arith.constant 0.000000e+00 : f32
      %12 = vector.broadcast %cst_9 : f32 to vector<8x256xf32>
      %c0_10 = arith.constant 0 : index
      %c0_11 = arith.constant 0 : index
      %13 = vector.load %arg6[%c0_10, %c0_11] : memref<8x256xf32, #tpu.memory_space<vmem>>, vector<8x256xf32>
      tpu.vector_store %arg6[%c0_10, %c0_11], %12 {strides = array<i32>} : memref<8x256xf32, #tpu.memory_space<vmem>>, vector<8x256xf32>,
    } else {
    }
    %c0 = arith.constant 0 : index
    %c0_1 = arith.constant 0 : index
    %3 = vector.load %arg6[%c0, %c0_1] : memref<8x256xf32, #tpu.memory_space<vmem>>, vector<8x256xf32>
    %c0_2 = arith.constant 0 : index
    %c0_3 = arith.constant 0 : index
    %4 = vector.load %arg2[%c0_2, %c0_3] : memref<8x512xbf16, #tpu.memory_space<vmem>>, vector<8x512xbf16>
    %c0_4 = arith.constant 0 : index
    %c0_5 = arith.constant 0 : index
    %5 = vector.load %arg3[%c0_4, %c0_5] : memref<512x256xbf16, #tpu.memory_space<vmem>>, vector<512x256xbf16>
    %cst = arith.constant dense<0.000000e+00> : vector<8x256xf32>
    %6 = tpu.matmul %4, %5, %cst {dimension_numbers = #tpu.dot_dimension_numbers<[1], [0], [0], [1], [0, 0, 1, 1], [], []>} : vector<8x512xbf16>, vector<512x256xbf16>, vector<8x256xf32> -> vector<8x256xf32>
    %7 = arith.addf %3, %6 : vector<8x256xf32>
    %c0_6 = arith.constant 0 : index
    %c0_7 = arith.constant 0 : index
    %8 = vector.load %arg6[%c0_6, %c0_7] : memref<8x256xf32, #tpu.memory_space<vmem>>, vector<8x256xf32>
    tpu.vector_store %arg6[%c0_6, %c0_7], %7 {strides = array<i32>} : memref<8x256xf32, #tpu.memory_space<vmem>>, vector<8x256xf32>,
    %c4_i32 = arith.constant 4 : i32
    %9 = arith.cmpi eq, %arg1, %c4_i32 : i32
    %10 = arith.extui %9 : i1 to i32
    %c0_i32_8 = arith.constant 0 : i32
    %11 = arith.cmpi ne, %10, %c0_i32_8 : i32
    scf.if %11 {
      %c0_9 = arith.constant 0 : index
      %c0_10 = arith.constant 0 : index
      %12 = vector.load %arg6[%c0_9, %c0_10] : memref<8x256xf32, #tpu.memory_space<vmem>>, vector<8x256xf32>
      %cst_11 = arith.constant 9.765625E-4 : f32
      %13 = vector.broadcast %cst_11 : f32 to vector<8x256xf32>
      %14 = arith.divf %12, %13 : vector<8x256xf32>
      %15 = math.roundeven %14 : vector<8x256xf32>
      %cst_12 = arith.constant -3.276800e+04 : f32
      %cst_13 = arith.constant 3.276700e+04 : f32
      %16 = vector.broadcast %cst_12 : f32 to vector<8x256xf32>
      %17 = arith.maximumf %16, %15 : vector<8x256xf32>
      %18 = vector.broadcast %cst_13 : f32 to vector<8x256xf32>
      %19 = arith.minimumf %18, %17 : vector<8x256xf32>
      %cst_14 = arith.constant 9.765625E-4 : f32
      %20 = vector.broadcast %cst_14 : f32 to vector<8x256xf32>
      %21 = arith.mulf %19, %20 : vector<8x256xf32>
      %c0_15 = arith.constant 0 : index
      %c0_16 = arith.constant 0 : index
      %22 = vector.load %arg4[%c0_15, %c0_16] : memref<1x256xf32, #tpu.memory_space<vmem>>, vector<1x256xf32>
      %23 = vector.broadcast %22 : vector<1x256xf32> to vector<8x256xf32>
      %24 = arith.addf %21, %23 : vector<8x256xf32>
      %cst_17 = arith.constant 6.250000e-02 : f32
      %25 = vector.broadcast %cst_17 : f32 to vector<8x256xf32>
      %26 = arith.divf %24, %25 : vector<8x256xf32>
      %27 = math.roundeven %26 : vector<8x256xf32>
      %cst_18 = arith.constant -1.280000e+02 : f32
      %cst_19 = arith.constant 1.270000e+02 : f32
      %28 = vector.broadcast %cst_18 : f32 to vector<8x256xf32>
      %29 = arith.maximumf %28, %27 : vector<8x256xf32>
      %30 = vector.broadcast %cst_19 : f32 to vector<8x256xf32>
      %31 = arith.minimumf %30, %29 : vector<8x256xf32>
      %cst_20 = arith.constant 6.250000e-02 : f32
      %32 = vector.broadcast %cst_20 : f32 to vector<8x256xf32>
      %33 = arith.mulf %31, %32 : vector<8x256xf32>
      %cst_21 = arith.constant 0.000000e+00 : f32
      %34 = vector.broadcast %cst_21 : f32 to vector<8x256xf32>
      %35 = arith.maximumf %33, %34 : vector<8x256xf32>
      %36 = arith.truncf %35 : vector<8x256xf32> to vector<8x256xbf16>
      %c0_22 = arith.constant 0 : index
      %c0_23 = arith.constant 0 : index
      %37 = vector.load %arg5[%c0_22, %c0_23] : memref<8x256xbf16, #tpu.memory_space<vmem>>, vector<8x256xbf16>
      tpu.vector_store %arg5[%c0_22, %c0_23], %36 {strides = array<i32>} : memref<8x256xbf16, #tpu.memory_space<vmem>>, vector<8x256xbf16>,
    } else {
    }
    return
  }
  func.func @transform_0(%arg0: i32, %arg1: i32) -> (i32, i32) {
    %c0_i32 = arith.constant 0 : i32
    return %arg0, %arg1 : i32, i32
  }
  func.func @transform_1(%arg0: i32, %arg1: i32) -> (i32, i32) {
    %c0_i32 = arith.constant 0 : i32
    %c0_i32_0 = arith.constant 0 : i32
    return %arg1, %c0_i32 : i32, i32
  }
  func.func @transform_2(%arg0: i32, %arg1: i32) -> (i32, i32) {
    %c0_i32 = arith.constant 0 : i32
    %c0_i32_0 = arith.constant 0 : i32
    %c0_i32_1 = arith.constant 0 : i32
    return %c0_i32, %c0_i32_0 : i32, i32
  }
  func.func @transform_3(%arg0: i32, %arg1: i32) -> (i32, i32) {
    %c0_i32 = arith.constant 0 : i32
    %c0_i32_0 = arith.constant 0 : i32
    return %arg0, %c0_i32 : i32, i32
  }
}

module attributes {stable_mosaic.version = 11 : i64} {
  func.func @_mm_quant_kernel(%arg0: i32, %arg1: i32, %arg2: memref<8x512xbf16, #tpu.memory_space<vmem>>, %arg3: memref<512x512xbf16, #tpu.memory_space<vmem>>, %arg4: memref<1x512xf32, #tpu.memory_space<vmem>>, %arg5: memref<8x512xbf16, #tpu.memory_space<vmem>>, %arg6: memref<8x512xf32, #tpu.memory_space<vmem>>) attributes {dimension_semantics = [#tpu.dimension_semantics<parallel>, #tpu.dimension_semantics<arbitrary>], iteration_bounds = array<i64: 1, 5>, scalar_prefetch = 0 : i64, scratch_operands = 1 : i64, tpu.core_type = #tpu.core_type<tc>, window_params = [{transform_indices = @transform_0, window_bounds = array<i64: 8, 512>}, {transform_indices = @transform_1, window_bounds = array<i64: 512, 512>}, {pipeline_mode = #tpu.pipeline_mode<synchronous>, transform_indices = @transform_2, window_bounds = array<i64: 1, 512>}, {transform_indices = @transform_3, window_bounds = array<i64: 8, 512>}]} {
    %c0_i32 = arith.constant 0 : i32
    %0 = arith.cmpi eq, %arg1, %c0_i32 : i32
    %1 = arith.extui %0 : i1 to i32
    %c0_i32_0 = arith.constant 0 : i32
    %2 = arith.cmpi ne, %1, %c0_i32_0 : i32
    scf.if %2 {
      %cst_9 = arith.constant 0.000000e+00 : f32
      %12 = vector.broadcast %cst_9 : f32 to vector<8x512xf32>
      %c0_10 = arith.constant 0 : index
      %c0_11 = arith.constant 0 : index
      %13 = vector.load %arg6[%c0_10, %c0_11] : memref<8x512xf32, #tpu.memory_space<vmem>>, vector<8x512xf32>
      tpu.vector_store %arg6[%c0_10, %c0_11], %12 {strides = array<i32>} : memref<8x512xf32, #tpu.memory_space<vmem>>, vector<8x512xf32>,
    } else {
    }
    %c0 = arith.constant 0 : index
    %c0_1 = arith.constant 0 : index
    %3 = vector.load %arg6[%c0, %c0_1] : memref<8x512xf32, #tpu.memory_space<vmem>>, vector<8x512xf32>
    %c0_2 = arith.constant 0 : index
    %c0_3 = arith.constant 0 : index
    %4 = vector.load %arg2[%c0_2, %c0_3] : memref<8x512xbf16, #tpu.memory_space<vmem>>, vector<8x512xbf16>
    %c0_4 = arith.constant 0 : index
    %c0_5 = arith.constant 0 : index
    %5 = vector.load %arg3[%c0_4, %c0_5] : memref<512x512xbf16, #tpu.memory_space<vmem>>, vector<512x512xbf16>
    %cst = arith.constant dense<0.000000e+00> : vector<8x512xf32>
    %6 = tpu.matmul %4, %5, %cst {dimension_numbers = #tpu.dot_dimension_numbers<[1], [0], [0], [1], [0, 0, 1, 1], [], []>} : vector<8x512xbf16>, vector<512x512xbf16>, vector<8x512xf32> -> vector<8x512xf32>
    %7 = arith.addf %3, %6 : vector<8x512xf32>
    %c0_6 = arith.constant 0 : index
    %c0_7 = arith.constant 0 : index
    %8 = vector.load %arg6[%c0_6, %c0_7] : memref<8x512xf32, #tpu.memory_space<vmem>>, vector<8x512xf32>
    tpu.vector_store %arg6[%c0_6, %c0_7], %7 {strides = array<i32>} : memref<8x512xf32, #tpu.memory_space<vmem>>, vector<8x512xf32>,
    %c4_i32 = arith.constant 4 : i32
    %9 = arith.cmpi eq, %arg1, %c4_i32 : i32
    %10 = arith.extui %9 : i1 to i32
    %c0_i32_8 = arith.constant 0 : i32
    %11 = arith.cmpi ne, %10, %c0_i32_8 : i32
    scf.if %11 {
      %c0_9 = arith.constant 0 : index
      %c0_10 = arith.constant 0 : index
      %12 = vector.load %arg6[%c0_9, %c0_10] : memref<8x512xf32, #tpu.memory_space<vmem>>, vector<8x512xf32>
      %cst_11 = arith.constant 9.765625E-4 : f32
      %13 = vector.broadcast %cst_11 : f32 to vector<8x512xf32>
      %14 = arith.divf %12, %13 : vector<8x512xf32>
      %15 = math.roundeven %14 : vector<8x512xf32>
      %cst_12 = arith.constant -3.276800e+04 : f32
      %cst_13 = arith.constant 3.276700e+04 : f32
      %16 = vector.broadcast %cst_12 : f32 to vector<8x512xf32>
      %17 = arith.maximumf %16, %15 : vector<8x512xf32>
      %18 = vector.broadcast %cst_13 : f32 to vector<8x512xf32>
      %19 = arith.minimumf %18, %17 : vector<8x512xf32>
      %cst_14 = arith.constant 9.765625E-4 : f32
      %20 = vector.broadcast %cst_14 : f32 to vector<8x512xf32>
      %21 = arith.mulf %19, %20 : vector<8x512xf32>
      %c0_15 = arith.constant 0 : index
      %c0_16 = arith.constant 0 : index
      %22 = vector.load %arg4[%c0_15, %c0_16] : memref<1x512xf32, #tpu.memory_space<vmem>>, vector<1x512xf32>
      %23 = vector.broadcast %22 : vector<1x512xf32> to vector<8x512xf32>
      %24 = arith.addf %21, %23 : vector<8x512xf32>
      %cst_17 = arith.constant 6.250000e-02 : f32
      %25 = vector.broadcast %cst_17 : f32 to vector<8x512xf32>
      %26 = arith.divf %24, %25 : vector<8x512xf32>
      %27 = math.roundeven %26 : vector<8x512xf32>
      %cst_18 = arith.constant -1.280000e+02 : f32
      %cst_19 = arith.constant 1.270000e+02 : f32
      %28 = vector.broadcast %cst_18 : f32 to vector<8x512xf32>
      %29 = arith.maximumf %28, %27 : vector<8x512xf32>
      %30 = vector.broadcast %cst_19 : f32 to vector<8x512xf32>
      %31 = arith.minimumf %30, %29 : vector<8x512xf32>
      %cst_20 = arith.constant 6.250000e-02 : f32
      %32 = vector.broadcast %cst_20 : f32 to vector<8x512xf32>
      %33 = arith.mulf %31, %32 : vector<8x512xf32>
      %cst_21 = arith.constant 0.000000e+00 : f32
      %34 = vector.broadcast %cst_21 : f32 to vector<8x512xf32>
      %35 = arith.maximumf %33, %34 : vector<8x512xf32>
      %36 = arith.truncf %35 : vector<8x512xf32> to vector<8x512xbf16>
      %c0_22 = arith.constant 0 : index
      %c0_23 = arith.constant 0 : index
      %37 = vector.load %arg5[%c0_22, %c0_23] : memref<8x512xbf16, #tpu.memory_space<vmem>>, vector<8x512xbf16>
      tpu.vector_store %arg5[%c0_22, %c0_23], %36 {strides = array<i32>} : memref<8x512xbf16, #tpu.memory_space<vmem>>, vector<8x512xbf16>,
    } else {
    }
    return
  }
  func.func @transform_0(%arg0: i32, %arg1: i32) -> (i32, i32) {
    %c0_i32 = arith.constant 0 : i32
    return %arg0, %arg1 : i32, i32
  }
  func.func @transform_1(%arg0: i32, %arg1: i32) -> (i32, i32) {
    %c0_i32 = arith.constant 0 : i32
    %c0_i32_0 = arith.constant 0 : i32
    return %arg1, %c0_i32 : i32, i32
  }
  func.func @transform_2(%arg0: i32, %arg1: i32) -> (i32, i32) {
    %c0_i32 = arith.constant 0 : i32
    %c0_i32_0 = arith.constant 0 : i32
    %c0_i32_1 = arith.constant 0 : i32
    return %c0_i32, %c0_i32_0 : i32, i32
  }
  func.func @transform_3(%arg0: i32, %arg1: i32) -> (i32, i32) {
    %c0_i32 = arith.constant 0 : i32
    %c0_i32_0 = arith.constant 0 : i32
    return %arg0, %c0_i32 : i32, i32
  }
}

module attributes {stable_mosaic.version = 11 : i64} {
  func.func @_mm_quant_kernel(%arg0: i32, %arg1: i32, %arg2: memref<8x256xbf16, #tpu.memory_space<vmem>>, %arg3: memref<256x512xbf16, #tpu.memory_space<vmem>>, %arg4: memref<1x512xf32, #tpu.memory_space<vmem>>, %arg5: memref<8x512xbf16, #tpu.memory_space<vmem>>, %arg6: memref<8x512xf32, #tpu.memory_space<vmem>>) attributes {dimension_semantics = [#tpu.dimension_semantics<parallel>, #tpu.dimension_semantics<arbitrary>], iteration_bounds = array<i64: 1, 1>, scalar_prefetch = 0 : i64, scratch_operands = 1 : i64, tpu.core_type = #tpu.core_type<tc>, window_params = [{transform_indices = @transform_0, window_bounds = array<i64: 8, 256>}, {transform_indices = @transform_1, window_bounds = array<i64: 256, 512>}, {pipeline_mode = #tpu.pipeline_mode<synchronous>, transform_indices = @transform_2, window_bounds = array<i64: 1, 512>}, {transform_indices = @transform_3, window_bounds = array<i64: 8, 512>}]} {
    %c0_i32 = arith.constant 0 : i32
    %0 = arith.cmpi eq, %arg1, %c0_i32 : i32
    %1 = arith.extui %0 : i1 to i32
    %c0_i32_0 = arith.constant 0 : i32
    %2 = arith.cmpi ne, %1, %c0_i32_0 : i32
    scf.if %2 {
      %cst_10 = arith.constant 0.000000e+00 : f32
      %12 = vector.broadcast %cst_10 : f32 to vector<8x512xf32>
      %c0_11 = arith.constant 0 : index
      %c0_12 = arith.constant 0 : index
      %13 = vector.load %arg6[%c0_11, %c0_12] : memref<8x512xf32, #tpu.memory_space<vmem>>, vector<8x512xf32>
      tpu.vector_store %arg6[%c0_11, %c0_12], %12 {strides = array<i32>} : memref<8x512xf32, #tpu.memory_space<vmem>>, vector<8x512xf32>,
    } else {
    }
    %c0 = arith.constant 0 : index
    %c0_1 = arith.constant 0 : index
    %3 = vector.load %arg6[%c0, %c0_1] : memref<8x512xf32, #tpu.memory_space<vmem>>, vector<8x512xf32>
    %c0_2 = arith.constant 0 : index
    %c0_3 = arith.constant 0 : index
    %4 = vector.load %arg2[%c0_2, %c0_3] : memref<8x256xbf16, #tpu.memory_space<vmem>>, vector<8x256xbf16>
    %c0_4 = arith.constant 0 : index
    %c0_5 = arith.constant 0 : index
    %5 = vector.load %arg3[%c0_4, %c0_5] : memref<256x512xbf16, #tpu.memory_space<vmem>>, vector<256x512xbf16>
    %cst = arith.constant dense<0.000000e+00> : vector<8x512xf32>
    %6 = tpu.matmul %4, %5, %cst {dimension_numbers = #tpu.dot_dimension_numbers<[1], [0], [0], [1], [0, 0, 1, 1], [], []>} : vector<8x256xbf16>, vector<256x512xbf16>, vector<8x512xf32> -> vector<8x512xf32>
    %7 = arith.addf %3, %6 : vector<8x512xf32>
    %c0_6 = arith.constant 0 : index
    %c0_7 = arith.constant 0 : index
    %8 = vector.load %arg6[%c0_6, %c0_7] : memref<8x512xf32, #tpu.memory_space<vmem>>, vector<8x512xf32>
    tpu.vector_store %arg6[%c0_6, %c0_7], %7 {strides = array<i32>} : memref<8x512xf32, #tpu.memory_space<vmem>>, vector<8x512xf32>,
    %c0_i32_8 = arith.constant 0 : i32
    %9 = arith.cmpi eq, %arg1, %c0_i32_8 : i32
    %10 = arith.extui %9 : i1 to i32
    %c0_i32_9 = arith.constant 0 : i32
    %11 = arith.cmpi ne, %10, %c0_i32_9 : i32
    scf.if %11 {
      %c0_10 = arith.constant 0 : index
      %c0_11 = arith.constant 0 : index
      %12 = vector.load %arg6[%c0_10, %c0_11] : memref<8x512xf32, #tpu.memory_space<vmem>>, vector<8x512xf32>
      %cst_12 = arith.constant 9.765625E-4 : f32
      %13 = vector.broadcast %cst_12 : f32 to vector<8x512xf32>
      %14 = arith.divf %12, %13 : vector<8x512xf32>
      %15 = math.roundeven %14 : vector<8x512xf32>
      %cst_13 = arith.constant -3.276800e+04 : f32
      %cst_14 = arith.constant 3.276700e+04 : f32
      %16 = vector.broadcast %cst_13 : f32 to vector<8x512xf32>
      %17 = arith.maximumf %16, %15 : vector<8x512xf32>
      %18 = vector.broadcast %cst_14 : f32 to vector<8x512xf32>
      %19 = arith.minimumf %18, %17 : vector<8x512xf32>
      %cst_15 = arith.constant 9.765625E-4 : f32
      %20 = vector.broadcast %cst_15 : f32 to vector<8x512xf32>
      %21 = arith.mulf %19, %20 : vector<8x512xf32>
      %c0_16 = arith.constant 0 : index
      %c0_17 = arith.constant 0 : index
      %22 = vector.load %arg4[%c0_16, %c0_17] : memref<1x512xf32, #tpu.memory_space<vmem>>, vector<1x512xf32>
      %23 = vector.broadcast %22 : vector<1x512xf32> to vector<8x512xf32>
      %24 = arith.addf %21, %23 : vector<8x512xf32>
      %cst_18 = arith.constant 6.250000e-02 : f32
      %25 = vector.broadcast %cst_18 : f32 to vector<8x512xf32>
      %26 = arith.divf %24, %25 : vector<8x512xf32>
      %27 = math.roundeven %26 : vector<8x512xf32>
      %cst_19 = arith.constant -1.280000e+02 : f32
      %cst_20 = arith.constant 1.270000e+02 : f32
      %28 = vector.broadcast %cst_19 : f32 to vector<8x512xf32>
      %29 = arith.maximumf %28, %27 : vector<8x512xf32>
      %30 = vector.broadcast %cst_20 : f32 to vector<8x512xf32>
      %31 = arith.minimumf %30, %29 : vector<8x512xf32>
      %cst_21 = arith.constant 6.250000e-02 : f32
      %32 = vector.broadcast %cst_21 : f32 to vector<8x512xf32>
      %33 = arith.mulf %31, %32 : vector<8x512xf32>
      %34 = arith.truncf %33 : vector<8x512xf32> to vector<8x512xbf16>
      %c0_22 = arith.constant 0 : index
      %c0_23 = arith.constant 0 : index
      %35 = vector.load %arg5[%c0_22, %c0_23] : memref<8x512xbf16, #tpu.memory_space<vmem>>, vector<8x512xbf16>
      tpu.vector_store %arg5[%c0_22, %c0_23], %34 {strides = array<i32>} : memref<8x512xbf16, #tpu.memory_space<vmem>>, vector<8x512xbf16>,
    } else {
    }
    return
  }
  func.func @transform_0(%arg0: i32, %arg1: i32) -> (i32, i32) {
    %c0_i32 = arith.constant 0 : i32
    return %arg0, %arg1 : i32, i32
  }
  func.func @transform_1(%arg0: i32, %arg1: i32) -> (i32, i32) {
    %c0_i32 = arith.constant 0 : i32
    %c0_i32_0 = arith.constant 0 : i32
    return %arg1, %c0_i32 : i32, i32
  }
  func.func @transform_2(%arg0: i32, %arg1: i32) -> (i32, i32) {
    %c0_i32 = arith.constant 0 : i32
    %c0_i32_0 = arith.constant 0 : i32
    %c0_i32_1 = arith.constant 0 : i32
    return %c0_i32, %c0_i32_0 : i32, i32
  }
  func.func @transform_3(%arg0: i32, %arg1: i32) -> (i32, i32) {
    %c0_i32 = arith.constant 0 : i32
    %c0_i32_0 = arith.constant 0 : i32
    return %arg0, %c0_i32 : i32, i32
  }
}

module attributes {stable_mosaic.version = 11 : i64} {
  func.func @_mm_quant_res_kernel(%arg0: i32, %arg1: i32, %arg2: memref<8x512xbf16, #tpu.memory_space<vmem>>, %arg3: memref<512x512xbf16, #tpu.memory_space<vmem>>, %arg4: memref<1x512xf32, #tpu.memory_space<vmem>>, %arg5: memref<8x512xbf16, #tpu.memory_space<vmem>>, %arg6: memref<1x512xf32, #tpu.memory_space<vmem>>, %arg7: memref<1x512xf32, #tpu.memory_space<vmem>>, %arg8: memref<8x512xbf16, #tpu.memory_space<vmem>>, %arg9: memref<8x512xf32, #tpu.memory_space<vmem>>) attributes {dimension_semantics = [#tpu.dimension_semantics<parallel>, #tpu.dimension_semantics<arbitrary>], iteration_bounds = array<i64: 1, 9>, scalar_prefetch = 0 : i64, scratch_operands = 1 : i64, tpu.core_type = #tpu.core_type<tc>, window_params = [{transform_indices = @transform_0, window_bounds = array<i64: 8, 512>}, {transform_indices = @transform_1, window_bounds = array<i64: 512, 512>}, {pipeline_mode = #tpu.pipeline_mode<synchronous>, transform_indices = @transform_2, window_bounds = array<i64: 1, 512>}, {transform_indices = @transform_3, window_bounds = array<i64: 8, 512>}, {pipeline_mode = #tpu.pipeline_mode<synchronous>, transform_indices = @transform_4, window_bounds = array<i64: 1, 512>}, {pipeline_mode = #tpu.pipeline_mode<synchronous>, transform_indices = @transform_5, window_bounds = array<i64: 1, 512>}, {transform_indices = @transform_6, window_bounds = array<i64: 8, 512>}]} {
    %c0_i32 = arith.constant 0 : i32
    %0 = arith.cmpi eq, %arg1, %c0_i32 : i32
    %1 = arith.extui %0 : i1 to i32
    %c0_i32_0 = arith.constant 0 : i32
    %2 = arith.cmpi ne, %1, %c0_i32_0 : i32
    scf.if %2 {
      %cst_9 = arith.constant 0.000000e+00 : f32
      %12 = vector.broadcast %cst_9 : f32 to vector<8x512xf32>
      %c0_10 = arith.constant 0 : index
      %c0_11 = arith.constant 0 : index
      %13 = vector.load %arg9[%c0_10, %c0_11] : memref<8x512xf32, #tpu.memory_space<vmem>>, vector<8x512xf32>
      tpu.vector_store %arg9[%c0_10, %c0_11], %12 {strides = array<i32>} : memref<8x512xf32, #tpu.memory_space<vmem>>, vector<8x512xf32>,
    } else {
    }
    %c0 = arith.constant 0 : index
    %c0_1 = arith.constant 0 : index
    %3 = vector.load %arg9[%c0, %c0_1] : memref<8x512xf32, #tpu.memory_space<vmem>>, vector<8x512xf32>
    %c0_2 = arith.constant 0 : index
    %c0_3 = arith.constant 0 : index
    %4 = vector.load %arg2[%c0_2, %c0_3] : memref<8x512xbf16, #tpu.memory_space<vmem>>, vector<8x512xbf16>
    %c0_4 = arith.constant 0 : index
    %c0_5 = arith.constant 0 : index
    %5 = vector.load %arg3[%c0_4, %c0_5] : memref<512x512xbf16, #tpu.memory_space<vmem>>, vector<512x512xbf16>
    %cst = arith.constant dense<0.000000e+00> : vector<8x512xf32>
    %6 = tpu.matmul %4, %5, %cst {dimension_numbers = #tpu.dot_dimension_numbers<[1], [0], [0], [1], [0, 0, 1, 1], [], []>} : vector<8x512xbf16>, vector<512x512xbf16>, vector<8x512xf32> -> vector<8x512xf32>
    %7 = arith.addf %3, %6 : vector<8x512xf32>
    %c0_6 = arith.constant 0 : index
    %c0_7 = arith.constant 0 : index
    %8 = vector.load %arg9[%c0_6, %c0_7] : memref<8x512xf32, #tpu.memory_space<vmem>>, vector<8x512xf32>
    tpu.vector_store %arg9[%c0_6, %c0_7], %7 {strides = array<i32>} : memref<8x512xf32, #tpu.memory_space<vmem>>, vector<8x512xf32>,
    %c8_i32 = arith.constant 8 : i32
    %9 = arith.cmpi eq, %arg1, %c8_i32 : i32
    %10 = arith.extui %9 : i1 to i32
    %c0_i32_8 = arith.constant 0 : i32
    %11 = arith.cmpi ne, %10, %c0_i32_8 : i32
    scf.if %11 {
      %c0_9 = arith.constant 0 : index
      %c0_10 = arith.constant 0 : index
      %12 = vector.load %arg9[%c0_9, %c0_10] : memref<8x512xf32, #tpu.memory_space<vmem>>, vector<8x512xf32>
      %cst_11 = arith.constant 9.765625E-4 : f32
      %13 = vector.broadcast %cst_11 : f32 to vector<8x512xf32>
      %14 = arith.divf %12, %13 : vector<8x512xf32>
      %15 = math.roundeven %14 : vector<8x512xf32>
      %cst_12 = arith.constant -3.276800e+04 : f32
      %cst_13 = arith.constant 3.276700e+04 : f32
      %16 = vector.broadcast %cst_12 : f32 to vector<8x512xf32>
      %17 = arith.maximumf %16, %15 : vector<8x512xf32>
      %18 = vector.broadcast %cst_13 : f32 to vector<8x512xf32>
      %19 = arith.minimumf %18, %17 : vector<8x512xf32>
      %cst_14 = arith.constant 9.765625E-4 : f32
      %20 = vector.broadcast %cst_14 : f32 to vector<8x512xf32>
      %21 = arith.mulf %19, %20 : vector<8x512xf32>
      %c0_15 = arith.constant 0 : index
      %c0_16 = arith.constant 0 : index
      %22 = vector.load %arg4[%c0_15, %c0_16] : memref<1x512xf32, #tpu.memory_space<vmem>>, vector<1x512xf32>
      %23 = vector.broadcast %22 : vector<1x512xf32> to vector<8x512xf32>
      %24 = arith.addf %21, %23 : vector<8x512xf32>
      %cst_17 = arith.constant 6.250000e-02 : f32
      %25 = vector.broadcast %cst_17 : f32 to vector<8x512xf32>
      %26 = arith.divf %24, %25 : vector<8x512xf32>
      %27 = math.roundeven %26 : vector<8x512xf32>
      %cst_18 = arith.constant -1.280000e+02 : f32
      %cst_19 = arith.constant 1.270000e+02 : f32
      %28 = vector.broadcast %cst_18 : f32 to vector<8x512xf32>
      %29 = arith.maximumf %28, %27 : vector<8x512xf32>
      %30 = vector.broadcast %cst_19 : f32 to vector<8x512xf32>
      %31 = arith.minimumf %30, %29 : vector<8x512xf32>
      %cst_20 = arith.constant 6.250000e-02 : f32
      %32 = vector.broadcast %cst_20 : f32 to vector<8x512xf32>
      %33 = arith.mulf %31, %32 : vector<8x512xf32>
      %c0_21 = arith.constant 0 : index
      %c0_22 = arith.constant 0 : index
      %34 = vector.load %arg6[%c0_21, %c0_22] : memref<1x512xf32, #tpu.memory_space<vmem>>, vector<1x512xf32>
      %35 = vector.broadcast %34 : vector<1x512xf32> to vector<8x512xf32>
      %36 = arith.mulf %33, %35 : vector<8x512xf32>
      %c0_23 = arith.constant 0 : index
      %c0_24 = arith.constant 0 : index
      %37 = vector.load %arg5[%c0_23, %c0_24] : memref<8x512xbf16, #tpu.memory_space<vmem>>, vector<8x512xbf16>
      %38 = arith.extf %37 : vector<8x512xbf16> to vector<8x512xf32>
      %c0_25 = arith.constant 0 : index
      %c0_26 = arith.constant 0 : index
      %39 = vector.load %arg7[%c0_25, %c0_26] : memref<1x512xf32, #tpu.memory_space<vmem>>, vector<1x512xf32>
      %40 = vector.broadcast %39 : vector<1x512xf32> to vector<8x512xf32>
      %41 = arith.mulf %38, %40 : vector<8x512xf32>
      %42 = arith.addf %36, %41 : vector<8x512xf32>
      %cst_27 = arith.constant 6.250000e-02 : f32
      %43 = vector.broadcast %cst_27 : f32 to vector<8x512xf32>
      %44 = arith.divf %42, %43 : vector<8x512xf32>
      %45 = math.roundeven %44 : vector<8x512xf32>
      %cst_28 = arith.constant -1.280000e+02 : f32
      %cst_29 = arith.constant 1.270000e+02 : f32
      %46 = vector.broadcast %cst_28 : f32 to vector<8x512xf32>
      %47 = arith.maximumf %46, %45 : vector<8x512xf32>
      %48 = vector.broadcast %cst_29 : f32 to vector<8x512xf32>
      %49 = arith.minimumf %48, %47 : vector<8x512xf32>
      %cst_30 = arith.constant 6.250000e-02 : f32
      %50 = vector.broadcast %cst_30 : f32 to vector<8x512xf32>
      %51 = arith.mulf %49, %50 : vector<8x512xf32>
      %cst_31 = arith.constant 0.000000e+00 : f32
      %52 = vector.broadcast %cst_31 : f32 to vector<8x512xf32>
      %53 = arith.maximumf %51, %52 : vector<8x512xf32>
      %54 = arith.truncf %53 : vector<8x512xf32> to vector<8x512xbf16>
      %c0_32 = arith.constant 0 : index
      %c0_33 = arith.constant 0 : index
      %55 = vector.load %arg8[%c0_32, %c0_33] : memref<8x512xbf16, #tpu.memory_space<vmem>>, vector<8x512xbf16>
      tpu.vector_store %arg8[%c0_32, %c0_33], %54 {strides = array<i32>} : memref<8x512xbf16, #tpu.memory_space<vmem>>, vector<8x512xbf16>,
    } else {
    }
    return
  }
  func.func @transform_0(%arg0: i32, %arg1: i32) -> (i32, i32) {
    %c0_i32 = arith.constant 0 : i32
    return %arg0, %arg1 : i32, i32
  }
  func.func @transform_1(%arg0: i32, %arg1: i32) -> (i32, i32) {
    %c0_i32 = arith.constant 0 : i32
    %c0_i32_0 = arith.constant 0 : i32
    return %arg1, %c0_i32 : i32, i32
  }
  func.func @transform_2(%arg0: i32, %arg1: i32) -> (i32, i32) {
    %c0_i32 = arith.constant 0 : i32
    %c0_i32_0 = arith.constant 0 : i32
    %c0_i32_1 = arith.constant 0 : i32
    return %c0_i32, %c0_i32_0 : i32, i32
  }
  func.func @transform_3(%arg0: i32, %arg1: i32) -> (i32, i32) {
    %c0_i32 = arith.constant 0 : i32
    %c0_i32_0 = arith.constant 0 : i32
    return %arg0, %c0_i32 : i32, i32
  }
  func.func @transform_4(%arg0: i32, %arg1: i32) -> (i32, i32) {
    %c0_i32 = arith.constant 0 : i32
    %c0_i32_0 = arith.constant 0 : i32
    %c0_i32_1 = arith.constant 0 : i32
    return %c0_i32, %c0_i32_0 : i32, i32
  }
  func.func @transform_5(%arg0: i32, %arg1: i32) -> (i32, i32) {
    %c0_i32 = arith.constant 0 : i32
    %c0_i32_0 = arith.constant 0 : i32
    %c0_i32_1 = arith.constant 0 : i32
    return %c0_i32, %c0_i32_0 : i32, i32
  }
  func.func @transform_6(%arg0: i32, %arg1: i32) -> (i32, i32) {
    %c0_i32 = arith.constant 0 : i32
    %c0_i32_0 = arith.constant 0 : i32
    return %arg0, %c0_i32 : i32, i32
  }
}

module attributes {stable_mosaic.version = 11 : i64} {
  func.func @_mm_quant_kernel(%arg0: i32, %arg1: i32, %arg2: memref<8x512xbf16, #tpu.memory_space<vmem>>, %arg3: memref<512x512xbf16, #tpu.memory_space<vmem>>, %arg4: memref<1x512xf32, #tpu.memory_space<vmem>>, %arg5: memref<8x512xbf16, #tpu.memory_space<vmem>>, %arg6: memref<8x512xf32, #tpu.memory_space<vmem>>) attributes {dimension_semantics = [#tpu.dimension_semantics<parallel>, #tpu.dimension_semantics<arbitrary>], iteration_bounds = array<i64: 1, 9>, scalar_prefetch = 0 : i64, scratch_operands = 1 : i64, tpu.core_type = #tpu.core_type<tc>, window_params = [{transform_indices = @transform_0, window_bounds = array<i64: 8, 512>}, {transform_indices = @transform_1, window_bounds = array<i64: 512, 512>}, {pipeline_mode = #tpu.pipeline_mode<synchronous>, transform_indices = @transform_2, window_bounds = array<i64: 1, 512>}, {transform_indices = @transform_3, window_bounds = array<i64: 8, 512>}]} {
    %c0_i32 = arith.constant 0 : i32
    %0 = arith.cmpi eq, %arg1, %c0_i32 : i32
    %1 = arith.extui %0 : i1 to i32
    %c0_i32_0 = arith.constant 0 : i32
    %2 = arith.cmpi ne, %1, %c0_i32_0 : i32
    scf.if %2 {
      %cst_9 = arith.constant 0.000000e+00 : f32
      %12 = vector.broadcast %cst_9 : f32 to vector<8x512xf32>
      %c0_10 = arith.constant 0 : index
      %c0_11 = arith.constant 0 : index
      %13 = vector.load %arg6[%c0_10, %c0_11] : memref<8x512xf32, #tpu.memory_space<vmem>>, vector<8x512xf32>
      tpu.vector_store %arg6[%c0_10, %c0_11], %12 {strides = array<i32>} : memref<8x512xf32, #tpu.memory_space<vmem>>, vector<8x512xf32>,
    } else {
    }
    %c0 = arith.constant 0 : index
    %c0_1 = arith.constant 0 : index
    %3 = vector.load %arg6[%c0, %c0_1] : memref<8x512xf32, #tpu.memory_space<vmem>>, vector<8x512xf32>
    %c0_2 = arith.constant 0 : index
    %c0_3 = arith.constant 0 : index
    %4 = vector.load %arg2[%c0_2, %c0_3] : memref<8x512xbf16, #tpu.memory_space<vmem>>, vector<8x512xbf16>
    %c0_4 = arith.constant 0 : index
    %c0_5 = arith.constant 0 : index
    %5 = vector.load %arg3[%c0_4, %c0_5] : memref<512x512xbf16, #tpu.memory_space<vmem>>, vector<512x512xbf16>
    %cst = arith.constant dense<0.000000e+00> : vector<8x512xf32>
    %6 = tpu.matmul %4, %5, %cst {dimension_numbers = #tpu.dot_dimension_numbers<[1], [0], [0], [1], [0, 0, 1, 1], [], []>} : vector<8x512xbf16>, vector<512x512xbf16>, vector<8x512xf32> -> vector<8x512xf32>
    %7 = arith.addf %3, %6 : vector<8x512xf32>
    %c0_6 = arith.constant 0 : index
    %c0_7 = arith.constant 0 : index
    %8 = vector.load %arg6[%c0_6, %c0_7] : memref<8x512xf32, #tpu.memory_space<vmem>>, vector<8x512xf32>
    tpu.vector_store %arg6[%c0_6, %c0_7], %7 {strides = array<i32>} : memref<8x512xf32, #tpu.memory_space<vmem>>, vector<8x512xf32>,
    %c8_i32 = arith.constant 8 : i32
    %9 = arith.cmpi eq, %arg1, %c8_i32 : i32
    %10 = arith.extui %9 : i1 to i32
    %c0_i32_8 = arith.constant 0 : i32
    %11 = arith.cmpi ne, %10, %c0_i32_8 : i32
    scf.if %11 {
      %c0_9 = arith.constant 0 : index
      %c0_10 = arith.constant 0 : index
      %12 = vector.load %arg6[%c0_9, %c0_10] : memref<8x512xf32, #tpu.memory_space<vmem>>, vector<8x512xf32>
      %cst_11 = arith.constant 9.765625E-4 : f32
      %13 = vector.broadcast %cst_11 : f32 to vector<8x512xf32>
      %14 = arith.divf %12, %13 : vector<8x512xf32>
      %15 = math.roundeven %14 : vector<8x512xf32>
      %cst_12 = arith.constant -3.276800e+04 : f32
      %cst_13 = arith.constant 3.276700e+04 : f32
      %16 = vector.broadcast %cst_12 : f32 to vector<8x512xf32>
      %17 = arith.maximumf %16, %15 : vector<8x512xf32>
      %18 = vector.broadcast %cst_13 : f32 to vector<8x512xf32>
      %19 = arith.minimumf %18, %17 : vector<8x512xf32>
      %cst_14 = arith.constant 9.765625E-4 : f32
      %20 = vector.broadcast %cst_14 : f32 to vector<8x512xf32>
      %21 = arith.mulf %19, %20 : vector<8x512xf32>
      %c0_15 = arith.constant 0 : index
      %c0_16 = arith.constant 0 : index
      %22 = vector.load %arg4[%c0_15, %c0_16] : memref<1x512xf32, #tpu.memory_space<vmem>>, vector<1x512xf32>
      %23 = vector.broadcast %22 : vector<1x512xf32> to vector<8x512xf32>
      %24 = arith.addf %21, %23 : vector<8x512xf32>
      %cst_17 = arith.constant 6.250000e-02 : f32
      %25 = vector.broadcast %cst_17 : f32 to vector<8x512xf32>
      %26 = arith.divf %24, %25 : vector<8x512xf32>
      %27 = math.roundeven %26 : vector<8x512xf32>
      %cst_18 = arith.constant -1.280000e+02 : f32
      %cst_19 = arith.constant 1.270000e+02 : f32
      %28 = vector.broadcast %cst_18 : f32 to vector<8x512xf32>
      %29 = arith.maximumf %28, %27 : vector<8x512xf32>
      %30 = vector.broadcast %cst_19 : f32 to vector<8x512xf32>
      %31 = arith.minimumf %30, %29 : vector<8x512xf32>
      %cst_20 = arith.constant 6.250000e-02 : f32
      %32 = vector.broadcast %cst_20 : f32 to vector<8x512xf32>
      %33 = arith.mulf %31, %32 : vector<8x512xf32>
      %cst_21 = arith.constant 0.000000e+00 : f32
      %34 = vector.broadcast %cst_21 : f32 to vector<8x512xf32>
      %35 = arith.maximumf %33, %34 : vector<8x512xf32>
      %36 = arith.truncf %35 : vector<8x512xf32> to vector<8x512xbf16>
      %c0_22 = arith.constant 0 : index
      %c0_23 = arith.constant 0 : index
      %37 = vector.load %arg5[%c0_22, %c0_23] : memref<8x512xbf16, #tpu.memory_space<vmem>>, vector<8x512xbf16>
      tpu.vector_store %arg5[%c0_22, %c0_23], %36 {strides = array<i32>} : memref<8x512xbf16, #tpu.memory_space<vmem>>, vector<8x512xbf16>,
    } else {
    }
    return
  }
  func.func @transform_0(%arg0: i32, %arg1: i32) -> (i32, i32) {
    %c0_i32 = arith.constant 0 : i32
    return %arg0, %arg1 : i32, i32
  }
  func.func @transform_1(%arg0: i32, %arg1: i32) -> (i32, i32) {
    %c0_i32 = arith.constant 0 : i32
    %c0_i32_0 = arith.constant 0 : i32
    return %arg1, %c0_i32 : i32, i32
  }
  func.func @transform_2(%arg0: i32, %arg1: i32) -> (i32, i32) {
    %c0_i32 = arith.constant 0 : i32
    %c0_i32_0 = arith.constant 0 : i32
    %c0_i32_1 = arith.constant 0 : i32
    return %c0_i32, %c0_i32_0 : i32, i32
  }
  func.func @transform_3(%arg0: i32, %arg1: i32) -> (i32, i32) {
    %c0_i32 = arith.constant 0 : i32
    %c0_i32_0 = arith.constant 0 : i32
    return %arg0, %c0_i32 : i32, i32
  }
}

module attributes {stable_mosaic.version = 11 : i64} {
  func.func @_mm_quant_kernel(%arg0: i32, %arg1: i32, %arg2: memref<8x512xbf16, #tpu.memory_space<vmem>>, %arg3: memref<512x128xbf16, #tpu.memory_space<vmem>>, %arg4: memref<1x128xf32, #tpu.memory_space<vmem>>, %arg5: memref<8x128xf32, #tpu.memory_space<vmem>>, %arg6: memref<8x128xf32, #tpu.memory_space<vmem>>) attributes {dimension_semantics = [#tpu.dimension_semantics<parallel>, #tpu.dimension_semantics<arbitrary>], iteration_bounds = array<i64: 1, 1>, scalar_prefetch = 0 : i64, scratch_operands = 1 : i64, tpu.core_type = #tpu.core_type<tc>, window_params = [{transform_indices = @transform_0, window_bounds = array<i64: 8, 512>}, {transform_indices = @transform_1, window_bounds = array<i64: 512, 128>}, {pipeline_mode = #tpu.pipeline_mode<synchronous>, transform_indices = @transform_2, window_bounds = array<i64: 1, 128>}, {transform_indices = @transform_3, window_bounds = array<i64: 8, 128>}]} {
    %c0_i32 = arith.constant 0 : i32
    %0 = arith.cmpi eq, %arg1, %c0_i32 : i32
    %1 = arith.extui %0 : i1 to i32
    %c0_i32_0 = arith.constant 0 : i32
    %2 = arith.cmpi ne, %1, %c0_i32_0 : i32
    scf.if %2 {
      %cst_10 = arith.constant 0.000000e+00 : f32
      %12 = vector.broadcast %cst_10 : f32 to vector<8x128xf32>
      %c0_11 = arith.constant 0 : index
      %c0_12 = arith.constant 0 : index
      %13 = vector.load %arg6[%c0_11, %c0_12] : memref<8x128xf32, #tpu.memory_space<vmem>>, vector<8x128xf32>
      tpu.vector_store %arg6[%c0_11, %c0_12], %12 {strides = array<i32>} : memref<8x128xf32, #tpu.memory_space<vmem>>, vector<8x128xf32>,
    } else {
    }
    %c0 = arith.constant 0 : index
    %c0_1 = arith.constant 0 : index
    %3 = vector.load %arg6[%c0, %c0_1] : memref<8x128xf32, #tpu.memory_space<vmem>>, vector<8x128xf32>
    %c0_2 = arith.constant 0 : index
    %c0_3 = arith.constant 0 : index
    %4 = vector.load %arg2[%c0_2, %c0_3] : memref<8x512xbf16, #tpu.memory_space<vmem>>, vector<8x512xbf16>
    %c0_4 = arith.constant 0 : index
    %c0_5 = arith.constant 0 : index
    %5 = vector.load %arg3[%c0_4, %c0_5] : memref<512x128xbf16, #tpu.memory_space<vmem>>, vector<512x128xbf16>
    %cst = arith.constant dense<0.000000e+00> : vector<8x128xf32>
    %6 = tpu.matmul %4, %5, %cst {dimension_numbers = #tpu.dot_dimension_numbers<[1], [0], [0], [1], [0, 0, 1, 1], [], []>} : vector<8x512xbf16>, vector<512x128xbf16>, vector<8x128xf32> -> vector<8x128xf32>
    %7 = arith.addf %3, %6 : vector<8x128xf32>
    %c0_6 = arith.constant 0 : index
    %c0_7 = arith.constant 0 : index
    %8 = vector.load %arg6[%c0_6, %c0_7] : memref<8x128xf32, #tpu.memory_space<vmem>>, vector<8x128xf32>
    tpu.vector_store %arg6[%c0_6, %c0_7], %7 {strides = array<i32>} : memref<8x128xf32, #tpu.memory_space<vmem>>, vector<8x128xf32>,
    %c0_i32_8 = arith.constant 0 : i32
    %9 = arith.cmpi eq, %arg1, %c0_i32_8 : i32
    %10 = arith.extui %9 : i1 to i32
    %c0_i32_9 = arith.constant 0 : i32
    %11 = arith.cmpi ne, %10, %c0_i32_9 : i32
    scf.if %11 {
      %c0_10 = arith.constant 0 : index
      %c0_11 = arith.constant 0 : index
      %12 = vector.load %arg6[%c0_10, %c0_11] : memref<8x128xf32, #tpu.memory_space<vmem>>, vector<8x128xf32>
      %cst_12 = arith.constant 9.765625E-4 : f32
      %13 = vector.broadcast %cst_12 : f32 to vector<8x128xf32>
      %14 = arith.divf %12, %13 : vector<8x128xf32>
      %15 = math.roundeven %14 : vector<8x128xf32>
      %cst_13 = arith.constant -3.276800e+04 : f32
      %cst_14 = arith.constant 3.276700e+04 : f32
      %16 = vector.broadcast %cst_13 : f32 to vector<8x128xf32>
      %17 = arith.maximumf %16, %15 : vector<8x128xf32>
      %18 = vector.broadcast %cst_14 : f32 to vector<8x128xf32>
      %19 = arith.minimumf %18, %17 : vector<8x128xf32>
      %cst_15 = arith.constant 9.765625E-4 : f32
      %20 = vector.broadcast %cst_15 : f32 to vector<8x128xf32>
      %21 = arith.mulf %19, %20 : vector<8x128xf32>
      %c0_16 = arith.constant 0 : index
      %c0_17 = arith.constant 0 : index
      %22 = vector.load %arg4[%c0_16, %c0_17] : memref<1x128xf32, #tpu.memory_space<vmem>>, vector<1x128xf32>
      %23 = vector.broadcast %22 : vector<1x128xf32> to vector<8x128xf32>
      %24 = arith.addf %21, %23 : vector<8x128xf32>
      %cst_18 = arith.constant 1.562500e-02 : f32
      %25 = vector.broadcast %cst_18 : f32 to vector<8x128xf32>
      %26 = arith.divf %24, %25 : vector<8x128xf32>
      %27 = math.roundeven %26 : vector<8x128xf32>
      %cst_19 = arith.constant -1.280000e+02 : f32
      %cst_20 = arith.constant 1.270000e+02 : f32
      %28 = vector.broadcast %cst_19 : f32 to vector<8x128xf32>
      %29 = arith.maximumf %28, %27 : vector<8x128xf32>
      %30 = vector.broadcast %cst_20 : f32 to vector<8x128xf32>
      %31 = arith.minimumf %30, %29 : vector<8x128xf32>
      %cst_21 = arith.constant 1.562500e-02 : f32
      %32 = vector.broadcast %cst_21 : f32 to vector<8x128xf32>
      %33 = arith.mulf %31, %32 : vector<8x128xf32>
      %c0_22 = arith.constant 0 : index
      %c0_23 = arith.constant 0 : index
      %34 = vector.load %arg5[%c0_22, %c0_23] : memref<8x128xf32, #tpu.memory_space<vmem>>, vector<8x128xf32>
      tpu.vector_store %arg5[%c0_22, %c0_23], %33 {strides = array<i32>} : memref<8x128xf32, #tpu.memory_space<vmem>>, vector<8x128xf32>,
    } else {
    }
    return
  }
  func.func @transform_0(%arg0: i32, %arg1: i32) -> (i32, i32) {
    %c0_i32 = arith.constant 0 : i32
    return %arg0, %arg1 : i32, i32
  }
  func.func @transform_1(%arg0: i32, %arg1: i32) -> (i32, i32) {
    %c0_i32 = arith.constant 0 : i32
    %c0_i32_0 = arith.constant 0 : i32
    return %arg1, %c0_i32 : i32, i32
  }
  func.func @transform_2(%arg0: i32, %arg1: i32) -> (i32, i32) {
    %c0_i32 = arith.constant 0 : i32
    %c0_i32_0 = arith.constant 0 : i32
    %c0_i32_1 = arith.constant 0 : i32
    return %c0_i32, %c0_i32_0 : i32, i32
  }
  func.func @transform_3(%arg0: i32, %arg1: i32) -> (i32, i32) {
    %c0_i32 = arith.constant 0 : i32
    %c0_i32_0 = arith.constant 0 : i32
    return %arg0, %c0_i32 : i32, i32
  }
}

</mosaic_0001>

<bundles_post_ra>
// kernel: _lambda_.21
= control target key start
LH: loop header
LB: loop body
LE: loop exit
PB: predicated region body
PF: predicated region fallthrough
CT: control target
= control target key end

     0   :  { %v2918_v0 = vmov 0   ;;  %s3531_s1 = inlined_call_operand.vmem [shape: bf16[256,128], index: 1, kind: input, shape index: {}]   ;;  %s3532_s0 = inlined_call_operand.vmem [shape: bf16[512,256], index: 0, kind: input, shape index: {}]   ;;  %s3533_s2 = inlined_call_operand.vmem [shape: f32[1,128], index: 2, kind: input, shape index: {}]   ;;  %s3534_s3 = inlined_call_operand.vmem [shape: bf16[512,128], index: 3, kind: output, shape index: {}]  }
   0x1   :  { %659 = vmatprep.subr.bf16.mxu0 %v2918_v0  ;;  %2644 = vmatprep.subr.bf16.mxu1 %v2918_v0  ;;  %v2805_v1 = vld [vmem:[%s3531_s1] sm:$0xff]   ;;  %v2806_v2 = vld [vmem:[%s3531_s1 + $0x8] sm:$0xff]   ;;  %v2807_v3 = vld [vmem:[%s3531_s1 + $0x10] sm:$0xff]  }
   0x2   :  { %660 = vmatpush1.bf16.msra.mxu0 %v2805_v1  ;;  %2660 = vmatpush1.bf16.msra.mxu1 %v2805_v1  ;;  %v2808_v4 = vld [vmem:[%s3531_s1 + $0x18] sm:$0xff]   ;;  %v2809_v5 = vld [vmem:[%s3531_s1 + $0x20] sm:$0xff]   ;;  %v2810_v7 = vld [vmem:[%s3531_s1 + $0x28] sm:$0xff]  }
   0x3   :  { %661 = vmatprep.subr.bf16.mxu0 %v2918_v0  ;;  %2645 = vmatprep.subr.bf16.mxu1 %v2918_v0  ;;  %v2823_v6 = vld [vmem:[%s3532_s0 + $0x4] ss:$8 sps:$4 sm:$0xff]   ;;  %v2811_v9 = vld [vmem:[%s3531_s1 + $0x30] sm:$0xff]   ;;  %v2812_v10 = vld [vmem:[%s3531_s1 + $0x38] sm:$0xff]  }
   0x4   :  { %v2826_v8 = vld [vmem:[%s3532_s0 + $0x104] ss:$8 sps:$4 sm:$0xff]   ;;  %691 = vmatprep.mubr.bf16.mxu0 %v2823_v6  ;;  %v2815_v13 = vld [vmem:[%s3531_s1 + $0x50] sm:$0xff]   ;;  %v2816_v14 = vld [vmem:[%s3531_s1 + $0x58] sm:$0xff]  }
   0x5   :  { %819 = vmatprep.mubr.bf16.mxu1 %v2826_v8  ;;  %v2813_v11 = vld [vmem:[%s3531_s1 + $0x40] sm:$0xff]   ;;  %v2814_v12 = vld [vmem:[%s3531_s1 + $0x48] sm:$0xff]   ;;  %v2819_v17 = vld [vmem:[%s3531_s1 + $0x70] sm:$0xff]  }
   0x6   :  { %662 = vmatpush1.bf16.msra.mxu0 %v2806_v2  ;;  %2661 = vmatpush1.bf16.msra.mxu1 %v2806_v2  ;;  %v2817_v15 = vld [vmem:[%s3531_s1 + $0x60] sm:$0xff]   ;;  %v2818_v16 = vld [vmem:[%s3531_s1 + $0x68] sm:$0xff]   ;;  %v2820_v18 = vld [vmem:[%s3531_s1 + $0x78] sm:$0xff]  }
   0x7   :  { %663 = vmatprep.subr.bf16.mxu0 %v2918_v0  ;;  %2646 = vmatprep.subr.bf16.mxu1 %v2918_v0  ;;  %v2821_v19 = vld [vmem:[%s3532_s0] ss:$8 sps:$4 sm:$0xff]   ;;  %v2827_v21 = vld [vmem:[%s3532_s0 + $0x14] ss:$8 sps:$4 sm:$0xff]   ;;  %v2831_v23 = vld [vmem:[%s3532_s0 + $0x10] ss:$8 sps:$4 sm:$0xff]  }
   0x8   :  { %v2824_v20 = vld [vmem:[%s3532_s0 + $0x100] ss:$8 sps:$4 sm:$0xff]   ;;  %v2829_v22 = vld [vmem:[%s3532_s0 + $0x114] ss:$8 sps:$4 sm:$0xff]   ;;  %v2832_v24 = vld [vmem:[%s3532_s0 + $0x110] ss:$8 sps:$4 sm:$0xff]  }
   0x9   :  { %v2833_v25 = vld [vmem:[%s3532_s0 + $0x24] ss:$8 sps:$4 sm:$0xff]   ;;  %v2837_v27 = vld [vmem:[%s3532_s0 + $0x20] ss:$8 sps:$4 sm:$0xff]   ;;  %v2839_v29 = vld [vmem:[%s3532_s0 + $0x34] ss:$8 sps:$4 sm:$0xff]  }
   0xa   :  { %664 = vmatpush1.bf16.msra.mxu0 %v2807_v3  ;;  %2662 = vmatpush1.bf16.msra.mxu1 %v2807_v3  ;;  %v2835_v26 = vld [vmem:[%s3532_s0 + $0x124] ss:$8 sps:$4 sm:$0xff]   ;;  %v2838_v28 = vld [vmem:[%s3532_s0 + $0x120] ss:$8 sps:$4 sm:$0xff]   ;;  %v2841_v30 = vld [vmem:[%s3532_s0 + $0x134] ss:$8 sps:$4 sm:$0xff]  }
   0xb   :  { %665 = vmatprep.subr.bf16.mxu0 %v2918_v0  ;;  %2647 = vmatprep.subr.bf16.mxu1 %v2918_v0  ;;  %v2843_v31 = vld [vmem:[%s3532_s0 + $0x30] ss:$8 sps:$4 sm:$0xff]   ;;  %v2845_v33 = vld [vmem:[%s3532_s0 + $0x44] ss:$8 sps:$4 sm:$0xff]   ;;  %v2849_v35 = vld [vmem:[%s3532_s0 + $0x40] ss:$8 sps:$4 sm:$0xff]  }
   0xc   :  { %v2844_v32 = vld [vmem:[%s3532_s0 + $0x130] ss:$8 sps:$4 sm:$0xff]   ;;  %v2847_v34 = vld [vmem:[%s3532_s0 + $0x144] ss:$8 sps:$4 sm:$0xff]   ;;  %v2850_v36 = vld [vmem:[%s3532_s0 + $0x140] ss:$8 sps:$4 sm:$0xff]  }
   0xd   :  { %v2851_v37 = vld [vmem:[%s3532_s0 + $0x54] ss:$8 sps:$4 sm:$0xff]   ;;  %v2855_v39 = vld [vmem:[%s3532_s0 + $0x50] ss:$8 sps:$4 sm:$0xff]   ;;  %v2857_v41 = vld [vmem:[%s3532_s0 + $0x64] ss:$8 sps:$4 sm:$0xff]  }
   0xe   :  { %666 = vmatpush1.bf16.msra.mxu0 %v2808_v4  ;;  %2663 = vmatpush1.bf16.msra.mxu1 %v2808_v4  ;;  %v2853_v38 = vld [vmem:[%s3532_s0 + $0x154] ss:$8 sps:$4 sm:$0xff]   ;;  %v2856_v40 = vld [vmem:[%s3532_s0 + $0x150] ss:$8 sps:$4 sm:$0xff]   ;;  %v2859_v42 = vld [vmem:[%s3532_s0 + $0x164] ss:$8 sps:$4 sm:$0xff]  }
   0xf   :  { %667 = vmatprep.subr.bf16.mxu0 %v2918_v0  ;;  %2648 = vmatprep.subr.bf16.mxu1 %v2918_v0  ;;  %v2861_v43 = vld [vmem:[%s3532_s0 + $0x60] ss:$8 sps:$4 sm:$0xff]   ;;  %v2863_v45 = vld [vmem:[%s3532_s0 + $0x74] ss:$8 sps:$4 sm:$0xff]   ;;  %v2867_v47 = vld [vmem:[%s3532_s0 + $0x70] ss:$8 sps:$4 sm:$0xff]  }
  0x10   :  { %v2862_v44 = vld [vmem:[%s3532_s0 + $0x160] ss:$8 sps:$4 sm:$0xff]   ;;  %v2865_v46 = vld [vmem:[%s3532_s0 + $0x174] ss:$8 sps:$4 sm:$0xff]   ;;  %v2868_v48 = vld [vmem:[%s3532_s0 + $0x170] ss:$8 sps:$4 sm:$0xff]  }
  0x11   :  { %v2869_v49 = vld [vmem:[%s3532_s0 + $0x84] ss:$8 sps:$4 sm:$0xff]   ;;  %v2873_v51 = vld [vmem:[%s3532_s0 + $0x80] ss:$8 sps:$4 sm:$0xff]   ;;  %v2875_v53 = vld [vmem:[%s3532_s0 + $0x94] ss:$8 sps:$4 sm:$0xff]  }
  0x12   :  { %668 = vmatpush1.bf16.msra.mxu0 %v2809_v5  ;;  %2664 = vmatpush1.bf16.msra.mxu1 %v2809_v5  ;;  %v2871_v50 = vld [vmem:[%s3532_s0 + $0x184] ss:$8 sps:$4 sm:$0xff]   ;;  %v2874_v52 = vld [vmem:[%s3532_s0 + $0x180] ss:$8 sps:$4 sm:$0xff]   ;;  %v2877_v54 = vld [vmem:[%s3532_s0 + $0x194] ss:$8 sps:$4 sm:$0xff]  }
  0x13   :  { %669 = vmatprep.subr.bf16.mxu0 %v2918_v0  ;;  %2649 = vmatprep.subr.bf16.mxu1 %v2918_v0  ;;  %v2879_v55 = vld [vmem:[%s3532_s0 + $0x90] ss:$8 sps:$4 sm:$0xff]   ;;  %v2881_v57 = vld [vmem:[%s3532_s0 + $0xa4] ss:$8 sps:$4 sm:$0xff]   ;;  %v2885_v59 = vld [vmem:[%s3532_s0 + $0xa0] ss:$8 sps:$4 sm:$0xff]  }
  0x14   :  { %v2880_v56 = vld [vmem:[%s3532_s0 + $0x190] ss:$8 sps:$4 sm:$0xff]   ;;  %v2883_v58 = vld [vmem:[%s3532_s0 + $0x1a4] ss:$8 sps:$4 sm:$0xff]   ;;  %v2886_v60 = vld [vmem:[%s3532_s0 + $0x1a0] ss:$8 sps:$4 sm:$0xff]  }
  0x15   :  { %v2887_v61 = vld [vmem:[%s3532_s0 + $0xb4] ss:$8 sps:$4 sm:$0xff]   ;;  %v2891_v63 = vld [vmem:[%s3532_s0 + $0xb0] ss:$8 sps:$4 sm:$0xff]   ;;  %v2893_v1 = vld [vmem:[%s3532_s0 + $0xc4] ss:$8 sps:$4 sm:$0xff]  }
  0x16   :  { %670 = vmatpush1.bf16.msra.mxu0 %v2810_v7  ;;  %2665 = vmatpush1.bf16.msra.mxu1 %v2810_v7  ;;  %v2889_v62 = vld [vmem:[%s3532_s0 + $0x1b4] ss:$8 sps:$4 sm:$0xff]   ;;  %v2895_v2 = vld [vmem:[%s3532_s0 + $0x1c4] ss:$8 sps:$4 sm:$0xff]   ;;  %v2897_v3 = vld [vmem:[%s3532_s0 + $0xc0] ss:$8 sps:$4 sm:$0xff]  }
  0x17   :  { %671 = vmatprep.subr.bf16.mxu0 %v2918_v0  ;;  %2650 = vmatprep.subr.bf16.mxu1 %v2918_v0  ;;  %v2898_v4 = vld [vmem:[%s3532_s0 + $0x1c0] ss:$8 sps:$4 sm:$0xff]   ;;  %v2899_v5 = vld [vmem:[%s3532_s0 + $0xd4] ss:$8 sps:$4 sm:$0xff]   ;;  %v2903_v7 = vld [vmem:[%s3532_s0 + $0xd0] ss:$8 sps:$4 sm:$0xff]  }
  0x18   :  { %v2901_v6 = vld [vmem:[%s3532_s0 + $0x1d4] ss:$8 sps:$4 sm:$0xff]   ;;  %v2904_v8 = vld [vmem:[%s3532_s0 + $0x1d0] ss:$8 sps:$4 sm:$0xff]  }
  0x1a   :  { %672 = vmatpush1.bf16.msra.mxu0 %v2811_v9  ;;  %2666 = vmatpush1.bf16.msra.mxu1 %v2811_v9  ;;  %v2905_v9 = vld [vmem:[%s3532_s0 + $0xe4] ss:$8 sps:$4 sm:$0xff]  }
  0x1b   :  { %673 = vmatprep.subr.bf16.mxu0 %v2918_v0  ;;  %2651 = vmatprep.subr.bf16.mxu1 %v2918_v0 }
  0x1e   :  { %674 = vmatpush1.bf16.msra.mxu0 %v2812_v10  ;;  %2667 = vmatpush1.bf16.msra.mxu1 %v2812_v10  ;;  %v2907_v10 = vld [vmem:[%s3532_s0 + $0x1e4] ss:$8 sps:$4 sm:$0xff]  }
  0x1f   :  { %675 = vmatprep.subr.bf16.mxu0 %v2918_v0  ;;  %2652 = vmatprep.subr.bf16.mxu1 %v2918_v0 }
  0x22   :  { %676 = vmatpush1.bf16.msra.mxu0 %v2813_v11  ;;  %2668 = vmatpush1.bf16.msra.mxu1 %v2813_v11  ;;  %v2909_v11 = vld [vmem:[%s3532_s0 + $0xe0] ss:$8 sps:$4 sm:$0xff]  }
  0x23   :  { %677 = vmatprep.subr.bf16.mxu0 %v2918_v0  ;;  %2653 = vmatprep.subr.bf16.mxu1 %v2918_v0 }
  0x26   :  { %678 = vmatpush1.bf16.msra.mxu0 %v2814_v12  ;;  %2669 = vmatpush1.bf16.msra.mxu1 %v2814_v12  ;;  %v2910_v12 = vld [vmem:[%s3532_s0 + $0x1e0] ss:$8 sps:$4 sm:$0xff]  }
  0x27   :  { %679 = vmatprep.subr.bf16.mxu0 %v2918_v0  ;;  %2654 = vmatprep.subr.bf16.mxu1 %v2918_v0 }
  0x2a   :  { %680 = vmatpush1.bf16.msra.mxu0 %v2815_v13  ;;  %2670 = vmatpush1.bf16.msra.mxu1 %v2815_v13  ;;  %v2911_v13 = vld [vmem:[%s3532_s0 + $0xf4] ss:$8 sps:$4 sm:$0xff]  }
  0x2b   :  { %681 = vmatprep.subr.bf16.mxu0 %v2918_v0  ;;  %2655 = vmatprep.subr.bf16.mxu1 %v2918_v0 }
  0x2e   :  { %682 = vmatpush1.bf16.msra.mxu0 %v2816_v14  ;;  %2671 = vmatpush1.bf16.msra.mxu1 %v2816_v14  ;;  %v2913_v14 = vld [vmem:[%s3532_s0 + $0x1f4] ss:$8 sps:$4 sm:$0xff]  }
  0x2f   :  { %683 = vmatprep.subr.bf16.mxu0 %v2918_v0  ;;  %2656 = vmatprep.subr.bf16.mxu1 %v2918_v0 }
  0x32   :  { %684 = vmatpush1.bf16.msra.mxu0 %v2817_v15  ;;  %2672 = vmatpush1.bf16.msra.mxu1 %v2817_v15  ;;  %v2915_v15 = vld [vmem:[%s3532_s0 + $0xf0] ss:$8 sps:$4 sm:$0xff]  }
  0x33   :  { %685 = vmatprep.subr.bf16.mxu0 %v2918_v0  ;;  %2657 = vmatprep.subr.bf16.mxu1 %v2918_v0 }
  0x36   :  { %686 = vmatpush1.bf16.msra.mxu0 %v2818_v16  ;;  %2673 = vmatpush1.bf16.msra.mxu1 %v2818_v16  ;;  %v2916_v16 = vld [vmem:[%s3532_s0 + $0x1f0] ss:$8 sps:$4 sm:$0xff]  }
  0x37   :  { %687 = vmatprep.subr.bf16.mxu0 %v2918_v0  ;;  %2658 = vmatprep.subr.bf16.mxu1 %v2918_v0 }
  0x3a   :  { %688 = vmatpush1.bf16.msra.mxu0 %v2819_v17  ;;  %2674 = vmatpush1.bf16.msra.mxu1 %v2819_v17 }
  0x3b   :  { %689 = vmatprep.subr.bf16.mxu0 %v2918_v0  ;;  %2659 = vmatprep.subr.bf16.mxu1 %v2918_v0  ;;  %v2892_v0 = vld [vmem:[%s3532_s0 + $0x1b0] ss:$8 sps:$4 sm:$0xff]  }
  0x3e   :  { %690 = vmatpush1.bf16.msra.mxu0 %v2820_v18  ;;  %2675 = vmatpush1.bf16.msra.mxu1 %v2820_v18 }
  0x41   :  { %692 = vmatmul.mubr.bf16.vlgmr.msra.gmra.mrb[0].mxu0 %v2821_v19  ;;  %820 = vmatmul.mubr.bf16.vlgmr.msra.gmra.mrb[0].mxu1 %v2824_v20 }
  0x42   :  { %699 = vmatprep.mubr.bf16.mxu0 %v2827_v21  ;;  %827 = vmatprep.mubr.bf16.mxu1 %v2829_v22 }
  0x49   :  { %700 = vmatmul.mubr.bf16.gmra.mrb[4].mxu0 %v2831_v23  ;;  %828 = vmatmul.mubr.bf16.gmra.mrb[4].mxu1 %v2832_v24 }
  0x4a   :  { %707 = vmatprep.mubr.bf16.mxu0 %v2833_v25  ;;  %835 = vmatprep.mubr.bf16.mxu1 %v2835_v26 }
  0x51   :  { %708 = vmatmul.mubr.bf16.gmra.mrb[8].mxu0 %v2837_v27  ;;  %836 = vmatmul.mubr.bf16.gmra.mrb[8].mxu1 %v2838_v28 }
  0x52   :  { %715 = vmatprep.mubr.bf16.mxu0 %v2839_v29  ;;  %843 = vmatprep.mubr.bf16.mxu1 %v2841_v30 }
  0x59   :  { %716 = vmatmul.mubr.bf16.gmra.mrb[12].mxu0 %v2843_v31  ;;  %844 = vmatmul.mubr.bf16.gmra.mrb[12].mxu1 %v2844_v32 }
  0x5a   :  { %723 = vmatprep.mubr.bf16.mxu0 %v2845_v33  ;;  %851 = vmatprep.mubr.bf16.mxu1 %v2847_v34 }
  0x61   :  { %724 = vmatmul.mubr.bf16.gmra.mrb[16].mxu0 %v2849_v35  ;;  %852 = vmatmul.mubr.bf16.gmra.mrb[16].mxu1 %v2850_v36 }
  0x62   :  { %731 = vmatprep.mubr.bf16.mxu0 %v2851_v37  ;;  %859 = vmatprep.mubr.bf16.mxu1 %v2853_v38 }
  0x69   :  { %732 = vmatmul.mubr.bf16.gmra.mrb[20].mxu0 %v2855_v39  ;;  %860 = vmatmul.mubr.bf16.gmra.mrb[20].mxu1 %v2856_v40  ;;  %v3214_v39 = vld [vmem:[%s3533_s2] ss:$0 sm:$0xff] }
  0x6a   :  { %739 = vmatprep.mubr.bf16.mxu0 %v2857_v41  ;;  %867 = vmatprep.mubr.bf16.mxu1 %v2859_v42 }
  0x71   :  { %740 = vmatmul.mubr.bf16.gmra.mrb[24].mxu0 %v2861_v43  ;;  %868 = vmatmul.mubr.bf16.gmra.mrb[24].mxu1 %v2862_v44 }
  0x72   :  { %747 = vmatprep.mubr.bf16.mxu0 %v2863_v45  ;;  %875 = vmatprep.mubr.bf16.mxu1 %v2865_v46 }
  0x79   :  { %748 = vmatmul.mubr.bf16.gmra.mrb[28].mxu0 %v2867_v47  ;;  %876 = vmatmul.mubr.bf16.gmra.mrb[28].mxu1 %v2868_v48 }
  0x7a   :  { %755 = vmatprep.mubr.bf16.mxu0 %v2869_v49  ;;  %883 = vmatprep.mubr.bf16.mxu1 %v2871_v50 }
  0x81   :  { %756 = vmatmul.mubr.bf16.gmra.mrb[32].mxu0 %v2873_v51  ;;  %884 = vmatmul.mubr.bf16.gmra.mrb[32].mxu1 %v2874_v52 }
  0x82   :  { %763 = vmatprep.mubr.bf16.mxu0 %v2875_v53  ;;  %891 = vmatprep.mubr.bf16.mxu1 %v2877_v54 }
  0x89   :  { %764 = vmatmul.mubr.bf16.gmra.mrb[36].mxu0 %v2879_v55  ;;  %892 = vmatmul.mubr.bf16.gmra.mrb[36].mxu1 %v2880_v56 }
  0x8a   :  { %771 = vmatprep.mubr.bf16.mxu0 %v2881_v57  ;;  %899 = vmatprep.mubr.bf16.mxu1 %v2883_v58 }
  0x91   :  { %772 = vmatmul.mubr.bf16.gmra.mrb[40].mxu0 %v2885_v59  ;;  %900 = vmatmul.mubr.bf16.gmra.mrb[40].mxu1 %v2886_v60 }
  0x92   :  { %779 = vmatprep.mubr.bf16.mxu0 %v2887_v61  ;;  %907 = vmatprep.mubr.bf16.mxu1 %v2889_v62 }
  0x99   :  { %780 = vmatmul.mubr.bf16.gmra.mrb[44].mxu0 %v2891_v63  ;;  %908 = vmatmul.mubr.bf16.gmra.mrb[44].mxu1 %v2892_v0 }
  0x9a   :  { %787 = vmatprep.mubr.bf16.mxu0 %v2893_v1  ;;  %915 = vmatprep.mubr.bf16.mxu1 %v2895_v2 }
  0xa1   :  { %788 = vmatmul.mubr.bf16.gmra.mrb[48].mxu0 %v2897_v3  ;;  %916 = vmatmul.mubr.bf16.gmra.mrb[48].mxu1 %v2898_v4 }
  0xa2   :  { %795 = vmatprep.mubr.bf16.mxu0 %v2899_v5  ;;  %923 = vmatprep.mubr.bf16.mxu1 %v2901_v6 }
  0xa9   :  { %796 = vmatmul.mubr.bf16.gmra.mrb[52].mxu0 %v2903_v7  ;;  %924 = vmatmul.mubr.bf16.gmra.mrb[52].mxu1 %v2904_v8 }
  0xaa   :  { %803 = vmatprep.mubr.bf16.mxu0 %v2905_v9  ;;  %931 = vmatprep.mubr.bf16.mxu1 %v2907_v10 }
  0xb1   :  { %804 = vmatmul.mubr.bf16.gmra.mrb[56].mxu0 %v2909_v11  ;;  %932 = vmatmul.mubr.bf16.gmra.mrb[56].mxu1 %v2910_v12 }
  0xb2   :  { %811 = vmatprep.mubr.bf16.mxu0 %v2911_v13  ;;  %939 = vmatprep.mubr.bf16.mxu1 %v2913_v14 }
  0xb9   :  { %812 = vmatmul.mubr.bf16.gmra.mrb[60].mxu0 %v2915_v15  ;;  %940 = vmatmul.mubr.bf16.gmra.mrb[60].mxu1 %v2916_v16 }
 0x114   :  { %v693_v17 = vpop.f32.mrb[0].mxu0  ;;  %v821_v18 = vpop.f32.mrb[0].mxu1 }
 0x115   :  { %v1144_v19 = vmul.f32 1024.0, %v693_v17  ;;  %v1176_v20 = vmul.f32 1024.0, %v821_v18  ;;  %v695_v21 = vpop.f32.mrb[1].mxu0  ;;  %v823_v22 = vpop.f32.mrb[1].mxu1 }
 0x116   :  { %v696_v23 = vpop.f32.mrb[2].mxu0  ;;  %v824_v24 = vpop.f32.mrb[2].mxu1 }
 0x117   :  { %v2676_v25 = vround.rtne.f32 %v1144_v19  ;;  %v2708_v26 = vround.rtne.f32 %v1176_v20  ;;  %v1145_v27 = vmul.f32 1024.0, %v696_v23  ;;  %v1177_v28 = vmul.f32 1024.0, %v824_v24  ;;  %v698_v29 = vpop.f32.mrb[3].mxu0  ;;  %v826_v30 = vpop.f32.mrb[3].mxu1 }
 0x119   :  { %v1272_v31 = vmax.f32 %v2676_v25, -32768.0  ;;  %v1304_v32 = vmax.f32 %v2708_v26, -32768.0  ;;  %v2677_v33 = vround.rtne.f32 %v1145_v27  ;;  %v2709_v34 = vround.rtne.f32 %v1177_v28 }
 0x11b   :  { %v1336_v35 = vmin.f32 %v1272_v31, 32767.0  ;;  %v1368_v36 = vmin.f32 %v1304_v32, 32767.0  ;;  %v1273_v37 = vmax.f32 %v2677_v33, -32768.0  ;;  %v1305_v38 = vmax.f32 %v2709_v34, -32768.0 }
 0x11c   :  { %v701_v40 = vpop.f32.mrb[4].mxu0  ;;  %v829_v41 = vpop.f32.mrb[4].mxu1 }
 0x11d   :  { %v1400_v42 = vmul.f32 0.0009765625, %v1336_v35  ;;  %v1432_v43 = vmul.f32 0.0009765625, %v1368_v36  ;;  %v1337_v44 = vmin.f32 %v1273_v37, 32767.0  ;;  %v1369_v45 = vmin.f32 %v1305_v38, 32767.0 }
 0x11e   :  { %v1146_v46 = vmul.f32 1024.0, %v701_v40  ;;  %v1178_v47 = vmul.f32 1024.0, %v829_v41  ;;  %v703_v48 = vpop.f32.mrb[5].mxu0  ;;  %v831_v49 = vpop.f32.mrb[5].mxu1 }
 0x11f   :  { %v1471_v50 = vadd.f32 %v3214_v39, %v1400_v42  ;;  %v1503_v51 = vadd.f32 %v3214_v39, %v1432_v43  ;;  %v1401_v52 = vmul.f32 0.0009765625, %v1337_v44  ;;  %v1433_v53 = vmul.f32 0.0009765625, %v1369_v45  ;;  %v704_v54 = vpop.f32.mrb[6].mxu0  ;;  %v832_v55 = vpop.f32.mrb[6].mxu1 }
 0x120   :  { %v2678_v56 = vround.rtne.f32 %v1146_v46  ;;  %v2710_v57 = vround.rtne.f32 %v1178_v47  ;;  %v1147_v58 = vmul.f32 1024.0, %v704_v54  ;;  %v1179_v59 = vmul.f32 1024.0, %v832_v55  ;;  %v706_v60 = vpop.f32.mrb[7].mxu0  ;;  %v834_v61 = vpop.f32.mrb[7].mxu1 }
 0x121   :  { %v1536_v62 = vmul.f32 16.0, %v1471_v50  ;;  %v1568_v63 = vmul.f32 16.0, %v1503_v51  ;;  %v1472_v0 = vadd.f32 %v3214_v39, %v1401_v52  ;;  %v1504_v1 = vadd.f32 %v3214_v39, %v1433_v53 }
 0x122   :  { %v1274_v2 = vmax.f32 %v2678_v56, -32768.0  ;;  %v1306_v3 = vmax.f32 %v2710_v57, -32768.0  ;;  %v2679_v4 = vround.rtne.f32 %v1147_v58  ;;  %v2711_v5 = vround.rtne.f32 %v1179_v59 }
 0x123   :  { %v2740_v6 = vround.rtne.f32 %v1536_v62  ;;  %v2772_v7 = vround.rtne.f32 %v1568_v63  ;;  %v1537_v8 = vmul.f32 16.0, %v1472_v0  ;;  %v1569_v9 = vmul.f32 16.0, %v1504_v1 }
 0x124   :  { %v1338_v10 = vmin.f32 %v1274_v2, 32767.0  ;;  %v1370_v11 = vmin.f32 %v1306_v3, 32767.0  ;;  %v1275_v12 = vmax.f32 %v2679_v4, -32768.0  ;;  %v1307_v13 = vmax.f32 %v2711_v5, -32768.0 }
 0x125   :  { %v1664_v14 = vmax.f32 %v2740_v6, -128.0  ;;  %v1696_v15 = vmax.f32 %v2772_v7, -128.0  ;;  %v2741_v16 = vround.rtne.f32 %v1537_v8  ;;  %v2773_v17 = vround.rtne.f32 %v1569_v9  ;;  %v709_v18 = vpop.f32.mrb[8].mxu0  ;;  %v837_v19 = vpop.f32.mrb[8].mxu1 }
 0x126   :  { %v1402_v20 = vmul.f32 0.0009765625, %v1338_v10  ;;  %v1434_v21 = vmul.f32 0.0009765625, %v1370_v11  ;;  %v1339_v22 = vmin.f32 %v1275_v12, 32767.0  ;;  %v1371_v23 = vmin.f32 %v1307_v13, 32767.0 }
 0x127   :  { %v1728_v24 = vmin.f32 %v1664_v14, 127.0  ;;  %v1760_v25 = vmin.f32 %v1696_v15, 127.0  ;;  %v1665_v26 = vmax.f32 %v2741_v16, -128.0  ;;  %v1697_v27 = vmax.f32 %v2773_v17, -128.0  ;;  %v711_v28 = vpop.f32.mrb[9].mxu0  ;;  %v839_v29 = vpop.f32.mrb[9].mxu1 }
 0x128   :  { %v1473_v30 = vadd.f32 %v3214_v39, %v1402_v20  ;;  %v1505_v31 = vadd.f32 %v3214_v39, %v1434_v21  ;;  %v1403_v32 = vmul.f32 0.0009765625, %v1339_v22  ;;  %v1435_v33 = vmul.f32 0.0009765625, %v1371_v23  ;;  %v712_v34 = vpop.f32.mrb[10].mxu0  ;;  %v840_v35 = vpop.f32.mrb[10].mxu1 }
 0x129   :  { %v1792_v36 = vmul.f32 0.0625, %v1728_v24  ;;  %v1824_v37 = vmul.f32 0.0625, %v1760_v25  ;;  %v1729_v38 = vmin.f32 %v1665_v26, 127.0  ;;  %v1761_v40 = vmin.f32 %v1697_v27, 127.0  ;;  %v714_v41 = vpop.f32.mrb[11].mxu0  ;;  %v842_v42 = vpop.f32.mrb[11].mxu1 }
 0x12a   :  { %v1538_v43 = vmul.f32 16.0, %v1473_v30  ;;  %v1570_v44 = vmul.f32 16.0, %v1505_v31  ;;  %v1474_v45 = vadd.f32 %v3214_v39, %v1403_v32  ;;  %v1506_v46 = vadd.f32 %v3214_v39, %v1435_v33 }
 0x12b   :  { %v1856_v47 = vmax.f32 %v1792_v36, 0.0  ;;  %v1888_v48 = vmax.f32 %v1824_v37, 0.0  ;;  %v1793_v49 = vmul.f32 0.0625, %v1729_v38  ;;  %v1825_v50 = vmul.f32 0.0625, %v1761_v40 }
 0x12c   :  { %v2742_v51 = vround.rtne.f32 %v1538_v43  ;;  %v2774_v52 = vround.rtne.f32 %v1570_v44  ;;  %v1539_v53 = vmul.f32 16.0, %v1474_v45  ;;  %v1571_v54 = vmul.f32 16.0, %v1506_v46  ;;  %v717_v55 = vpop.f32.mrb[12].mxu0  ;;  %v845_v56 = vpop.f32.mrb[12].mxu1 }
 0x12d   :  { %v1857_v57 = vmax.f32 %v1793_v49, 0.0  ;;  %v1889_v58 = vmax.f32 %v1825_v50, 0.0  ;;  %v1148_v59 = vmul.f32 1024.0, %v709_v18  ;;  %v1180_v60 = vmul.f32 1024.0, %v837_v19  ;;  %v719_v61 = vpop.f32.mrb[13].mxu0  ;;  %v847_v62 = vpop.f32.mrb[13].mxu1 }
 0x12e   :  { %v1666_v63 = vmax.f32 %v2742_v51, -128.0  ;;  %v1698_v0 = vmax.f32 %v2774_v52, -128.0  ;;  %v2743_v1 = vround.rtne.f32 %v1539_v53  ;;  %v2775_v2 = vround.rtne.f32 %v1571_v54  ;;  %v720_v3 = vpop.f32.mrb[14].mxu0  ;;  %v848_v4 = vpop.f32.mrb[14].mxu1 }
 0x12f   :  { %v2456_v5 = vpack.c.bf16 %v1857_v57, %v1856_v47  ;;  %v2536_v6 = vpack.c.bf16 %v1889_v58, %v1888_v48  ;;  %v2680_v7 = vround.rtne.f32 %v1148_v59  ;;  %v2712_v8 = vround.rtne.f32 %v1180_v60  ;;  %v722_v9 = vpop.f32.mrb[15].mxu0  ;;  %v850_v10 = vpop.f32.mrb[15].mxu1 }
 0x130   :  { %v1730_v11 = vmin.f32 %v1666_v63, 127.0  ;;  %v1762_v12 = vmin.f32 %v1698_v0, 127.0  ;;  %v1667_v13 = vmax.f32 %v2743_v1, -128.0  ;;  %v1699_v14 = vmax.f32 %v2775_v2, -128.0 }
 0x131   :  { %2457 = vst [vmem:[%s3534_s3] sm:$0xff] %v2456_v5   ;;  %2628 = vst [vmem:[%s3534_s3 + $0x80] sm:$0xff] %v2536_v6   ;;  %v1276_v15 = vmax.f32 %v2680_v7, -32768.0  ;;  %v1308_v16 = vmax.f32 %v2712_v8, -32768.0  ;;  %v1149_v17 = vmul.f32 1024.0, %v712_v34  ;;  %v1181_v18 = vmul.f32 1024.0, %v840_v35 }
 0x132   :  { %v1794_v19 = vmul.f32 0.0625, %v1730_v11  ;;  %v1826_v20 = vmul.f32 0.0625, %v1762_v12  ;;  %v1731_v21 = vmin.f32 %v1667_v13, 127.0  ;;  %v1763_v22 = vmin.f32 %v1699_v14, 127.0 }
 0x133   :  { %v1340_v23 = vmin.f32 %v1276_v15, 32767.0  ;;  %v1372_v24 = vmin.f32 %v1308_v16, 32767.0  ;;  %v2681_v25 = vround.rtne.f32 %v1149_v17  ;;  %v2713_v26 = vround.rtne.f32 %v1181_v18 }
 0x134   :  { %v1858_v27 = vmax.f32 %v1794_v19, 0.0  ;;  %v1890_v28 = vmax.f32 %v1826_v20, 0.0  ;;  %v1795_v29 = vmul.f32 0.0625, %v1731_v21  ;;  %v1827_v30 = vmul.f32 0.0625, %v1763_v22  ;;  %v3230_v31 = vpop.f32.mrb[16].mxu0  ;;  %v3232_v32 = vpop.f32.mrb[16].mxu1 }
 0x135   :  { %v1404_v33 = vmul.f32 0.0009765625, %v1340_v23  ;;  %v1436_v36 = vmul.f32 0.0009765625, %v1372_v24  ;;  %v1277_v34 = vmax.f32 %v2681_v25, -32768.0  ;;  %v1309_v35 = vmax.f32 %v2713_v26, -32768.0  ;;  %v727_v37 = vpop.f32.mrb[17].mxu0  ;;  %v855_v38 = vpop.f32.mrb[17].mxu1 }
 0x136   :  { %v1859_v40 = vmax.f32 %v1795_v29, 0.0  ;;  %v1891_v41 = vmax.f32 %v1827_v30, 0.0  ;;  %v1150_v42 = vmul.f32 1024.0, %v717_v55  ;;  %v1182_v43 = vmul.f32 1024.0, %v845_v56  ;;  %v3234_v44 = vpop.f32.mrb[18].mxu0  ;;  %v3236_v45 = vpop.f32.mrb[18].mxu1 }
 0x137   :  { %v1475_v46 = vadd.f32 %v3214_v39, %v1404_v33  ;;  %v1507_v47 = vadd.f32 %v3214_v39, %v1436_v36  ;;  %v1341_v48 = vmin.f32 %v1277_v34, 32767.0  ;;  %v1373_v49 = vmin.f32 %v1309_v35, 32767.0  ;;  %v730_v50 = vpop.f32.mrb[19].mxu0  ;;  %v858_v51 = vpop.f32.mrb[19].mxu1 }
 0x138   :  { %v2461_v52 = vpack.c.bf16 %v1859_v40, %v1858_v27  ;;  %v2541_v53 = vpack.c.bf16 %v1891_v41, %v1890_v28  ;;  %v2682_v54 = vround.rtne.f32 %v1150_v42  ;;  %v2714_v57 = vround.rtne.f32 %v1182_v43 }
 0x139   :  { %v1540_v58 = vmul.f32 16.0, %v1475_v46  ;;  %v1572_v59 = vmul.f32 16.0, %v1507_v47  ;;  %v1405_v55 = vmul.f32 0.0009765625, %v1341_v48  ;;  %v1437_v56 = vmul.f32 0.0009765625, %v1373_v49 }
 0x13a   :  { %2613 = vst [vmem:[%s3534_s3 + $0x8] sm:$0xff] %v2461_v52   ;;  %2629 = vst [vmem:[%s3534_s3 + $0x88] sm:$0xff] %v2541_v53   ;;  %v1278_v60 = vmax.f32 %v2682_v54, -32768.0  ;;  %v1310_v61 = vmax.f32 %v2714_v57, -32768.0  ;;  %v1151_v62 = vmul.f32 1024.0, %v720_v3  ;;  %v1183_v63 = vmul.f32 1024.0, %v848_v4 }
 0x13b   :  { %v2744_v0 = vround.rtne.f32 %v1540_v58  ;;  %v2776_v1 = vround.rtne.f32 %v1572_v59  ;;  %v1476_v2 = vadd.f32 %v3214_v39, %v1405_v55  ;;  %v1508_v5 = vadd.f32 %v3214_v39, %v1437_v56 }
 0x13c   :  { %v1342_v6 = vmin.f32 %v1278_v60, 32767.0  ;;  %v1374_v7 = vmin.f32 %v1310_v61, 32767.0  ;;  %v2683_v8 = vround.rtne.f32 %v1151_v62  ;;  %v2715_v9 = vround.rtne.f32 %v1183_v63  ;;  %v3248_v10 = vpop.f32.mrb[20].mxu0  ;;  %v3250_v11 = vpop.f32.mrb[20].mxu1 }
 0x13d   :  { %v1668_v12 = vmax.f32 %v2744_v0, -128.0  ;;  %v1700_v13 = vmax.f32 %v2776_v1, -128.0  ;;  %v1541_v14 = vmul.f32 16.0, %v1476_v2  ;;  %v1573_v15 = vmul.f32 16.0, %v1508_v5  ;;  %v735_v3 = vpop.f32.mrb[21].mxu0  ;;  %v863_v4 = vpop.f32.mrb[21].mxu1 }
 0x13e   :  { %v1406_v16 = vmul.f32 0.0009765625, %v1342_v6  ;;  %v1438_v17 = vmul.f32 0.0009765625, %v1374_v7  ;;  %v1279_v18 = vmax.f32 %v2683_v8, -32768.0  ;;  %v1311_v19 = vmax.f32 %v2715_v9, -32768.0  ;;  %v3252_v20 = vpop.f32.mrb[22].mxu0  ;;  %v3254_v21 = vpop.f32.mrb[22].mxu1 }
 0x13f   :  { %v1732_v22 = vmin.f32 %v1668_v12, 127.0  ;;  %v1764_v23 = vmin.f32 %v1700_v13, 127.0  ;;  %v2745_v24 = vround.rtne.f32 %v1541_v14  ;;  %v2777_v25 = vround.rtne.f32 %v1573_v15  ;;  %v738_v26 = vpop.f32.mrb[23].mxu0  ;;  %v866_v27 = vpop.f32.mrb[23].mxu1 }
 0x140   :  { %v1477_v28 = vadd.f32 %v3214_v39, %v1406_v16  ;;  %v1509_v29 = vadd.f32 %v3214_v39, %v1438_v17  ;;  %v1343_v30 = vmin.f32 %v1279_v18, 32767.0  ;;  %v1375_v33 = vmin.f32 %v1311_v19, 32767.0 }
 0x141   :  { %v1796_v36 = vmul.f32 0.0625, %v1732_v22  ;;  %v1828_v34 = vmul.f32 0.0625, %v1764_v23  ;;  %v1669_v35 = vmax.f32 %v2745_v24, -128.0  ;;  %v1701_v37 = vmax.f32 %v2777_v25, -128.0 }
 0x142   :  { %v1542_v38 = vmul.f32 16.0, %v1477_v28  ;;  %v1574_v40 = vmul.f32 16.0, %v1509_v29  ;;  %v1407_v41 = vmul.f32 0.0009765625, %v1343_v30  ;;  %v1439_v42 = vmul.f32 0.0009765625, %v1375_v33 }
 0x143   :  { %v1860_v43 = vmax.f32 %v1796_v36, 0.0  ;;  %v1892_v46 = vmax.f32 %v1828_v34, 0.0  ;;  %v1733_v47 = vmin.f32 %v1669_v35, 127.0  ;;  %v1765_v48 = vmin.f32 %v1701_v37, 127.0 }
 0x144   :  { %v2746_v49 = vround.rtne.f32 %v1542_v38  ;;  %v2778_v50 = vround.rtne.f32 %v1574_v40  ;;  %v1478_v51 = vadd.f32 %v3214_v39, %v1407_v41  ;;  %v1510_v52 = vadd.f32 %v3214_v39, %v1439_v42  ;;  %v3260_v53 = vpop.f32.mrb[24].mxu0  ;;  %v3262_v54 = vpop.f32.mrb[24].mxu1 }
 0x145   :  { %v1797_v57 = vmul.f32 0.0625, %v1733_v47  ;;  %v1829_v58 = vmul.f32 0.0625, %v1765_v48  ;;  %v1152_v59 = vmul.f32 1024.0, %v3230_v31  ;;  %v1184_v55 = vmul.f32 1024.0, %v3232_v32  ;;  %v743_v56 = vpop.f32.mrb[25].mxu0  ;;  %v871_v60 = vpop.f32.mrb[25].mxu1 }
 0x146   :  { %v1670_v61 = vmax.f32 %v2746_v49, -128.0  ;;  %v1702_v62 = vmax.f32 %v2778_v50, -128.0  ;;  %v1543_v63 = vmul.f32 16.0, %v1478_v51  ;;  %v1575_v0 = vmul.f32 16.0, %v1510_v52  ;;  %v3266_v1 = vpop.f32.mrb[26].mxu0  ;;  %v3268_v2 = vpop.f32.mrb[26].mxu1 }
 0x147   :  { %v1861_v5 = vmax.f32 %v1797_v57, 0.0  ;;  %v1893_v6 = vmax.f32 %v1829_v58, 0.0  ;;  %v2684_v7 = vround.rtne.f32 %v1152_v59  ;;  %v2716_v8 = vround.rtne.f32 %v1184_v55  ;;  %v746_v9 = vpop.f32.mrb[27].mxu0  ;;  %v874_v12 = vpop.f32.mrb[27].mxu1 }
 0x148   :  { %v1734_v13 = vmin.f32 %v1670_v61, 127.0  ;;  %v1766_v31 = vmin.f32 %v1702_v62, 127.0  ;;  %v2747_v14 = vround.rtne.f32 %v1543_v63  ;;  %v2779_v32 = vround.rtne.f32 %v1575_v0 }
 0x149   :  { %v2466_v15 = vpack.c.bf16 %v1861_v5, %v1860_v43  ;;  %v2546_v3 = vpack.c.bf16 %v1893_v6, %v1892_v46  ;;  %v1280_v4 = vmax.f32 %v2684_v7, -32768.0  ;;  %v1312_v16 = vmax.f32 %v2716_v8, -32768.0 }
 0x14a   :  { %v1798_v17 = vmul.f32 0.0625, %v1734_v13  ;;  %v1830_v18 = vmul.f32 0.0625, %v1766_v31  ;;  %v1671_v19 = vmax.f32 %v2747_v14, -128.0  ;;  %v1703_v22 = vmax.f32 %v2779_v32, -128.0 }
 0x14b   :  { %2614 = vst [vmem:[%s3534_s3 + $0x10] sm:$0xff] %v2466_v15   ;;  %2630 = vst [vmem:[%s3534_s3 + $0x90] sm:$0xff] %v2546_v3   ;;  %v1344_v23 = vmin.f32 %v1280_v4, 32767.0  ;;  %v1376_v24 = vmin.f32 %v1312_v16, 32767.0 }
 0x14c   :  { %v1153_v25 = vmul.f32 1024.0, %v3234_v44  ;;  %v1185_v26 = vmul.f32 1024.0, %v3236_v45  ;;  %v1862_v27 = vmax.f32 %v1798_v17, 0.0  ;;  %v1894_v28 = vmax.f32 %v1830_v18, 0.0  ;;  %v3278_v33 = vpop.f32.mrb[28].mxu0  ;;  %v3280_v36 = vpop.f32.mrb[28].mxu1 }
 0x14d   :  { %v1735_v29 = vmin.f32 %v1671_v19, 127.0  ;;  %v1767_v30 = vmin.f32 %v1703_v22, 127.0  ;;  %v1408_v34 = vmul.f32 0.0009765625, %v1344_v23  ;;  %v1440_v35 = vmul.f32 0.0009765625, %v1376_v24  ;;  %v751_v40 = vpop.f32.mrb[29].mxu0  ;;  %v879_v41 = vpop.f32.mrb[29].mxu1 }
 0x14e   :  { %v2685_v37 = vround.rtne.f32 %v1153_v25  ;;  %v2717_v38 = vround.rtne.f32 %v1185_v26  ;;  %v1154_v44 = vmul.f32 1024.0, %v3248_v10  ;;  %v1186_v45 = vmul.f32 1024.0, %v3250_v11  ;;  %v3284_v46 = vpop.f32.mrb[30].mxu0  ;;  %v3286_v47 = vpop.f32.mrb[30].mxu1 }
 0x14f   :  { %v1799_v42 = vmul.f32 0.0625, %v1735_v29  ;;  %v1831_v43 = vmul.f32 0.0625, %v1767_v30  ;;  %v1479_v48 = vadd.f32 %v3214_v39, %v1408_v34  ;;  %v1511_v49 = vadd.f32 %v3214_v39, %v1440_v35  ;;  %v754_v52 = vpop.f32.mrb[31].mxu0  ;;  %v882_v57 = vpop.f32.mrb[31].mxu1 }
 0x150   :  { %v1281_v50 = vmax.f32 %v2685_v37, -32768.0  ;;  %v1313_v51 = vmax.f32 %v2717_v38, -32768.0  ;;  %v2686_v55 = vround.rtne.f32 %v1154_v44  ;;  %v2718_v56 = vround.rtne.f32 %v1186_v45 }
 0x151   :  { %v1863_v58 = vmax.f32 %v1799_v42, 0.0  ;;  %v1895_v59 = vmax.f32 %v1831_v43, 0.0  ;;  %v1544_v60 = vmul.f32 16.0, %v1479_v48  ;;  %v1576_v10 = vmul.f32 16.0, %v1511_v49 }
 0x152   :  { %v1345_v61 = vmin.f32 %v1281_v50, 32767.0  ;;  %v1377_v11 = vmin.f32 %v1313_v51, 32767.0  ;;  %v1282_v0 = vmax.f32 %v2686_v55, -32768.0  ;;  %v1314_v5 = vmax.f32 %v2718_v56, -32768.0 }
 0x153   :  { %v2471_v62 = vpack.c.bf16 %v1863_v58, %v1862_v27  ;;  %v2551_v63 = vpack.c.bf16 %v1895_v59, %v1894_v28  ;;  %v2748_v6 = vround.rtne.f32 %v1544_v60  ;;  %v2780_v7 = vround.rtne.f32 %v1576_v10 }
 0x154   :  { %v1409_v8 = vmul.f32 0.0009765625, %v1345_v61  ;;  %v1441_v9 = vmul.f32 0.0009765625, %v1377_v11  ;;  %v1346_v12 = vmin.f32 %v1282_v0, 32767.0  ;;  %v1378_v13 = vmin.f32 %v1314_v5, 32767.0 }
 0x155   :  { %2615 = vst [vmem:[%s3534_s3 + $0x18] sm:$0xff] %v2471_v62   ;;  %2631 = vst [vmem:[%s3534_s3 + $0x98] sm:$0xff] %v2551_v63   ;;  %v1155_v31 = vmul.f32 1024.0, %v3252_v20  ;;  %v1187_v14 = vmul.f32 1024.0, %v3254_v21  ;;  %v1672_v32 = vmax.f32 %v2748_v6, -128.0  ;;  %v1704_v15 = vmax.f32 %v2780_v7, -128.0 }
 0x156   :  { %v1480_v3 = vadd.f32 %v3214_v39, %v1409_v8  ;;  %v1512_v4 = vadd.f32 %v3214_v39, %v1441_v9  ;;  %v3300_v16 = vpop.f32.mrb[32].mxu0  ;;  %v3302_v17 = vpop.f32.mrb[32].mxu1  ;;  %v1410_v18 = vmul.f32 0.0009765625, %v1346_v12  ;;  %v1442_v19 = vmul.f32 0.0009765625, %v1378_v13 }
 0x157   :  { %v2687_v22 = vround.rtne.f32 %v1155_v31  ;;  %v2719_v23 = vround.rtne.f32 %v1187_v14  ;;  %v759_v24 = vpop.f32.mrb[33].mxu0  ;;  %v887_v25 = vpop.f32.mrb[33].mxu1  ;;  %v1736_v26 = vmin.f32 %v1672_v32, 127.0  ;;  %v1768_v20 = vmin.f32 %v1704_v15, 127.0 }
 0x158   :  { %v1545_v27 = vmul.f32 16.0, %v1480_v3  ;;  %v1577_v21 = vmul.f32 16.0, %v1512_v4  ;;  %v3304_v28 = vpop.f32.mrb[34].mxu0  ;;  %v3306_v29 = vpop.f32.mrb[34].mxu1  ;;  %v1481_v30 = vadd.f32 %v3214_v39, %v1410_v18  ;;  %v1513_v34 = vadd.f32 %v3214_v39, %v1442_v19 }
 0x159   :  { %v1283_v35 = vmax.f32 %v2687_v22, -32768.0  ;;  %v1315_v37 = vmax.f32 %v2719_v23, -32768.0  ;;  %v762_v38 = vpop.f32.mrb[35].mxu0  ;;  %v890_v40 = vpop.f32.mrb[35].mxu1  ;;  %v1800_v41 = vmul.f32 0.0625, %v1736_v26  ;;  %v1832_v42 = vmul.f32 0.0625, %v1768_v20 }
 0x15a   :  { %v2749_v43 = vround.rtne.f32 %v1545_v27  ;;  %v2781_v44 = vround.rtne.f32 %v1577_v21  ;;  %v1546_v45 = vmul.f32 16.0, %v1481_v30  ;;  %v1578_v48 = vmul.f32 16.0, %v1513_v34 }
 0x15b   :  { %v1347_v49 = vmin.f32 %v1283_v35, 32767.0  ;;  %v1379_v50 = vmin.f32 %v1315_v37, 32767.0  ;;  %v1864_v51 = vmax.f32 %v1800_v41, 0.0  ;;  %v1896_v52 = vmax.f32 %v1832_v42, 0.0 }
 0x15c   :  { %v1673_v57 = vmax.f32 %v2749_v43, -128.0  ;;  %v1705_v58 = vmax.f32 %v2781_v44, -128.0  ;;  %v2750_v59 = vround.rtne.f32 %v1546_v45  ;;  %v2782_v55 = vround.rtne.f32 %v1578_v48  ;;  %v3310_v10 = vpop.f32.mrb[36].mxu0  ;;  %v3312_v61 = vpop.f32.mrb[36].mxu1 }
 0x15d   :  { %v1411_v56 = vmul.f32 0.0009765625, %v1347_v49  ;;  %v1443_v60 = vmul.f32 0.0009765625, %v1379_v50  ;;  %v1156_v63 = vmul.f32 1024.0, %v3260_v53  ;;  %v1188_v0 = vmul.f32 1024.0, %v3262_v54  ;;  %v767_v5 = vpop.f32.mrb[37].mxu0  ;;  %v895_v6 = vpop.f32.mrb[37].mxu1 }
 0x15e   :  { %v1737_v11 = vmin.f32 %v1673_v57, 127.0  ;;  %v1769_v62 = vmin.f32 %v1705_v58, 127.0  ;;  %v1674_v7 = vmax.f32 %v2750_v59, -128.0  ;;  %v1706_v8 = vmax.f32 %v2782_v55, -128.0  ;;  %v3318_v13 = vpop.f32.mrb[38].mxu0  ;;  %v3320_v31 = vpop.f32.mrb[38].mxu1 }
 0x15f   :  { %v1482_v9 = vadd.f32 %v3214_v39, %v1411_v56  ;;  %v1514_v12 = vadd.f32 %v3214_v39, %v1443_v60  ;;  %v2688_v15 = vround.rtne.f32 %v1156_v63  ;;  %v2720_v3 = vround.rtne.f32 %v1188_v0  ;;  %v770_v4 = vpop.f32.mrb[39].mxu0  ;;  %v898_v53 = vpop.f32.mrb[39].mxu1 }
 0x160   :  { %v1801_v14 = vmul.f32 0.0625, %v1737_v11  ;;  %v1833_v32 = vmul.f32 0.0625, %v1769_v62  ;;  %v1738_v18 = vmin.f32 %v1674_v7, 127.0  ;;  %v1770_v54 = vmin.f32 %v1706_v8, 127.0 }
 0x161   :  { %v1547_v19 = vmul.f32 16.0, %v1482_v9  ;;  %v1579_v22 = vmul.f32 16.0, %v1514_v12  ;;  %v1284_v25 = vmax.f32 %v2688_v15, -32768.0  ;;  %v1316_v26 = vmax.f32 %v2720_v3, -32768.0 }
 0x162   :  { %v1865_v23 = vmax.f32 %v1801_v14, 0.0  ;;  %v1897_v24 = vmax.f32 %v1833_v32, 0.0  ;;  %v1802_v20 = vmul.f32 0.0625, %v1738_v18  ;;  %v1834_v27 = vmul.f32 0.0625, %v1770_v54 }
 0x163   :  { %v2751_v21 = vround.rtne.f32 %v1547_v19  ;;  %v2783_v30 = vround.rtne.f32 %v1579_v22  ;;  %v1348_v37 = vmin.f32 %v1284_v25, 32767.0  ;;  %v1380_v38 = vmin.f32 %v1316_v26, 32767.0 }
 0x164   :  { %v2476_v34 = vpack.c.bf16 %v1865_v23, %v1864_v51  ;;  %v2556_v35 = vpack.c.bf16 %v1897_v24, %v1896_v52  ;;  %v1866_v40 = vmax.f32 %v1802_v20, 0.0  ;;  %v1898_v41 = vmax.f32 %v1834_v27, 0.0  ;;  %v3322_v44 = vpop.f32.mrb[40].mxu0  ;;  %v3324_v45 = vpop.f32.mrb[40].mxu1 }
 0x165   :  { %v1675_v42 = vmax.f32 %v2751_v21, -128.0  ;;  %v1707_v43 = vmax.f32 %v2783_v30, -128.0  ;;  %v1412_v48 = vmul.f32 0.0009765625, %v1348_v37  ;;  %v1444_v49 = vmul.f32 0.0009765625, %v1380_v38  ;;  %v775_v52 = vpop.f32.mrb[41].mxu0  ;;  %v903_v57 = vpop.f32.mrb[41].mxu1 }
 0x166   :  { %2616 = vst [vmem:[%s3534_s3 + $0x20] sm:$0xff] %v2476_v34   ;;  %2632 = vst [vmem:[%s3534_s3 + $0xa0] sm:$0xff] %v2556_v35   ;;  %v1157_v50 = vmul.f32 1024.0, %v3266_v1  ;;  %v1189_v51 = vmul.f32 1024.0, %v3268_v2  ;;  %v1158_v55 = vmul.f32 1024.0, %v3278_v33  ;;  %v1190_v56 = vmul.f32 1024.0, %v3280_v36 }
 0x167   :  { %v1739_v58 = vmin.f32 %v1675_v42, 127.0  ;;  %v1771_v59 = vmin.f32 %v1707_v43, 127.0  ;;  %v3336_v60 = vpop.f32.mrb[42].mxu0  ;;  %v3338_v11 = vpop.f32.mrb[42].mxu1  ;;  %v1483_v62 = vadd.f32 %v3214_v39, %v1412_v48  ;;  %v1515_v63 = vadd.f32 %v3214_v39, %v1444_v49 }
 0x168   :  { %v2689_v0 = vround.rtne.f32 %v1157_v50  ;;  %v2721_v1 = vround.rtne.f32 %v1189_v51  ;;  %v778_v5 = vpop.f32.mrb[43].mxu0  ;;  %v906_v2 = vpop.f32.mrb[43].mxu1  ;;  %v2690_v8 = vround.rtne.f32 %v1158_v55  ;;  %v2722_v9 = vround.rtne.f32 %v1190_v56 }
 0x169   :  { %v1803_v6 = vmul.f32 0.0625, %v1739_v58  ;;  %v1835_v7 = vmul.f32 0.0625, %v1771_v59  ;;  %v1548_v12 = vmul.f32 16.0, %v1483_v62  ;;  %v1580_v33 = vmul.f32 16.0, %v1515_v63 }
 0x16a   :  { %v1285_v14 = vmax.f32 %v2689_v0, -32768.0  ;;  %v1317_v36 = vmax.f32 %v2721_v1, -32768.0  ;;  %v1286_v3 = vmax.f32 %v2690_v8, -32768.0  ;;  %v1318_v4 = vmax.f32 %v2722_v9, -32768.0 }
 0x16b   :  { %v1867_v32 = vmax.f32 %v1803_v6, 0.0  ;;  %v1899_v15 = vmax.f32 %v1835_v7, 0.0  ;;  %v2752_v53 = vround.rtne.f32 %v1548_v12  ;;  %v2784_v18 = vround.rtne.f32 %v1580_v33 }
 0x16c   :  { %v1349_v54 = vmin.f32 %v1285_v14, 32767.0  ;;  %v1381_v19 = vmin.f32 %v1317_v36, 32767.0  ;;  %v1350_v24 = vmin.f32 %v1286_v3, 32767.0 }
 0x16d   :  { %v2481_v22 = vpack.c.bf16 %v1867_v32, %v1866_v40  ;;  %v2561_v23 = vpack.c.bf16 %v1899_v15, %v1898_v41  ;;  %v1382_v25 = vmin.f32 %v1318_v4, 32767.0  ;;  %v3342_v26 = vpop.f32.mrb[44].mxu0  ;;  %v3344_v20 = vpop.f32.mrb[44].mxu1  ;;  %v1676_v27 = vmax.f32 %v2752_v53, -128.0 }
 0x16e   :  { %v1708_v21 = vmax.f32 %v2784_v18, -128.0  ;;  %v1413_v30 = vmul.f32 0.0009765625, %v1349_v54  ;;  %v1445_v34 = vmul.f32 0.0009765625, %v1381_v19  ;;  %v783_v35 = vpop.f32.mrb[45].mxu0  ;;  %v911_v37 = vpop.f32.mrb[45].mxu1  ;;  %v1414_v38 = vmul.f32 0.0009765625, %v1350_v24 }
 0x16f   :  { %2617 = vst [vmem:[%s3534_s3 + $0x28] sm:$0xff] %v2481_v22   ;;  %2633 = vst [vmem:[%s3534_s3 + $0xa8] sm:$0xff] %v2561_v23   ;;  %v1446_v40 = vmul.f32 0.0009765625, %v1382_v25  ;;  %v1159_v41 = vmul.f32 1024.0, %v3284_v46  ;;  %v1191_v42 = vmul.f32 1024.0, %v3286_v47  ;;  %v3354_v43 = vpop.f32.mrb[46].mxu0 }
 0x170   :  { %v3356_v48 = vpop.f32.mrb[46].mxu1  ;;  %v1740_v49 = vmin.f32 %v1676_v27, 127.0  ;;  %v1772_v50 = vmin.f32 %v1708_v21, 127.0  ;;  %v1484_v51 = vadd.f32 %v3214_v39, %v1413_v30  ;;  %v1516_v52 = vadd.f32 %v3214_v39, %v1445_v34  ;;  %v786_v57 = vpop.f32.mrb[47].mxu0 }
 0x171   :  { %v914_v58 = vpop.f32.mrb[47].mxu1  ;;  %v1485_v59 = vadd.f32 %v3214_v39, %v1414_v38  ;;  %v1517_v55 = vadd.f32 %v3214_v39, %v1446_v40  ;;  %v2691_v56 = vround.rtne.f32 %v1159_v41  ;;  %v2723_v46 = vround.rtne.f32 %v1191_v42 }
 0x172   :  { %v1804_v62 = vmul.f32 0.0625, %v1740_v49  ;;  %v1836_v47 = vmul.f32 0.0625, %v1772_v50  ;;  %v1549_v63 = vmul.f32 16.0, %v1484_v51  ;;  %v1581_v0 = vmul.f32 16.0, %v1516_v52 }
 0x173   :  { %v1550_v1 = vmul.f32 16.0, %v1485_v59  ;;  %v1582_v5 = vmul.f32 16.0, %v1517_v55  ;;  %v1287_v2 = vmax.f32 %v2691_v56, -32768.0  ;;  %v1319_v6 = vmax.f32 %v2723_v46, -32768.0 }
 0x174   :  { %v1868_v7 = vmax.f32 %v1804_v62, 0.0  ;;  %v1900_v8 = vmax.f32 %v1836_v47, 0.0  ;;  %v2753_v9 = vround.rtne.f32 %v1549_v63  ;;  %v2785_v12 = vround.rtne.f32 %v1581_v0  ;;  %v3362_v15 = vpop.f32.mrb[48].mxu0  ;;  %v3364_v3 = vpop.f32.mrb[48].mxu1 }
 0x175   :  { %v2754_v33 = vround.rtne.f32 %v1550_v1  ;;  %v2786_v14 = vround.rtne.f32 %v1582_v5  ;;  %v1351_v36 = vmin.f32 %v1287_v2, 32767.0  ;;  %v1383_v32 = vmin.f32 %v1319_v6, 32767.0  ;;  %v791_v19 = vpop.f32.mrb[49].mxu0  ;;  %v919_v22 = vpop.f32.mrb[49].mxu1 }
 0x176   :  { %v1677_v4 = vmax.f32 %v2753_v9, -128.0  ;;  %v1709_v53 = vmax.f32 %v2785_v12, -128.0  ;;  %v1160_v18 = vmul.f32 1024.0, %v3300_v16  ;;  %v1192_v54 = vmul.f32 1024.0, %v3302_v17  ;;  %v3368_v21 = vpop.f32.mrb[50].mxu0  ;;  %v3370_v30 = vpop.f32.mrb[50].mxu1 }
 0x177   :  { %v1678_v23 = vmax.f32 %v2754_v33, -128.0  ;;  %v1710_v24 = vmax.f32 %v2786_v14, -128.0  ;;  %v1415_v25 = vmul.f32 0.0009765625, %v1351_v36  ;;  %v1447_v27 = vmul.f32 0.0009765625, %v1383_v32  ;;  %v794_v40 = vpop.f32.mrb[51].mxu0  ;;  %v922_v41 = vpop.f32.mrb[51].mxu1 }
 0x178   :  { %v1741_v34 = vmin.f32 %v1677_v4, 127.0  ;;  %v1773_v35 = vmin.f32 %v1709_v53, 127.0  ;;  %v2692_v37 = vround.rtne.f32 %v1160_v18  ;;  %v2724_v38 = vround.rtne.f32 %v1192_v54 }
 0x179   :  { %v1742_v42 = vmin.f32 %v1678_v23, 127.0  ;;  %v1774_v16 = vmin.f32 %v1710_v24, 127.0  ;;  %v1486_v17 = vadd.f32 %v3214_v39, %v1415_v25  ;;  %v1518_v49 = vadd.f32 %v3214_v39, %v1447_v27 }
 0x17a   :  { %v1805_v50 = vmul.f32 0.0625, %v1741_v34  ;;  %v1837_v51 = vmul.f32 0.0625, %v1773_v35  ;;  %v1288_v52 = vmax.f32 %v2692_v37, -32768.0  ;;  %v1320_v57 = vmax.f32 %v2724_v38, -32768.0 }
 0x17b   :  { %v1806_v58 = vmul.f32 0.0625, %v1742_v42  ;;  %v1838_v59 = vmul.f32 0.0625, %v1774_v16  ;;  %v1551_v55 = vmul.f32 16.0, %v1486_v17  ;;  %v1583_v56 = vmul.f32 16.0, %v1518_v49 }
 0x17c   :  { %v1869_v46 = vmax.f32 %v1805_v50, 0.0  ;;  %v1901_v62 = vmax.f32 %v1837_v51, 0.0  ;;  %v1352_v47 = vmin.f32 %v1288_v52, 32767.0  ;;  %v1384_v63 = vmin.f32 %v1320_v57, 32767.0 }
 0x17d   :  { %v1870_v0 = vmax.f32 %v1806_v58, 0.0  ;;  %v1902_v1 = vmax.f32 %v1838_v59, 0.0  ;;  %v2755_v5 = vround.rtne.f32 %v1551_v55  ;;  %v2787_v2 = vround.rtne.f32 %v1583_v56  ;;  %v3374_v6 = vpop.f32.mrb[52].mxu0  ;;  %v3376_v9 = vpop.f32.mrb[52].mxu1 }
 0x17e   :  { %v2486_v12 = vpack.c.bf16 %v1869_v46, %v1868_v7  ;;  %v2566_v33 = vpack.c.bf16 %v1901_v62, %v1900_v8  ;;  %v1416_v14 = vmul.f32 0.0009765625, %v1352_v47  ;;  %v1448_v36 = vmul.f32 0.0009765625, %v1384_v63  ;;  %v799_v32 = vpop.f32.mrb[53].mxu0  ;;  %v927_v4 = vpop.f32.mrb[53].mxu1 }
 0x17f   :  { %v1679_v53 = vmax.f32 %v2755_v5, -128.0  ;;  %v1711_v18 = vmax.f32 %v2787_v2, -128.0  ;;  %v1161_v54 = vmul.f32 1024.0, %v3304_v28  ;;  %v1193_v19 = vmul.f32 1024.0, %v3306_v29  ;;  %v3380_v22 = vpop.f32.mrb[54].mxu0  ;;  %v3382_v23 = vpop.f32.mrb[54].mxu1 }
 0x180   :  { %2618 = vst [vmem:[%s3534_s3 + $0x30] sm:$0xff] %v2486_v12   ;;  %2634 = vst [vmem:[%s3534_s3 + $0xb0] sm:$0xff] %v2566_v33   ;;  %v1487_v7 = vadd.f32 %v3214_v39, %v1416_v14  ;;  %v1519_v8 = vadd.f32 %v3214_v39, %v1448_v36  ;;  %v1162_v28 = vmul.f32 1024.0, %v3310_v10  ;;  %v1194_v29 = vmul.f32 1024.0, %v3312_v61  ;;  %v802_v24 = vpop.f32.mrb[55].mxu0  ;;  %v930_v25 = vpop.f32.mrb[55].mxu1 }
 0x181   :  { %v1743_v27 = vmin.f32 %v1679_v53, 127.0  ;;  %v1775_v34 = vmin.f32 %v1711_v18, 127.0  ;;  %v2693_v35 = vround.rtne.f32 %v1161_v54  ;;  %v2725_v37 = vround.rtne.f32 %v1193_v19 }
 0x182   :  { %v1552_v38 = vmul.f32 16.0, %v1487_v7  ;;  %v1584_v40 = vmul.f32 16.0, %v1519_v8  ;;  %v2694_v41 = vround.rtne.f32 %v1162_v28  ;;  %v2726_v42 = vround.rtne.f32 %v1194_v29 }
 0x183   :  { %v1807_v16 = vmul.f32 0.0625, %v1743_v27  ;;  %v1839_v17 = vmul.f32 0.0625, %v1775_v34  ;;  %v1289_v49 = vmax.f32 %v2693_v35, -32768.0  ;;  %v1321_v50 = vmax.f32 %v2725_v37, -32768.0 }
 0x184   :  { %v2756_v51 = vround.rtne.f32 %v1552_v38  ;;  %v2788_v39 = vround.rtne.f32 %v1584_v40  ;;  %v1290_v52 = vmax.f32 %v2694_v41, -32768.0  ;;  %v1322_v10 = vmax.f32 %v2726_v42, -32768.0  ;;  %v3394_v12 = vpop.f32.mrb[56].mxu0  ;;  %v3396_v33 = vpop.f32.mrb[56].mxu1 }
 0x185   :  { %v1871_v57 = vmax.f32 %v1807_v16, 0.0  ;;  %v1903_v61 = vmax.f32 %v1839_v17, 0.0  ;;  %v1353_v58 = vmin.f32 %v1289_v49, 32767.0  ;;  %v1385_v59 = vmin.f32 %v1321_v50, 32767.0 }
 0x186   :  { %v1680_v55 = vmax.f32 %v2756_v51, -128.0  ;;  %v1712_v56 = vmax.f32 %v2788_v39, -128.0  ;;  %v1354_v46 = vmin.f32 %v1290_v52, 32767.0  ;;  %v1386_v62 = vmin.f32 %v1322_v10, 32767.0 }
 0x187   :  { %v2491_v47 = vpack.c.bf16 %v1871_v57, %v1870_v0  ;;  %v2571_v63 = vpack.c.bf16 %v1903_v61, %v1902_v1  ;;  %v1417_v5 = vmul.f32 0.0009765625, %v1353_v58  ;;  %v1449_v2 = vmul.f32 0.0009765625, %v1385_v59  ;;  %v807_v53 = vpop.f32.mrb[57].mxu0  ;;  %v935_v18 = vpop.f32.mrb[57].mxu1  ;;  %v3407_v0 = vld [vmem:[%s3533_s2] ss:$0 sm:$0xff] }
 0x188   :  { %v1744_v14 = vmin.f32 %v1680_v55, 127.0  ;;  %v1776_v36 = vmin.f32 %v1712_v56, 127.0  ;;  %v1418_v32 = vmul.f32 0.0009765625, %v1354_v46  ;;  %v1450_v4 = vmul.f32 0.0009765625, %v1386_v62  ;;  %v3413_v8 = vpop.f32.mrb[58].mxu0  ;;  %v3415_v28 = vpop.f32.mrb[58].mxu1 }
 0x189   :  { %2619 = vst [vmem:[%s3534_s3 + $0x38] sm:$0xff] %v2491_v47   ;;  %2635 = vst [vmem:[%s3534_s3 + $0xb8] sm:$0xff] %v2571_v63   ;;  %v1488_v1 = vadd.f32 %v3407_v0, %v1417_v5  ;;  %v1520_v54 = vadd.f32 %v3407_v0, %v1449_v2  ;;  %v1163_v19 = vmul.f32 1024.0, %v3318_v13  ;;  %v1195_v7 = vmul.f32 1024.0, %v3320_v31  ;;  %v810_v34 = vpop.f32.mrb[59].mxu0  ;;  %v938_v35 = vpop.f32.mrb[59].mxu1 }
 0x18a   :  { %v3417_v29 = vmul.f32 0.0625, %v1744_v14  ;;  %v3419_v24 = vmul.f32 0.0625, %v1776_v36  ;;  %v1489_v25 = vadd.f32 %v3407_v0, %v1418_v32  ;;  %v1521_v27 = vadd.f32 %v3407_v0, %v1450_v4 }
 0x18b   :  { %v1553_v37 = vmul.f32 16.0, %v1488_v1  ;;  %v1585_v38 = vmul.f32 16.0, %v1520_v54  ;;  %v2695_v40 = vround.rtne.f32 %v1163_v19  ;;  %v2727_v13 = vround.rtne.f32 %v1195_v7 }
 0x18c   :  { %v1872_v31 = vmax.f32 %v3417_v29, 0.0  ;;  %v1904_v41 = vmax.f32 %v3419_v24, 0.0  ;;  %v1554_v42 = vmul.f32 16.0, %v1489_v25  ;;  %v1586_v16 = vmul.f32 16.0, %v1521_v27  ;;  %v3425_v39 = vpop.f32.mrb[60].mxu0  ;;  %v3427_v52 = vpop.f32.mrb[60].mxu1 }
 0x18d   :  { %v2757_v17 = vround.rtne.f32 %v1553_v37  ;;  %v2789_v49 = vround.rtne.f32 %v1585_v38  ;;  %v1291_v50 = vmax.f32 %v2695_v40, -32768.0  ;;  %v1323_v51 = vmax.f32 %v2727_v13, -32768.0  ;;  %v815_v59 = vpop.f32.mrb[61].mxu0  ;;  %v943_v55 = vpop.f32.mrb[61].mxu1 }
 0x18e   :  { %v2758_v10 = vround.rtne.f32 %v1554_v42  ;;  %v2790_v57 = vround.rtne.f32 %v1586_v16  ;;  %v1164_v61 = vmul.f32 1024.0, %v3322_v44  ;;  %v1196_v58 = vmul.f32 1024.0, %v3324_v45  ;;  %v3431_v36 = vpop.f32.mrb[62].mxu0  ;;  %v3433_v32 = vpop.f32.mrb[62].mxu1 }
 0x18f   :  { %v1681_v56 = vmax.f32 %v2757_v17, -128.0  ;;  %v1713_v46 = vmax.f32 %v2789_v49, -128.0  ;;  %v1355_v62 = vmin.f32 %v1291_v50, 32767.0  ;;  %v1387_v47 = vmin.f32 %v1323_v51, 32767.0 }
 0x190   :  { %v1682_v63 = vmax.f32 %v2758_v10, -128.0  ;;  %v1714_v5 = vmax.f32 %v2790_v57, -128.0  ;;  %v2696_v2 = vround.rtne.f32 %v1164_v61  ;;  %v2728_v14 = vround.rtne.f32 %v1196_v58  ;;  %v818_v1 = vpop.f32.mrb[63].mxu0  ;;  %v946_v45 = vpop.f32.mrb[63].mxu1 }
 0x191   :  { %v1745_v4 = vmin.f32 %v1681_v56, 127.0  ;;  %v1777_v53 = vmin.f32 %v1713_v46, 127.0  ;;  %v1419_v18 = vmul.f32 0.0009765625, %v1355_v62  ;;  %v1451_v44 = vmul.f32 0.0009765625, %v1387_v47 }
 0x192   :  { %v1746_v54 = vmin.f32 %v1682_v63, 127.0  ;;  %v1778_v19 = vmin.f32 %v1714_v5, 127.0  ;;  %v1292_v7 = vmax.f32 %v2696_v2, -32768.0  ;;  %v1324_v29 = vmax.f32 %v2728_v14, -32768.0 }
 0x193   :  { %v1809_v24 = vmul.f32 0.0625, %v1745_v4  ;;  %v1841_v25 = vmul.f32 0.0625, %v1777_v53  ;;  %v1490_v27 = vadd.f32 %v3407_v0, %v1419_v18  ;;  %v1522_v34 = vadd.f32 %v3407_v0, %v1451_v44 }
 0x194   :  { %v1810_v35 = vmul.f32 0.0625, %v1746_v54  ;;  %v1842_v37 = vmul.f32 0.0625, %v1778_v19  ;;  %v1356_v38 = vmin.f32 %v1292_v7, 32767.0  ;;  %v1388_v40 = vmin.f32 %v1324_v29, 32767.0 }
 0x195   :  { %v1873_v13 = vmax.f32 %v1809_v24, 0.0  ;;  %v1905_v42 = vmax.f32 %v1841_v25, 0.0  ;;  %v1555_v16 = vmul.f32 16.0, %v1490_v27  ;;  %v1587_v17 = vmul.f32 16.0, %v1522_v34 }
 0x196   :  { %v1874_v49 = vmax.f32 %v1810_v35, 0.0  ;;  %v1906_v50 = vmax.f32 %v1842_v37, 0.0  ;;  %v1420_v51 = vmul.f32 0.0009765625, %v1356_v38  ;;  %v1452_v10 = vmul.f32 0.0009765625, %v1388_v40 }
 0x197   :  { %v2496_v57 = vpack.c.bf16 %v1873_v13, %v1872_v31  ;;  %v2576_v61 = vpack.c.bf16 %v1905_v42, %v1904_v41  ;;  %v2759_v58 = vround.rtne.f32 %v1555_v16  ;;  %v2791_v59 = vround.rtne.f32 %v1587_v17 }
 0x198   :  { %v1491_v55 = vadd.f32 %v3407_v0, %v1420_v51  ;;  %v1523_v56 = vadd.f32 %v3407_v0, %v1452_v10  ;;  %v1165_v46 = vmul.f32 1024.0, %v3336_v60  ;;  %v1197_v62 = vmul.f32 1024.0, %v3338_v11 }
 0x199   :  { %2620 = vst [vmem:[%s3534_s3 + $0x40] sm:$0xff] %v2496_v57   ;;  %2636 = vst [vmem:[%s3534_s3 + $0xc0] sm:$0xff] %v2576_v61   ;;  %v1683_v31 = vmax.f32 %v2759_v58, -128.0  ;;  %v1715_v41 = vmax.f32 %v2791_v59, -128.0  ;;  %v1166_v47 = vmul.f32 1024.0, %v3342_v26  ;;  %v1198_v63 = vmul.f32 1024.0, %v3344_v20 }
 0x19a   :  { %v1556_v5 = vmul.f32 16.0, %v1491_v55  ;;  %v1588_v2 = vmul.f32 16.0, %v1523_v56  ;;  %v2697_v14 = vround.rtne.f32 %v1165_v46  ;;  %v2729_v60 = vround.rtne.f32 %v1197_v62 }
 0x19b   :  { %v1747_v4 = vmin.f32 %v1683_v31, 127.0  ;;  %v1779_v11 = vmin.f32 %v1715_v41, 127.0  ;;  %v2698_v53 = vround.rtne.f32 %v1166_v47  ;;  %v2730_v18 = vround.rtne.f32 %v1198_v63 }
 0x19c   :  { %v2760_v44 = vround.rtne.f32 %v1556_v5  ;;  %v2792_v1 = vround.rtne.f32 %v1588_v2  ;;  %v1293_v45 = vmax.f32 %v2697_v14, -32768.0  ;;  %v1325_v54 = vmax.f32 %v2729_v60, -32768.0 }
 0x19d   :  { %v1811_v19 = vmul.f32 0.0625, %v1747_v4  ;;  %v1843_v7 = vmul.f32 0.0625, %v1779_v11  ;;  %v1294_v29 = vmax.f32 %v2698_v53, -32768.0  ;;  %v1326_v24 = vmax.f32 %v2730_v18, -32768.0 }
 0x19e   :  { %v1684_v25 = vmax.f32 %v2760_v44, -128.0  ;;  %v1716_v26 = vmax.f32 %v2792_v1, -128.0  ;;  %v1357_v27 = vmin.f32 %v1293_v45, 32767.0  ;;  %v1389_v20 = vmin.f32 %v1325_v54, 32767.0 }
 0x19f   :  { %v1875_v34 = vmax.f32 %v1811_v19, 0.0  ;;  %v1907_v35 = vmax.f32 %v1843_v7, 0.0  ;;  %v1358_v37 = vmin.f32 %v1294_v29, 32767.0  ;;  %v1390_v38 = vmin.f32 %v1326_v24, 32767.0 }
 0x1a0   :  { %v1748_v40 = vmin.f32 %v1684_v25, 127.0  ;;  %v1780_v13 = vmin.f32 %v1716_v26, 127.0  ;;  %v1421_v42 = vmul.f32 0.0009765625, %v1357_v27  ;;  %v1453_v16 = vmul.f32 0.0009765625, %v1389_v20 }
 0x1a1   :  { %v2501_v17 = vpack.c.bf16 %v1875_v34, %v1874_v49  ;;  %v2581_v51 = vpack.c.bf16 %v1907_v35, %v1906_v50  ;;  %v1422_v10 = vmul.f32 0.0009765625, %v1358_v37  ;;  %v1454_v57 = vmul.f32 0.0009765625, %v1390_v38 }
 0x1a2   :  { %v1492_v61 = vadd.f32 %v3407_v0, %v1421_v42  ;;  %v1524_v58 = vadd.f32 %v3407_v0, %v1453_v16  ;;  %v1167_v49 = vmul.f32 1024.0, %v3354_v43  ;;  %v1199_v50 = vmul.f32 1024.0, %v3356_v48 }
 0x1a3   :  { %2621 = vst [vmem:[%s3534_s3 + $0x48] sm:$0xff] %v2501_v17   ;;  %2637 = vst [vmem:[%s3534_s3 + $0xc8] sm:$0xff] %v2581_v51   ;;  %v1493_v59 = vadd.f32 %v3407_v0, %v1422_v10  ;;  %v1525_v55 = vadd.f32 %v3407_v0, %v1454_v57  ;;  %v1812_v56 = vmul.f32 0.0625, %v1748_v40  ;;  %v1844_v46 = vmul.f32 0.0625, %v1780_v13 }
 0x1a4   :  { %v1557_v62 = vmul.f32 16.0, %v1492_v61  ;;  %v1589_v31 = vmul.f32 16.0, %v1524_v58  ;;  %v2699_v63 = vround.rtne.f32 %v1167_v49  ;;  %v2731_v5 = vround.rtne.f32 %v1199_v50 }
 0x1a5   :  { %v1558_v41 = vmul.f32 16.0, %v1493_v59  ;;  %v1590_v47 = vmul.f32 16.0, %v1525_v55  ;;  %v1168_v60 = vmul.f32 1024.0, %v3362_v15  ;;  %v1200_v4 = vmul.f32 1024.0, %v3364_v3 }
 0x1a6   :  { %v2761_v2 = vround.rtne.f32 %v1557_v62  ;;  %v2793_v14 = vround.rtne.f32 %v1589_v31  ;;  %v1295_v18 = vmax.f32 %v2699_v63, -32768.0  ;;  %v1327_v43 = vmax.f32 %v2731_v5, -32768.0 }
 0x1a7   :  { %v2762_v11 = vround.rtne.f32 %v1558_v41  ;;  %v2794_v53 = vround.rtne.f32 %v1590_v47  ;;  %v2700_v1 = vround.rtne.f32 %v1168_v60  ;;  %v2732_v45 = vround.rtne.f32 %v1200_v4 }
 0x1a8   :  { %v1685_v44 = vmax.f32 %v2761_v2, -128.0  ;;  %v1717_v48 = vmax.f32 %v2793_v14, -128.0  ;;  %v1359_v7 = vmin.f32 %v1295_v18, 32767.0  ;;  %v1391_v29 = vmin.f32 %v1327_v43, 32767.0 }
 0x1a9   :  { %v1686_v54 = vmax.f32 %v2762_v11, -128.0  ;;  %v1718_v19 = vmax.f32 %v2794_v53, -128.0  ;;  %v1296_v26 = vmax.f32 %v2700_v1, -32768.0  ;;  %v1328_v27 = vmax.f32 %v2732_v45, -32768.0 }
 0x1aa   :  { %v1749_v24 = vmin.f32 %v1685_v44, 127.0  ;;  %v1781_v25 = vmin.f32 %v1717_v48, 127.0  ;;  %v1423_v34 = vmul.f32 0.0009765625, %v1359_v7  ;;  %v1455_v3 = vmul.f32 0.0009765625, %v1391_v29 }
 0x1ab   :  { %v1750_v20 = vmin.f32 %v1686_v54, 127.0  ;;  %v1782_v15 = vmin.f32 %v1718_v19, 127.0  ;;  %v1360_v38 = vmin.f32 %v1296_v26, 32767.0  ;;  %v1392_v40 = vmin.f32 %v1328_v27, 32767.0 }
 0x1ac   :  { %v1813_v35 = vmul.f32 0.0625, %v1749_v24  ;;  %v1845_v37 = vmul.f32 0.0625, %v1781_v25  ;;  %v1876_v13 = vmax.f32 %v1812_v56, 0.0  ;;  %v1908_v42 = vmax.f32 %v1844_v46, 0.0 }
 0x1ad   :  { %v1494_v16 = vadd.f32 %v3407_v0, %v1423_v34  ;;  %v1526_v17 = vadd.f32 %v3407_v0, %v1455_v3  ;;  %v1424_v57 = vmul.f32 0.0009765625, %v1360_v38  ;;  %v1456_v61 = vmul.f32 0.0009765625, %v1392_v40 }
 0x1ae   :  { %v1877_v51 = vmax.f32 %v1813_v35, 0.0  ;;  %v1909_v10 = vmax.f32 %v1845_v37, 0.0  ;;  %v1814_v58 = vmul.f32 0.0625, %v1750_v20  ;;  %v1846_v59 = vmul.f32 0.0625, %v1782_v15 }
 0x1af   :  { %v1559_v55 = vmul.f32 16.0, %v1494_v16  ;;  %v1591_v49 = vmul.f32 16.0, %v1526_v17  ;;  %v1495_v31 = vadd.f32 %v3407_v0, %v1424_v57  ;;  %v1527_v41 = vadd.f32 %v3407_v0, %v1456_v61 }
 0x1b0   :  { %v2506_v50 = vpack.c.bf16 %v1877_v51, %v1876_v13  ;;  %v2586_v62 = vpack.c.bf16 %v1909_v10, %v1908_v42  ;;  %v1169_v47 = vmul.f32 1024.0, %v3368_v21  ;;  %v1201_v63 = vmul.f32 1024.0, %v3370_v30 }
 0x1b1   :  { %v2763_v56 = vround.rtne.f32 %v1559_v55  ;;  %v2795_v46 = vround.rtne.f32 %v1591_v49  ;;  %v1560_v5 = vmul.f32 16.0, %v1495_v31  ;;  %v1592_v2 = vmul.f32 16.0, %v1527_v41 }
 0x1b2   :  { %2622 = vst [vmem:[%s3534_s3 + $0x50] sm:$0xff] %v2506_v50   ;;  %2638 = vst [vmem:[%s3534_s3 + $0xd0] sm:$0xff] %v2586_v62   ;;  %v1170_v14 = vmul.f32 1024.0, %v3374_v6  ;;  %v1202_v60 = vmul.f32 1024.0, %v3376_v9  ;;  %v2701_v53 = vround.rtne.f32 %v1169_v47  ;;  %v2733_v21 = vround.rtne.f32 %v1201_v63 }
 0x1b3   :  { %v1687_v4 = vmax.f32 %v2763_v56, -128.0  ;;  %v1719_v11 = vmax.f32 %v2795_v46, -128.0  ;;  %v2764_v18 = vround.rtne.f32 %v1560_v5  ;;  %v2796_v30 = vround.rtne.f32 %v1592_v2 }
 0x1b4   :  { %v2702_v43 = vround.rtne.f32 %v1170_v14  ;;  %v2734_v44 = vround.rtne.f32 %v1202_v60  ;;  %v1297_v45 = vmax.f32 %v2701_v53, -32768.0  ;;  %v1329_v54 = vmax.f32 %v2733_v21, -32768.0 }
 0x1b5   :  { %v1751_v48 = vmin.f32 %v1687_v4, 127.0  ;;  %v1783_v1 = vmin.f32 %v1719_v11, 127.0  ;;  %v1878_v19 = vmax.f32 %v1814_v58, 0.0  ;;  %v1910_v7 = vmax.f32 %v1846_v59, 0.0 }
 0x1b6   :  { %v1298_v29 = vmax.f32 %v2702_v43, -32768.0  ;;  %v1330_v24 = vmax.f32 %v2734_v44, -32768.0  ;;  %v1361_v26 = vmin.f32 %v1297_v45, 32767.0  ;;  %v1393_v9 = vmin.f32 %v1329_v54, 32767.0 }
 0x1b7   :  { %v1815_v25 = vmul.f32 0.0625, %v1751_v48  ;;  %v1847_v6 = vmul.f32 0.0625, %v1783_v1  ;;  %v1688_v27 = vmax.f32 %v2764_v18, -128.0  ;;  %v1720_v20 = vmax.f32 %v2796_v30, -128.0 }
 0x1b8   :  { %v1362_v15 = vmin.f32 %v1298_v29, 32767.0  ;;  %v1394_v34 = vmin.f32 %v1330_v24, 32767.0  ;;  %v1425_v37 = vmul.f32 0.0009765625, %v1361_v26  ;;  %v1457_v38 = vmul.f32 0.0009765625, %v1393_v9 }
 0x1b9   :  { %v1879_v3 = vmax.f32 %v1815_v25, 0.0  ;;  %v1911_v35 = vmax.f32 %v1847_v6, 0.0  ;;  %v1752_v10 = vmin.f32 %v1688_v27, 127.0  ;;  %v1784_v57 = vmin.f32 %v1720_v20, 127.0 }
 0x1ba   :  { %v1426_v40 = vmul.f32 0.0009765625, %v1362_v15  ;;  %v1458_v13 = vmul.f32 0.0009765625, %v1394_v34  ;;  %v1496_v17 = vadd.f32 %v3407_v0, %v1425_v37  ;;  %v1528_v51 = vadd.f32 %v3407_v0, %v1457_v38 }
 0x1bb   :  { %v2511_v42 = vpack.c.bf16 %v1879_v3, %v1878_v19  ;;  %v2591_v16 = vpack.c.bf16 %v1911_v35, %v1910_v7  ;;  %v1171_v49 = vmul.f32 1024.0, %v3380_v22  ;;  %v1203_v50 = vmul.f32 1024.0, %v3382_v23 }
 0x1bc   :  { %v1497_v61 = vadd.f32 %v3407_v0, %v1426_v40  ;;  %v1529_v58 = vadd.f32 %v3407_v0, %v1458_v13  ;;  %v1561_v59 = vmul.f32 16.0, %v1496_v17  ;;  %v1593_v55 = vmul.f32 16.0, %v1528_v51 }
 0x1bd   :  { %2623 = vst [vmem:[%s3534_s3 + $0x58] sm:$0xff] %v2511_v42   ;;  %2639 = vst [vmem:[%s3534_s3 + $0xd8] sm:$0xff] %v2591_v16   ;;  %v1172_v41 = vmul.f32 1024.0, %v3394_v12  ;;  %v1204_v56 = vmul.f32 1024.0, %v3396_v33  ;;  %v2703_v63 = vround.rtne.f32 %v1171_v49  ;;  %v2735_v5 = vround.rtne.f32 %v1203_v50 }
 0x1be   :  { %v1562_v62 = vmul.f32 16.0, %v1497_v61  ;;  %v1594_v31 = vmul.f32 16.0, %v1529_v58  ;;  %v2765_v46 = vround.rtne.f32 %v1561_v59  ;;  %v2797_v47 = vround.rtne.f32 %v1593_v55 }
 0x1bf   :  { %v2704_v60 = vround.rtne.f32 %v1172_v41  ;;  %v2736_v4 = vround.rtne.f32 %v1204_v56  ;;  %v1299_v21 = vmax.f32 %v2703_v63, -32768.0  ;;  %v1331_v22 = vmax.f32 %v2735_v5, -32768.0 }
 0x1c0   :  { %v2766_v2 = vround.rtne.f32 %v1562_v62  ;;  %v2798_v14 = vround.rtne.f32 %v1594_v31  ;;  %v1689_v11 = vmax.f32 %v2765_v46, -128.0  ;;  %v1721_v53 = vmax.f32 %v2797_v47, -128.0 }
 0x1c1   :  { %v1816_v18 = vmul.f32 0.0625, %v1752_v10  ;;  %v1848_v23 = vmul.f32 0.0625, %v1784_v57  ;;  %v1300_v30 = vmax.f32 %v2704_v60, -32768.0  ;;  %v1332_v43 = vmax.f32 %v2736_v4, -32768.0 }
 0x1c2   :  { %v1753_v44 = vmin.f32 %v1689_v11, 127.0  ;;  %v1785_v12 = vmin.f32 %v1721_v53, 127.0  ;;  %v1363_v48 = vmin.f32 %v1299_v21, 32767.0  ;;  %v1395_v33 = vmin.f32 %v1331_v22, 32767.0 }
 0x1c3   :  { %v1690_v1 = vmax.f32 %v2766_v2, -128.0  ;;  %v1722_v45 = vmax.f32 %v2798_v14, -128.0  ;;  %v1364_v54 = vmin.f32 %v1300_v30, 32767.0  ;;  %v1396_v19 = vmin.f32 %v1332_v43, 32767.0 }
 0x1c4   :  { %v1817_v7 = vmul.f32 0.0625, %v1753_v44  ;;  %v1849_v29 = vmul.f32 0.0625, %v1785_v12  ;;  %v1427_v24 = vmul.f32 0.0009765625, %v1363_v48  ;;  %v1459_v25 = vmul.f32 0.0009765625, %v1395_v33 }
 0x1c5   :  { %v1880_v6 = vmax.f32 %v1816_v18, 0.0  ;;  %v1912_v26 = vmax.f32 %v1848_v23, 0.0  ;;  %v1428_v9 = vmul.f32 0.0009765625, %v1364_v54  ;;  %v1460_v27 = vmul.f32 0.0009765625, %v1396_v19 }
 0x1c6   :  { %v1881_v20 = vmax.f32 %v1817_v7, 0.0  ;;  %v1913_v15 = vmax.f32 %v1849_v29, 0.0  ;;  %v1498_v34 = vadd.f32 %v3407_v0, %v1427_v24  ;;  %v1530_v3 = vadd.f32 %v3407_v0, %v1459_v25 }
 0x1c7   :  { %v1754_v35 = vmin.f32 %v1690_v1, 127.0  ;;  %v1786_v37 = vmin.f32 %v1722_v45, 127.0  ;;  %v1499_v38 = vadd.f32 %v3407_v0, %v1428_v9  ;;  %v1531_v40 = vadd.f32 %v3407_v0, %v1460_v27 }
 0x1c8   :  { %v2516_v13 = vpack.c.bf16 %v1881_v20, %v1880_v6  ;;  %v2596_v42 = vpack.c.bf16 %v1913_v15, %v1912_v26  ;;  %v1563_v16 = vmul.f32 16.0, %v1498_v34  ;;  %v1595_v17 = vmul.f32 16.0, %v1530_v3 }
 0x1c9   :  { %v1564_v51 = vmul.f32 16.0, %v1499_v38  ;;  %v1596_v10 = vmul.f32 16.0, %v1531_v40  ;;  %v1173_v57 = vmul.f32 1024.0, %v3413_v8  ;;  %v1205_v61 = vmul.f32 1024.0, %v3415_v28 }
 0x1ca   :  { %2624 = vst [vmem:[%s3534_s3 + $0x60] sm:$0xff] %v2516_v13   ;;  %2640 = vst [vmem:[%s3534_s3 + $0xe0] sm:$0xff] %v2596_v42   ;;  %v2767_v58 = vround.rtne.f32 %v1563_v16  ;;  %v2799_v59 = vround.rtne.f32 %v1595_v17  ;;  %v1174_v55 = vmul.f32 1024.0, %v3425_v39  ;;  %v1206_v49 = vmul.f32 1024.0, %v3427_v52 }
 0x1cb   :  { %v1818_v50 = vmul.f32 0.0625, %v1754_v35  ;;  %v1850_v62 = vmul.f32 0.0625, %v1786_v37  ;;  %v2705_v31 = vround.rtne.f32 %v1173_v57  ;;  %v2737_v8 = vround.rtne.f32 %v1205_v61 }
 0x1cc   :  { %v1691_v41 = vmax.f32 %v2767_v58, -128.0  ;;  %v1723_v28 = vmax.f32 %v2799_v59, -128.0  ;;  %v2706_v56 = vround.rtne.f32 %v1174_v55  ;;  %v2738_v46 = vround.rtne.f32 %v1206_v49 }
 0x1cd   :  { %v2768_v47 = vround.rtne.f32 %v1564_v51  ;;  %v2800_v63 = vround.rtne.f32 %v1596_v10  ;;  %v1301_v5 = vmax.f32 %v2705_v31, -32768.0  ;;  %v1333_v2 = vmax.f32 %v2737_v8, -32768.0 }
 0x1ce   :  { %v1755_v14 = vmin.f32 %v1691_v41, 127.0  ;;  %v1787_v60 = vmin.f32 %v1723_v28, 127.0  ;;  %v1302_v4 = vmax.f32 %v2706_v56, -32768.0  ;;  %v1334_v11 = vmax.f32 %v2738_v46, -32768.0 }
 0x1cf   :  { %v1882_v53 = vmax.f32 %v1818_v50, 0.0  ;;  %v1914_v39 = vmax.f32 %v1850_v62, 0.0  ;;  %v1365_v21 = vmin.f32 %v1301_v5, 32767.0  ;;  %v1397_v52 = vmin.f32 %v1333_v2, 32767.0 }
 0x1d0   :  { %v1819_v22 = vmul.f32 0.0625, %v1755_v14  ;;  %v1851_v18 = vmul.f32 0.0625, %v1787_v60  ;;  %v1366_v23 = vmin.f32 %v1302_v4, 32767.0  ;;  %v1398_v30 = vmin.f32 %v1334_v11, 32767.0 }
 0x1d1   :  { %v1692_v43 = vmax.f32 %v2768_v47, -128.0  ;;  %v1724_v44 = vmax.f32 %v2800_v63, -128.0  ;;  %v1429_v12 = vmul.f32 0.0009765625, %v1365_v21  ;;  %v1461_v48 = vmul.f32 0.0009765625, %v1397_v52 }
 0x1d2   :  { %v1883_v33 = vmax.f32 %v1819_v22, 0.0  ;;  %v1915_v1 = vmax.f32 %v1851_v18, 0.0  ;;  %v1430_v45 = vmul.f32 0.0009765625, %v1366_v23  ;;  %v1462_v54 = vmul.f32 0.0009765625, %v1398_v30 }
 0x1d3   :  { %v1500_v19 = vadd.f32 %v3407_v0, %v1429_v12  ;;  %v1532_v7 = vadd.f32 %v3407_v0, %v1461_v48  ;;  %v1175_v27 = vmul.f32 1024.0, %v3431_v36  ;;  %v1207_v20 = vmul.f32 1024.0, %v3433_v32 }
 0x1d4   :  { %v2521_v29 = vpack.c.bf16 %v1883_v33, %v1882_v53  ;;  %v2601_v24 = vpack.c.bf16 %v1915_v1, %v1914_v39  ;;  %v1501_v25 = vadd.f32 %v3407_v0, %v1430_v45  ;;  %v1533_v6 = vadd.f32 %v3407_v0, %v1462_v54 }
 0x1d5   :  { %v1565_v26 = vmul.f32 16.0, %v1500_v19  ;;  %v1597_v9 = vmul.f32 16.0, %v1532_v7  ;;  %v1756_v15 = vmin.f32 %v1692_v43, 127.0  ;;  %v1788_v34 = vmin.f32 %v1724_v44, 127.0 }
 0x1d6   :  { %2625 = vst [vmem:[%s3534_s3 + $0x68] sm:$0xff] %v2521_v29   ;;  %2641 = vst [vmem:[%s3534_s3 + $0xe8] sm:$0xff] %v2601_v24   ;;  %v1566_v3 = vmul.f32 16.0, %v1501_v25  ;;  %v1598_v35 = vmul.f32 16.0, %v1533_v6  ;;  %v2707_v40 = vround.rtne.f32 %v1175_v27  ;;  %v2739_v13 = vround.rtne.f32 %v1207_v20 }
 0x1d7   :  { %v2769_v37 = vround.rtne.f32 %v1565_v26  ;;  %v2801_v38 = vround.rtne.f32 %v1597_v9  ;;  %v1820_v17 = vmul.f32 0.0625, %v1756_v15  ;;  %v1852_v51 = vmul.f32 0.0625, %v1788_v34 }
 0x1d8   :  { %v1303_v16 = vmax.f32 %v2707_v40, -32768.0  ;;  %v1335_v32 = vmax.f32 %v2739_v13, -32768.0  ;;  %v2770_v10 = vround.rtne.f32 %v1566_v3  ;;  %v2802_v57 = vround.rtne.f32 %v1598_v35 }
 0x1d9   :  { %v1693_v42 = vmax.f32 %v2769_v37, -128.0  ;;  %v1725_v36 = vmax.f32 %v2801_v38, -128.0  ;;  %v1884_v8 = vmax.f32 %v1820_v17, 0.0  ;;  %v1916_v41 = vmax.f32 %v1852_v51, 0.0 }
 0x1da   :  { %v1367_v59 = vmin.f32 %v1303_v16, 32767.0  ;;  %v1399_v55 = vmin.f32 %v1335_v32, 32767.0  ;;  %v1694_v28 = vmax.f32 %v2770_v10, -128.0  ;;  %v1726_v56 = vmax.f32 %v2802_v57, -128.0 }
 0x1db   :  { %v1757_v61 = vmin.f32 %v1693_v42, 127.0  ;;  %v1789_v58 = vmin.f32 %v1725_v36, 127.0 }
 0x1dc   :  { %v1431_v62 = vmul.f32 0.0009765625, %v1367_v59  ;;  %v1463_v31 = vmul.f32 0.0009765625, %v1399_v55  ;;  %v1758_v11 = vmin.f32 %v1694_v28, 127.0  ;;  %v1790_v53 = vmin.f32 %v1726_v56, 127.0 }
 0x1dd   :  { %v1821_v49 = vmul.f32 0.0625, %v1757_v61  ;;  %v1853_v50 = vmul.f32 0.0625, %v1789_v58 }
 0x1de   :  { %v1502_v63 = vadd.f32 %v3407_v0, %v1431_v62  ;;  %v1534_v5 = vadd.f32 %v3407_v0, %v1463_v31  ;;  %v1822_v18 = vmul.f32 0.0625, %v1758_v11  ;;  %v1854_v0 = vmul.f32 0.0625, %v1790_v53 }
 0x1df   :  { %v1885_v46 = vmax.f32 %v1821_v49, 0.0  ;;  %v1917_v47 = vmax.f32 %v1853_v50, 0.0 }
 0x1e0   :  { %v1567_v60 = vmul.f32 16.0, %v1502_v63  ;;  %v1599_v4 = vmul.f32 16.0, %v1534_v5  ;;  %v1886_v12 = vmax.f32 %v1822_v18, 0.0  ;;  %v1918_v48 = vmax.f32 %v1854_v0, 0.0 }
 0x1e1   :  { %v2526_v2 = vpack.c.bf16 %v1885_v46, %v1884_v8  ;;  %v2606_v14 = vpack.c.bf16 %v1917_v47, %v1916_v41 }
 0x1e2   :  { %v2771_v39 = vround.rtne.f32 %v1567_v60  ;;  %v2803_v21 = vround.rtne.f32 %v1599_v4 }
 0x1e3   :  { %2626 = vst [vmem:[%s3534_s3 + $0x70] sm:$0xff] %v2526_v2   ;;  %2642 = vst [vmem:[%s3534_s3 + $0xf0] sm:$0xff] %v2606_v14  }
 0x1e4   :  { %v1695_v52 = vmax.f32 %v2771_v39, -128.0  ;;  %v1727_v22 = vmax.f32 %v2803_v21, -128.0 }
 0x1e6   :  { %v1759_v23 = vmin.f32 %v1695_v52, 127.0  ;;  %v1791_v30 = vmin.f32 %v1727_v22, 127.0 }
 0x1e8   :  { %v1823_v43 = vmul.f32 0.0625, %v1759_v23  ;;  %v1855_v44 = vmul.f32 0.0625, %v1791_v30 }
 0x1ea   :  { %v1887_v33 = vmax.f32 %v1823_v43, 0.0  ;;  %v1919_v1 = vmax.f32 %v1855_v44, 0.0 }
 0x1ec   :  { %v2531_v45 = vpack.c.bf16 %v1887_v33, %v1886_v12  ;;  %v2611_v54 = vpack.c.bf16 %v1919_v1, %v1918_v48 }
 0x1ee   :  { %2627 = vst [vmem:[%s3534_s3 + $0x78] sm:$0xff] %v2531_v45   ;;  %2643 = vst [vmem:[%s3534_s3 + $0xf8] sm:$0xff] %v2611_v54  }

// kernel: _lambda_.22
= control target key start
LH: loop header
LB: loop body
LE: loop exit
PB: predicated region body
PF: predicated region fallthrough
CT: control target
= control target key end

     0   :  { %s1465_s12 = smov 0   ;;  %s1467_s13 = smov 0   ;;  %s1631_s0 = inlined_call_operand.vmem [shape: bf16[128,768], index: 0, kind: input, shape index: {}]   ;;  %s1632_s1 = inlined_call_operand.vmem [shape: bf16[768,128], index: 1, kind: input, shape index: {}]   ;;  %s1633_s2 = inlined_call_operand.vmem [shape: f32[1,128], index: 2, kind: input, shape index: {}]   ;;  %s1634_s3 = inlined_call_operand.vmem [shape: bf16[128,128], index: 3, kind: output, shape index: {}]  }
   0x1   :  { %s1469_s14 = smov 0   ;;  %s1471_s15 = smov 0  }
   0x2   :  { %s1473_s16 = smov 0  }
   0x3 LB: > { %s22_s17 = sadd.s32 1, %s1438_s15  ;;  %p41_p1 = scmp.ne.s32.totalorder %s1430_s13, %s1426_s12  ;;  %s1442_s16 = sphi %s1473_s16, %s13_s16   ;;  %s1438_s15 = sphi %s1471_s15, %s1638_s15   ;;  %s1434_s14 = sphi %s1469_s14, %s1637_s14   ;;  %s1430_s13 = sphi %s1467_s13, %s1636_s13   ;;  %s1426_s12 = sphi %s1465_s12, %s1635_s12  }
   0x4   : > { %p23_p0 = scmp.ge.s32.totalorder %s22_s17, 3  ;;  %p42_p2 = scmp.eq.s32.totalorder %s1442_s16, 0 }
   0x5   : > { %s34_s19 = sadd.s32 1, %s1430_s13  ;;  %p1084_p5 = scmp.ge.s32.totalorder %s1442_s16, 3 }
   0x6   : > { %s1640_s17 = smov (%p23_p0, %s22_s17), 0  ;;  %p43_p3 = por %p42_p2, %p41_p1 }
   0x7   : > { %s30_s18 = ssub.s32 %s1438_s15, %s1640_s17  ;;  %143 = sbr.rel (%p1084_p5) target bundleno = 26 (0x1a), region = 20 }
   0x8   : > { %p32_p4 = scmp.eq.s32.totalorder %s30_s18, 0 }
   0xa   : > { %s1500_s20 = scalar_select %p32_p4, %s1430_s13, %s34_s19  }
   0xe   : > { %146 = sbr.rel (!%p43_p3) target bundleno = 26 (0x1a), region = 24  ;;  %s148_s21 = sand.u32 (%p43_p3), 1, %s1430_s13  }
   0xf   : > { %s1147_s22 = sshll.u32 (%p43_p3), %s1438_s15, 3  ;;  %s1085_s23 = sshll.u32 (%p43_p3), %s148_s21, 7 }
  0x10   : > { %s1508_s26 = scalar_lea.vmem (%p43_p3), %s1631_s0, %s1147_s22  ;;  %s150_s27 = scalar_lea.vmem (%p43_p3), [#allocation3], %s1085_s23 }
  0x11   : > { %v214_v0 = vld [vmem:[%s1508_s26] sm:$0xff] (%p43_p3)  ;;  %v216_v1 = vld [vmem:[%s1508_s26 + $0x18] sm:$0xff] (%p43_p3)  ;;  %v218_v2 = vld [vmem:[%s1508_s26 + $0x30] sm:$0xff] (%p43_p3) }
  0x12   : > { %215 = vst [vmem:[%s150_s27] sm:$0xff] (%p43_p3), %v214_v0  ;;  %217 = vst [vmem:[%s150_s27 + $0x8] sm:$0xff] (%p43_p3), %v216_v1  ;;  %v220_v3 = vld [vmem:[%s1508_s26 + $0x48] sm:$0xff] (%p43_p3)  ;;  %v222_v4 = vld [vmem:[%s1508_s26 + $0x60] sm:$0xff] (%p43_p3) }
  0x13   : > { %219 = vst [vmem:[%s150_s27 + $0x10] sm:$0xff] (%p43_p3), %v218_v2  ;;  %v224_v5 = vld [vmem:[%s1508_s26 + $0x78] sm:$0xff] (%p43_p3)  ;;  %221 = vst [vmem:[%s150_s27 + $0x18] sm:$0xff] (%p43_p3), %v220_v3  ;;  %v226_v6 = vld [vmem:[%s1508_s26 + $0x90] sm:$0xff] (%p43_p3) }
  0x14   : > { %223 = vst [vmem:[%s150_s27 + $0x20] sm:$0xff] (%p43_p3), %v222_v4  ;;  %225 = vst [vmem:[%s150_s27 + $0x28] sm:$0xff] (%p43_p3), %v224_v5  ;;  %v228_v7 = vld [vmem:[%s1508_s26 + $0xa8] sm:$0xff] (%p43_p3)  ;;  %v230_v8 = vld [vmem:[%s1508_s26 + $0xc0] sm:$0xff] (%p43_p3) }
  0x15   : > { %227 = vst [vmem:[%s150_s27 + $0x30] sm:$0xff] %v226_v6  ;;  %229 = vst [vmem:[%s150_s27 + $0x38] sm:$0xff] %v228_v7  ;;  %v232_v9 = vld [vmem:[%s1508_s26 + $0xd8] sm:$0xff]  ;;  %v234_v10 = vld [vmem:[%s1508_s26 + $0xf0] sm:$0xff] }
  0x16   : > { %231 = vst [vmem:[%s150_s27 + $0x40] sm:$0xff] %v230_v8  ;;  %v236_v11 = vld [vmem:[%s1508_s26 + $0x108] sm:$0xff]  ;;  %233 = vst [vmem:[%s150_s27 + $0x48] sm:$0xff] %v232_v9  ;;  %v238_v12 = vld [vmem:[%s1508_s26 + $0x120] sm:$0xff] }
  0x17   : > { %235 = vst [vmem:[%s150_s27 + $0x50] sm:$0xff] %v234_v10  ;;  %237 = vst [vmem:[%s150_s27 + $0x58] sm:$0xff] %v236_v11  ;;  %v240_v13 = vld [vmem:[%s1508_s26 + $0x138] sm:$0xff]  ;;  %v242_v14 = vld [vmem:[%s1508_s26 + $0x150] sm:$0xff] }
  0x18   : > { %239 = vst [vmem:[%s150_s27 + $0x60] sm:$0xff] %v238_v12  ;;  %241 = vst [vmem:[%s150_s27 + $0x68] sm:$0xff] %v240_v13  ;;  %v244_v15 = vld [vmem:[%s1508_s26 + $0x168] sm:$0xff] }
  0x19   : > { %243 = vst [vmem:[%s150_s27 + $0x70] sm:$0xff] %v242_v14  ;;  %245 = vst [vmem:[%s150_s27 + $0x78] sm:$0xff] %v244_v15 }
  0x1a PF: > { %p1088_p6 = scmp.ge.s32.totalorder %s1442_s16, 1  ;;  %p259_p7 = scmp.lt.s32.totalorder %s1442_s16, 4 }
  0x1c   : > { %p260_p8 = pnand %p1088_p6, %p259_p7 }
  0x1d   : > { %s266_s28 = sand.u32 (!%p260_p8), 1, %s1426_s12   ;;  %s1090_s29 = sshll.u32 (!%p260_p8), %s1434_s14, 5 }
  0x1e   : > { %263 = sbr.rel (%p260_p8) target bundleno = 374 (0x176), region = 66  ;;  %s1089_s30 = sshll.u32 (!%p260_p8), %s266_s28, 7 }
  0x1f   : > { %p297_p9 = scmp.lt.s32.totalorder (!%p260_p8), %s1090_s29, 95  ;;  %s1535_s8 = scalar_lea.vmem (!%p260_p8), [#allocation3], %s1089_s30 }
  0x20   : > { %p1092_p10 = scmp.ne.s32.totalorder (!%p260_p8), %s1434_s14, 0 }
  0x25   : > { %s1642_s29 = smov (!%p297_p9, %s1090_s29), 95  ;;  %312 = sbr.rel (%p1092_p10) target bundleno = 47 (0x2f), region = 74 }
  0x26   : > { %s1091_s4 = sshll.u32 %s1642_s29, 2  ;;  %v1444_v16 = vmov (!%p1092_p10), 0.0  }
  0x27   : > { %s1533_s7 = scalar_lea.vmem %s1632_s1, %s1091_s4  ;;  %313 = vst [vmem:[#allocation2] sm:$0xff] (!%p1092_p10), %v1444_v16  ;;  %314 = vst [vmem:[#allocation2 + $0x8] sm:$0xff] (!%p1092_p10), %v1444_v16 }
  0x28   : > { %315 = vst [vmem:[#allocation2 + $0x10] sm:$0xff] (!%p1092_p10), %v1444_v16  ;;  %316 = vst [vmem:[#allocation2 + $0x18] sm:$0xff] (!%p1092_p10), %v1444_v16 }
  0x29   : > { %317 = vst [vmem:[#allocation2 + $0x20] sm:$0xff] (!%p1092_p10), %v1444_v16  ;;  %318 = vst [vmem:[#allocation2 + $0x28] sm:$0xff] (!%p1092_p10), %v1444_v16 }
  0x2a   : > { %319 = vst [vmem:[#allocation2 + $0x30] sm:$0xff] (!%p1092_p10), %v1444_v16  ;;  %320 = vst [vmem:[#allocation2 + $0x38] sm:$0xff] (!%p1092_p10), %v1444_v16 }
  0x2b   : > { %321 = vst [vmem:[#allocation2 + $0x40] sm:$0xff] (!%p1092_p10), %v1444_v16  ;;  %322 = vst [vmem:[#allocation2 + $0x48] sm:$0xff] (!%p1092_p10), %v1444_v16 }
  0x2c   : > { %323 = vst [vmem:[#allocation2 + $0x50] sm:$0xff] %v1444_v16  ;;  %324 = vst [vmem:[#allocation2 + $0x58] sm:$0xff] %v1444_v16 }
  0x2d   : > { %325 = vst [vmem:[#allocation2 + $0x60] sm:$0xff] %v1444_v16  ;;  %326 = vst [vmem:[#allocation2 + $0x68] sm:$0xff] %v1444_v16 }
  0x2e   : > { %327 = vst [vmem:[#allocation2 + $0x70] sm:$0xff] %v1444_v16  ;;  %328 = vst [vmem:[#allocation2 + $0x78] sm:$0xff] %v1444_v16 }
  0x2f PF: > { %v1364_v17 = vld [vmem:[%s1533_s7 + $0x40] sm:$0xff]   ;;  %v1366_v19 = vld [vmem:[%s1533_s7 + $0x48] sm:$0xff]   ;;  %v1368_v21 = vld [vmem:[%s1533_s7 + $0x50] sm:$0xff]   ;;  %p1125_p11 = scmp.ne.s32.totalorder %s1434_s14, 2 }
  0x30   : > { %v1365_v18 = vld [vmem:[%s1533_s7] sm:$0xff]   ;;  %1211 = vmatprep.subr.bf16.mxu0 %v1364_v17  ;;  %1275 = vmatprep.subr.bf16.mxu1 %v1364_v17  ;;  %v1367_v20 = vld [vmem:[%s1533_s7 + $0x8] sm:$0xff]   ;;  %v1369_v22 = vld [vmem:[%s1533_s7 + $0x10] sm:$0xff]  }
  0x31   : > { %1212 = vmatpush3.bf16.msra.mxu0 %v1365_v18  ;;  %1283 = vmatpush3.bf16.msra.mxu1 %v1365_v18  ;;  %v1370_v23 = vld [vmem:[%s1533_s7 + $0x58] sm:$0xff]   ;;  %v1372_v25 = vld [vmem:[%s1533_s7 + $0x60] sm:$0xff]   ;;  %v1374_v27 = vld [vmem:[%s1533_s7 + $0x68] sm:$0xff]  }
  0x32   : > { %1213 = vmatprep.subr.bf16.mxu0 %v1366_v19  ;;  %1276 = vmatprep.subr.bf16.mxu1 %v1366_v19  ;;  %v1371_v24 = vld [vmem:[%s1533_s7 + $0x18] sm:$0xff]   ;;  %v1373_v26 = vld [vmem:[%s1533_s7 + $0x20] sm:$0xff]   ;;  %v1375_v30 = vld [vmem:[%s1533_s7 + $0x28] sm:$0xff]  }
  0x33   : > { %v1382_v28 = vld [vmem:[%s1535_s8 + $0x4] ss:$8 sps:$4 sm:$0xff]   ;;  %v1376_v31 = vld [vmem:[%s1533_s7 + $0x70] sm:$0xff]   ;;  %v1378_v33 = vld [vmem:[%s1533_s7 + $0x78] sm:$0xff]  }
  0x34   : > { %v1385_v29 = vld [vmem:[%s1535_s8 + $0x44] ss:$8 sps:$4 sm:$0xff]   ;;  %601 = vmatprep.mubr.bf16.mxu0 %v1382_v28  ;;  %v1377_v32 = vld [vmem:[%s1533_s7 + $0x30] sm:$0xff]   ;;  %v1379_v34 = vld [vmem:[%s1533_s7 + $0x38] sm:$0xff]  }
  0x35   : > { %1214 = vmatpush3.bf16.msra.mxu0 %v1367_v20  ;;  %1284 = vmatpush3.bf16.msra.mxu1 %v1367_v20  ;;  %v1380_v35 = vld [vmem:[%s1535_s8] ss:$8 sps:$4 sm:$0xff]   ;;  %v1386_v37 = vld [vmem:[%s1535_s8 + $0x14] ss:$8 sps:$4 sm:$0xff]   ;;  %v1390_v39 = vld [vmem:[%s1535_s8 + $0x10] ss:$8 sps:$4 sm:$0xff]  }
  0x36   : > { %1215 = vmatprep.subr.bf16.mxu0 %v1368_v21  ;;  %1277 = vmatprep.subr.bf16.mxu1 %v1368_v21  ;;  %v1383_v36 = vld [vmem:[%s1535_s8 + $0x40] ss:$8 sps:$4 sm:$0xff]   ;;  %v1388_v38 = vld [vmem:[%s1535_s8 + $0x54] ss:$8 sps:$4 sm:$0xff]   ;;  %v1391_v40 = vld [vmem:[%s1535_s8 + $0x50] ss:$8 sps:$4 sm:$0xff]  }
  0x37   : > { %633 = vmatprep.mubr.bf16.mxu1 %v1385_v29  ;;  %v1392_v41 = vld [vmem:[%s1535_s8 + $0x24] ss:$8 sps:$4 sm:$0xff]   ;;  %v1396_v43 = vld [vmem:[%s1535_s8 + $0x20] ss:$8 sps:$4 sm:$0xff]   ;;  %v1398_v45 = vld [vmem:[%s1535_s8 + $0x34] ss:$8 sps:$4 sm:$0xff]  }
  0x38   : > { %v1394_v42 = vld [vmem:[%s1535_s8 + $0x64] ss:$8 sps:$4 sm:$0xff]   ;;  %v1397_v44 = vld [vmem:[%s1535_s8 + $0x60] ss:$8 sps:$4 sm:$0xff]   ;;  %v1400_v46 = vld [vmem:[%s1535_s8 + $0x74] ss:$8 sps:$4 sm:$0xff]  }
  0x39   : > { %1216 = vmatpush3.bf16.msra.mxu0 %v1369_v22  ;;  %1285 = vmatpush3.bf16.msra.mxu1 %v1369_v22  ;;  %v1402_v47 = vld [vmem:[%s1535_s8 + $0x30] ss:$8 sps:$4 sm:$0xff]   ;;  %v329_v51 = vld [vmem:[#allocation2] sm:$0xff]  ;;  %v330_v59 = vld [vmem:[#allocation2 + $0x8] sm:$0xff] }
  0x3a   : > { %1217 = vmatprep.subr.bf16.mxu0 %v1370_v23  ;;  %1278 = vmatprep.subr.bf16.mxu1 %v1370_v23  ;;  %v1403_v48 = vld [vmem:[%s1535_s8 + $0x70] ss:$8 sps:$4 sm:$0xff]   ;;  %v337_v53 = vld [vmem:[#allocation2 + $0x40] sm:$0xff]  ;;  %v338_v61 = vld [vmem:[#allocation2 + $0x48] sm:$0xff] }
  0x3b   : > { %v331_v7 = vld [vmem:[#allocation2 + $0x10] sm:$0xff]  ;;  %v332_v15 = vld [vmem:[#allocation2 + $0x18] sm:$0xff]  ;;  %v341_v29 = vld [vmem:[#allocation2 + $0x60] sm:$0xff] }
  0x3c   : > { %v339_v9 = vld [vmem:[#allocation2 + $0x50] sm:$0xff]  ;;  %v340_v17 = vld [vmem:[#allocation2 + $0x58] sm:$0xff] }
  0x3d   : > { %1218 = vmatpush3.bf16.msra.mxu0 %v1371_v24  ;;  %1286 = vmatpush3.bf16.msra.mxu1 %v1371_v24 }
  0x3e   : > { %1219 = vmatprep.subr.bf16.mxu0 %v1372_v25  ;;  %1279 = vmatprep.subr.bf16.mxu1 %v1372_v25 }
  0x41   : > { %1220 = vmatpush3.bf16.msra.mxu0 %v1373_v26  ;;  %1287 = vmatpush3.bf16.msra.mxu1 %v1373_v26 }
  0x42   : > { %1221 = vmatprep.subr.bf16.mxu0 %v1374_v27  ;;  %1280 = vmatprep.subr.bf16.mxu1 %v1374_v27  ;;  %v333_v27 = vld [vmem:[#allocation2 + $0x20] sm:$0xff] }
  0x45   : > { %1222 = vmatpush3.bf16.msra.mxu0 %v1375_v30  ;;  %1288 = vmatpush3.bf16.msra.mxu1 %v1375_v30 }
  0x46   : > { %1223 = vmatprep.subr.bf16.mxu0 %v1376_v31  ;;  %1281 = vmatprep.subr.bf16.mxu1 %v1376_v31 }
  0x49   : > { %1224 = vmatpush3.bf16.msra.mxu0 %v1377_v32  ;;  %1289 = vmatpush3.bf16.msra.mxu1 %v1377_v32 }
  0x4a   : > { %1225 = vmatprep.subr.bf16.mxu0 %v1378_v33  ;;  %1282 = vmatprep.subr.bf16.mxu1 %v1378_v33 }
  0x4d   : > { %1226 = vmatpush3.bf16.msra.mxu0 %v1379_v34  ;;  %1290 = vmatpush3.bf16.msra.mxu1 %v1379_v34 }
  0x50   : > { %602 = vmatmul.mubr.bf16.vlgmr.msra.gmra.mrb[0].mxu0 %v1380_v35  ;;  %634 = vmatmul.mubr.bf16.vlgmr.msra.gmra.mrb[0].mxu1 %v1383_v36  ;;  %v334_v35 = vld [vmem:[#allocation2 + $0x28] sm:$0xff] }
  0x51   : > { %609 = vmatprep.mubr.bf16.mxu0 %v1386_v37  ;;  %641 = vmatprep.mubr.bf16.mxu1 %v1388_v38  ;;  %v342_v37 = vld [vmem:[#allocation2 + $0x68] sm:$0xff] }
  0x58   : > { %610 = vmatmul.mubr.bf16.gmra.mrb[4].mxu0 %v1390_v39  ;;  %642 = vmatmul.mubr.bf16.gmra.mrb[4].mxu1 %v1391_v40 }
  0x59   : > { %617 = vmatprep.mubr.bf16.mxu0 %v1392_v41  ;;  %649 = vmatprep.mubr.bf16.mxu1 %v1394_v42 }
  0x60   : > { %618 = vmatmul.mubr.bf16.gmra.mrb[8].mxu0 %v1396_v43  ;;  %650 = vmatmul.mubr.bf16.gmra.mrb[8].mxu1 %v1397_v44 }
  0x61   : > { %625 = vmatprep.mubr.bf16.mxu0 %v1398_v45  ;;  %657 = vmatprep.mubr.bf16.mxu1 %v1400_v46 }
  0x68   : > { %626 = vmatmul.mubr.bf16.gmra.mrb[12].mxu0 %v1402_v47  ;;  %658 = vmatmul.mubr.bf16.gmra.mrb[12].mxu1 %v1403_v48  ;;  %v335_v47 = vld [vmem:[#allocation2 + $0x30] sm:$0xff] }
 0x123   : > { %v1227_v49 = vpop.f32.mrb[0].mxu0  ;;  %v1251_v50 = vpop.f32.mrb[0].mxu1 }
 0x124   : > { %v1228_v52 = vpop.f32.mrb[1].mxu0  ;;  %v1252_v54 = vpop.f32.mrb[1].mxu1 }
 0x125   : > { %v1229_v55 = vadd.f32 %v1228_v52, %v1227_v49  ;;  %v1253_v56 = vadd.f32 %v1252_v54, %v1251_v50  ;;  %v1230_v57 = vpop.f32.mrb[2].mxu0  ;;  %v1254_v58 = vpop.f32.mrb[2].mxu1  ;;  %v343_v49 = vld [vmem:[#allocation2 + $0x70] sm:$0xff] }
 0x126   : > { %v1231_v60 = vpop.f32.mrb[3].mxu0  ;;  %v1255_v62 = vpop.f32.mrb[3].mxu1 }
 0x127   : > { %v666_v63 = vadd.f32 %v1229_v55, %v329_v51  ;;  %v674_v0 = vadd.f32 %v1253_v56, %v337_v53  ;;  %v1232_v1 = vadd.f32 %v1231_v60, %v1230_v57  ;;  %v1256_v2 = vadd.f32 %v1255_v62, %v1254_v58  ;;  %v336_v55 = vld [vmem:[#allocation2 + $0x38] sm:$0xff] }
 0x128   : > { %v344_v57 = vld [vmem:[#allocation2 + $0x78] sm:$0xff] }
 0x129   : > { %682 = vst [vmem:[#allocation2] sm:$0xff] %v666_v63  ;;  %690 = vst [vmem:[#allocation2 + $0x40] sm:$0xff] %v674_v0  ;;  %v667_v3 = vadd.f32 %v1232_v1, %v330_v59  ;;  %v675_v4 = vadd.f32 %v1256_v2, %v338_v61 }
 0x12b   : > { %683 = vst [vmem:[#allocation2 + $0x8] sm:$0xff] %v667_v3  ;;  %691 = vst [vmem:[#allocation2 + $0x48] sm:$0xff] %v675_v4  ;;  %v1233_v5 = vpop.f32.mrb[4].mxu0  ;;  %v1257_v6 = vpop.f32.mrb[4].mxu1 }
 0x12c   : > { %v1234_v8 = vpop.f32.mrb[5].mxu0  ;;  %v1258_v10 = vpop.f32.mrb[5].mxu1 }
 0x12d   : > { %v1235_v11 = vadd.f32 %v1234_v8, %v1233_v5  ;;  %v1259_v12 = vadd.f32 %v1258_v10, %v1257_v6  ;;  %v1236_v13 = vpop.f32.mrb[6].mxu0  ;;  %v1260_v14 = vpop.f32.mrb[6].mxu1 }
 0x12e   : > { %v1237_v16 = vpop.f32.mrb[7].mxu0  ;;  %v1261_v18 = vpop.f32.mrb[7].mxu1 }
 0x12f   : > { %v668_v19 = vadd.f32 %v1235_v11, %v331_v7  ;;  %v676_v20 = vadd.f32 %v1259_v12, %v339_v9  ;;  %v1238_v21 = vadd.f32 %v1237_v16, %v1236_v13  ;;  %v1262_v22 = vadd.f32 %v1261_v18, %v1260_v14 }
 0x130   : > { %v702_v1 = vld [vmem:[#allocation2] sm:$0xff] (!%p1125_p11) }
 0x131   : > { %684 = vst [vmem:[#allocation2 + $0x10] sm:$0xff] %v668_v19  ;;  %692 = vst [vmem:[#allocation2 + $0x50] sm:$0xff] %v676_v20  ;;  %v669_v23 = vadd.f32 %v1238_v21, %v332_v15  ;;  %v677_v24 = vadd.f32 %v1262_v22, %v340_v17  ;;  %v719_v3 = vmul.f32 (!%p1125_p11), 1024.0, %v702_v1 }
 0x132   : > { %v703_v2 = vld [vmem:[#allocation2 + $0x8] sm:$0xff] (!%p1125_p11) }
 0x133   : > { %685 = vst [vmem:[#allocation2 + $0x18] sm:$0xff] %v669_v23  ;;  %693 = vst [vmem:[#allocation2 + $0x58] sm:$0xff] %v677_v24  ;;  %v1239_v25 = vpop.f32.mrb[8].mxu0  ;;  %v1263_v26 = vpop.f32.mrb[8].mxu1  ;;  %v720_v4 = vmul.f32 (!%p1125_p11), 1024.0, %v703_v2  ;;  %v1291_v14 = vround.rtne.f32 (!%p1125_p11), %v719_v3 }
 0x134   : > { %v1240_v28 = vpop.f32.mrb[9].mxu0  ;;  %v1264_v30 = vpop.f32.mrb[9].mxu1 }
 0x135   : > { %v1241_v31 = vadd.f32 %v1240_v28, %v1239_v25  ;;  %v1265_v32 = vadd.f32 %v1264_v30, %v1263_v26  ;;  %v1242_v33 = vpop.f32.mrb[10].mxu0  ;;  %v1266_v34 = vpop.f32.mrb[10].mxu1  ;;  %v1292_v15 = vround.rtne.f32 (!%p1125_p11), %v720_v4  ;;  %v751_v22 = vmax.f32 (!%p1125_p11), %v1291_v14, -32768.0  ;;  %v1574_v26 = vld [vmem:[%s1633_s2] ss:$0 sm:$0xff] (!%p1125_p11) }
 0x136   : > { %v1243_v36 = vpop.f32.mrb[11].mxu0  ;;  %v1267_v38 = vpop.f32.mrb[11].mxu1 }
 0x137   : > { %v670_v39 = vadd.f32 %v1241_v31, %v333_v27  ;;  %v678_v40 = vadd.f32 %v1265_v32, %v341_v29  ;;  %v1244_v41 = vadd.f32 %v1243_v36, %v1242_v33  ;;  %v1268_v42 = vadd.f32 %v1267_v38, %v1266_v34 }
 0x138   : > { %v704_v5 = vld [vmem:[#allocation2 + $0x10] sm:$0xff] (!%p1125_p11)  ;;  %v752_v23 = vmax.f32 (!%p1125_p11), %v1292_v15, -32768.0  ;;  %v767_v31 = vmin.f32 (!%p1125_p11), %v751_v22, 32767.0 }
 0x139   : > { %686 = vst [vmem:[#allocation2 + $0x20] sm:$0xff] %v670_v39  ;;  %694 = vst [vmem:[#allocation2 + $0x60] sm:$0xff] %v678_v40  ;;  %v671_v43 = vadd.f32 %v1244_v41, %v334_v35  ;;  %v679_v44 = vadd.f32 %v1268_v42, %v342_v37  ;;  %v721_v8 = vmul.f32 (!%p1125_p11), 1024.0, %v704_v5 }
 0x13a   : > { %v705_v6 = vld [vmem:[#allocation2 + $0x18] sm:$0xff] (!%p1125_p11)  ;;  %v768_v32 = vmin.f32 (!%p1125_p11), %v752_v23, 32767.0  ;;  %v783_v38 = vmul.f32 (!%p1125_p11), 0.0009765625, %v767_v31  ;;  %v710_v31 = vld [vmem:[#allocation2 + $0x40] sm:$0xff] (!%p1125_p11) }
 0x13b   : > { %687 = vst [vmem:[#allocation2 + $0x28] sm:$0xff] %v671_v43  ;;  %695 = vst [vmem:[#allocation2 + $0x68] sm:$0xff] %v679_v44  ;;  %v1245_v45 = vpop.f32.mrb[12].mxu0  ;;  %v1269_v46 = vpop.f32.mrb[12].mxu1  ;;  %v722_v9 = vmul.f32 (!%p1125_p11), 1024.0, %v705_v6  ;;  %v1293_v18 = vround.rtne.f32 (!%p1125_p11), %v721_v8 }
 0x13c   : > { %v1246_v48 = vpop.f32.mrb[13].mxu0  ;;  %v1270_v50 = vpop.f32.mrb[13].mxu1  ;;  %v784_v39 = vmul.f32 (!%p1125_p11), 0.0009765625, %v768_v32 }
 0x13d   : > { %v1247_v51 = vadd.f32 %v1246_v48, %v1245_v45  ;;  %v1271_v52 = vadd.f32 %v1270_v50, %v1269_v46  ;;  %v1248_v53 = vpop.f32.mrb[14].mxu0  ;;  %v1272_v54 = vpop.f32.mrb[14].mxu1  ;;  %701 = sbr.rel (%p1125_p11) target bundleno = 374 (0x176), region = 78  ;;  %v1294_v19 = vround.rtne.f32 (!%p1125_p11), %v722_v9  ;;  %v753_v27 = vmax.f32 (!%p1125_p11), %v1293_v18, -32768.0 }
 0x13e   : > { %v1249_v56 = vpop.f32.mrb[15].mxu0  ;;  %v1273_v58 = vpop.f32.mrb[15].mxu1  ;;  %v806_v46 = vadd.f32 (!%p1125_p11), %v1574_v26, %v783_v38 }
 0x13f   : > { %v672_v59 = vadd.f32 %v1247_v51, %v335_v47  ;;  %v680_v60 = vadd.f32 %v1271_v52, %v343_v49  ;;  %v1250_v61 = vadd.f32 %v1249_v56, %v1248_v53  ;;  %v1274_v62 = vadd.f32 %v1273_v58, %v1272_v54 }
 0x140   : > { %v706_v7 = vld [vmem:[#allocation2 + $0x20] sm:$0xff] (!%p1125_p11)  ;;  %v754_v28 = vmax.f32 (!%p1125_p11), %v1294_v19, -32768.0  ;;  %v769_v35 = vmin.f32 (!%p1125_p11), %v753_v27, 32767.0  ;;  %v807_v47 = vadd.f32 (!%p1125_p11), %v1574_v26, %v784_v39  ;;  %v823_v54 = vmul.f32 (!%p1125_p11), 16.0, %v806_v46 }
 0x141   : > { %688 = vst [vmem:[#allocation2 + $0x30] sm:$0xff] %v672_v59  ;;  %696 = vst [vmem:[#allocation2 + $0x70] sm:$0xff] %v680_v60  ;;  %v673_v63 = vadd.f32 %v1250_v61, %v336_v55  ;;  %v681_v0 = vadd.f32 %v1274_v62, %v344_v57  ;;  %v723_v11 = vmul.f32 (!%p1125_p11), 1024.0, %v706_v7  ;;  %v727_v46 = vmul.f32 (!%p1125_p11), 1024.0, %v710_v31 }
 0x142   : > { %v707_v10 = vld [vmem:[#allocation2 + $0x28] sm:$0xff] (!%p1125_p11)  ;;  %v770_v36 = vmin.f32 (!%p1125_p11), %v754_v28, 32767.0  ;;  %v785_v42 = vmul.f32 (!%p1125_p11), 0.0009765625, %v769_v35  ;;  %v824_v55 = vmul.f32 (!%p1125_p11), 16.0, %v807_v47  ;;  %v1307_v62 = vround.rtne.f32 (!%p1125_p11), %v823_v54  ;;  %v714_v47 = vld [vmem:[#allocation2 + $0x60] sm:$0xff] (!%p1125_p11) }
 0x143   : > { %689 = vst [vmem:[#allocation2 + $0x38] sm:$0xff] %v673_v63  ;;  %697 = vst [vmem:[#allocation2 + $0x78] sm:$0xff] %v681_v0  ;;  %v724_v16 = vmul.f32 (!%p1125_p11), 1024.0, %v707_v10  ;;  %v1295_v20 = vround.rtne.f32 (!%p1125_p11), %v723_v11 }
 0x144   : > { %v786_v43 = vmul.f32 0.0009765625, %v770_v36  ;;  %v808_v50 = vadd.f32 %v1574_v26, %v785_v42  ;;  %v1308_v63 = vround.rtne.f32 %v824_v55  ;;  %v855_v6 = vmax.f32 %v1307_v62, -128.0  ;;  %v711_v36 = vld [vmem:[#allocation2 + $0x48] sm:$0xff]  ;;  %v713_v42 = vld [vmem:[#allocation2 + $0x58] sm:$0xff] }
 0x145   : > { %v1296_v24 = vround.rtne.f32 %v724_v16  ;;  %v755_v29 = vmax.f32 %v1295_v20, -32768.0 }
 0x146   : > { %v809_v51 = vadd.f32 %v1574_v26, %v786_v43  ;;  %v825_v58 = vmul.f32 16.0, %v808_v50  ;;  %v856_v7 = vmax.f32 %v1308_v63, -128.0  ;;  %v871_v14 = vmin.f32 %v855_v6, 127.0 }
 0x147   : > { %v756_v33 = vmax.f32 %v1296_v24, -32768.0  ;;  %v771_v37 = vmin.f32 %v755_v29, 32767.0 }
 0x148   : > { %v708_v12 = vld [vmem:[#allocation2 + $0x30] sm:$0xff]  ;;  %v826_v59 = vmul.f32 16.0, %v809_v51  ;;  %v1309_v2 = vround.rtne.f32 %v825_v58  ;;  %v872_v15 = vmin.f32 %v856_v7, 127.0  ;;  %v887_v22 = vmul.f32 0.0625, %v871_v14 }
 0x149   : > { %v725_v17 = vmul.f32 1024.0, %v708_v12  ;;  %v772_v40 = vmin.f32 %v756_v33, 32767.0  ;;  %v787_v44 = vmul.f32 0.0009765625, %v771_v37  ;;  %v712_v37 = vld [vmem:[#allocation2 + $0x50] sm:$0xff]  ;;  %v728_v51 = vmul.f32 1024.0, %v711_v36 }
 0x14a   : > { %v709_v13 = vld [vmem:[#allocation2 + $0x38] sm:$0xff]  ;;  %v1310_v3 = vround.rtne.f32 %v826_v59  ;;  %v857_v10 = vmax.f32 %v1309_v2, -128.0  ;;  %v888_v23 = vmul.f32 0.0625, %v872_v15  ;;  %v903_v32 = vmax.f32 %v887_v22, 0.0 }
 0x14b   : > { %v726_v21 = vmul.f32 1024.0, %v709_v13  ;;  %v1297_v25 = vround.rtne.f32 %v725_v17  ;;  %v788_v48 = vmul.f32 0.0009765625, %v772_v40  ;;  %v810_v52 = vadd.f32 %v1574_v26, %v787_v44  ;;  %v717_v62 = vld [vmem:[#allocation2 + $0x78] sm:$0xff] }
 0x14c   : > { %v858_v11 = vmax.f32 %v1310_v3, -128.0  ;;  %v873_v18 = vmin.f32 %v857_v10, 127.0  ;;  %v904_v33 = vmax.f32 %v888_v23, 0.0  ;;  %v1300_v58 = vround.rtne.f32 %v728_v51 }
 0x14d   : > { %v1298_v30 = vround.rtne.f32 %v726_v21  ;;  %v757_v34 = vmax.f32 %v1297_v25, -32768.0  ;;  %v811_v56 = vadd.f32 %v1574_v26, %v788_v48  ;;  %v827_v60 = vmul.f32 16.0, %v810_v52  ;;  %v715_v48 = vld [vmem:[#allocation2 + $0x68] sm:$0xff] }
 0x14e   : > { %v874_v19 = vmin.f32 %v858_v11, 127.0  ;;  %v889_v27 = vmul.f32 0.0625, %v873_v18  ;;  %v1167_v43 = vpack.c.bf16 %v904_v33, %v903_v32  ;;  %v729_v52 = vmul.f32 1024.0, %v712_v37 }
 0x14f   : > { %v758_v41 = vmax.f32 %v1298_v30, -32768.0  ;;  %v773_v45 = vmin.f32 %v757_v34, 32767.0  ;;  %v828_v0 = vmul.f32 16.0, %v811_v56  ;;  %v1311_v4 = vround.rtne.f32 %v827_v60 }
 0x150   : > { %v890_v28 = vmul.f32 0.0625, %v874_v19  ;;  %v905_v38 = vmax.f32 %v889_v27, 0.0  ;;  %1168 = vst [vmem:[%s1634_s3] sm:$0xff] %v1167_v43   ;;  %v1299_v56 = vround.rtne.f32 %v727_v46  ;;  %v1301_v59 = vround.rtne.f32 %v729_v52 }
 0x151   : > { %v774_v49 = vmin.f32 %v758_v41, 32767.0  ;;  %v789_v53 = vmul.f32 0.0009765625, %v773_v45  ;;  %v1312_v8 = vround.rtne.f32 %v828_v0  ;;  %v859_v12 = vmax.f32 %v1311_v4, -128.0 }
 0x152   : > { %v906_v39 = vmax.f32 %v890_v28, 0.0  ;;  %v731_v60 = vmul.f32 1024.0, %v714_v47  ;;  %v759_v0 = vmax.f32 %v1299_v56, -32768.0  ;;  %v760_v3 = vmax.f32 %v1300_v58, -32768.0 }
 0x153   : > { %v790_v57 = vmul.f32 0.0009765625, %v774_v49  ;;  %v812_v61 = vadd.f32 %v1574_v26, %v789_v53  ;;  %v860_v16 = vmax.f32 %v1312_v8, -128.0  ;;  %v875_v20 = vmin.f32 %v859_v12, 127.0  ;;  %v716_v53 = vld [vmem:[#allocation2 + $0x70] sm:$0xff] }
 0x154   : > { %v1172_v49 = vpack.c.bf16 %v906_v39, %v905_v38  ;;  %v733_v2 = vmul.f32 1024.0, %v716_v53  ;;  %v761_v4 = vmax.f32 %v1301_v59, -32768.0  ;;  %v775_v7 = vmin.f32 %v759_v0, 32767.0 }
 0x155   : > { %v813_v1 = vadd.f32 %v1574_v26, %v790_v57  ;;  %v829_v5 = vmul.f32 16.0, %v812_v61  ;;  %v876_v24 = vmin.f32 %v860_v16, 127.0  ;;  %v891_v29 = vmul.f32 0.0625, %v875_v20 }
 0x156   : > { %v730_v57 = vmul.f32 1024.0, %v713_v42  ;;  %1204 = vst [vmem:[%s1634_s3 + $0x8] sm:$0xff] %v1172_v49   ;;  %v732_v61 = vmul.f32 1024.0, %v715_v48  ;;  %v1305_v10 = vround.rtne.f32 %v733_v2  ;;  %v776_v11 = vmin.f32 %v760_v3, 32767.0 }
 0x157   : > { %v830_v9 = vmul.f32 16.0, %v813_v1  ;;  %v1313_v13 = vround.rtne.f32 %v829_v5  ;;  %v892_v34 = vmul.f32 0.0625, %v876_v24  ;;  %v907_v40 = vmax.f32 %v891_v29, 0.0 }
 0x158   : > { %v1302_v1 = vround.rtne.f32 %v730_v57  ;;  %v1303_v5 = vround.rtne.f32 %v731_v60  ;;  %v1304_v6 = vround.rtne.f32 %v732_v61  ;;  %v777_v12 = vmin.f32 %v761_v4, 32767.0 }
 0x159   : > { %v1314_v17 = vround.rtne.f32 %v830_v9  ;;  %v861_v21 = vmax.f32 %v1313_v13, -128.0  ;;  %v908_v44 = vmax.f32 %v892_v34, 0.0  ;;  %v734_v9 = vmul.f32 1024.0, %v717_v62 }
 0x15a   : > { %v762_v8 = vmax.f32 %v1302_v1, -32768.0  ;;  %v763_v13 = vmax.f32 %v1303_v5, -32768.0  ;;  %v764_v14 = vmax.f32 %v1304_v6, -32768.0  ;;  %v791_v15 = vmul.f32 0.0009765625, %v775_v7 }
 0x15b   : > { %v862_v25 = vmax.f32 %v1314_v17, -128.0  ;;  %v877_v30 = vmin.f32 %v861_v21, 127.0  ;;  %v1177_v54 = vpack.c.bf16 %v908_v44, %v907_v40  ;;  %v1306_v17 = vround.rtne.f32 %v734_v9 }
 0x15c   : > { %v778_v16 = vmin.f32 %v762_v8, 32767.0  ;;  %v765_v18 = vmax.f32 %v1305_v10, -32768.0  ;;  %v792_v19 = vmul.f32 0.0009765625, %v776_v11  ;;  %v793_v20 = vmul.f32 0.0009765625, %v777_v12 }
 0x15d   : > { %v878_v35 = vmin.f32 %v862_v25, 127.0  ;;  %v893_v41 = vmul.f32 0.0625, %v877_v30  ;;  %1205 = vst [vmem:[%s1634_s3 + $0x10] sm:$0xff] %v1177_v54   ;;  %v779_v21 = vmin.f32 %v763_v13, 32767.0  ;;  %v814_v23 = vadd.f32 %v1574_v26, %v791_v15 }
 0x15e   : > { %v780_v22 = vmin.f32 %v764_v14, 32767.0  ;;  %v794_v24 = vmul.f32 0.0009765625, %v778_v16  ;;  %v766_v25 = vmax.f32 %v1306_v17, -32768.0  ;;  %v781_v27 = vmin.f32 %v765_v18, 32767.0 }
 0x15f   : > { %v894_v45 = vmul.f32 0.0625, %v878_v35  ;;  %v909_v50 = vmax.f32 %v893_v41, 0.0  ;;  %v815_v28 = vadd.f32 %v1574_v26, %v792_v19  ;;  %v816_v29 = vadd.f32 %v1574_v26, %v793_v20 }
 0x160   : > { %v795_v30 = vmul.f32 0.0009765625, %v779_v21  ;;  %v796_v31 = vmul.f32 0.0009765625, %v780_v22  ;;  %v831_v32 = vmul.f32 16.0, %v814_v23  ;;  %v817_v33 = vadd.f32 %v1574_v26, %v794_v24 }
 0x161   : > { %v910_v55 = vmax.f32 %v894_v45, 0.0  ;;  %v782_v34 = vmin.f32 %v766_v25, 32767.0  ;;  %v797_v35 = vmul.f32 0.0009765625, %v781_v27  ;;  %v832_v36 = vmul.f32 16.0, %v815_v28 }
 0x162   : > { %v833_v37 = vmul.f32 16.0, %v816_v29  ;;  %v818_v38 = vadd.f32 %v1574_v26, %v795_v30  ;;  %v819_v39 = vadd.f32 %v1574_v26, %v796_v31  ;;  %v1315_v40 = vround.rtne.f32 %v831_v32 }
 0x163   : > { %v1182_v63 = vpack.c.bf16 %v910_v55, %v909_v50  ;;  %v834_v41 = vmul.f32 16.0, %v817_v33  ;;  %v798_v42 = vmul.f32 0.0009765625, %v782_v34  ;;  %v820_v43 = vadd.f32 %v1574_v26, %v797_v35 }
 0x164   : > { %v1316_v44 = vround.rtne.f32 %v832_v36  ;;  %v1317_v45 = vround.rtne.f32 %v833_v37  ;;  %v835_v46 = vmul.f32 16.0, %v818_v38  ;;  %v836_v47 = vmul.f32 16.0, %v819_v39 }
 0x165   : > { %1206 = vst [vmem:[%s1634_s3 + $0x18] sm:$0xff] %v1182_v63   ;;  %v863_v48 = vmax.f32 %v1315_v40, -128.0  ;;  %v1318_v49 = vround.rtne.f32 %v834_v41  ;;  %v821_v50 = vadd.f32 %v1574_v26, %v798_v42  ;;  %v837_v51 = vmul.f32 16.0, %v820_v43 }
 0x166   : > { %v864_v52 = vmax.f32 %v1316_v44, -128.0  ;;  %v865_v53 = vmax.f32 %v1317_v45, -128.0  ;;  %v1319_v54 = vround.rtne.f32 %v835_v46  ;;  %v1320_v55 = vround.rtne.f32 %v836_v47 }
 0x167   : > { %v879_v56 = vmin.f32 %v863_v48, 127.0  ;;  %v866_v57 = vmax.f32 %v1318_v49, -128.0  ;;  %v838_v58 = vmul.f32 16.0, %v821_v50  ;;  %v1321_v59 = vround.rtne.f32 %v837_v51 }
 0x168   : > { %v880_v60 = vmin.f32 %v864_v52, 127.0  ;;  %v881_v61 = vmin.f32 %v865_v53, 127.0  ;;  %v867_v62 = vmax.f32 %v1319_v54, -128.0  ;;  %v868_v63 = vmax.f32 %v1320_v55, -128.0 }
 0x169   : > { %v895_v0 = vmul.f32 0.0625, %v879_v56  ;;  %v882_v1 = vmin.f32 %v866_v57, 127.0  ;;  %v1322_v2 = vround.rtne.f32 %v838_v58  ;;  %v869_v3 = vmax.f32 %v1321_v59, -128.0 }
 0x16a   : > { %v896_v4 = vmul.f32 0.0625, %v880_v60  ;;  %v897_v5 = vmul.f32 0.0625, %v881_v61  ;;  %v883_v26 = vmin.f32 %v867_v62, 127.0  ;;  %v884_v6 = vmin.f32 %v868_v63, 127.0 }
 0x16b   : > { %v911_v7 = vmax.f32 %v895_v0, 0.0  ;;  %v898_v8 = vmul.f32 0.0625, %v882_v1  ;;  %v870_v9 = vmax.f32 %v1322_v2, -128.0  ;;  %v885_v10 = vmin.f32 %v869_v3, 127.0 }
 0x16c   : > { %v912_v11 = vmax.f32 %v896_v4, 0.0  ;;  %v913_v12 = vmax.f32 %v897_v5, 0.0  ;;  %v899_v13 = vmul.f32 0.0625, %v883_v26  ;;  %v900_v14 = vmul.f32 0.0625, %v884_v6 }
 0x16d   : > { %v914_v15 = vmax.f32 %v898_v8, 0.0  ;;  %v886_v16 = vmin.f32 %v870_v9, 127.0  ;;  %v901_v17 = vmul.f32 0.0625, %v885_v10 }
 0x16e   : > { %v1187_v18 = vpack.c.bf16 %v912_v11, %v911_v7  ;;  %v915_v19 = vmax.f32 %v899_v13, 0.0  ;;  %v916_v20 = vmax.f32 %v900_v14, 0.0 }
 0x16f   : > { %v1192_v21 = vpack.c.bf16 %v914_v15, %v913_v12  ;;  %v902_v22 = vmul.f32 0.0625, %v886_v16  ;;  %v917_v23 = vmax.f32 %v901_v17, 0.0 }
 0x170   : > { %1207 = vst [vmem:[%s1634_s3 + $0x20] sm:$0xff] %v1187_v18   ;;  %v1197_v24 = vpack.c.bf16 %v916_v20, %v915_v19 }
 0x171   : > { %1208 = vst [vmem:[%s1634_s3 + $0x28] sm:$0xff] %v1192_v21   ;;  %v918_v25 = vmax.f32 %v902_v22, 0.0 }
 0x172   : > { %1209 = vst [vmem:[%s1634_s3 + $0x30] sm:$0xff] %v1197_v24  }
 0x173   : > { %v1202_v27 = vpack.c.bf16 %v918_v25, %v917_v23 }
 0x175   : > { %1210 = vst [vmem:[%s1634_s3 + $0x38] sm:$0xff] %v1202_v27  }
 0x176 PF: > { %s13_s16 = sadd.s32 1, %s1442_s16   ;;  %s1635_s12 = smov %s1430_s13 }
 0x177   : > { %p10_p12 = scmp.ge.s32.totalorder %s13_s16, 5   ;;  %s1636_s13 = smov %s1500_s20 }
 0x178   : > { %s1637_s14 = smov %s1438_s15  ;;  %s1638_s15 = smov %s1640_s17 }
 0x179   :  { %12 = sbr.rel (!%p10_p12) target bundleno = 3 (0x3), region = 116 }

// kernel: _lambda_.23
= control target key start
LH: loop header
LB: loop body
LE: loop exit
PB: predicated region body
PF: predicated region fallthrough
CT: control target
= control target key end

     0   :  { %s1830_s21 = smov 0   ;;  %s1832_s22 = smov 0   ;;  %s2098_s0 = inlined_call_operand.vmem [shape: bf16[128,768], index: 0, kind: input, shape index: {}]   ;;  %s2099_s1 = inlined_call_operand.vmem [shape: bf16[768,128], index: 1, kind: input, shape index: {}]   ;;  %s2100_s2 = inlined_call_operand.vmem [shape: f32[1,128], index: 2, kind: input, shape index: {}]   ;;  %s2101_s3 = inlined_call_operand.vmem [shape: bf16[128,128], index: 3, kind: input, shape index: {}]   ;;  %s2102_s4 = inlined_call_operand.vmem [shape: f32[1,128], index: 4, kind: input, shape index: {}]   ;;  %s2103_s5 = inlined_call_operand.vmem [shape: f32[1,128], index: 5, kind: input, shape index: {}]   ;;  %s2104_s6 = inlined_call_operand.vmem [shape: bf16[128,128], index: 6, kind: output, shape index: {}]  }
   0x1   :  { %s1834_s23 = smov 0   ;;  %s1836_s24 = smov 0  }
   0x2   :  { %s1838_s25 = smov 0  }
   0x3 LB: > { %s25_s26 = sadd.s32 1, %s1788_s24  ;;  %p44_p1 = scmp.ne.s32.totalorder %s1780_s22, %s1776_s21  ;;  %s1792_s25 = sphi %s1838_s25, %s16_s25   ;;  %s1788_s24 = sphi %s1836_s24, %s2108_s24   ;;  %s1784_s23 = sphi %s1834_s23, %s2107_s23   ;;  %s1780_s22 = sphi %s1832_s22, %s2106_s22   ;;  %s1776_s21 = sphi %s1830_s21, %s2105_s21  }
   0x4   : > { %p26_p0 = scmp.ge.s32.totalorder %s25_s26, 3  ;;  %p45_p2 = scmp.eq.s32.totalorder %s1792_s25, 0 }
   0x5   : > { %s37_s28 = sadd.s32 1, %s1780_s22  ;;  %p1377_p5 = scmp.ge.s32.totalorder %s1792_s25, 3 }
   0x6   : > { %s2110_s26 = smov (%p26_p0, %s25_s26), 0  ;;  %p46_p3 = por %p45_p2, %p44_p1 }
   0x7   : > { %s33_s27 = ssub.s32 %s1788_s24, %s2110_s26  ;;  %229 = sbr.rel (%p1377_p5) target bundleno = 26 (0x1a), region = 32 }
   0x8   : > { %p35_p4 = scmp.eq.s32.totalorder %s33_s27, 0 }
   0xa   : > { %s1865_s29 = scalar_select %p35_p4, %s1780_s22, %s37_s28  }
   0xe   : > { %232 = sbr.rel (!%p46_p3) target bundleno = 26 (0x1a), region = 36  ;;  %s234_s30 = sand.u32 (%p46_p3), 1, %s1780_s22  }
   0xf   : > { %s1442_s7 = sshll.u32 (%p46_p3), %s1788_s24, 3  ;;  %s1378_s8 = sshll.u32 (%p46_p3), %s234_s30, 7 }
  0x10   : > { %s1873_s11 = scalar_lea.vmem (%p46_p3), %s2098_s0, %s1442_s7  ;;  %s236_s12 = scalar_lea.vmem (%p46_p3), [#allocation3], %s1378_s8 }
  0x11   : > { %v300_v0 = vld [vmem:[%s1873_s11] sm:$0xff] (%p46_p3)  ;;  %v302_v1 = vld [vmem:[%s1873_s11 + $0x18] sm:$0xff] (%p46_p3)  ;;  %v304_v2 = vld [vmem:[%s1873_s11 + $0x30] sm:$0xff] (%p46_p3) }
  0x12   : > { %301 = vst [vmem:[%s236_s12] sm:$0xff] (%p46_p3), %v300_v0  ;;  %303 = vst [vmem:[%s236_s12 + $0x8] sm:$0xff] (%p46_p3), %v302_v1  ;;  %v306_v3 = vld [vmem:[%s1873_s11 + $0x48] sm:$0xff] (%p46_p3)  ;;  %v308_v4 = vld [vmem:[%s1873_s11 + $0x60] sm:$0xff] (%p46_p3) }
  0x13   : > { %305 = vst [vmem:[%s236_s12 + $0x10] sm:$0xff] (%p46_p3), %v304_v2  ;;  %v310_v5 = vld [vmem:[%s1873_s11 + $0x78] sm:$0xff] (%p46_p3)  ;;  %307 = vst [vmem:[%s236_s12 + $0x18] sm:$0xff] (%p46_p3), %v306_v3  ;;  %v312_v6 = vld [vmem:[%s1873_s11 + $0x90] sm:$0xff] (%p46_p3) }
  0x14   : > { %309 = vst [vmem:[%s236_s12 + $0x20] sm:$0xff] (%p46_p3), %v308_v4  ;;  %311 = vst [vmem:[%s236_s12 + $0x28] sm:$0xff] (%p46_p3), %v310_v5  ;;  %v314_v7 = vld [vmem:[%s1873_s11 + $0xa8] sm:$0xff] (%p46_p3)  ;;  %v316_v8 = vld [vmem:[%s1873_s11 + $0xc0] sm:$0xff] (%p46_p3) }
  0x15   : > { %313 = vst [vmem:[%s236_s12 + $0x30] sm:$0xff] %v312_v6  ;;  %315 = vst [vmem:[%s236_s12 + $0x38] sm:$0xff] %v314_v7  ;;  %v318_v9 = vld [vmem:[%s1873_s11 + $0xd8] sm:$0xff]  ;;  %v320_v10 = vld [vmem:[%s1873_s11 + $0xf0] sm:$0xff] }
  0x16   : > { %317 = vst [vmem:[%s236_s12 + $0x40] sm:$0xff] %v316_v8  ;;  %v322_v11 = vld [vmem:[%s1873_s11 + $0x108] sm:$0xff]  ;;  %319 = vst [vmem:[%s236_s12 + $0x48] sm:$0xff] %v318_v9  ;;  %v324_v12 = vld [vmem:[%s1873_s11 + $0x120] sm:$0xff] }
  0x17   : > { %321 = vst [vmem:[%s236_s12 + $0x50] sm:$0xff] %v320_v10  ;;  %323 = vst [vmem:[%s236_s12 + $0x58] sm:$0xff] %v322_v11  ;;  %v326_v13 = vld [vmem:[%s1873_s11 + $0x138] sm:$0xff]  ;;  %v328_v14 = vld [vmem:[%s1873_s11 + $0x150] sm:$0xff] }
  0x18   : > { %325 = vst [vmem:[%s236_s12 + $0x60] sm:$0xff] %v324_v12  ;;  %327 = vst [vmem:[%s236_s12 + $0x68] sm:$0xff] %v326_v13  ;;  %v330_v15 = vld [vmem:[%s1873_s11 + $0x168] sm:$0xff] }
  0x19   : > { %329 = vst [vmem:[%s236_s12 + $0x70] sm:$0xff] %v328_v14  ;;  %331 = vst [vmem:[%s236_s12 + $0x78] sm:$0xff] %v330_v15 }
  0x1a PF: > { %p1381_p6 = scmp.ge.s32.totalorder %s1792_s25, 1  ;;  %p345_p7 = scmp.lt.s32.totalorder %s1792_s25, 4 }
  0x1c   : > { %p346_p8 = pnand %p1381_p6, %p345_p7 }
  0x1d   : > { %s352_s13 = sand.u32 (!%p346_p8), 1, %s1776_s21   ;;  %s1383_s14 = sshll.u32 (!%p346_p8), %s1784_s23, 5 }
  0x1e   : > { %349 = sbr.rel (%p346_p8) target bundleno = 414 (0x19e), region = 78  ;;  %s1382_s15 = sshll.u32 (!%p346_p8), %s352_s13, 7 }
  0x1f   : > { %p394_p9 = scmp.lt.s32.totalorder (!%p346_p8), %s1383_s14, 95  ;;  %s1900_s20 = scalar_lea.vmem (!%p346_p8), [#allocation3], %s1382_s15 }
  0x20   : > { %p1385_p10 = scmp.ne.s32.totalorder (!%p346_p8), %s1784_s23, 0 }
  0x25   : > { %s2112_s14 = smov (!%p394_p9, %s1383_s14), 95  ;;  %415 = sbr.rel (%p1385_p10) target bundleno = 47 (0x2f), region = 86 }
  0x26   : > { %s1384_s16 = sshll.u32 %s2112_s14, 2  ;;  %v1794_v16 = vmov (!%p1385_p10), 0.0  }
  0x27   : > { %s1898_s19 = scalar_lea.vmem %s2099_s1, %s1384_s16  ;;  %416 = vst [vmem:[#allocation2] sm:$0xff] (!%p1385_p10), %v1794_v16  ;;  %417 = vst [vmem:[#allocation2 + $0x8] sm:$0xff] (!%p1385_p10), %v1794_v16 }
  0x28   : > { %418 = vst [vmem:[#allocation2 + $0x10] sm:$0xff] (!%p1385_p10), %v1794_v16  ;;  %419 = vst [vmem:[#allocation2 + $0x18] sm:$0xff] (!%p1385_p10), %v1794_v16 }
  0x29   : > { %420 = vst [vmem:[#allocation2 + $0x20] sm:$0xff] (!%p1385_p10), %v1794_v16  ;;  %421 = vst [vmem:[#allocation2 + $0x28] sm:$0xff] (!%p1385_p10), %v1794_v16 }
  0x2a   : > { %422 = vst [vmem:[#allocation2 + $0x30] sm:$0xff] (!%p1385_p10), %v1794_v16  ;;  %423 = vst [vmem:[#allocation2 + $0x38] sm:$0xff] (!%p1385_p10), %v1794_v16 }
  0x2b   : > { %424 = vst [vmem:[#allocation2 + $0x40] sm:$0xff] (!%p1385_p10), %v1794_v16  ;;  %425 = vst [vmem:[#allocation2 + $0x48] sm:$0xff] (!%p1385_p10), %v1794_v16 }
  0x2c   : > { %426 = vst [vmem:[#allocation2 + $0x50] sm:$0xff] %v1794_v16  ;;  %427 = vst [vmem:[#allocation2 + $0x58] sm:$0xff] %v1794_v16 }
  0x2d   : > { %428 = vst [vmem:[#allocation2 + $0x60] sm:$0xff] %v1794_v16  ;;  %429 = vst [vmem:[#allocation2 + $0x68] sm:$0xff] %v1794_v16 }
  0x2e   : > { %430 = vst [vmem:[#allocation2 + $0x70] sm:$0xff] %v1794_v16  ;;  %431 = vst [vmem:[#allocation2 + $0x78] sm:$0xff] %v1794_v16 }
  0x2f PF: > { %v1714_v17 = vld [vmem:[%s1898_s19 + $0x40] sm:$0xff]   ;;  %v1716_v19 = vld [vmem:[%s1898_s19 + $0x48] sm:$0xff]   ;;  %v1718_v21 = vld [vmem:[%s1898_s19 + $0x50] sm:$0xff]   ;;  %p1418_p11 = scmp.ne.s32.totalorder %s1784_s23, 2 }
  0x30   : > { %v1715_v18 = vld [vmem:[%s1898_s19] sm:$0xff]   ;;  %1545 = vmatprep.subr.bf16.mxu0 %v1714_v17  ;;  %1609 = vmatprep.subr.bf16.mxu1 %v1714_v17  ;;  %v1717_v20 = vld [vmem:[%s1898_s19 + $0x8] sm:$0xff]   ;;  %v1719_v22 = vld [vmem:[%s1898_s19 + $0x10] sm:$0xff]  }
  0x31   : > { %1546 = vmatpush3.bf16.msra.mxu0 %v1715_v18  ;;  %1617 = vmatpush3.bf16.msra.mxu1 %v1715_v18  ;;  %v1720_v23 = vld [vmem:[%s1898_s19 + $0x58] sm:$0xff]   ;;  %v1722_v25 = vld [vmem:[%s1898_s19 + $0x60] sm:$0xff]   ;;  %v1724_v27 = vld [vmem:[%s1898_s19 + $0x68] sm:$0xff]  }
  0x32   : > { %1547 = vmatprep.subr.bf16.mxu0 %v1716_v19  ;;  %1610 = vmatprep.subr.bf16.mxu1 %v1716_v19  ;;  %v1721_v24 = vld [vmem:[%s1898_s19 + $0x18] sm:$0xff]   ;;  %v1723_v26 = vld [vmem:[%s1898_s19 + $0x20] sm:$0xff]   ;;  %v1725_v30 = vld [vmem:[%s1898_s19 + $0x28] sm:$0xff]  }
  0x33   : > { %v1732_v28 = vld [vmem:[%s1900_s20 + $0x4] ss:$8 sps:$4 sm:$0xff]   ;;  %v1726_v31 = vld [vmem:[%s1898_s19 + $0x70] sm:$0xff]   ;;  %v1728_v33 = vld [vmem:[%s1898_s19 + $0x78] sm:$0xff]  }
  0x34   : > { %v1735_v29 = vld [vmem:[%s1900_s20 + $0x44] ss:$8 sps:$4 sm:$0xff]   ;;  %704 = vmatprep.mubr.bf16.mxu0 %v1732_v28  ;;  %v1727_v32 = vld [vmem:[%s1898_s19 + $0x30] sm:$0xff]   ;;  %v1729_v34 = vld [vmem:[%s1898_s19 + $0x38] sm:$0xff]  }
  0x35   : > { %1548 = vmatpush3.bf16.msra.mxu0 %v1717_v20  ;;  %1618 = vmatpush3.bf16.msra.mxu1 %v1717_v20  ;;  %v1730_v35 = vld [vmem:[%s1900_s20] ss:$8 sps:$4 sm:$0xff]   ;;  %v1736_v37 = vld [vmem:[%s1900_s20 + $0x14] ss:$8 sps:$4 sm:$0xff]   ;;  %v1740_v39 = vld [vmem:[%s1900_s20 + $0x10] ss:$8 sps:$4 sm:$0xff]  }
  0x36   : > { %1549 = vmatprep.subr.bf16.mxu0 %v1718_v21  ;;  %1611 = vmatprep.subr.bf16.mxu1 %v1718_v21  ;;  %v1733_v36 = vld [vmem:[%s1900_s20 + $0x40] ss:$8 sps:$4 sm:$0xff]   ;;  %v1738_v38 = vld [vmem:[%s1900_s20 + $0x54] ss:$8 sps:$4 sm:$0xff]   ;;  %v1741_v40 = vld [vmem:[%s1900_s20 + $0x50] ss:$8 sps:$4 sm:$0xff]  }
  0x37   : > { %736 = vmatprep.mubr.bf16.mxu1 %v1735_v29  ;;  %v1742_v41 = vld [vmem:[%s1900_s20 + $0x24] ss:$8 sps:$4 sm:$0xff]   ;;  %v1746_v43 = vld [vmem:[%s1900_s20 + $0x20] ss:$8 sps:$4 sm:$0xff]   ;;  %v1748_v45 = vld [vmem:[%s1900_s20 + $0x34] ss:$8 sps:$4 sm:$0xff]  }
  0x38   : > { %v1744_v42 = vld [vmem:[%s1900_s20 + $0x64] ss:$8 sps:$4 sm:$0xff]   ;;  %v1747_v44 = vld [vmem:[%s1900_s20 + $0x60] ss:$8 sps:$4 sm:$0xff]   ;;  %v1750_v46 = vld [vmem:[%s1900_s20 + $0x74] ss:$8 sps:$4 sm:$0xff]  }
  0x39   : > { %1550 = vmatpush3.bf16.msra.mxu0 %v1719_v22  ;;  %1619 = vmatpush3.bf16.msra.mxu1 %v1719_v22  ;;  %v1752_v47 = vld [vmem:[%s1900_s20 + $0x30] ss:$8 sps:$4 sm:$0xff]   ;;  %v432_v51 = vld [vmem:[#allocation2] sm:$0xff]  ;;  %v433_v59 = vld [vmem:[#allocation2 + $0x8] sm:$0xff] }
  0x3a   : > { %1551 = vmatprep.subr.bf16.mxu0 %v1720_v23  ;;  %1612 = vmatprep.subr.bf16.mxu1 %v1720_v23  ;;  %v1753_v48 = vld [vmem:[%s1900_s20 + $0x70] ss:$8 sps:$4 sm:$0xff]   ;;  %v440_v53 = vld [vmem:[#allocation2 + $0x40] sm:$0xff]  ;;  %v441_v61 = vld [vmem:[#allocation2 + $0x48] sm:$0xff] }
  0x3b   : > { %v434_v7 = vld [vmem:[#allocation2 + $0x10] sm:$0xff]  ;;  %v435_v15 = vld [vmem:[#allocation2 + $0x18] sm:$0xff]  ;;  %v444_v29 = vld [vmem:[#allocation2 + $0x60] sm:$0xff] }
  0x3c   : > { %v442_v9 = vld [vmem:[#allocation2 + $0x50] sm:$0xff]  ;;  %v443_v17 = vld [vmem:[#allocation2 + $0x58] sm:$0xff] }
  0x3d   : > { %1552 = vmatpush3.bf16.msra.mxu0 %v1721_v24  ;;  %1620 = vmatpush3.bf16.msra.mxu1 %v1721_v24 }
  0x3e   : > { %1553 = vmatprep.subr.bf16.mxu0 %v1722_v25  ;;  %1613 = vmatprep.subr.bf16.mxu1 %v1722_v25 }
  0x41   : > { %1554 = vmatpush3.bf16.msra.mxu0 %v1723_v26  ;;  %1621 = vmatpush3.bf16.msra.mxu1 %v1723_v26 }
  0x42   : > { %1555 = vmatprep.subr.bf16.mxu0 %v1724_v27  ;;  %1614 = vmatprep.subr.bf16.mxu1 %v1724_v27  ;;  %v436_v27 = vld [vmem:[#allocation2 + $0x20] sm:$0xff] }
  0x45   : > { %1556 = vmatpush3.bf16.msra.mxu0 %v1725_v30  ;;  %1622 = vmatpush3.bf16.msra.mxu1 %v1725_v30 }
  0x46   : > { %1557 = vmatprep.subr.bf16.mxu0 %v1726_v31  ;;  %1615 = vmatprep.subr.bf16.mxu1 %v1726_v31 }
  0x49   : > { %1558 = vmatpush3.bf16.msra.mxu0 %v1727_v32  ;;  %1623 = vmatpush3.bf16.msra.mxu1 %v1727_v32 }
  0x4a   : > { %1559 = vmatprep.subr.bf16.mxu0 %v1728_v33  ;;  %1616 = vmatprep.subr.bf16.mxu1 %v1728_v33 }
  0x4d   : > { %1560 = vmatpush3.bf16.msra.mxu0 %v1729_v34  ;;  %1624 = vmatpush3.bf16.msra.mxu1 %v1729_v34 }
  0x50   : > { %705 = vmatmul.mubr.bf16.vlgmr.msra.gmra.mrb[0].mxu0 %v1730_v35  ;;  %737 = vmatmul.mubr.bf16.vlgmr.msra.gmra.mrb[0].mxu1 %v1733_v36  ;;  %v437_v35 = vld [vmem:[#allocation2 + $0x28] sm:$0xff] }
  0x51   : > { %712 = vmatprep.mubr.bf16.mxu0 %v1736_v37  ;;  %744 = vmatprep.mubr.bf16.mxu1 %v1738_v38  ;;  %v445_v37 = vld [vmem:[#allocation2 + $0x68] sm:$0xff] }
  0x58   : > { %713 = vmatmul.mubr.bf16.gmra.mrb[4].mxu0 %v1740_v39  ;;  %745 = vmatmul.mubr.bf16.gmra.mrb[4].mxu1 %v1741_v40 }
  0x59   : > { %720 = vmatprep.mubr.bf16.mxu0 %v1742_v41  ;;  %752 = vmatprep.mubr.bf16.mxu1 %v1744_v42 }
  0x60   : > { %721 = vmatmul.mubr.bf16.gmra.mrb[8].mxu0 %v1746_v43  ;;  %753 = vmatmul.mubr.bf16.gmra.mrb[8].mxu1 %v1747_v44 }
  0x61   : > { %728 = vmatprep.mubr.bf16.mxu0 %v1748_v45  ;;  %760 = vmatprep.mubr.bf16.mxu1 %v1750_v46 }
  0x68   : > { %729 = vmatmul.mubr.bf16.gmra.mrb[12].mxu0 %v1752_v47  ;;  %761 = vmatmul.mubr.bf16.gmra.mrb[12].mxu1 %v1753_v48  ;;  %v438_v47 = vld [vmem:[#allocation2 + $0x30] sm:$0xff] }
 0x123   : > { %v1561_v49 = vpop.f32.mrb[0].mxu0  ;;  %v1585_v50 = vpop.f32.mrb[0].mxu1 }
 0x124   : > { %v1562_v52 = vpop.f32.mrb[1].mxu0  ;;  %v1586_v54 = vpop.f32.mrb[1].mxu1 }
 0x125   : > { %v1563_v55 = vadd.f32 %v1562_v52, %v1561_v49  ;;  %v1587_v56 = vadd.f32 %v1586_v54, %v1585_v50  ;;  %v1564_v57 = vpop.f32.mrb[2].mxu0  ;;  %v1588_v58 = vpop.f32.mrb[2].mxu1  ;;  %v446_v49 = vld [vmem:[#allocation2 + $0x70] sm:$0xff] }
 0x126   : > { %v1565_v60 = vpop.f32.mrb[3].mxu0  ;;  %v1589_v62 = vpop.f32.mrb[3].mxu1 }
 0x127   : > { %v769_v63 = vadd.f32 %v1563_v55, %v432_v51  ;;  %v777_v0 = vadd.f32 %v1587_v56, %v440_v53  ;;  %v1566_v1 = vadd.f32 %v1565_v60, %v1564_v57  ;;  %v1590_v2 = vadd.f32 %v1589_v62, %v1588_v58  ;;  %v439_v55 = vld [vmem:[#allocation2 + $0x38] sm:$0xff] }
 0x128   : > { %v447_v57 = vld [vmem:[#allocation2 + $0x78] sm:$0xff] }
 0x129   : > { %785 = vst [vmem:[#allocation2] sm:$0xff] %v769_v63  ;;  %793 = vst [vmem:[#allocation2 + $0x40] sm:$0xff] %v777_v0  ;;  %v770_v3 = vadd.f32 %v1566_v1, %v433_v59  ;;  %v778_v4 = vadd.f32 %v1590_v2, %v441_v61 }
 0x12b   : > { %786 = vst [vmem:[#allocation2 + $0x8] sm:$0xff] %v770_v3  ;;  %794 = vst [vmem:[#allocation2 + $0x48] sm:$0xff] %v778_v4  ;;  %v1567_v5 = vpop.f32.mrb[4].mxu0  ;;  %v1591_v6 = vpop.f32.mrb[4].mxu1 }
 0x12c   : > { %v1568_v8 = vpop.f32.mrb[5].mxu0  ;;  %v1592_v10 = vpop.f32.mrb[5].mxu1 }
 0x12d   : > { %v1569_v11 = vadd.f32 %v1568_v8, %v1567_v5  ;;  %v1593_v12 = vadd.f32 %v1592_v10, %v1591_v6  ;;  %v1570_v13 = vpop.f32.mrb[6].mxu0  ;;  %v1594_v14 = vpop.f32.mrb[6].mxu1  ;;  %v1460_v5 = vld [vmem:[%s2101_s3] sm:$0xff] (!%p1418_p11)  }
 0x12e   : > { %v1571_v16 = vpop.f32.mrb[7].mxu0  ;;  %v1595_v18 = vpop.f32.mrb[7].mxu1  ;;  %v1462_v8 = vunpack.c.h.bf16 (!%p1418_p11), %v1460_v5 }
 0x12f   : > { %v771_v19 = vadd.f32 %v1569_v11, %v434_v7  ;;  %v779_v20 = vadd.f32 %v1593_v12, %v442_v9  ;;  %v1572_v21 = vadd.f32 %v1571_v16, %v1570_v13  ;;  %v1596_v22 = vadd.f32 %v1595_v18, %v1594_v14  ;;  %v1942_v9 = vld [vmem:[%s2103_s5] ss:$0 sm:$0xff] (!%p1418_p11)  ;;  %v1531_v12 = vld [vmem:[%s2101_s3 + $0x8] sm:$0xff] (!%p1418_p11)  }
 0x130   : > { %v805_v1 = vld [vmem:[#allocation2] sm:$0xff] (!%p1418_p11)  ;;  %v1461_v7 = vunpack.c.l.bf16 (!%p1418_p11), %v1460_v5  ;;  %v1465_v16 = vunpack.c.l.bf16 (!%p1418_p11), %v1531_v12 }
 0x131   : > { %787 = vst [vmem:[#allocation2 + $0x10] sm:$0xff] %v771_v19  ;;  %795 = vst [vmem:[#allocation2 + $0x50] sm:$0xff] %v779_v20  ;;  %v772_v23 = vadd.f32 %v1572_v21, %v435_v15  ;;  %v780_v24 = vadd.f32 %v1596_v22, %v443_v17  ;;  %v822_v3 = vmul.f32 (!%p1418_p11), 1024.0, %v805_v1  ;;  %v1951_v20 = vmul.f32 (!%p1418_p11), %v1462_v8, %v1942_v9 }
 0x132   : > { %v806_v2 = vld [vmem:[#allocation2 + $0x8] sm:$0xff] (!%p1418_p11)  ;;  %v1948_v19 = vmul.f32 (!%p1418_p11), %v1461_v7, %v1942_v9  ;;  %v1466_v22 = vunpack.c.h.bf16 (!%p1418_p11), %v1531_v12 }
 0x133   : > { %788 = vst [vmem:[#allocation2 + $0x18] sm:$0xff] %v772_v23  ;;  %796 = vst [vmem:[#allocation2 + $0x58] sm:$0xff] %v780_v24  ;;  %v1573_v25 = vpop.f32.mrb[8].mxu0  ;;  %v1597_v26 = vpop.f32.mrb[8].mxu1  ;;  %v823_v4 = vmul.f32 (!%p1418_p11), 1024.0, %v806_v2  ;;  %v1625_v13 = vround.rtne.f32 (!%p1418_p11), %v822_v3  ;;  %v1532_v23 = vld [vmem:[%s2101_s3 + $0x10] sm:$0xff] (!%p1418_p11)  }
 0x134   : > { %v1574_v28 = vpop.f32.mrb[9].mxu0  ;;  %v1598_v30 = vpop.f32.mrb[9].mxu1 }
 0x135   : > { %v1575_v31 = vadd.f32 %v1574_v28, %v1573_v25  ;;  %v1599_v32 = vadd.f32 %v1598_v30, %v1597_v26  ;;  %v1576_v33 = vpop.f32.mrb[10].mxu0  ;;  %v1600_v34 = vpop.f32.mrb[10].mxu1  ;;  %v1626_v14 = vround.rtne.f32 (!%p1418_p11), %v823_v4  ;;  %v854_v24 = vmax.f32 (!%p1418_p11), %v1625_v13, -32768.0 }
 0x136   : > { %v1577_v36 = vpop.f32.mrb[11].mxu0  ;;  %v1601_v38 = vpop.f32.mrb[11].mxu1 }
 0x137   : > { %v773_v39 = vadd.f32 %v1575_v31, %v436_v27  ;;  %v781_v40 = vadd.f32 %v1599_v32, %v444_v29  ;;  %v1578_v41 = vadd.f32 %v1577_v36, %v1576_v33  ;;  %v1602_v42 = vadd.f32 %v1601_v38, %v1600_v34  ;;  %v1965_v36 = vld [vmem:[%s2100_s2] ss:$0 sm:$0xff] (!%p1418_p11) }
 0x138   : > { %v807_v6 = vld [vmem:[#allocation2 + $0x10] sm:$0xff] (!%p1418_p11)  ;;  %v855_v25 = vmax.f32 (!%p1418_p11), %v1626_v14, -32768.0  ;;  %v1957_v27 = vmul.f32 (!%p1418_p11), %v1465_v16, %v1942_v9  ;;  %v1960_v29 = vmul.f32 (!%p1418_p11), %v1466_v22, %v1942_v9  ;;  %v870_v32 = vmin.f32 (!%p1418_p11), %v854_v24, 32767.0 }
 0x139   : > { %789 = vst [vmem:[#allocation2 + $0x20] sm:$0xff] %v773_v39  ;;  %797 = vst [vmem:[#allocation2 + $0x60] sm:$0xff] %v781_v40  ;;  %v774_v43 = vadd.f32 %v1578_v41, %v437_v35  ;;  %v782_v44 = vadd.f32 %v1602_v42, %v445_v37  ;;  %v824_v11 = vmul.f32 (!%p1418_p11), 1024.0, %v807_v6  ;;  %v1469_v35 = vunpack.c.l.bf16 (!%p1418_p11), %v1532_v23 }
 0x13a   : > { %v808_v10 = vld [vmem:[#allocation2 + $0x18] sm:$0xff] (!%p1418_p11)  ;;  %v871_v33 = vmin.f32 (!%p1418_p11), %v855_v25, 32767.0  ;;  %v1470_v40 = vunpack.c.h.bf16 (!%p1418_p11), %v1532_v23  ;;  %v886_v42 = vmul.f32 (!%p1418_p11), 0.0009765625, %v870_v32 }
 0x13b   : > { %790 = vst [vmem:[#allocation2 + $0x28] sm:$0xff] %v774_v43  ;;  %798 = vst [vmem:[#allocation2 + $0x68] sm:$0xff] %v782_v44  ;;  %v1579_v45 = vpop.f32.mrb[12].mxu0  ;;  %v1603_v46 = vpop.f32.mrb[12].mxu1  ;;  %v825_v15 = vmul.f32 (!%p1418_p11), 1024.0, %v808_v10  ;;  %v1627_v21 = vround.rtne.f32 (!%p1418_p11), %v824_v11 }
 0x13c   : > { %v1580_v48 = vpop.f32.mrb[13].mxu0  ;;  %v1604_v50 = vpop.f32.mrb[13].mxu1  ;;  %v887_v43 = vmul.f32 (!%p1418_p11), 0.0009765625, %v871_v33 }
 0x13d   : > { %v1581_v51 = vadd.f32 %v1580_v48, %v1579_v45  ;;  %v1605_v52 = vadd.f32 %v1604_v50, %v1603_v46  ;;  %v1582_v53 = vpop.f32.mrb[14].mxu0  ;;  %v1606_v54 = vpop.f32.mrb[14].mxu1  ;;  %804 = sbr.rel (%p1418_p11) target bundleno = 414 (0x19e), region = 90  ;;  %v1628_v26 = vround.rtne.f32 (!%p1418_p11), %v825_v15  ;;  %v856_v28 = vmax.f32 (!%p1418_p11), %v1627_v21, -32768.0 }
 0x13e   : > { %v1583_v56 = vpop.f32.mrb[15].mxu0  ;;  %v1607_v58 = vpop.f32.mrb[15].mxu1  ;;  %v1968_v45 = vmul.f32 (!%p1418_p11), %v1469_v35, %v1942_v9  ;;  %v1971_v50 = vmul.f32 (!%p1418_p11), %v1470_v40, %v1942_v9 }
 0x13f   : > { %v775_v59 = vadd.f32 %v1581_v51, %v438_v47  ;;  %v783_v60 = vadd.f32 %v1605_v52, %v446_v49  ;;  %v1584_v61 = vadd.f32 %v1583_v56, %v1582_v53  ;;  %v1608_v62 = vadd.f32 %v1607_v58, %v1606_v54 }
 0x140   : > { %v809_v17 = vld [vmem:[#allocation2 + $0x20] sm:$0xff] (!%p1418_p11)  ;;  %v857_v34 = vmax.f32 (!%p1418_p11), %v1628_v26, -32768.0  ;;  %v872_v37 = vmin.f32 (!%p1418_p11), %v856_v28, 32767.0  ;;  %v909_v51 = vadd.f32 (!%p1418_p11), %v1965_v36, %v886_v42  ;;  %v910_v52 = vadd.f32 (!%p1418_p11), %v1965_v36, %v887_v43 }
 0x141   : > { %791 = vst [vmem:[#allocation2 + $0x30] sm:$0xff] %v775_v59  ;;  %799 = vst [vmem:[#allocation2 + $0x70] sm:$0xff] %v783_v60  ;;  %v776_v63 = vadd.f32 %v1584_v61, %v439_v55  ;;  %v784_v0 = vadd.f32 %v1608_v62, %v447_v57  ;;  %v826_v30 = vmul.f32 (!%p1418_p11), 1024.0, %v809_v17  ;;  %v1982_v26 = vld [vmem:[%s2102_s4] ss:$0 sm:$0xff] (!%p1418_p11) }
 0x142   : > { %v810_v18 = vld [vmem:[#allocation2 + $0x28] sm:$0xff] (!%p1418_p11)  ;;  %v873_v44 = vmin.f32 (!%p1418_p11), %v857_v34, 32767.0  ;;  %v888_v47 = vmul.f32 (!%p1418_p11), 0.0009765625, %v872_v37  ;;  %v926_v59 = vmul.f32 (!%p1418_p11), 16.0, %v909_v51  ;;  %v927_v60 = vmul.f32 (!%p1418_p11), 16.0, %v910_v52 }
 0x143   : > { %792 = vst [vmem:[#allocation2 + $0x38] sm:$0xff] %v776_v63  ;;  %800 = vst [vmem:[#allocation2 + $0x78] sm:$0xff] %v784_v0  ;;  %v827_v31 = vmul.f32 (!%p1418_p11), 1024.0, %v810_v18  ;;  %v1629_v38 = vround.rtne.f32 (!%p1418_p11), %v826_v30 }
 0x144   : > { %v889_v53 = vmul.f32 0.0009765625, %v873_v44  ;;  %v911_v55 = vadd.f32 %v1965_v36, %v888_v47  ;;  %v1641_v3 = vround.rtne.f32 %v926_v59  ;;  %v1642_v4 = vround.rtne.f32 %v927_v60 }
 0x145   : > { %v1630_v39 = vround.rtne.f32 %v827_v31  ;;  %v858_v48 = vmax.f32 %v1629_v38, -32768.0 }
 0x146   : > { %v912_v61 = vadd.f32 %v1965_v36, %v889_v53  ;;  %v928_v63 = vmul.f32 16.0, %v911_v55  ;;  %v958_v12 = vmax.f32 %v1641_v3, -128.0  ;;  %v959_v13 = vmax.f32 %v1642_v4, -128.0 }
 0x147   : > { %v859_v49 = vmax.f32 %v1630_v39, -32768.0  ;;  %v874_v56 = vmin.f32 %v858_v48, 32767.0 }
 0x148   : > { %v811_v41 = vld [vmem:[#allocation2 + $0x30] sm:$0xff]  ;;  %v929_v5 = vmul.f32 16.0, %v912_v61  ;;  %v1643_v7 = vround.rtne.f32 %v928_v63  ;;  %v974_v22 = vmin.f32 %v958_v12, 127.0  ;;  %v975_v23 = vmin.f32 %v959_v13, 127.0 }
 0x149   : > { %v828_v54 = vmul.f32 1024.0, %v811_v41  ;;  %v875_v57 = vmin.f32 %v859_v49, 32767.0  ;;  %v890_v0 = vmul.f32 0.0009765625, %v874_v56 }
 0x14a   : > { %v812_v46 = vld [vmem:[#allocation2 + $0x38] sm:$0xff]  ;;  %v1644_v14 = vround.rtne.f32 %v929_v5  ;;  %v960_v16 = vmax.f32 %v1643_v7, -128.0  ;;  %v990_v33 = vmul.f32 0.0625, %v974_v22  ;;  %v991_v34 = vmul.f32 0.0625, %v975_v23 }
 0x14b   : > { %v829_v58 = vmul.f32 1024.0, %v812_v46  ;;  %v1631_v62 = vround.rtne.f32 %v828_v54  ;;  %v891_v1 = vmul.f32 0.0009765625, %v875_v57  ;;  %v913_v8 = vadd.f32 %v1965_v36, %v890_v0 }
 0x14c   : > { %v961_v24 = vmax.f32 %v1644_v14, -128.0  ;;  %v976_v28 = vmin.f32 %v960_v16, 127.0  ;;  %v1013_v42 = vmul.f32 %v1982_v26, %v990_v33  ;;  %v1014_v43 = vmul.f32 %v1982_v26, %v991_v34 }
 0x14d   : > { %v1632_v2 = vround.rtne.f32 %v829_v58  ;;  %v860_v6 = vmax.f32 %v1631_v62, -32768.0  ;;  %v914_v10 = vadd.f32 %v1965_v36, %v891_v1  ;;  %v930_v17 = vmul.f32 16.0, %v913_v8 }
 0x14e   : > { %v977_v35 = vmin.f32 %v961_v24, 127.0  ;;  %v992_v38 = vmul.f32 0.0625, %v976_v28  ;;  %v1084_v52 = vadd.f32 %v1948_v19, %v1013_v42  ;;  %v1085_v53 = vadd.f32 %v1951_v20, %v1014_v43  ;;  %v814_v43 = vld [vmem:[#allocation2 + $0x48] sm:$0xff] }
 0x14f   : > { %v861_v11 = vmax.f32 %v1632_v2, -32768.0  ;;  %v876_v15 = vmin.f32 %v860_v6, 32767.0  ;;  %v931_v18 = vmul.f32 16.0, %v914_v10  ;;  %v1645_v30 = vround.rtne.f32 %v930_v17  ;;  %v1533_v17 = vld [vmem:[%s2101_s3 + $0x18] sm:$0xff]  }
 0x150   : > { %v993_v44 = vmul.f32 0.0625, %v977_v35  ;;  %v1015_v47 = vmul.f32 %v1982_v26, %v992_v38  ;;  %v1100_v60 = vmul.f32 16.0, %v1084_v52  ;;  %v1101_v61 = vmul.f32 16.0, %v1085_v53  ;;  %v813_v38 = vld [vmem:[#allocation2 + $0x40] sm:$0xff] }
 0x151   : > { %v877_v21 = vmin.f32 %v861_v11, 32767.0  ;;  %v892_v25 = vmul.f32 0.0009765625, %v876_v15  ;;  %v1646_v31 = vround.rtne.f32 %v931_v18  ;;  %v962_v39 = vmax.f32 %v1645_v30, -128.0 }
 0x152   : > { %v1016_v54 = vmul.f32 %v1982_v26, %v993_v44  ;;  %v1086_v56 = vadd.f32 %v1957_v27, %v1015_v47  ;;  %v1657_v20 = vround.rtne.f32 %v1100_v60  ;;  %v1658_v3 = vround.rtne.f32 %v1101_v61 }
 0x153   : > { %v893_v32 = vmul.f32 0.0009765625, %v877_v21  ;;  %v915_v37 = vadd.f32 %v1965_v36, %v892_v25  ;;  %v963_v40 = vmax.f32 %v1646_v31, -128.0  ;;  %v978_v48 = vmin.f32 %v962_v39, 127.0 }
 0x154   : > { %v1087_v62 = vadd.f32 %v1960_v29, %v1016_v54  ;;  %v1102_v0 = vmul.f32 16.0, %v1086_v56  ;;  %v1132_v10 = vmax.f32 %v1657_v20, -128.0  ;;  %v1133_v11 = vmax.f32 %v1658_v3, -128.0  ;;  %v816_v20 = vld [vmem:[#allocation2 + $0x58] sm:$0xff] }
 0x155   : > { %v916_v41 = vadd.f32 %v1965_v36, %v893_v32  ;;  %v932_v46 = vmul.f32 16.0, %v915_v37  ;;  %v979_v49 = vmin.f32 %v963_v40, 127.0  ;;  %v994_v57 = vmul.f32 0.0625, %v978_v48 }
 0x156   : > { %v1103_v4 = vmul.f32 16.0, %v1087_v62  ;;  %v1659_v6 = vround.rtne.f32 %v1102_v0  ;;  %v1148_v18 = vmin.f32 %v1132_v10, 127.0  ;;  %v1149_v21 = vmin.f32 %v1133_v11, 127.0 }
 0x157   : > { %v933_v51 = vmul.f32 16.0, %v916_v41  ;;  %v1647_v55 = vround.rtne.f32 %v932_v46  ;;  %v995_v58 = vmul.f32 0.0625, %v979_v49  ;;  %v1017_v1 = vmul.f32 %v1982_v26, %v994_v57  ;;  %v1534_v49 = vld [vmem:[%s2101_s3 + $0x20] sm:$0xff]  }
 0x158   : > { %v1660_v29 = vround.rtne.f32 %v1103_v4  ;;  %v1134_v13 = vmax.f32 %v1659_v6, -128.0  ;;  %v1164_v28 = vmul.f32 0.0625, %v1148_v18  ;;  %v1165_v30 = vmul.f32 0.0625, %v1149_v21 }
 0x159   : > { %v1648_v59 = vround.rtne.f32 %v933_v51  ;;  %v964_v63 = vmax.f32 %v1647_v55, -128.0  ;;  %v1018_v19 = vmul.f32 %v1982_v26, %v995_v58  ;;  %v1088_v27 = vadd.f32 %v1968_v45, %v1017_v1 }
 0x15a   : > { %v1135_v22 = vmax.f32 %v1660_v29, -128.0  ;;  %v1150_v23 = vmin.f32 %v1134_v13, 127.0  ;;  %v1473_v32 = vunpack.c.l.bf16 %v1533_v17  ;;  %v1474_v37 = vunpack.c.h.bf16 %v1533_v17 }
 0x15b   : > { %v965_v2 = vmax.f32 %v1648_v59, -128.0  ;;  %v980_v5 = vmin.f32 %v964_v63, 127.0  ;;  %v1089_v7 = vadd.f32 %v1971_v50, %v1018_v19  ;;  %v1104_v14 = vmul.f32 16.0, %v1088_v27  ;;  %v815_v63 = vld [vmem:[#allocation2 + $0x50] sm:$0xff]  ;;  %v1535_v27 = vld [vmem:[%s2101_s3 + $0x28] sm:$0xff]  }
 0x15c   : > { %v1151_v31 = vmin.f32 %v1135_v22, 127.0  ;;  %v1166_v33 = vmul.f32 0.0625, %v1150_v23  ;;  %v1180_v39 = vmax.f32 %v1164_v28, 0.0  ;;  %v1181_v40 = vmax.f32 %v1165_v30, 0.0 }
 0x15d   : > { %v981_v8 = vmin.f32 %v965_v2, 127.0  ;;  %v996_v12 = vmul.f32 0.0625, %v980_v5  ;;  %v1105_v15 = vmul.f32 16.0, %v1089_v7  ;;  %v1661_v50 = vround.rtne.f32 %v1104_v14 }
 0x15e   : > { %v1167_v41 = vmul.f32 0.0625, %v1151_v31  ;;  %v1074_v42 = vmul.f32 %v1473_v32, %v1942_v9  ;;  %v1182_v44 = vmax.f32 %v1166_v33, 0.0  ;;  %v1075_v48 = vmul.f32 %v1474_v37, %v1942_v9  ;;  %v818_v31 = vld [vmem:[#allocation2 + $0x68] sm:$0xff] }
 0x15f   : > { %v997_v16 = vmul.f32 0.0625, %v981_v8  ;;  %v1019_v45 = vmul.f32 %v1982_v26, %v996_v12  ;;  %v1662_v24 = vround.rtne.f32 %v1105_v15  ;;  %v1136_v34 = vmax.f32 %v1661_v50, -128.0  ;;  %v817_v50 = vld [vmem:[#allocation2 + $0x60] sm:$0xff] }
 0x160   : > { %v1494_v51 = vpack.c.bf16 %v1181_v40, %v1180_v39  ;;  %v1183_v52 = vmax.f32 %v1167_v41, 0.0  ;;  %v830_v54 = vmul.f32 1024.0, %v813_v38  ;;  %v831_v58 = vmul.f32 1024.0, %v814_v43  ;;  %v1536_v41 = vld [vmem:[%s2101_s3 + $0x30] sm:$0xff]  }
 0x161   : > { %v1020_v25 = vmul.f32 %v1982_v26, %v997_v16  ;;  %v1137_v35 = vmax.f32 %v1662_v24, -128.0  ;;  %v1152_v46 = vmin.f32 %v1136_v34, 127.0  ;;  %v1090_v53 = vadd.f32 %v1074_v42, %v1019_v45 }
 0x162   : > { %1495 = vst [vmem:[%s2104_s6] sm:$0xff] %v1494_v51   ;;  %v1499_v59 = vpack.c.bf16 %v1183_v52, %v1182_v44  ;;  %v1633_v61 = vround.rtne.f32 %v830_v54  ;;  %v1477_v62 = vunpack.c.l.bf16 %v1534_v49  ;;  %v1634_v2 = vround.rtne.f32 %v831_v58 }
 0x163   : > { %v1153_v47 = vmin.f32 %v1137_v35, 127.0  ;;  %v1168_v55 = vmul.f32 0.0625, %v1152_v46  ;;  %v1091_v57 = vadd.f32 %v1075_v48, %v1020_v25  ;;  %v1106_v60 = vmul.f32 16.0, %v1090_v53 }
 0x164   : > { %1538 = vst [vmem:[%s2104_s6 + $0x8] sm:$0xff] %v1499_v59   ;;  %v862_v4 = vmax.f32 %v1633_v61, -32768.0  ;;  %v1478_v5 = vunpack.c.h.bf16 %v1534_v49  ;;  %v2015_v6 = vmul.f32 %v1477_v62, %v1942_v9  ;;  %v863_v10 = vmax.f32 %v1634_v2, -32768.0 }
 0x165   : > { %v1169_v56 = vmul.f32 0.0625, %v1153_v47  ;;  %v1184_v0 = vmax.f32 %v1168_v55, 0.0  ;;  %v1107_v19 = vmul.f32 16.0, %v1091_v57  ;;  %v1663_v3 = vround.rtne.f32 %v1106_v60 }
 0x166   : > { %v832_v11 = vmul.f32 1024.0, %v815_v63  ;;  %v878_v12 = vmin.f32 %v862_v4, 32767.0  ;;  %v2021_v13 = vmul.f32 %v1478_v5, %v1942_v9  ;;  %v833_v14 = vmul.f32 1024.0, %v816_v20 }
 0x167   : > { %v1185_v1 = vmax.f32 %v1169_v56, 0.0  ;;  %v1664_v8 = vround.rtne.f32 %v1107_v19  ;;  %v1138_v29 = vmax.f32 %v1663_v3, -128.0  ;;  %v879_v16 = vmin.f32 %v863_v10, 32767.0  ;;  %v820_v3 = vld [vmem:[#allocation2 + $0x78] sm:$0xff] }
 0x168   : > { %v1635_v17 = vround.rtne.f32 %v832_v11  ;;  %v1481_v18 = vunpack.c.l.bf16 %v1535_v27  ;;  %v894_v22 = vmul.f32 0.0009765625, %v878_v12  ;;  %v1636_v45 = vround.rtne.f32 %v833_v14 }
 0x169   : > { %v1504_v7 = vpack.c.bf16 %v1185_v1, %v1184_v0  ;;  %v1139_v15 = vmax.f32 %v1664_v8, -128.0  ;;  %v1154_v21 = vmin.f32 %v1138_v29, 127.0  ;;  %v1482_v23 = vunpack.c.h.bf16 %v1535_v27  ;;  %v819_v0 = vld [vmem:[#allocation2 + $0x70] sm:$0xff] }
 0x16a   : > { %v895_v25 = vmul.f32 0.0009765625, %v879_v16  ;;  %v864_v28 = vmax.f32 %v1635_v17, -32768.0  ;;  %v2027_v30 = vmul.f32 %v1481_v18, %v1942_v9  ;;  %v917_v33 = vadd.f32 %v1965_v36, %v894_v22 }
 0x16b   : > { %1539 = vst [vmem:[%s2104_s6 + $0x10] sm:$0xff] %v1504_v7   ;;  %v1155_v24 = vmin.f32 %v1139_v15, 127.0  ;;  %v1170_v32 = vmul.f32 0.0625, %v1154_v21  ;;  %v865_v34 = vmax.f32 %v1636_v45, -32768.0  ;;  %v2031_v35 = vmul.f32 %v1482_v23, %v1942_v9 }
 0x16c   : > { %v918_v38 = vadd.f32 %v1965_v36, %v895_v25  ;;  %v880_v39 = vmin.f32 %v864_v28, 32767.0  ;;  %v834_v40 = vmul.f32 1024.0, %v817_v50  ;;  %v934_v43 = vmul.f32 16.0, %v917_v33 }
 0x16d   : > { %v1171_v37 = vmul.f32 0.0625, %v1155_v24  ;;  %v1186_v42 = vmax.f32 %v1170_v32, 0.0  ;;  %v881_v44 = vmin.f32 %v865_v34, 32767.0  ;;  %v835_v46 = vmul.f32 1024.0, %v818_v31 }
 0x16e   : > { %v935_v48 = vmul.f32 16.0, %v918_v38  ;;  %v896_v49 = vmul.f32 0.0009765625, %v880_v39  ;;  %v1637_v51 = vround.rtne.f32 %v834_v40  ;;  %v1649_v52 = vround.rtne.f32 %v934_v43 }
 0x16f   : > { %v1187_v47 = vmax.f32 %v1171_v37, 0.0  ;;  %v897_v53 = vmul.f32 0.0009765625, %v881_v44  ;;  %v1638_v54 = vround.rtne.f32 %v835_v46  ;;  %v1485_v55 = vunpack.c.l.bf16 %v1536_v41 }
 0x170   : > { %v1650_v57 = vround.rtne.f32 %v935_v48  ;;  %v919_v58 = vadd.f32 %v1965_v36, %v896_v49  ;;  %v866_v59 = vmax.f32 %v1637_v51, -32768.0  ;;  %v966_v60 = vmax.f32 %v1649_v52, -128.0 }
 0x171   : > { %v1509_v56 = vpack.c.bf16 %v1187_v47, %v1186_v42  ;;  %v920_v61 = vadd.f32 %v1965_v36, %v897_v53  ;;  %v867_v62 = vmax.f32 %v1638_v54, -32768.0  ;;  %v1486_v63 = vunpack.c.h.bf16 %v1536_v41 }
 0x172   : > { %v967_v1 = vmax.f32 %v1650_v57, -128.0  ;;  %v936_v19 = vmul.f32 16.0, %v919_v58  ;;  %v882_v2 = vmin.f32 %v866_v59, 32767.0  ;;  %v2043_v20 = vmul.f32 %v1485_v55, %v1942_v9 }
 0x173   : > { %1540 = vst [vmem:[%s2104_s6 + $0x18] sm:$0xff] %v1509_v56   ;;  %v982_v4 = vmin.f32 %v966_v60, 127.0  ;;  %v937_v5 = vmul.f32 16.0, %v920_v61  ;;  %v883_v27 = vmin.f32 %v867_v62, 32767.0  ;;  %v2046_v7 = vmul.f32 %v1486_v63, %v1942_v9 }
 0x174   : > { %v983_v8 = vmin.f32 %v967_v1, 127.0  ;;  %v1651_v10 = vround.rtne.f32 %v936_v19  ;;  %v898_v11 = vmul.f32 0.0009765625, %v882_v2  ;;  %v836_v29 = vmul.f32 1024.0, %v819_v0 }
 0x175   : > { %v998_v12 = vmul.f32 0.0625, %v982_v4  ;;  %v1652_v14 = vround.rtne.f32 %v937_v5  ;;  %v899_v15 = vmul.f32 0.0009765625, %v883_v27  ;;  %v837_v16 = vmul.f32 1024.0, %v820_v3 }
 0x176   : > { %v999_v17 = vmul.f32 0.0625, %v983_v8  ;;  %v968_v18 = vmax.f32 %v1651_v10, -128.0  ;;  %v921_v21 = vadd.f32 %v1965_v36, %v898_v11  ;;  %v1639_v22 = vround.rtne.f32 %v836_v29 }
 0x177   : > { %v1021_v45 = vmul.f32 %v1982_v26, %v998_v12  ;;  %v969_v23 = vmax.f32 %v1652_v14, -128.0  ;;  %v922_v50 = vadd.f32 %v1965_v36, %v899_v15  ;;  %v1640_v24 = vround.rtne.f32 %v837_v16 }
 0x178   : > { %v1022_v25 = vmul.f32 %v1982_v26, %v999_v17  ;;  %v984_v28 = vmin.f32 %v968_v18, 127.0  ;;  %v938_v31 = vmul.f32 16.0, %v921_v21  ;;  %v868_v32 = vmax.f32 %v1639_v22, -32768.0  ;;  %v1537_v17 = vld [vmem:[%s2101_s3 + $0x38] sm:$0xff]  }
 0x179   : > { %v1092_v33 = vadd.f32 %v2015_v6, %v1021_v45  ;;  %v985_v34 = vmin.f32 %v969_v23, 127.0  ;;  %v939_v37 = vmul.f32 16.0, %v922_v50  ;;  %v869_v38 = vmax.f32 %v1640_v24, -32768.0 }
 0x17a   : > { %v1093_v39 = vadd.f32 %v2021_v13, %v1022_v25  ;;  %v1000_v40 = vmul.f32 0.0625, %v984_v28  ;;  %v1653_v41 = vround.rtne.f32 %v938_v31  ;;  %v884_v42 = vmin.f32 %v868_v32, 32767.0 }
 0x17b   : > { %v1108_v43 = vmul.f32 16.0, %v1092_v33  ;;  %v1001_v44 = vmul.f32 0.0625, %v985_v34  ;;  %v1654_v46 = vround.rtne.f32 %v939_v37  ;;  %v885_v47 = vmin.f32 %v869_v38, 32767.0 }
 0x17c   : > { %v1109_v48 = vmul.f32 16.0, %v1093_v39  ;;  %v1023_v49 = vmul.f32 %v1982_v26, %v1000_v40  ;;  %v970_v51 = vmax.f32 %v1653_v41, -128.0  ;;  %v900_v52 = vmul.f32 0.0009765625, %v884_v42 }
 0x17d   : > { %v1665_v53 = vround.rtne.f32 %v1108_v43  ;;  %v1024_v6 = vmul.f32 %v1982_v26, %v1001_v44  ;;  %v971_v54 = vmax.f32 %v1654_v46, -128.0  ;;  %v901_v55 = vmul.f32 0.0009765625, %v885_v47 }
 0x17e   : > { %v1666_v56 = vround.rtne.f32 %v1109_v48  ;;  %v1094_v13 = vadd.f32 %v2027_v30, %v1023_v49  ;;  %v986_v57 = vmin.f32 %v970_v51, 127.0  ;;  %v923_v58 = vadd.f32 %v1965_v36, %v900_v52 }
 0x17f   : > { %v1140_v59 = vmax.f32 %v1665_v53, -128.0  ;;  %v1095_v60 = vadd.f32 %v2031_v35, %v1024_v6  ;;  %v987_v61 = vmin.f32 %v971_v54, 127.0  ;;  %v924_v62 = vadd.f32 %v1965_v36, %v901_v55 }
 0x180   : > { %v1141_v63 = vmax.f32 %v1666_v56, -128.0  ;;  %v1110_v0 = vmul.f32 16.0, %v1094_v13  ;;  %v1002_v1 = vmul.f32 0.0625, %v986_v57  ;;  %v940_v19 = vmul.f32 16.0, %v923_v58 }
 0x181   : > { %v1156_v2 = vmin.f32 %v1140_v59, 127.0  ;;  %v1111_v3 = vmul.f32 16.0, %v1095_v60  ;;  %v1003_v4 = vmul.f32 0.0625, %v987_v61  ;;  %v941_v5 = vmul.f32 16.0, %v924_v62 }
 0x182   : > { %v1157_v27 = vmin.f32 %v1141_v63, 127.0  ;;  %v1667_v8 = vround.rtne.f32 %v1110_v0  ;;  %v1025_v30 = vmul.f32 %v1982_v26, %v1002_v1  ;;  %v1655_v10 = vround.rtne.f32 %v940_v19 }
 0x183   : > { %v1172_v11 = vmul.f32 0.0625, %v1156_v2  ;;  %v1668_v29 = vround.rtne.f32 %v1111_v3  ;;  %v1026_v35 = vmul.f32 %v1982_v26, %v1003_v4  ;;  %v1656_v12 = vround.rtne.f32 %v941_v5 }
 0x184   : > { %v1173_v14 = vmul.f32 0.0625, %v1157_v27  ;;  %v1142_v36 = vmax.f32 %v1667_v8, -128.0  ;;  %v1096_v15 = vadd.f32 %v2043_v20, %v1025_v30  ;;  %v972_v16 = vmax.f32 %v1655_v10, -128.0 }
 0x185   : > { %v1188_v18 = vmax.f32 %v1172_v11, 0.0  ;;  %v1143_v21 = vmax.f32 %v1668_v29, -128.0  ;;  %v1097_v22 = vadd.f32 %v2046_v7, %v1026_v35  ;;  %v973_v45 = vmax.f32 %v1656_v12, -128.0 }
 0x186   : > { %v1189_v23 = vmax.f32 %v1173_v14, 0.0  ;;  %v1158_v50 = vmin.f32 %v1142_v36, 127.0  ;;  %v1112_v24 = vmul.f32 16.0, %v1096_v15  ;;  %v988_v25 = vmin.f32 %v972_v16, 127.0 }
 0x187   : > { %v1159_v28 = vmin.f32 %v1143_v21, 127.0  ;;  %v1113_v31 = vmul.f32 16.0, %v1097_v22  ;;  %v989_v32 = vmin.f32 %v973_v45, 127.0  ;;  %v1489_v33 = vunpack.c.l.bf16 %v1537_v17 }
 0x188   : > { %v1514_v34 = vpack.c.bf16 %v1189_v23, %v1188_v18  ;;  %v1174_v20 = vmul.f32 0.0625, %v1158_v50  ;;  %v1669_v37 = vround.rtne.f32 %v1112_v24  ;;  %v1004_v38 = vmul.f32 0.0625, %v988_v25 }
 0x189   : > { %v1175_v39 = vmul.f32 0.0625, %v1159_v28  ;;  %v1670_v40 = vround.rtne.f32 %v1113_v31  ;;  %v1005_v41 = vmul.f32 0.0625, %v989_v32  ;;  %v1490_v42 = vunpack.c.h.bf16 %v1537_v17 }
 0x18a   : > { %1541 = vst [vmem:[%s2104_s6 + $0x20] sm:$0xff] %v1514_v34   ;;  %v1190_v7 = vmax.f32 %v1174_v20, 0.0  ;;  %v1144_v43 = vmax.f32 %v1669_v37, -128.0  ;;  %v1027_v44 = vmul.f32 %v1982_v26, %v1004_v38  ;;  %v1082_v46 = vmul.f32 %v1489_v33, %v1942_v9 }
 0x18b   : > { %v1191_v47 = vmax.f32 %v1175_v39, 0.0  ;;  %v1145_v48 = vmax.f32 %v1670_v40, -128.0  ;;  %v1028_v49 = vmul.f32 %v1982_v26, %v1005_v41  ;;  %v1083_v51 = vmul.f32 %v1490_v42, %v1942_v9 }
 0x18c   : > { %v1160_v52 = vmin.f32 %v1144_v43, 127.0  ;;  %v1098_v53 = vadd.f32 %v1082_v46, %v1027_v44 }
 0x18d   : > { %v1519_v6 = vpack.c.bf16 %v1191_v47, %v1190_v7  ;;  %v1161_v54 = vmin.f32 %v1145_v48, 127.0  ;;  %v1099_v55 = vadd.f32 %v1083_v51, %v1028_v49 }
 0x18e   : > { %v1176_v56 = vmul.f32 0.0625, %v1160_v52  ;;  %v1114_v13 = vmul.f32 16.0, %v1098_v53 }
 0x18f   : > { %1542 = vst [vmem:[%s2104_s6 + $0x28] sm:$0xff] %v1519_v6   ;;  %v1177_v57 = vmul.f32 0.0625, %v1161_v54  ;;  %v1115_v58 = vmul.f32 16.0, %v1099_v55 }
 0x190   : > { %v1192_v59 = vmax.f32 %v1176_v56, 0.0  ;;  %v1671_v60 = vround.rtne.f32 %v1114_v13 }
 0x191   : > { %v1193_v61 = vmax.f32 %v1177_v57, 0.0  ;;  %v1672_v62 = vround.rtne.f32 %v1115_v58 }
 0x192   : > { %v1146_v26 = vmax.f32 %v1671_v60, -128.0 }
 0x193   : > { %v1524_v63 = vpack.c.bf16 %v1193_v61, %v1192_v59  ;;  %v1147_v9 = vmax.f32 %v1672_v62, -128.0 }
 0x194   : > { %v1162_v0 = vmin.f32 %v1146_v26, 127.0 }
 0x195   : > { %1543 = vst [vmem:[%s2104_s6 + $0x30] sm:$0xff] %v1524_v63   ;;  %v1163_v1 = vmin.f32 %v1147_v9, 127.0 }
 0x196   : > { %v1178_v19 = vmul.f32 0.0625, %v1162_v0 }
 0x197   : > { %v1179_v2 = vmul.f32 0.0625, %v1163_v1 }
 0x198   : > { %v1194_v3 = vmax.f32 %v1178_v19, 0.0 }
 0x199   : > { %v1195_v4 = vmax.f32 %v1179_v2, 0.0 }
 0x19b   : > { %v1529_v5 = vpack.c.bf16 %v1195_v4, %v1194_v3 }
 0x19d   : > { %1544 = vst [vmem:[%s2104_s6 + $0x38] sm:$0xff] %v1529_v5  }
 0x19e PF: > { %s16_s25 = sadd.s32 1, %s1792_s25   ;;  %s2105_s21 = smov %s1780_s22 }
 0x19f   : > { %p13_p12 = scmp.ge.s32.totalorder %s16_s25, 5   ;;  %s2106_s22 = smov %s1865_s29 }
 0x1a0   : > { %s2107_s23 = smov %s1788_s24  ;;  %s2108_s24 = smov %s2110_s26 }
 0x1a1   :  { %15 = sbr.rel (!%p13_p12) target bundleno = 3 (0x3), region = 131 }

// kernel: _lambda_.26
= control target key start
LH: loop header
LB: loop body
LE: loop exit
PB: predicated region body
PF: predicated region fallthrough
CT: control target
= control target key end

     0   :  { %s883_s12 = smov 0   ;;  %s885_s13 = smov 0   ;;  %s983_s0 = inlined_call_operand.vmem [shape: bf16[32,768], index: 0, kind: input, shape index: {}]   ;;  %s984_s1 = inlined_call_operand.vmem [shape: bf16[768,128], index: 1, kind: input, shape index: {}]   ;;  %s985_s2 = inlined_call_operand.vmem [shape: f32[1,128], index: 2, kind: input, shape index: {}]   ;;  %s986_s3 = inlined_call_operand.vmem [shape: bf16[32,128], index: 3, kind: output, shape index: {}]  }
   0x1   :  { %s887_s14 = smov 0   ;;  %s889_s15 = smov 0  }
   0x2   :  { %s891_s16 = smov 0  }
   0x3 LB: > { %s22_s17 = sadd.s32 1, %s856_s15  ;;  %p41_p1 = scmp.ne.s32.totalorder %s848_s13, %s844_s12  ;;  %s860_s16 = sphi %s891_s16, %s13_s16   ;;  %s856_s15 = sphi %s889_s15, %s990_s15   ;;  %s852_s14 = sphi %s887_s14, %s989_s14   ;;  %s848_s13 = sphi %s885_s13, %s988_s13   ;;  %s844_s12 = sphi %s883_s12, %s987_s12  }
   0x4   : > { %p23_p0 = scmp.ge.s32.totalorder %s22_s17, 3  ;;  %p42_p2 = scmp.eq.s32.totalorder %s860_s16, 0 }
   0x5   : > { %s34_s19 = sadd.s32 1, %s848_s13  ;;  %p652_p5 = scmp.ge.s32.totalorder %s860_s16, 3 }
   0x6   : > { %s992_s17 = smov (%p23_p0, %s22_s17), 0  ;;  %p43_p3 = por %p42_p2, %p41_p1 }
   0x7   : > { %s30_s18 = ssub.s32 %s856_s15, %s992_s17  ;;  %143 = sbr.rel (%p652_p5) target bundleno = 21 (0x15), region = 20 }
   0x8   : > { %p32_p4 = scmp.eq.s32.totalorder %s30_s18, 0 }
   0xa   : > { %s918_s20 = scalar_select %p32_p4, %s848_s13, %s34_s19  }
   0xe   : > { %146 = sbr.rel (!%p43_p3) target bundleno = 21 (0x15), region = 24  ;;  %s148_s21 = sand.u32 (%p43_p3), 1, %s848_s13  }
   0xf   : > { %s691_s22 = sshll.u32 (%p43_p3), %s856_s15, 3  ;;  %s653_s23 = sshll.u32 (%p43_p3), %s148_s21, 5 }
  0x10   : > { %s156_s26 = scalar_lea.vmem (%p43_p3), %s983_s0, %s691_s22  ;;  %s150_s27 = scalar_lea.vmem (%p43_p3), [#allocation3], %s653_s23 }
  0x11   : > { %v190_v0 = vld [vmem:[%s156_s26] sm:$0xff] (%p43_p3)  ;;  %v192_v1 = vld [vmem:[%s156_s26 + $0x18] sm:$0xff] (%p43_p3)  ;;  %v194_v2 = vld [vmem:[%s156_s26 + $0x30] sm:$0xff] (%p43_p3) }
  0x12   : > { %191 = vst [vmem:[%s150_s27] sm:$0xff] (%p43_p3), %v190_v0  ;;  %193 = vst [vmem:[%s150_s27 + $0x8] sm:$0xff] (%p43_p3), %v192_v1  ;;  %v196_v3 = vld [vmem:[%s156_s26 + $0x48] sm:$0xff] (%p43_p3) }
  0x13   : > { %195 = vst [vmem:[%s150_s27 + $0x10] sm:$0xff] (%p43_p3), %v194_v2  ;;  %197 = vst [vmem:[%s150_s27 + $0x18] sm:$0xff] (%p43_p3), %v196_v3 }
  0x15 PF: > { %p656_p6 = scmp.ge.s32.totalorder %s860_s16, 1  ;;  %p211_p7 = scmp.lt.s32.totalorder %s860_s16, 4 }
  0x17   : > { %p212_p8 = pnand %p656_p6, %p211_p7 }
  0x18   : > { %s218_s28 = sand.u32 (!%p212_p8), 1, %s844_s12   ;;  %s658_s29 = sshll.u32 (!%p212_p8), %s852_s14, 5 }
  0x19   : > { %215 = sbr.rel (%p212_p8) target bundleno = 326 (0x146), region = 66  ;;  %s657_s30 = sshll.u32 (!%p212_p8), %s218_s28, 5 }
  0x1a   : > { %p249_p9 = scmp.lt.s32.totalorder (!%p212_p8), %s658_s29, 95  ;;  %s935_s8 = scalar_lea.vmem (!%p212_p8), [#allocation3], %s657_s30 }
  0x1b   : > { %p660_p10 = scmp.ne.s32.totalorder (!%p212_p8), %s852_s14, 0 }
  0x20   : > { %s994_s29 = smov (!%p249_p9, %s658_s29), 95  ;;  %264 = sbr.rel (%p660_p10) target bundleno = 39 (0x27), region = 74 }
  0x21   : > { %s659_s4 = sshll.u32 %s994_s29, 2  ;;  %v862_v4 = vmov (!%p660_p10), 0.0  }
  0x22   : > { %s933_s7 = scalar_lea.vmem %s984_s1, %s659_s4  ;;  %265 = vst [vmem:[#allocation2] sm:$0xff] (!%p660_p10), %v862_v4  ;;  %266 = vst [vmem:[#allocation2 + $0x8] sm:$0xff] (!%p660_p10), %v862_v4 }
  0x23   : > { %267 = vst [vmem:[#allocation2 + $0x10] sm:$0xff] (!%p660_p10), %v862_v4  ;;  %268 = vst [vmem:[#allocation2 + $0x18] sm:$0xff] (!%p660_p10), %v862_v4 }
  0x27 PF: > { %v800_v5 = vld [vmem:[%s933_s7 + $0x40] sm:$0xff]   ;;  %v802_v7 = vld [vmem:[%s933_s7 + $0x48] sm:$0xff]   ;;  %v804_v9 = vld [vmem:[%s933_s7 + $0x50] sm:$0xff]   ;;  %p681_p11 = scmp.ne.s32.totalorder %s852_s14, 2 }
  0x28   : > { %v801_v6 = vld [vmem:[%s933_s7] sm:$0xff]   ;;  %707 = vmatprep.subr.bf16.mxu0 %v800_v5  ;;  %735 = vmatprep.subr.bf16.mxu1 %v800_v5  ;;  %v803_v8 = vld [vmem:[%s933_s7 + $0x8] sm:$0xff]   ;;  %v805_v10 = vld [vmem:[%s933_s7 + $0x10] sm:$0xff]  }
  0x29   : > { %708 = vmatpush3.bf16.msra.mxu0 %v801_v6  ;;  %743 = vmatpush3.bf16.msra.mxu1 %v801_v6  ;;  %v806_v11 = vld [vmem:[%s933_s7 + $0x58] sm:$0xff]   ;;  %v808_v13 = vld [vmem:[%s933_s7 + $0x60] sm:$0xff]   ;;  %v810_v15 = vld [vmem:[%s933_s7 + $0x68] sm:$0xff]  }
  0x2a   : > { %709 = vmatprep.subr.bf16.mxu0 %v802_v7  ;;  %736 = vmatprep.subr.bf16.mxu1 %v802_v7  ;;  %v807_v12 = vld [vmem:[%s933_s7 + $0x18] sm:$0xff]   ;;  %v809_v14 = vld [vmem:[%s933_s7 + $0x20] sm:$0xff]   ;;  %v811_v18 = vld [vmem:[%s933_s7 + $0x28] sm:$0xff]  }
  0x2b   : > { %v818_v16 = vld [vmem:[%s935_s8 + $0x4] ss:$8 sps:$4 sm:$0xff]   ;;  %v821_v17 = vld [vmem:[%s935_s8 + $0x14] ss:$8 sps:$4 sm:$0xff]   ;;  %v816_v23 = vld [vmem:[%s935_s8] ss:$8 sps:$4 sm:$0xff]  }
  0x2c   : > { %v812_v19 = vld [vmem:[%s933_s7 + $0x70] sm:$0xff]   ;;  %457 = vmatprep.mubr.bf16.mxu0 %v818_v16  ;;  %465 = vmatprep.mubr.bf16.mxu1 %v821_v17  ;;  %v814_v21 = vld [vmem:[%s933_s7 + $0x78] sm:$0xff]   ;;  %v269_v27 = vld [vmem:[#allocation2] sm:$0xff] }
  0x2d   : > { %710 = vmatpush3.bf16.msra.mxu0 %v803_v8  ;;  %744 = vmatpush3.bf16.msra.mxu1 %v803_v8  ;;  %v813_v20 = vld [vmem:[%s933_s7 + $0x30] sm:$0xff]   ;;  %v815_v22 = vld [vmem:[%s933_s7 + $0x38] sm:$0xff]   ;;  %v270_v35 = vld [vmem:[#allocation2 + $0x8] sm:$0xff] }
  0x2e   : > { %711 = vmatprep.subr.bf16.mxu0 %v804_v9  ;;  %737 = vmatprep.subr.bf16.mxu1 %v804_v9  ;;  %v819_v24 = vld [vmem:[%s935_s8 + $0x10] ss:$8 sps:$4 sm:$0xff]   ;;  %v682_v63 = vld [vmem:[%s985_s2] ss:$0 sm:$0xff] (!%p681_p11) }
  0x2f   : > { %v271_v29 = vld [vmem:[#allocation2 + $0x10] sm:$0xff]  ;;  %v272_v37 = vld [vmem:[#allocation2 + $0x18] sm:$0xff] }
  0x31   : > { %712 = vmatpush3.bf16.msra.mxu0 %v805_v10  ;;  %745 = vmatpush3.bf16.msra.mxu1 %v805_v10 }
  0x32   : > { %713 = vmatprep.subr.bf16.mxu0 %v806_v11  ;;  %738 = vmatprep.subr.bf16.mxu1 %v806_v11 }
  0x35   : > { %714 = vmatpush3.bf16.msra.mxu0 %v807_v12  ;;  %746 = vmatpush3.bf16.msra.mxu1 %v807_v12 }
  0x36   : > { %715 = vmatprep.subr.bf16.mxu0 %v808_v13  ;;  %739 = vmatprep.subr.bf16.mxu1 %v808_v13 }
  0x39   : > { %716 = vmatpush3.bf16.msra.mxu0 %v809_v14  ;;  %747 = vmatpush3.bf16.msra.mxu1 %v809_v14 }
  0x3a   : > { %717 = vmatprep.subr.bf16.mxu0 %v810_v15  ;;  %740 = vmatprep.subr.bf16.mxu1 %v810_v15 }
  0x3d   : > { %718 = vmatpush3.bf16.msra.mxu0 %v811_v18  ;;  %748 = vmatpush3.bf16.msra.mxu1 %v811_v18 }
  0x3e   : > { %719 = vmatprep.subr.bf16.mxu0 %v812_v19  ;;  %741 = vmatprep.subr.bf16.mxu1 %v812_v19 }
  0x41   : > { %720 = vmatpush3.bf16.msra.mxu0 %v813_v20  ;;  %749 = vmatpush3.bf16.msra.mxu1 %v813_v20 }
  0x42   : > { %721 = vmatprep.subr.bf16.mxu0 %v814_v21  ;;  %742 = vmatprep.subr.bf16.mxu1 %v814_v21 }
  0x45   : > { %722 = vmatpush3.bf16.msra.mxu0 %v815_v22  ;;  %750 = vmatpush3.bf16.msra.mxu1 %v815_v22 }
  0x48   : > { %458 = vmatmul.mubr.bf16.vlgmr.msra.gmra.mrb[0].mxu0 %v816_v23  ;;  %466 = vmatmul.mubr.bf16.vlgmr.msra.gmra.mrb[0].mxu1 %v819_v24 }
 0x11b   : > { %v723_v25 = vpop.f32.mrb[0].mxu0  ;;  %v729_v26 = vpop.f32.mrb[0].mxu1 }
 0x11c   : > { %v724_v28 = vpop.f32.mrb[1].mxu0  ;;  %v730_v30 = vpop.f32.mrb[1].mxu1 }
 0x11d   : > { %v725_v31 = vadd.f32 %v724_v28, %v723_v25  ;;  %v731_v32 = vadd.f32 %v730_v30, %v729_v26  ;;  %v726_v33 = vpop.f32.mrb[2].mxu0  ;;  %v732_v34 = vpop.f32.mrb[2].mxu1  ;;  %485 = sbr.rel (%p681_p11) target bundleno = 326 (0x146), region = 78 }
 0x11e   : > { %v727_v36 = vpop.f32.mrb[3].mxu0  ;;  %v733_v38 = vpop.f32.mrb[3].mxu1 }
 0x11f   : > { %v474_v39 = vadd.f32 %v725_v31, %v269_v27  ;;  %v476_v40 = vadd.f32 %v731_v32, %v271_v29  ;;  %v728_v41 = vadd.f32 %v727_v36, %v726_v33  ;;  %v734_v42 = vadd.f32 %v733_v38, %v732_v34 }
 0x121   : > { %478 = vst [vmem:[#allocation2] sm:$0xff] %v474_v39  ;;  %480 = vst [vmem:[#allocation2 + $0x10] sm:$0xff] %v476_v40  ;;  %v475_v43 = vadd.f32 %v728_v41, %v270_v35  ;;  %v477_v44 = vadd.f32 %v734_v42, %v272_v37 }
 0x123   : > { %479 = vst [vmem:[#allocation2 + $0x8] sm:$0xff] %v475_v43  ;;  %481 = vst [vmem:[#allocation2 + $0x18] sm:$0xff] %v477_v44 }
 0x128   : > { %v486_v45 = vld [vmem:[#allocation2] sm:$0xff]  ;;  %v488_v49 = vld [vmem:[#allocation2 + $0x10] sm:$0xff] }
 0x129   : > { %v491_v47 = vmul.f32 1024.0, %v486_v45  ;;  %v493_v51 = vmul.f32 1024.0, %v488_v49 }
 0x12a   : > { %v487_v46 = vld [vmem:[#allocation2 + $0x8] sm:$0xff]  ;;  %v489_v50 = vld [vmem:[#allocation2 + $0x18] sm:$0xff] }
 0x12b   : > { %v492_v48 = vmul.f32 1024.0, %v487_v46  ;;  %v494_v52 = vmul.f32 1024.0, %v489_v50  ;;  %v751_v53 = vround.rtne.f32 %v491_v47  ;;  %v753_v55 = vround.rtne.f32 %v493_v51 }
 0x12d   : > { %v752_v54 = vround.rtne.f32 %v492_v48  ;;  %v754_v56 = vround.rtne.f32 %v494_v52  ;;  %v499_v57 = vmax.f32 %v751_v53, -32768.0  ;;  %v501_v59 = vmax.f32 %v753_v55, -32768.0 }
 0x12f   : > { %v500_v58 = vmax.f32 %v752_v54, -32768.0  ;;  %v502_v60 = vmax.f32 %v754_v56, -32768.0  ;;  %v503_v61 = vmin.f32 %v499_v57, 32767.0  ;;  %v505_v0 = vmin.f32 %v501_v59, 32767.0 }
 0x131   : > { %v504_v62 = vmin.f32 %v500_v58, 32767.0  ;;  %v506_v1 = vmin.f32 %v502_v60, 32767.0  ;;  %v507_v2 = vmul.f32 0.0009765625, %v503_v61  ;;  %v509_v4 = vmul.f32 0.0009765625, %v505_v0 }
 0x133   : > { %v508_v3 = vmul.f32 0.0009765625, %v504_v62  ;;  %v510_v5 = vmul.f32 0.0009765625, %v506_v1  ;;  %v518_v6 = vadd.f32 %v682_v63, %v507_v2  ;;  %v520_v8 = vadd.f32 %v682_v63, %v509_v4 }
 0x135   : > { %v519_v7 = vadd.f32 %v682_v63, %v508_v3  ;;  %v521_v9 = vadd.f32 %v682_v63, %v510_v5  ;;  %v523_v10 = vmul.f32 16.0, %v518_v6  ;;  %v525_v12 = vmul.f32 16.0, %v520_v8 }
 0x137   : > { %v524_v11 = vmul.f32 16.0, %v519_v7  ;;  %v526_v13 = vmul.f32 16.0, %v521_v9  ;;  %v755_v14 = vround.rtne.f32 %v523_v10  ;;  %v757_v16 = vround.rtne.f32 %v525_v12 }
 0x139   : > { %v756_v15 = vround.rtne.f32 %v524_v11  ;;  %v758_v17 = vround.rtne.f32 %v526_v13  ;;  %v531_v18 = vmax.f32 %v755_v14, -128.0  ;;  %v533_v20 = vmax.f32 %v757_v16, -128.0 }
 0x13b   : > { %v532_v19 = vmax.f32 %v756_v15, -128.0  ;;  %v534_v21 = vmax.f32 %v758_v17, -128.0  ;;  %v535_v22 = vmin.f32 %v531_v18, 127.0  ;;  %v537_v24 = vmin.f32 %v533_v20, 127.0 }
 0x13d   : > { %v536_v23 = vmin.f32 %v532_v19, 127.0  ;;  %v538_v25 = vmin.f32 %v534_v21, 127.0  ;;  %v539_v26 = vmul.f32 0.0625, %v535_v22  ;;  %v541_v28 = vmul.f32 0.0625, %v537_v24 }
 0x13f   : > { %v540_v27 = vmul.f32 0.0625, %v536_v23  ;;  %v542_v29 = vmul.f32 0.0625, %v538_v25  ;;  %v543_v30 = vmax.f32 %v539_v26, 0.0  ;;  %v545_v32 = vmax.f32 %v541_v28, 0.0 }
 0x141   : > { %v544_v31 = vmax.f32 %v540_v27, 0.0  ;;  %v546_v33 = vmax.f32 %v542_v29, 0.0 }
 0x143   : > { %v699_v34 = vpack.c.bf16 %v544_v31, %v543_v30  ;;  %v704_v35 = vpack.c.bf16 %v546_v33, %v545_v32 }
 0x145   : > { %700 = vst [vmem:[%s986_s3] sm:$0xff] %v699_v34   ;;  %706 = vst [vmem:[%s986_s3 + $0x8] sm:$0xff] %v704_v35  }
 0x146 PF: > { %s13_s16 = sadd.s32 1, %s860_s16   ;;  %s987_s12 = smov %s848_s13 }
 0x147   : > { %p10_p12 = scmp.ge.s32.totalorder %s13_s16, 5   ;;  %s988_s13 = smov %s918_s20 }
 0x148   : > { %s989_s14 = smov %s856_s15  ;;  %s990_s15 = smov %s992_s17 }
 0x149   :  { %12 = sbr.rel (!%p10_p12) target bundleno = 3 (0x3), region = 116 }

// kernel: _lambda_.27
= control target key start
LH: loop header
LB: loop body
LE: loop exit
PB: predicated region body
PF: predicated region fallthrough
CT: control target
= control target key end

     0   :  { %s385_s1 = inlined_call_operand.vmem [shape: bf16[128,128], index: 1, kind: input, shape index: {}]   ;;  %s386_s0 = inlined_call_operand.vmem [shape: bf16[32,128], index: 0, kind: input, shape index: {}]   ;;  %s387_s2 = inlined_call_operand.vmem [shape: f32[1,128], index: 2, kind: input, shape index: {}]   ;;  %s388_s3 = inlined_call_operand.vmem [shape: bf16[32,128], index: 3, kind: output, shape index: {}]  }
   0x1   :  { %v316_v0 = vld [vmem:[%s385_s1] sm:$0xff]   ;;  %v317_v1 = vld [vmem:[%s385_s1 + $0x8] sm:$0xff]   ;;  %v318_v2 = vld [vmem:[%s385_s1 + $0x10] sm:$0xff]  }
   0x2   :  { %288 = vmatprep.subr.bf16.mxu0 %v316_v0  ;;  %v319_v3 = vld [vmem:[%s385_s1 + $0x18] sm:$0xff]   ;;  %v324_v4 = vld [vmem:[%s386_s0] sm:$0xff]   ;;  %v321_v6 = vld [vmem:[%s385_s1 + $0x28] sm:$0xff]  }
   0x3   :  { %289 = vmatpush3.bf16.msra.mxu0 %v316_v0  ;;  %304 = vmatprep.mubr.bf16.mxu0 %v324_v4  ;;  %v320_v5 = vld [vmem:[%s385_s1 + $0x20] sm:$0xff]   ;;  %v322_v7 = vld [vmem:[%s385_s1 + $0x30] sm:$0xff]   ;;  %v323_v8 = vld [vmem:[%s385_s1 + $0x38] sm:$0xff]  }
   0x4   :  { %290 = vmatprep.subr.bf16.mxu0 %v317_v1  ;;  %v325_v9 = vld [vmem:[%s386_s0 + $0x8] sm:$0xff]   ;;  %v258_v26 = vld [vmem:[%s387_s2] ss:$0 sm:$0xff] }
   0x7   :  { %291 = vmatpush3.bf16.msra.mxu0 %v317_v1 }
   0x8   :  { %292 = vmatprep.subr.bf16.mxu0 %v318_v2 }
   0xb   :  { %293 = vmatpush3.bf16.msra.mxu0 %v318_v2 }
   0xc   :  { %294 = vmatprep.subr.bf16.mxu0 %v319_v3 }
   0xf   :  { %295 = vmatpush3.bf16.msra.mxu0 %v319_v3 }
  0x10   :  { %296 = vmatprep.subr.bf16.mxu0 %v320_v5 }
  0x13   :  { %297 = vmatpush3.bf16.msra.mxu0 %v320_v5 }
  0x14   :  { %298 = vmatprep.subr.bf16.mxu0 %v321_v6 }
  0x17   :  { %299 = vmatpush3.bf16.msra.mxu0 %v321_v6 }
  0x18   :  { %300 = vmatprep.subr.bf16.mxu0 %v322_v7 }
  0x1b   :  { %301 = vmatpush3.bf16.msra.mxu0 %v322_v7 }
  0x1c   :  { %302 = vmatprep.subr.bf16.mxu0 %v323_v8 }
  0x1f   :  { %303 = vmatpush3.bf16.msra.mxu0 %v323_v8 }
  0x22   :  { %305 = vmatmul.mubr.bf16.vlgmr.msra.gmra.mrb[0].mxu0 %v325_v9 }
  0xf5   :  { %v306_v10 = vpop.f32.mrb[0].mxu0 }
  0xf6   :  { %v174_v11 = vmul.f32 1024.0, %v306_v10  ;;  %v141_v12 = vpop.f32.mrb[1].mxu0 }
  0xf7   :  { %v172_v13 = vmul.f32 1024.0, %v141_v12  ;;  %v307_v14 = vpop.f32.mrb[2].mxu0 }
  0xf8   :  { %v310_v15 = vround.rtne.f32 %v174_v11  ;;  %v175_v16 = vmul.f32 1024.0, %v307_v14  ;;  %v144_v17 = vpop.f32.mrb[3].mxu0 }
  0xf9   :  { %v308_v18 = vround.rtne.f32 %v172_v13  ;;  %v173_v19 = vmul.f32 1024.0, %v144_v17 }
  0xfa   :  { %v182_v20 = vmax.f32 %v310_v15, -32768.0  ;;  %v311_v21 = vround.rtne.f32 %v175_v16 }
  0xfb   :  { %v180_v22 = vmax.f32 %v308_v18, -32768.0  ;;  %v309_v23 = vround.rtne.f32 %v173_v19 }
  0xfc   :  { %v186_v24 = vmin.f32 %v182_v20, 32767.0  ;;  %v183_v25 = vmax.f32 %v311_v21, -32768.0 }
  0xfd   :  { %v184_v27 = vmin.f32 %v180_v22, 32767.0  ;;  %v181_v28 = vmax.f32 %v309_v23, -32768.0 }
  0xfe   :  { %v190_v29 = vmul.f32 0.0009765625, %v186_v24  ;;  %v187_v30 = vmin.f32 %v183_v25, 32767.0 }
  0xff   :  { %v188_v31 = vmul.f32 0.0009765625, %v184_v27  ;;  %v185_v32 = vmin.f32 %v181_v28, 32767.0 }
 0x100   :  { %v201_v33 = vadd.f32 %v258_v26, %v190_v29  ;;  %v191_v34 = vmul.f32 0.0009765625, %v187_v30 }
 0x101   :  { %v199_v35 = vadd.f32 %v258_v26, %v188_v31  ;;  %v189_v36 = vmul.f32 0.0009765625, %v185_v32 }
 0x102   :  { %v206_v37 = vmul.f32 16.0, %v201_v33  ;;  %v202_v38 = vadd.f32 %v258_v26, %v191_v34 }
 0x103   :  { %v204_v39 = vmul.f32 16.0, %v199_v35  ;;  %v200_v40 = vadd.f32 %v258_v26, %v189_v36 }
 0x104   :  { %v314_v41 = vround.rtne.f32 %v206_v37  ;;  %v207_v42 = vmul.f32 16.0, %v202_v38 }
 0x105   :  { %v312_v43 = vround.rtne.f32 %v204_v39  ;;  %v205_v44 = vmul.f32 16.0, %v200_v40 }
 0x106   :  { %v214_v45 = vmax.f32 %v314_v41, -128.0  ;;  %v315_v46 = vround.rtne.f32 %v207_v42 }
 0x107   :  { %v212_v47 = vmax.f32 %v312_v43, -128.0  ;;  %v313_v48 = vround.rtne.f32 %v205_v44 }
 0x108   :  { %v218_v49 = vmin.f32 %v214_v45, 127.0  ;;  %v215_v50 = vmax.f32 %v315_v46, -128.0 }
 0x109   :  { %v216_v51 = vmin.f32 %v212_v47, 127.0  ;;  %v213_v52 = vmax.f32 %v313_v48, -128.0 }
 0x10a   :  { %v219_v53 = vmin.f32 %v215_v50, 127.0  ;;  %v222_v55 = vmul.f32 0.0625, %v218_v49 }
 0x10b   :  { %v217_v54 = vmin.f32 %v213_v52, 127.0  ;;  %v220_v57 = vmul.f32 0.0625, %v216_v51 }
 0x10c   :  { %v223_v56 = vmul.f32 0.0625, %v219_v53 }
 0x10d   :  { %v221_v58 = vmul.f32 0.0625, %v217_v54 }
 0x10e   :  { %v275_v59 = vpack.c.bf16 %v223_v56, %v222_v55 }
 0x10f   :  { %v270_v60 = vpack.c.bf16 %v221_v58, %v220_v57 }
 0x110   :  { %277 = vst [vmem:[%s388_s3 + $0x8] sm:$0xff] %v275_v59  }
 0x111   :  { %271 = vst [vmem:[%s388_s3] sm:$0xff] %v270_v60  }

// kernel: _lambda_.29
= control target key start
LH: loop header
LB: loop body
LE: loop exit
PB: predicated region body
PF: predicated region fallthrough
CT: control target
= control target key end

     0   :  { %s883_s12 = smov 0   ;;  %s885_s13 = smov 0   ;;  %s983_s0 = inlined_call_operand.vmem [shape: bf16[32,1280], index: 0, kind: input, shape index: {}]   ;;  %s984_s1 = inlined_call_operand.vmem [shape: bf16[1280,128], index: 1, kind: input, shape index: {}]   ;;  %s985_s2 = inlined_call_operand.vmem [shape: f32[1,128], index: 2, kind: input, shape index: {}]   ;;  %s986_s3 = inlined_call_operand.vmem [shape: bf16[32,128], index: 3, kind: output, shape index: {}]  }
   0x1   :  { %s887_s14 = smov 0   ;;  %s889_s15 = smov 0  }
   0x2   :  { %s891_s16 = smov 0  }
   0x3 LB: > { %s22_s17 = sadd.s32 1, %s856_s15  ;;  %p41_p1 = scmp.ne.s32.totalorder %s848_s13, %s844_s12  ;;  %s860_s16 = sphi %s891_s16, %s13_s16   ;;  %s856_s15 = sphi %s889_s15, %s990_s15   ;;  %s852_s14 = sphi %s887_s14, %s989_s14   ;;  %s848_s13 = sphi %s885_s13, %s988_s13   ;;  %s844_s12 = sphi %s883_s12, %s987_s12  }
   0x4   : > { %p23_p0 = scmp.ge.s32.totalorder %s22_s17, 5  ;;  %p42_p2 = scmp.eq.s32.totalorder %s860_s16, 0 }
   0x5   : > { %s34_s19 = sadd.s32 1, %s848_s13  ;;  %p652_p5 = scmp.ge.s32.totalorder %s860_s16, 5 }
   0x6   : > { %s992_s17 = smov (%p23_p0, %s22_s17), 0  ;;  %p43_p3 = por %p42_p2, %p41_p1 }
   0x7   : > { %s30_s18 = ssub.s32 %s856_s15, %s992_s17  ;;  %143 = sbr.rel (%p652_p5) target bundleno = 21 (0x15), region = 20 }
   0x8   : > { %p32_p4 = scmp.eq.s32.totalorder %s30_s18, 0 }
   0xa   : > { %s918_s20 = scalar_select %p32_p4, %s848_s13, %s34_s19  }
   0xe   : > { %146 = sbr.rel (!%p43_p3) target bundleno = 21 (0x15), region = 24  ;;  %s148_s21 = sand.u32 (%p43_p3), 1, %s848_s13  }
   0xf   : > { %s691_s22 = sshll.u32 (%p43_p3), %s856_s15, 3  ;;  %s653_s23 = sshll.u32 (%p43_p3), %s148_s21, 5 }
  0x10   : > { %s156_s26 = scalar_lea.vmem (%p43_p3), %s983_s0, %s691_s22  ;;  %s150_s27 = scalar_lea.vmem (%p43_p3), [#allocation3], %s653_s23 }
  0x11   : > { %v190_v0 = vld [vmem:[%s156_s26] sm:$0xff] (%p43_p3)  ;;  %v192_v1 = vld [vmem:[%s156_s26 + $0x28] sm:$0xff] (%p43_p3)  ;;  %v194_v2 = vld [vmem:[%s156_s26 + $0x50] sm:$0xff] (%p43_p3) }
  0x12   : > { %191 = vst [vmem:[%s150_s27] sm:$0xff] (%p43_p3), %v190_v0  ;;  %193 = vst [vmem:[%s150_s27 + $0x8] sm:$0xff] (%p43_p3), %v192_v1  ;;  %v196_v3 = vld [vmem:[%s156_s26 + $0x78] sm:$0xff] (%p43_p3) }
  0x13   : > { %195 = vst [vmem:[%s150_s27 + $0x10] sm:$0xff] (%p43_p3), %v194_v2  ;;  %197 = vst [vmem:[%s150_s27 + $0x18] sm:$0xff] (%p43_p3), %v196_v3 }
  0x15 PF: > { %p656_p6 = scmp.ge.s32.totalorder %s860_s16, 1  ;;  %p211_p7 = scmp.lt.s32.totalorder %s860_s16, 6 }
  0x17   : > { %p212_p8 = pnand %p656_p6, %p211_p7 }
  0x18   : > { %s218_s28 = sand.u32 (!%p212_p8), 1, %s844_s12   ;;  %s658_s29 = sshll.u32 (!%p212_p8), %s852_s14, 5 }
  0x19   : > { %215 = sbr.rel (%p212_p8) target bundleno = 326 (0x146), region = 66  ;;  %s657_s30 = sshll.u32 (!%p212_p8), %s218_s28, 5 }
  0x1a   : > { %p249_p9 = scmp.lt.s32.totalorder (!%p212_p8), %s658_s29, 159  ;;  %s935_s8 = scalar_lea.vmem (!%p212_p8), [#allocation3], %s657_s30 }
  0x1b   : > { %p660_p10 = scmp.ne.s32.totalorder (!%p212_p8), %s852_s14, 0 }
  0x20   : > { %s994_s29 = smov (!%p249_p9, %s658_s29), 159  ;;  %264 = sbr.rel (%p660_p10) target bundleno = 39 (0x27), region = 74 }
  0x21   : > { %s659_s4 = sshll.u32 %s994_s29, 2  ;;  %v862_v4 = vmov (!%p660_p10), 0.0  }
  0x22   : > { %s933_s7 = scalar_lea.vmem %s984_s1, %s659_s4  ;;  %265 = vst [vmem:[#allocation2] sm:$0xff] (!%p660_p10), %v862_v4  ;;  %266 = vst [vmem:[#allocation2 + $0x8] sm:$0xff] (!%p660_p10), %v862_v4 }
  0x23   : > { %267 = vst [vmem:[#allocation2 + $0x10] sm:$0xff] (!%p660_p10), %v862_v4  ;;  %268 = vst [vmem:[#allocation2 + $0x18] sm:$0xff] (!%p660_p10), %v862_v4 }
  0x27 PF: > { %v800_v5 = vld [vmem:[%s933_s7 + $0x40] sm:$0xff]   ;;  %v802_v7 = vld [vmem:[%s933_s7 + $0x48] sm:$0xff]   ;;  %v804_v9 = vld [vmem:[%s933_s7 + $0x50] sm:$0xff]   ;;  %p681_p11 = scmp.ne.s32.totalorder %s852_s14, 4 }
  0x28   : > { %v801_v6 = vld [vmem:[%s933_s7] sm:$0xff]   ;;  %707 = vmatprep.subr.bf16.mxu0 %v800_v5  ;;  %735 = vmatprep.subr.bf16.mxu1 %v800_v5  ;;  %v803_v8 = vld [vmem:[%s933_s7 + $0x8] sm:$0xff]   ;;  %v805_v10 = vld [vmem:[%s933_s7 + $0x10] sm:$0xff]  }
  0x29   : > { %708 = vmatpush3.bf16.msra.mxu0 %v801_v6  ;;  %743 = vmatpush3.bf16.msra.mxu1 %v801_v6  ;;  %v806_v11 = vld [vmem:[%s933_s7 + $0x58] sm:$0xff]   ;;  %v808_v13 = vld [vmem:[%s933_s7 + $0x60] sm:$0xff]   ;;  %v810_v15 = vld [vmem:[%s933_s7 + $0x68] sm:$0xff]  }
  0x2a   : > { %709 = vmatprep.subr.bf16.mxu0 %v802_v7  ;;  %736 = vmatprep.subr.bf16.mxu1 %v802_v7  ;;  %v807_v12 = vld [vmem:[%s933_s7 + $0x18] sm:$0xff]   ;;  %v809_v14 = vld [vmem:[%s933_s7 + $0x20] sm:$0xff]   ;;  %v811_v18 = vld [vmem:[%s933_s7 + $0x28] sm:$0xff]  }
  0x2b   : > { %v818_v16 = vld [vmem:[%s935_s8 + $0x4] ss:$8 sps:$4 sm:$0xff]   ;;  %v821_v17 = vld [vmem:[%s935_s8 + $0x14] ss:$8 sps:$4 sm:$0xff]   ;;  %v816_v23 = vld [vmem:[%s935_s8] ss:$8 sps:$4 sm:$0xff]  }
  0x2c   : > { %v812_v19 = vld [vmem:[%s933_s7 + $0x70] sm:$0xff]   ;;  %457 = vmatprep.mubr.bf16.mxu0 %v818_v16  ;;  %465 = vmatprep.mubr.bf16.mxu1 %v821_v17  ;;  %v814_v21 = vld [vmem:[%s933_s7 + $0x78] sm:$0xff]   ;;  %v269_v27 = vld [vmem:[#allocation2] sm:$0xff] }
  0x2d   : > { %710 = vmatpush3.bf16.msra.mxu0 %v803_v8  ;;  %744 = vmatpush3.bf16.msra.mxu1 %v803_v8  ;;  %v813_v20 = vld [vmem:[%s933_s7 + $0x30] sm:$0xff]   ;;  %v815_v22 = vld [vmem:[%s933_s7 + $0x38] sm:$0xff]   ;;  %v270_v35 = vld [vmem:[#allocation2 + $0x8] sm:$0xff] }
  0x2e   : > { %711 = vmatprep.subr.bf16.mxu0 %v804_v9  ;;  %737 = vmatprep.subr.bf16.mxu1 %v804_v9  ;;  %v819_v24 = vld [vmem:[%s935_s8 + $0x10] ss:$8 sps:$4 sm:$0xff]   ;;  %v682_v63 = vld [vmem:[%s985_s2] ss:$0 sm:$0xff] (!%p681_p11) }
  0x2f   : > { %v271_v29 = vld [vmem:[#allocation2 + $0x10] sm:$0xff]  ;;  %v272_v37 = vld [vmem:[#allocation2 + $0x18] sm:$0xff] }
  0x31   : > { %712 = vmatpush3.bf16.msra.mxu0 %v805_v10  ;;  %745 = vmatpush3.bf16.msra.mxu1 %v805_v10 }
  0x32   : > { %713 = vmatprep.subr.bf16.mxu0 %v806_v11  ;;  %738 = vmatprep.subr.bf16.mxu1 %v806_v11 }
  0x35   : > { %714 = vmatpush3.bf16.msra.mxu0 %v807_v12  ;;  %746 = vmatpush3.bf16.msra.mxu1 %v807_v12 }
  0x36   : > { %715 = vmatprep.subr.bf16.mxu0 %v808_v13  ;;  %739 = vmatprep.subr.bf16.mxu1 %v808_v13 }
  0x39   : > { %716 = vmatpush3.bf16.msra.mxu0 %v809_v14  ;;  %747 = vmatpush3.bf16.msra.mxu1 %v809_v14 }
  0x3a   : > { %717 = vmatprep.subr.bf16.mxu0 %v810_v15  ;;  %740 = vmatprep.subr.bf16.mxu1 %v810_v15 }
  0x3d   : > { %718 = vmatpush3.bf16.msra.mxu0 %v811_v18  ;;  %748 = vmatpush3.bf16.msra.mxu1 %v811_v18 }
  0x3e   : > { %719 = vmatprep.subr.bf16.mxu0 %v812_v19  ;;  %741 = vmatprep.subr.bf16.mxu1 %v812_v19 }
  0x41   : > { %720 = vmatpush3.bf16.msra.mxu0 %v813_v20  ;;  %749 = vmatpush3.bf16.msra.mxu1 %v813_v20 }
  0x42   : > { %721 = vmatprep.subr.bf16.mxu0 %v814_v21  ;;  %742 = vmatprep.subr.bf16.mxu1 %v814_v21 }
  0x45   : > { %722 = vmatpush3.bf16.msra.mxu0 %v815_v22  ;;  %750 = vmatpush3.bf16.msra.mxu1 %v815_v22 }
  0x48   : > { %458 = vmatmul.mubr.bf16.vlgmr.msra.gmra.mrb[0].mxu0 %v816_v23  ;;  %466 = vmatmul.mubr.bf16.vlgmr.msra.gmra.mrb[0].mxu1 %v819_v24 }
 0x11b   : > { %v723_v25 = vpop.f32.mrb[0].mxu0  ;;  %v729_v26 = vpop.f32.mrb[0].mxu1 }
 0x11c   : > { %v724_v28 = vpop.f32.mrb[1].mxu0  ;;  %v730_v30 = vpop.f32.mrb[1].mxu1 }
 0x11d   : > { %v725_v31 = vadd.f32 %v724_v28, %v723_v25  ;;  %v731_v32 = vadd.f32 %v730_v30, %v729_v26  ;;  %v726_v33 = vpop.f32.mrb[2].mxu0  ;;  %v732_v34 = vpop.f32.mrb[2].mxu1  ;;  %485 = sbr.rel (%p681_p11) target bundleno = 326 (0x146), region = 78 }
 0x11e   : > { %v727_v36 = vpop.f32.mrb[3].mxu0  ;;  %v733_v38 = vpop.f32.mrb[3].mxu1 }
 0x11f   : > { %v474_v39 = vadd.f32 %v725_v31, %v269_v27  ;;  %v476_v40 = vadd.f32 %v731_v32, %v271_v29  ;;  %v728_v41 = vadd.f32 %v727_v36, %v726_v33  ;;  %v734_v42 = vadd.f32 %v733_v38, %v732_v34 }
 0x121   : > { %478 = vst [vmem:[#allocation2] sm:$0xff] %v474_v39  ;;  %480 = vst [vmem:[#allocation2 + $0x10] sm:$0xff] %v476_v40  ;;  %v475_v43 = vadd.f32 %v728_v41, %v270_v35  ;;  %v477_v44 = vadd.f32 %v734_v42, %v272_v37 }
 0x123   : > { %479 = vst [vmem:[#allocation2 + $0x8] sm:$0xff] %v475_v43  ;;  %481 = vst [vmem:[#allocation2 + $0x18] sm:$0xff] %v477_v44 }
 0x128   : > { %v486_v45 = vld [vmem:[#allocation2] sm:$0xff]  ;;  %v488_v49 = vld [vmem:[#allocation2 + $0x10] sm:$0xff] }
 0x129   : > { %v491_v47 = vmul.f32 1024.0, %v486_v45  ;;  %v493_v51 = vmul.f32 1024.0, %v488_v49 }
 0x12a   : > { %v487_v46 = vld [vmem:[#allocation2 + $0x8] sm:$0xff]  ;;  %v489_v50 = vld [vmem:[#allocation2 + $0x18] sm:$0xff] }
 0x12b   : > { %v492_v48 = vmul.f32 1024.0, %v487_v46  ;;  %v494_v52 = vmul.f32 1024.0, %v489_v50  ;;  %v751_v53 = vround.rtne.f32 %v491_v47  ;;  %v753_v55 = vround.rtne.f32 %v493_v51 }
 0x12d   : > { %v752_v54 = vround.rtne.f32 %v492_v48  ;;  %v754_v56 = vround.rtne.f32 %v494_v52  ;;  %v499_v57 = vmax.f32 %v751_v53, -32768.0  ;;  %v501_v59 = vmax.f32 %v753_v55, -32768.0 }
 0x12f   : > { %v500_v58 = vmax.f32 %v752_v54, -32768.0  ;;  %v502_v60 = vmax.f32 %v754_v56, -32768.0  ;;  %v503_v61 = vmin.f32 %v499_v57, 32767.0  ;;  %v505_v0 = vmin.f32 %v501_v59, 32767.0 }
 0x131   : > { %v504_v62 = vmin.f32 %v500_v58, 32767.0  ;;  %v506_v1 = vmin.f32 %v502_v60, 32767.0  ;;  %v507_v2 = vmul.f32 0.0009765625, %v503_v61  ;;  %v509_v4 = vmul.f32 0.0009765625, %v505_v0 }
 0x133   : > { %v508_v3 = vmul.f32 0.0009765625, %v504_v62  ;;  %v510_v5 = vmul.f32 0.0009765625, %v506_v1  ;;  %v518_v6 = vadd.f32 %v682_v63, %v507_v2  ;;  %v520_v8 = vadd.f32 %v682_v63, %v509_v4 }
 0x135   : > { %v519_v7 = vadd.f32 %v682_v63, %v508_v3  ;;  %v521_v9 = vadd.f32 %v682_v63, %v510_v5  ;;  %v523_v10 = vmul.f32 16.0, %v518_v6  ;;  %v525_v12 = vmul.f32 16.0, %v520_v8 }
 0x137   : > { %v524_v11 = vmul.f32 16.0, %v519_v7  ;;  %v526_v13 = vmul.f32 16.0, %v521_v9  ;;  %v755_v14 = vround.rtne.f32 %v523_v10  ;;  %v757_v16 = vround.rtne.f32 %v525_v12 }
 0x139   : > { %v756_v15 = vround.rtne.f32 %v524_v11  ;;  %v758_v17 = vround.rtne.f32 %v526_v13  ;;  %v531_v18 = vmax.f32 %v755_v14, -128.0  ;;  %v533_v20 = vmax.f32 %v757_v16, -128.0 }
 0x13b   : > { %v532_v19 = vmax.f32 %v756_v15, -128.0  ;;  %v534_v21 = vmax.f32 %v758_v17, -128.0  ;;  %v535_v22 = vmin.f32 %v531_v18, 127.0  ;;  %v537_v24 = vmin.f32 %v533_v20, 127.0 }
 0x13d   : > { %v536_v23 = vmin.f32 %v532_v19, 127.0  ;;  %v538_v25 = vmin.f32 %v534_v21, 127.0  ;;  %v539_v26 = vmul.f32 0.0625, %v535_v22  ;;  %v541_v28 = vmul.f32 0.0625, %v537_v24 }
 0x13f   : > { %v540_v27 = vmul.f32 0.0625, %v536_v23  ;;  %v542_v29 = vmul.f32 0.0625, %v538_v25  ;;  %v543_v30 = vmax.f32 %v539_v26, 0.0  ;;  %v545_v32 = vmax.f32 %v541_v28, 0.0 }
 0x141   : > { %v544_v31 = vmax.f32 %v540_v27, 0.0  ;;  %v546_v33 = vmax.f32 %v542_v29, 0.0 }
 0x143   : > { %v699_v34 = vpack.c.bf16 %v544_v31, %v543_v30  ;;  %v704_v35 = vpack.c.bf16 %v546_v33, %v545_v32 }
 0x145   : > { %700 = vst [vmem:[%s986_s3] sm:$0xff] %v699_v34   ;;  %706 = vst [vmem:[%s986_s3 + $0x8] sm:$0xff] %v704_v35  }
 0x146 PF: > { %s13_s16 = sadd.s32 1, %s860_s16   ;;  %s987_s12 = smov %s848_s13 }
 0x147   : > { %p10_p12 = scmp.ge.s32.totalorder %s13_s16, 7   ;;  %s988_s13 = smov %s918_s20 }
 0x148   : > { %s989_s14 = smov %s856_s15  ;;  %s990_s15 = smov %s992_s17 }
 0x149   :  { %12 = sbr.rel (!%p10_p12) target bundleno = 3 (0x3), region = 116 }

// kernel: _lambda_.28
= control target key start
LH: loop header
LB: loop body
LE: loop exit
PB: predicated region body
PF: predicated region fallthrough
CT: control target
= control target key end

     0   :  { %s1086_s21 = smov 0   ;;  %s1088_s22 = smov 0   ;;  %s1198_s0 = inlined_call_operand.vmem [shape: bf16[32,1280], index: 0, kind: input, shape index: {}]   ;;  %s1199_s1 = inlined_call_operand.vmem [shape: bf16[1280,128], index: 1, kind: input, shape index: {}]   ;;  %s1200_s2 = inlined_call_operand.vmem [shape: f32[1,128], index: 2, kind: input, shape index: {}]   ;;  %s1201_s3 = inlined_call_operand.vmem [shape: bf16[32,128], index: 3, kind: input, shape index: {}]   ;;  %s1202_s4 = inlined_call_operand.vmem [shape: f32[1,128], index: 4, kind: input, shape index: {}]   ;;  %s1203_s5 = inlined_call_operand.vmem [shape: f32[1,128], index: 5, kind: input, shape index: {}]   ;;  %s1204_s6 = inlined_call_operand.vmem [shape: bf16[32,128], index: 6, kind: output, shape index: {}]  }
   0x1   :  { %s1090_s23 = smov 0   ;;  %s1092_s24 = smov 0  }
   0x2   :  { %s1094_s25 = smov 0  }
   0x3 LB: > { %s25_s26 = sadd.s32 1, %s1044_s24  ;;  %p44_p1 = scmp.ne.s32.totalorder %s1036_s22, %s1032_s21  ;;  %s1048_s25 = sphi %s1094_s25, %s16_s25   ;;  %s1044_s24 = sphi %s1092_s24, %s1208_s24   ;;  %s1040_s23 = sphi %s1090_s23, %s1207_s23   ;;  %s1036_s22 = sphi %s1088_s22, %s1206_s22   ;;  %s1032_s21 = sphi %s1086_s21, %s1205_s21  }
   0x4   : > { %p26_p0 = scmp.ge.s32.totalorder %s25_s26, 5  ;;  %p45_p2 = scmp.eq.s32.totalorder %s1048_s25, 0 }
   0x5   : > { %s37_s28 = sadd.s32 1, %s1036_s22  ;;  %p825_p5 = scmp.ge.s32.totalorder %s1048_s25, 5 }
   0x6   : > { %s1210_s26 = smov (%p26_p0, %s25_s26), 0  ;;  %p46_p3 = por %p45_p2, %p44_p1 }
   0x7   : > { %s33_s27 = ssub.s32 %s1044_s24, %s1210_s26  ;;  %229 = sbr.rel (%p825_p5) target bundleno = 21 (0x15), region = 32 }
   0x8   : > { %p35_p4 = scmp.eq.s32.totalorder %s33_s27, 0 }
   0xa   : > { %s1121_s29 = scalar_select %p35_p4, %s1036_s22, %s37_s28  }
   0xe   : > { %232 = sbr.rel (!%p46_p3) target bundleno = 21 (0x15), region = 36  ;;  %s234_s30 = sand.u32 (%p46_p3), 1, %s1036_s22  }
   0xf   : > { %s866_s7 = sshll.u32 (%p46_p3), %s1044_s24, 3  ;;  %s826_s8 = sshll.u32 (%p46_p3), %s234_s30, 5 }
  0x10   : > { %s242_s11 = scalar_lea.vmem (%p46_p3), %s1198_s0, %s866_s7  ;;  %s236_s12 = scalar_lea.vmem (%p46_p3), [#allocation3], %s826_s8 }
  0x11   : > { %v276_v0 = vld [vmem:[%s242_s11] sm:$0xff] (%p46_p3)  ;;  %v278_v1 = vld [vmem:[%s242_s11 + $0x28] sm:$0xff] (%p46_p3)  ;;  %v280_v2 = vld [vmem:[%s242_s11 + $0x50] sm:$0xff] (%p46_p3) }
  0x12   : > { %277 = vst [vmem:[%s236_s12] sm:$0xff] (%p46_p3), %v276_v0  ;;  %279 = vst [vmem:[%s236_s12 + $0x8] sm:$0xff] (%p46_p3), %v278_v1  ;;  %v282_v3 = vld [vmem:[%s242_s11 + $0x78] sm:$0xff] (%p46_p3) }
  0x13   : > { %281 = vst [vmem:[%s236_s12 + $0x10] sm:$0xff] (%p46_p3), %v280_v2  ;;  %283 = vst [vmem:[%s236_s12 + $0x18] sm:$0xff] (%p46_p3), %v282_v3 }
  0x15 PF: > { %p829_p6 = scmp.ge.s32.totalorder %s1048_s25, 1  ;;  %p297_p7 = scmp.lt.s32.totalorder %s1048_s25, 6 }
  0x17   : > { %p298_p8 = pnand %p829_p6, %p297_p7 }
  0x18   : > { %s304_s13 = sand.u32 (!%p298_p8), 1, %s1032_s21   ;;  %s831_s14 = sshll.u32 (!%p298_p8), %s1040_s23, 5 }
  0x19   : > { %301 = sbr.rel (%p298_p8) target bundleno = 340 (0x154), region = 78  ;;  %s830_s15 = sshll.u32 (!%p298_p8), %s304_s13, 5 }
  0x1a   : > { %p346_p9 = scmp.lt.s32.totalorder (!%p298_p8), %s831_s14, 159  ;;  %s1138_s20 = scalar_lea.vmem (!%p298_p8), [#allocation3], %s830_s15 }
  0x1b   : > { %p833_p10 = scmp.ne.s32.totalorder (!%p298_p8), %s1040_s23, 0 }
  0x20   : > { %s1212_s14 = smov (!%p346_p9, %s831_s14), 159  ;;  %367 = sbr.rel (%p833_p10) target bundleno = 39 (0x27), region = 86 }
  0x21   : > { %s832_s16 = sshll.u32 %s1212_s14, 2  ;;  %v1050_v4 = vmov (!%p833_p10), 0.0  }
  0x22   : > { %s1136_s19 = scalar_lea.vmem %s1199_s1, %s832_s16  ;;  %368 = vst [vmem:[#allocation2] sm:$0xff] (!%p833_p10), %v1050_v4  ;;  %369 = vst [vmem:[#allocation2 + $0x8] sm:$0xff] (!%p833_p10), %v1050_v4 }
  0x23   : > { %370 = vst [vmem:[#allocation2 + $0x10] sm:$0xff] (!%p833_p10), %v1050_v4  ;;  %371 = vst [vmem:[#allocation2 + $0x18] sm:$0xff] (!%p833_p10), %v1050_v4 }
  0x27 PF: > { %v988_v5 = vld [vmem:[%s1136_s19 + $0x40] sm:$0xff]   ;;  %v990_v7 = vld [vmem:[%s1136_s19 + $0x48] sm:$0xff]   ;;  %v992_v9 = vld [vmem:[%s1136_s19 + $0x50] sm:$0xff]   ;;  %p854_p11 = scmp.ne.s32.totalorder %s1040_s23, 4 }
  0x28   : > { %v989_v6 = vld [vmem:[%s1136_s19] sm:$0xff]   ;;  %891 = vmatprep.subr.bf16.mxu0 %v988_v5  ;;  %919 = vmatprep.subr.bf16.mxu1 %v988_v5  ;;  %v991_v8 = vld [vmem:[%s1136_s19 + $0x8] sm:$0xff]   ;;  %v993_v10 = vld [vmem:[%s1136_s19 + $0x10] sm:$0xff]  }
  0x29   : > { %892 = vmatpush3.bf16.msra.mxu0 %v989_v6  ;;  %927 = vmatpush3.bf16.msra.mxu1 %v989_v6  ;;  %v994_v11 = vld [vmem:[%s1136_s19 + $0x58] sm:$0xff]   ;;  %v996_v13 = vld [vmem:[%s1136_s19 + $0x60] sm:$0xff]   ;;  %v998_v15 = vld [vmem:[%s1136_s19 + $0x68] sm:$0xff]  }
  0x2a   : > { %893 = vmatprep.subr.bf16.mxu0 %v990_v7  ;;  %920 = vmatprep.subr.bf16.mxu1 %v990_v7  ;;  %v995_v12 = vld [vmem:[%s1136_s19 + $0x18] sm:$0xff]   ;;  %v997_v14 = vld [vmem:[%s1136_s19 + $0x20] sm:$0xff]   ;;  %v999_v18 = vld [vmem:[%s1136_s19 + $0x28] sm:$0xff]  }
  0x2b   : > { %v1006_v16 = vld [vmem:[%s1138_s20 + $0x4] ss:$8 sps:$4 sm:$0xff]   ;;  %v1009_v17 = vld [vmem:[%s1138_s20 + $0x14] ss:$8 sps:$4 sm:$0xff]   ;;  %v1004_v23 = vld [vmem:[%s1138_s20] ss:$8 sps:$4 sm:$0xff]  }
  0x2c   : > { %v1000_v19 = vld [vmem:[%s1136_s19 + $0x70] sm:$0xff]   ;;  %560 = vmatprep.mubr.bf16.mxu0 %v1006_v16  ;;  %568 = vmatprep.mubr.bf16.mxu1 %v1009_v17  ;;  %v1002_v21 = vld [vmem:[%s1136_s19 + $0x78] sm:$0xff]   ;;  %v372_v27 = vld [vmem:[#allocation2] sm:$0xff] }
  0x2d   : > { %894 = vmatpush3.bf16.msra.mxu0 %v991_v8  ;;  %928 = vmatpush3.bf16.msra.mxu1 %v991_v8  ;;  %v1001_v20 = vld [vmem:[%s1136_s19 + $0x30] sm:$0xff]   ;;  %v1003_v22 = vld [vmem:[%s1136_s19 + $0x38] sm:$0xff]   ;;  %v373_v35 = vld [vmem:[#allocation2 + $0x8] sm:$0xff] }
  0x2e   : > { %895 = vmatprep.subr.bf16.mxu0 %v992_v9  ;;  %921 = vmatprep.subr.bf16.mxu1 %v992_v9  ;;  %v1007_v24 = vld [vmem:[%s1138_s20 + $0x10] ss:$8 sps:$4 sm:$0xff]   ;;  %v855_v63 = vld [vmem:[%s1200_s2] ss:$0 sm:$0xff] (!%p854_p11)  ;;  %v889_v17 = vld [vmem:[%s1201_s3 + $0x8] sm:$0xff] (!%p854_p11)  }
  0x2f   : > { %v374_v29 = vld [vmem:[#allocation2 + $0x10] sm:$0xff]  ;;  %v375_v37 = vld [vmem:[#allocation2 + $0x18] sm:$0xff] }
  0x31   : > { %896 = vmatpush3.bf16.msra.mxu0 %v993_v10  ;;  %929 = vmatpush3.bf16.msra.mxu1 %v993_v10 }
  0x32   : > { %897 = vmatprep.subr.bf16.mxu0 %v994_v11  ;;  %922 = vmatprep.subr.bf16.mxu1 %v994_v11  ;;  %v872_v11 = vld [vmem:[%s1201_s3] sm:$0xff] (!%p854_p11)  }
  0x35   : > { %898 = vmatpush3.bf16.msra.mxu0 %v995_v12  ;;  %930 = vmatpush3.bf16.msra.mxu1 %v995_v12 }
  0x36   : > { %899 = vmatprep.subr.bf16.mxu0 %v996_v13  ;;  %923 = vmatprep.subr.bf16.mxu1 %v996_v13 }
  0x39   : > { %900 = vmatpush3.bf16.msra.mxu0 %v997_v14  ;;  %931 = vmatpush3.bf16.msra.mxu1 %v997_v14 }
  0x3a   : > { %901 = vmatprep.subr.bf16.mxu0 %v998_v15  ;;  %924 = vmatprep.subr.bf16.mxu1 %v998_v15 }
  0x3d   : > { %902 = vmatpush3.bf16.msra.mxu0 %v999_v18  ;;  %932 = vmatpush3.bf16.msra.mxu1 %v999_v18  ;;  %v873_v18 = vunpack.c.l.bf16 (!%p854_p11), %v872_v11 }
  0x3e   : > { %903 = vmatprep.subr.bf16.mxu0 %v1000_v19  ;;  %925 = vmatprep.subr.bf16.mxu1 %v1000_v19 }
  0x41   : > { %904 = vmatpush3.bf16.msra.mxu0 %v1001_v20  ;;  %933 = vmatpush3.bf16.msra.mxu1 %v1001_v20 }
  0x42   : > { %905 = vmatprep.subr.bf16.mxu0 %v1002_v21  ;;  %926 = vmatprep.subr.bf16.mxu1 %v1002_v21 }
  0x45   : > { %906 = vmatpush3.bf16.msra.mxu0 %v1003_v22  ;;  %934 = vmatpush3.bf16.msra.mxu1 %v1003_v22  ;;  %v874_v22 = vunpack.c.h.bf16 (!%p854_p11), %v872_v11 }
  0x48   : > { %561 = vmatmul.mubr.bf16.vlgmr.msra.gmra.mrb[0].mxu0 %v1004_v23  ;;  %569 = vmatmul.mubr.bf16.vlgmr.msra.gmra.mrb[0].mxu1 %v1007_v24  ;;  %v857_v23 = vld [vmem:[%s1203_s5] ss:$0 sm:$0xff] (!%p854_p11) }
 0x11b   : > { %v907_v25 = vpop.f32.mrb[0].mxu0  ;;  %v913_v26 = vpop.f32.mrb[0].mxu1 }
 0x11c   : > { %v908_v28 = vpop.f32.mrb[1].mxu0  ;;  %v914_v30 = vpop.f32.mrb[1].mxu1 }
 0x11d   : > { %v909_v31 = vadd.f32 %v908_v28, %v907_v25  ;;  %v915_v32 = vadd.f32 %v914_v30, %v913_v26  ;;  %v910_v33 = vpop.f32.mrb[2].mxu0  ;;  %v916_v34 = vpop.f32.mrb[2].mxu1  ;;  %588 = sbr.rel (%p854_p11) target bundleno = 340 (0x154), region = 90  ;;  %v877_v26 = vunpack.c.l.bf16 (!%p854_p11), %v889_v17  ;;  %v878_v30 = vunpack.c.h.bf16 (!%p854_p11), %v889_v17 }
 0x11e   : > { %v911_v36 = vpop.f32.mrb[3].mxu0  ;;  %v917_v38 = vpop.f32.mrb[3].mxu1 }
 0x11f   : > { %v577_v39 = vadd.f32 %v909_v31, %v372_v27  ;;  %v579_v40 = vadd.f32 %v915_v32, %v374_v29  ;;  %v912_v41 = vadd.f32 %v911_v36, %v910_v33  ;;  %v918_v42 = vadd.f32 %v917_v38, %v916_v34  ;;  %v856_v31 = vld [vmem:[%s1202_s4] ss:$0 sm:$0xff] (!%p854_p11) }
 0x120   : > { %v672_v32 = vmul.f32 (!%p854_p11), %v873_v18, %v857_v23  ;;  %v673_v36 = vmul.f32 (!%p854_p11), %v874_v22, %v857_v23 }
 0x121   : > { %581 = vst [vmem:[#allocation2] sm:$0xff] %v577_v39  ;;  %583 = vst [vmem:[#allocation2 + $0x10] sm:$0xff] %v579_v40  ;;  %v578_v43 = vadd.f32 %v912_v41, %v373_v35  ;;  %v580_v44 = vadd.f32 %v918_v42, %v375_v37  ;;  %v674_v39 = vmul.f32 (!%p854_p11), %v877_v26, %v857_v23 }
 0x123   : > { %582 = vst [vmem:[#allocation2 + $0x8] sm:$0xff] %v578_v43  ;;  %584 = vst [vmem:[#allocation2 + $0x18] sm:$0xff] %v580_v44  ;;  %v675_v43 = vmul.f32 (!%p854_p11), %v878_v30, %v857_v23 }
 0x128   : > { %v589_v45 = vld [vmem:[#allocation2] sm:$0xff]  ;;  %v591_v49 = vld [vmem:[#allocation2 + $0x10] sm:$0xff] }
 0x129   : > { %v594_v47 = vmul.f32 1024.0, %v589_v45  ;;  %v596_v51 = vmul.f32 1024.0, %v591_v49 }
 0x12a   : > { %v590_v46 = vld [vmem:[#allocation2 + $0x8] sm:$0xff]  ;;  %v592_v50 = vld [vmem:[#allocation2 + $0x18] sm:$0xff] }
 0x12b   : > { %v595_v48 = vmul.f32 1024.0, %v590_v46  ;;  %v935_v52 = vround.rtne.f32 %v594_v47  ;;  %v597_v54 = vmul.f32 1024.0, %v592_v50  ;;  %v937_v55 = vround.rtne.f32 %v596_v51 }
 0x12d   : > { %v936_v53 = vround.rtne.f32 %v595_v48  ;;  %v602_v56 = vmax.f32 %v935_v52, -32768.0  ;;  %v938_v58 = vround.rtne.f32 %v597_v54  ;;  %v604_v59 = vmax.f32 %v937_v55, -32768.0 }
 0x12f   : > { %v603_v57 = vmax.f32 %v936_v53, -32768.0  ;;  %v606_v60 = vmin.f32 %v602_v56, 32767.0  ;;  %v605_v62 = vmax.f32 %v938_v58, -32768.0  ;;  %v608_v0 = vmin.f32 %v604_v59, 32767.0 }
 0x131   : > { %v607_v61 = vmin.f32 %v603_v57, 32767.0  ;;  %v610_v1 = vmul.f32 0.0009765625, %v606_v60  ;;  %v609_v3 = vmin.f32 %v605_v62, 32767.0  ;;  %v612_v4 = vmul.f32 0.0009765625, %v608_v0 }
 0x133   : > { %v611_v2 = vmul.f32 0.0009765625, %v607_v61  ;;  %v621_v5 = vadd.f32 %v855_v63, %v610_v1  ;;  %v613_v7 = vmul.f32 0.0009765625, %v609_v3  ;;  %v623_v8 = vadd.f32 %v855_v63, %v612_v4 }
 0x135   : > { %v622_v6 = vadd.f32 %v855_v63, %v611_v2  ;;  %v626_v9 = vmul.f32 16.0, %v621_v5  ;;  %v624_v12 = vadd.f32 %v855_v63, %v613_v7  ;;  %v628_v13 = vmul.f32 16.0, %v623_v8 }
 0x137   : > { %v627_v10 = vmul.f32 16.0, %v622_v6  ;;  %v939_v14 = vround.rtne.f32 %v626_v9  ;;  %v629_v16 = vmul.f32 16.0, %v624_v12  ;;  %v941_v19 = vround.rtne.f32 %v628_v13 }
 0x139   : > { %v940_v15 = vround.rtne.f32 %v627_v10  ;;  %v634_v20 = vmax.f32 %v939_v14, -128.0  ;;  %v942_v24 = vround.rtne.f32 %v629_v16  ;;  %v636_v25 = vmax.f32 %v941_v19, -128.0 }
 0x13b   : > { %v635_v21 = vmax.f32 %v940_v15, -128.0  ;;  %v638_v27 = vmin.f32 %v634_v20, 127.0  ;;  %v637_v29 = vmax.f32 %v942_v24, -128.0  ;;  %v640_v33 = vmin.f32 %v636_v25, 127.0 }
 0x13d   : > { %v639_v28 = vmin.f32 %v635_v21, 127.0  ;;  %v642_v34 = vmul.f32 0.0625, %v638_v27  ;;  %v641_v37 = vmin.f32 %v637_v29, 127.0  ;;  %v644_v38 = vmul.f32 0.0625, %v640_v33 }
 0x13f   : > { %v643_v35 = vmul.f32 0.0625, %v639_v28  ;;  %v653_v40 = vmul.f32 %v856_v31, %v642_v34  ;;  %v645_v42 = vmul.f32 0.0625, %v641_v37  ;;  %v655_v44 = vmul.f32 %v856_v31, %v644_v38 }
 0x141   : > { %v654_v41 = vmul.f32 %v856_v31, %v643_v35  ;;  %v676_v45 = vadd.f32 %v672_v32, %v653_v40  ;;  %v656_v47 = vmul.f32 %v856_v31, %v645_v42  ;;  %v678_v48 = vadd.f32 %v674_v39, %v655_v44 }
 0x143   : > { %v677_v46 = vadd.f32 %v673_v36, %v654_v41  ;;  %v680_v49 = vmul.f32 16.0, %v676_v45  ;;  %v679_v51 = vadd.f32 %v675_v43, %v656_v47  ;;  %v682_v52 = vmul.f32 16.0, %v678_v48 }
 0x145   : > { %v681_v50 = vmul.f32 16.0, %v677_v46  ;;  %v943_v53 = vround.rtne.f32 %v680_v49  ;;  %v683_v55 = vmul.f32 16.0, %v679_v51  ;;  %v945_v56 = vround.rtne.f32 %v682_v52 }
 0x147   : > { %v944_v54 = vround.rtne.f32 %v681_v50  ;;  %v688_v57 = vmax.f32 %v943_v53, -128.0  ;;  %v946_v59 = vround.rtne.f32 %v683_v55  ;;  %v690_v60 = vmax.f32 %v945_v56, -128.0 }
 0x149   : > { %v689_v58 = vmax.f32 %v944_v54, -128.0  ;;  %v692_v61 = vmin.f32 %v688_v57, 127.0  ;;  %v691_v63 = vmax.f32 %v946_v59, -128.0  ;;  %v694_v0 = vmin.f32 %v690_v60, 127.0 }
 0x14b   : > { %v693_v62 = vmin.f32 %v689_v58, 127.0  ;;  %v696_v1 = vmul.f32 0.0625, %v692_v61  ;;  %v695_v3 = vmin.f32 %v691_v63, 127.0  ;;  %v698_v4 = vmul.f32 0.0625, %v694_v0 }
 0x14d   : > { %v697_v2 = vmul.f32 0.0625, %v693_v62  ;;  %v700_v5 = vmax.f32 %v696_v1, 0.0  ;;  %v699_v7 = vmul.f32 0.0625, %v695_v3  ;;  %v702_v8 = vmax.f32 %v698_v4, 0.0 }
 0x14f   : > { %v701_v6 = vmax.f32 %v697_v2, 0.0  ;;  %v703_v10 = vmax.f32 %v699_v7, 0.0 }
 0x151   : > { %v882_v9 = vpack.c.bf16 %v701_v6, %v700_v5  ;;  %v887_v11 = vpack.c.bf16 %v703_v10, %v702_v8 }
 0x153   : > { %883 = vst [vmem:[%s1204_s6] sm:$0xff] %v882_v9   ;;  %890 = vst [vmem:[%s1204_s6 + $0x8] sm:$0xff] %v887_v11  }
 0x154 PF: > { %s16_s25 = sadd.s32 1, %s1048_s25   ;;  %s1205_s21 = smov %s1036_s22 }
 0x155   : > { %p13_p12 = scmp.ge.s32.totalorder %s16_s25, 7   ;;  %s1206_s22 = smov %s1121_s29 }
 0x156   : > { %s1207_s23 = smov %s1044_s24  ;;  %s1208_s24 = smov %s1210_s26 }
 0x157   :  { %15 = sbr.rel (!%p13_p12) target bundleno = 3 (0x3), region = 131 }

// kernel: _lambda_.31
= control target key start
LH: loop header
LB: loop body
LE: loop exit
PB: predicated region body
PF: predicated region fallthrough
CT: control target
= control target key end

     0   :  { %s784_s12 = smov 0   ;;  %s786_s13 = smov 0   ;;  %s866_s0 = inlined_call_operand.vmem [shape: bf16[8,1280], index: 0, kind: input, shape index: {}]   ;;  %s867_s1 = inlined_call_operand.vmem [shape: bf16[1280,256], index: 1, kind: input, shape index: {}]   ;;  %s868_s2 = inlined_call_operand.vmem [shape: f32[1,256], index: 2, kind: input, shape index: {}]   ;;  %s869_s3 = inlined_call_operand.vmem [shape: bf16[8,256], index: 3, kind: output, shape index: {}]  }
   0x1   :  { %s788_s14 = smov 0  }
   0x2 LB: > { %s22_s15 = sadd.s32 1, %s757_s13  ;;  %p612_p0 = scmp.ge.s32.totalorder %s761_s14, 1  ;;  %s761_s14 = sphi %s788_s14, %s13_s14   ;;  %s757_s13 = sphi %s786_s13, %s871_s13   ;;  %s753_s12 = sphi %s784_s12, %s870_s12  }
   0x3   : > { %p23_p1 = scmp.ge.s32.totalorder %s22_s15, 5  ;;  %p168_p2 = scmp.lt.s32.totalorder %s761_s14, 6 }
   0x5   : > { %s873_s15 = smov (%p23_p1, %s22_s15), 0  ;;  %p169_p3 = pnand %p612_p0, %p168_p2 }
   0x6   : > { %s613_s16 = sshll.u32 (!%p169_p3), %s753_s12, 1  ;;  %s615_s17 = sshll.u32 (!%p169_p3), %s753_s12, 5 }
   0x7   : > { %172 = sbr.rel (%p169_p3) target bundleno = 339 (0x153), region = 32  ;;  %p205_p4 = scmp.lt.s32.totalorder (!%p169_p3), %s613_s16, 9 }
   0x8   : > { %p213_p5 = scmp.lt.s32.totalorder (!%p169_p3), %s615_s17, 159  ;;  %p618_p6 = scmp.ne.s32.totalorder (!%p169_p3), %s753_s12, 0 }
   0xe   : > { %s875_s16 = smov (!%p205_p4, %s613_s16), 9  ;;  %s877_s17 = smov (!%p213_p5, %s615_s17), 159 }
   0xf   : > { %s614_s18 = sshll.u32 %s875_s16, 2  ;;  %s658_s22 = sshll.u32 %s877_s17, 3  ;;  %v763_v0 = vmov (!%p618_p6), 0.0  }
  0x10   : > { %s809_s21 = scalar_lea.vmem %s866_s0, %s614_s18  ;;  %s814_s25 = scalar_lea.vmem %s867_s1, %s658_s22  ;;  %228 = vst [vmem:[#allocation2] sm:$0xff] (!%p618_p6), %v763_v0  ;;  %229 = vst [vmem:[#allocation2 + $0x8] sm:$0xff] (!%p618_p6), %v763_v0 }
  0x11   : > { %227 = sbr.rel (%p618_p6) target bundleno = 24 (0x18), region = 36 }
  0x18 PF: > { %v689_v1 = vld [vmem:[%s814_s25 + $0x4] ss:$8 sps:$4 sm:$0xff]   ;;  %v691_v2 = vld [vmem:[%s814_s25] ss:$8 sps:$4 sm:$0xff]   ;;  %v692_v3 = vld [vmem:[%s814_s25 + $0x14] ss:$8 sps:$4 sm:$0xff]  }
  0x19   : > { %432 = vmatprep.subr.bf16.mxu0 %v689_v1  ;;  %v694_v4 = vld [vmem:[%s814_s25 + $0x10] ss:$8 sps:$4 sm:$0xff]   ;;  %v695_v5 = vld [vmem:[%s814_s25 + $0x24] ss:$8 sps:$4 sm:$0xff]   ;;  %v697_v6 = vld [vmem:[%s814_s25 + $0x20] ss:$8 sps:$4 sm:$0xff]  }
  0x1a   : > { %433 = vmatpush1.bf16.msra.mxu0 %v691_v2  ;;  %v698_v7 = vld [vmem:[%s814_s25 + $0x34] ss:$8 sps:$4 sm:$0xff]   ;;  %v700_v8 = vld [vmem:[%s814_s25 + $0x30] ss:$8 sps:$4 sm:$0xff]   ;;  %v701_v9 = vld [vmem:[%s814_s25 + $0x44] ss:$8 sps:$4 sm:$0xff]  }
  0x1b   : > { %434 = vmatprep.subr.bf16.mxu0 %v692_v3  ;;  %v703_v10 = vld [vmem:[%s814_s25 + $0x40] ss:$8 sps:$4 sm:$0xff]   ;;  %v704_v11 = vld [vmem:[%s814_s25 + $0x54] ss:$8 sps:$4 sm:$0xff]   ;;  %v706_v12 = vld [vmem:[%s814_s25 + $0x50] ss:$8 sps:$4 sm:$0xff]  }
  0x1c   : > { %v707_v13 = vld [vmem:[%s814_s25 + $0x64] ss:$8 sps:$4 sm:$0xff]   ;;  %v709_v16 = vld [vmem:[%s814_s25 + $0x60] ss:$8 sps:$4 sm:$0xff]   ;;  %v710_v17 = vld [vmem:[%s814_s25 + $0x74] ss:$8 sps:$4 sm:$0xff]  }
  0x1d   : > { %v232_v14 = vld [vmem:[%s809_s21] sm:$0xff]  ;;  %v712_v18 = vld [vmem:[%s814_s25 + $0x70] ss:$8 sps:$4 sm:$0xff]   ;;  %v716_v21 = vld [vmem:[%s814_s25 + $0x94] ss:$8 sps:$4 sm:$0xff]   ;;  %p653_p7 = scmp.ne.s32.totalorder %s753_s12, 4 }
  0x1e   : > { %435 = vmatpush1.bf16.msra.mxu0 %v694_v4  ;;  %v620_v15 = vcombine.high %v232_v14, %v232_v14  ;;  %v713_v19 = vld [vmem:[%s814_s25 + $0x84] ss:$8 sps:$4 sm:$0xff]   ;;  %v715_v20 = vld [vmem:[%s814_s25 + $0x80] ss:$8 sps:$4 sm:$0xff]   ;;  %v718_v22 = vld [vmem:[%s814_s25 + $0x90] ss:$8 sps:$4 sm:$0xff]   ;;  %v619_v35 = vcombine.low %v232_v14, %v232_v14  ;;  %v496_v46 = vlaneseq (!%p653_p7) }
  0x1f   : > { %436 = vmatprep.subr.bf16.mxu0 %v695_v5  ;;  %v719_v23 = vld [vmem:[%s814_s25 + $0xa4] ss:$8 sps:$4 sm:$0xff]   ;;  %v721_v24 = vld [vmem:[%s814_s25 + $0xa0] ss:$8 sps:$4 sm:$0xff]   ;;  %v722_v25 = vld [vmem:[%s814_s25 + $0xb4] ss:$8 sps:$4 sm:$0xff]  }
  0x20   : > { %464 = vmatprep.mubr.bf16.mxu0 %v620_v15  ;;  %v724_v26 = vld [vmem:[%s814_s25 + $0xb0] ss:$8 sps:$4 sm:$0xff]   ;;  %v725_v27 = vld [vmem:[%s814_s25 + $0xc4] ss:$8 sps:$4 sm:$0xff]   ;;  %v727_v28 = vld [vmem:[%s814_s25 + $0xc0] ss:$8 sps:$4 sm:$0xff]  }
  0x21   : > { %v728_v29 = vld [vmem:[%s814_s25 + $0xd4] ss:$8 sps:$4 sm:$0xff]   ;;  %v730_v30 = vld [vmem:[%s814_s25 + $0xd0] ss:$8 sps:$4 sm:$0xff]   ;;  %v731_v31 = vld [vmem:[%s814_s25 + $0xe4] ss:$8 sps:$4 sm:$0xff]  }
  0x22   : > { %437 = vmatpush1.bf16.msra.mxu0 %v697_v6  ;;  %v733_v32 = vld [vmem:[%s814_s25 + $0xe0] ss:$8 sps:$4 sm:$0xff]   ;;  %v734_v33 = vld [vmem:[%s814_s25 + $0xf4] ss:$8 sps:$4 sm:$0xff]   ;;  %v736_v34 = vld [vmem:[%s814_s25 + $0xf0] ss:$8 sps:$4 sm:$0xff]  }
  0x23   : > { %438 = vmatprep.subr.bf16.mxu0 %v698_v7  ;;  %v230_v36 = vld [vmem:[#allocation2] sm:$0xff]  ;;  %v231_v37 = vld [vmem:[#allocation2 + $0x8] sm:$0xff]  ;;  %v497_v49 = vshrl.u32 (!%p653_p7), %v496_v46, 7 }
  0x24   : > { %v494_v52 = vld [vmem:[%s868_s2] sm:$0x3] (!%p653_p7) }
  0x25   : > { %v498_v53 = vsub.s32 (!%p653_p7), 0, %v497_v49  ;;  %v502_v54 = vsub.s32 (!%p653_p7), 1, %v497_v49 }
  0x26   : > { %439 = vmatpush1.bf16.msra.mxu0 %v700_v8 }
  0x27   : > { %440 = vmatprep.subr.bf16.mxu0 %v701_v9  ;;  %v499_v59 = vrot.slane (!%p653_p7), %v494_v52, %v498_v53  ;;  %v503_v60 = vrot.slane (!%p653_p7), %v494_v52, %v502_v54 }
  0x2a   : > { %441 = vmatpush1.bf16.msra.mxu0 %v703_v10 }
  0x2b   : > { %442 = vmatprep.subr.bf16.mxu0 %v704_v11 }
  0x2e   : > { %443 = vmatpush1.bf16.msra.mxu0 %v706_v12 }
  0x2f   : > { %444 = vmatprep.subr.bf16.mxu0 %v707_v13 }
  0x32   : > { %445 = vmatpush1.bf16.msra.mxu0 %v709_v16 }
  0x33   : > { %446 = vmatprep.subr.bf16.mxu0 %v710_v17 }
  0x36   : > { %447 = vmatpush1.bf16.msra.mxu0 %v712_v18 }
  0x37   : > { %448 = vmatprep.subr.bf16.mxu0 %v713_v19 }
  0x3a   : > { %449 = vmatpush1.bf16.msra.mxu0 %v715_v20 }
  0x3b   : > { %450 = vmatprep.subr.bf16.mxu0 %v716_v21 }
  0x3e   : > { %451 = vmatpush1.bf16.msra.mxu0 %v718_v22 }
  0x3f   : > { %452 = vmatprep.subr.bf16.mxu0 %v719_v23 }
  0x42   : > { %453 = vmatpush1.bf16.msra.mxu0 %v721_v24 }
  0x43   : > { %454 = vmatprep.subr.bf16.mxu0 %v722_v25 }
  0x46   : > { %455 = vmatpush1.bf16.msra.mxu0 %v724_v26 }
  0x47   : > { %456 = vmatprep.subr.bf16.mxu0 %v725_v27 }
  0x4a   : > { %457 = vmatpush1.bf16.msra.mxu0 %v727_v28 }
  0x4b   : > { %458 = vmatprep.subr.bf16.mxu0 %v728_v29 }
  0x4e   : > { %459 = vmatpush1.bf16.msra.mxu0 %v730_v30 }
  0x4f   : > { %460 = vmatprep.subr.bf16.mxu0 %v731_v31 }
  0x52   : > { %461 = vmatpush1.bf16.msra.mxu0 %v733_v32 }
  0x53   : > { %462 = vmatprep.subr.bf16.mxu0 %v734_v33 }
  0x56   : > { %463 = vmatpush1.bf16.msra.mxu0 %v736_v34 }
  0x59   : > { %465 = vmatmul.mubr.bf16.vlgmr.msra.gmra.mrb[0].mxu0 %v619_v35 }
 0x12a   : > { %480 = sbr.rel (%p653_p7) target bundleno = 339 (0x153), region = 40 }
 0x12c   : > { %v466_v38 = vpop.f32.mrb[0].mxu0 }
 0x12d   : > { %v473_v39 = vadd.f32 %v466_v38, %v230_v36  ;;  %v468_v40 = vpop.f32.mrb[1].mxu0 }
 0x12e   : > { %v474_v41 = vadd.f32 %v468_v40, %v231_v37  ;;  %v470_v42 = vpop.f32.mrb[2].mxu0 }
 0x12f   : > { %475 = vst [vmem:[#allocation2] sm:$0xff] %v473_v39  ;;  %v471_v43 = vpop.f32.mrb[3].mxu0 }
 0x130   : > { %476 = vst [vmem:[#allocation2 + $0x8] sm:$0xff] %v474_v41 }
 0x136   : > { %v481_v44 = vld [vmem:[#allocation2] sm:$0xff] }
 0x137   : > { %v482_v45 = vld [vmem:[#allocation2 + $0x8] sm:$0xff]  ;;  %v484_v47 = vmul.f32 1024.0, %v481_v44 }
 0x138   : > { %v485_v48 = vmul.f32 1024.0, %v482_v45 }
 0x139   : > { %v660_v50 = vround.rtne.f32 %v484_v47 }
 0x13a   : > { %v661_v51 = vround.rtne.f32 %v485_v48 }
 0x13b   : > { %v488_v55 = vmax.f32 %v660_v50, -32768.0 }
 0x13c   : > { %v489_v56 = vmax.f32 %v661_v51, -32768.0 }
 0x13d   : > { %v490_v57 = vmin.f32 %v488_v55, 32767.0 }
 0x13e   : > { %v491_v58 = vmin.f32 %v489_v56, 32767.0 }
 0x13f   : > { %v492_v61 = vmul.f32 0.0009765625, %v490_v57 }
 0x140   : > { %v493_v62 = vmul.f32 0.0009765625, %v491_v58 }
 0x141   : > { %v506_v63 = vadd.f32 %v499_v59, %v492_v61 }
 0x142   : > { %v507_v0 = vadd.f32 %v503_v60, %v493_v62 }
 0x143   : > { %v509_v1 = vmul.f32 16.0, %v506_v63 }
 0x144   : > { %v510_v2 = vmul.f32 16.0, %v507_v0 }
 0x145   : > { %v662_v3 = vround.rtne.f32 %v509_v1 }
 0x146   : > { %v663_v4 = vround.rtne.f32 %v510_v2 }
 0x147   : > { %v513_v5 = vmax.f32 %v662_v3, -128.0 }
 0x148   : > { %v514_v6 = vmax.f32 %v663_v4, -128.0 }
 0x149   : > { %v515_v7 = vmin.f32 %v513_v5, 127.0 }
 0x14a   : > { %v516_v8 = vmin.f32 %v514_v6, 127.0 }
 0x14b   : > { %v517_v9 = vmul.f32 0.0625, %v515_v7 }
 0x14c   : > { %v518_v10 = vmul.f32 0.0625, %v516_v8 }
 0x14d   : > { %v519_v11 = vmax.f32 %v517_v9, 0.0 }
 0x14e   : > { %v520_v12 = vmax.f32 %v518_v10, 0.0 }
 0x150   : > { %v659_v13 = vpack.c.bf16 %v520_v12, %v519_v11 }
 0x152   : > { %529 = vst [vmem:[%s869_s3] sm:$0xff] %v659_v13 }
 0x153 PF: > { %s13_s14 = sadd.s32 1, %s761_s14   ;;  %s870_s12 = smov %s757_s13 }
 0x154   : > { %p10_p8 = scmp.ge.s32.totalorder %s13_s14, 7   ;;  %s871_s13 = smov %s873_s15 }
 0x156   :  { %12 = sbr.rel (!%p10_p8) target bundleno = 2 (0x2), region = 73 }

// kernel: _lambda_.32
= control target key start
LH: loop header
LB: loop body
LE: loop exit
PB: predicated region body
PF: predicated region fallthrough
CT: control target
= control target key end

     0   :  { %v266_v1 = vmov 0   ;;  %v183_v18 = vlaneseq  ;;  %s344_s1 = inlined_call_operand.vmem [shape: bf16[128,256], index: 1, kind: input, shape index: {}]   ;;  %s345_s0 = inlined_call_operand.vmem [shape: bf16[8,128], index: 0, kind: input, shape index: {}]   ;;  %s346_s2 = inlined_call_operand.vmem [shape: f32[1,256], index: 2, kind: input, shape index: {}]   ;;  %s347_s3 = inlined_call_operand.vmem [shape: bf16[8,256], index: 3, kind: output, shape index: {}]  }
   0x1   :  { %v242_v0 = vld [vmem:[%s344_s1 + $0x4] ss:$8 sps:$4 sm:$0xff]   ;;  %152 = vmatprep.mubr.bf16.mxu0 %v266_v1  ;;  %v244_v2 = vld [vmem:[%s344_s1] ss:$8 sps:$4 sm:$0xff]   ;;  %v245_v3 = vld [vmem:[%s344_s1 + $0x14] ss:$8 sps:$4 sm:$0xff]  }
   0x2   :  { %120 = vmatprep.subr.bf16.mxu0 %v242_v0  ;;  %v247_v4 = vld [vmem:[%s344_s1 + $0x10] ss:$8 sps:$4 sm:$0xff]   ;;  %v248_v5 = vld [vmem:[%s344_s1 + $0x24] ss:$8 sps:$4 sm:$0xff]   ;;  %v250_v6 = vld [vmem:[%s344_s1 + $0x20] ss:$8 sps:$4 sm:$0xff]  }
   0x3   :  { %121 = vmatpush1.bf16.msra.mxu0 %v244_v2  ;;  %v251_v7 = vld [vmem:[%s344_s1 + $0x34] ss:$8 sps:$4 sm:$0xff]   ;;  %v253_v8 = vld [vmem:[%s344_s1 + $0x30] ss:$8 sps:$4 sm:$0xff]   ;;  %v254_v9 = vld [vmem:[%s344_s1 + $0x44] ss:$8 sps:$4 sm:$0xff]  }
   0x4   :  { %122 = vmatprep.subr.bf16.mxu0 %v245_v3  ;;  %v256_v10 = vld [vmem:[%s344_s1 + $0x40] ss:$8 sps:$4 sm:$0xff]   ;;  %v257_v11 = vld [vmem:[%s344_s1 + $0x54] ss:$8 sps:$4 sm:$0xff]   ;;  %v259_v12 = vld [vmem:[%s344_s1 + $0x50] ss:$8 sps:$4 sm:$0xff]  }
   0x5   :  { %v260_v13 = vld [vmem:[%s344_s1 + $0x64] ss:$8 sps:$4 sm:$0xff]   ;;  %v262_v14 = vld [vmem:[%s344_s1 + $0x60] ss:$8 sps:$4 sm:$0xff]   ;;  %v263_v15 = vld [vmem:[%s344_s1 + $0x74] ss:$8 sps:$4 sm:$0xff]  }
   0x6   :  { %v265_v16 = vld [vmem:[%s344_s1 + $0x70] ss:$8 sps:$4 sm:$0xff]   ;;  %v23_v17 = vld [vmem:[%s345_s0] sm:$0xf]  ;;  %v184_v19 = vshrl.u32 %v183_v18, 7 }
   0x7   :  { %123 = vmatpush1.bf16.msra.mxu0 %v247_v4  ;;  %v181_v28 = vld [vmem:[%s346_s2] sm:$0x3] }
   0x8   :  { %124 = vmatprep.subr.bf16.mxu0 %v248_v5  ;;  %v185_v26 = vsub.s32 0, %v184_v19  ;;  %v189_v30 = vsub.s32 1, %v184_v19 }
   0xa   :  { %v186_v34 = vrot.slane %v181_v28, %v185_v26  ;;  %v190_v36 = vrot.slane %v181_v28, %v189_v30 }
   0xb   :  { %125 = vmatpush1.bf16.msra.mxu0 %v250_v6 }
   0xc   :  { %126 = vmatprep.subr.bf16.mxu0 %v251_v7 }
   0xf   :  { %127 = vmatpush1.bf16.msra.mxu0 %v253_v8 }
  0x10   :  { %128 = vmatprep.subr.bf16.mxu0 %v254_v9 }
  0x13   :  { %129 = vmatpush1.bf16.msra.mxu0 %v256_v10 }
  0x14   :  { %130 = vmatprep.subr.bf16.mxu0 %v257_v11 }
  0x17   :  { %131 = vmatpush1.bf16.msra.mxu0 %v259_v12 }
  0x18   :  { %132 = vmatprep.subr.bf16.mxu0 %v260_v13 }
  0x1b   :  { %133 = vmatpush1.bf16.msra.mxu0 %v262_v14 }
  0x1c   :  { %134 = vmatprep.subr.bf16.mxu0 %v263_v15 }
  0x1f   :  { %135 = vmatpush1.bf16.msra.mxu0 %v265_v16 }
  0x22   :  { %153 = vmatmul.mubr.bf16.vlgmr.msra.gmra.mrb[0].mxu0 %v23_v17 }
  0xf5   :  { %v154_v20 = vpop.f32.mrb[0].mxu0 }
  0xf6   :  { %v171_v21 = vmul.f32 1024.0, %v154_v20  ;;  %v156_v22 = vpop.f32.mrb[1].mxu0 }
  0xf7   :  { %v172_v23 = vmul.f32 1024.0, %v156_v22  ;;  %v158_v24 = vpop.f32.mrb[2].mxu0 }
  0xf8   :  { %v237_v25 = vround.rtne.f32 %v171_v21  ;;  %v159_v27 = vpop.f32.mrb[3].mxu0 }
  0xf9   :  { %v238_v29 = vround.rtne.f32 %v172_v23 }
  0xfa   :  { %v175_v31 = vmax.f32 %v237_v25, -32768.0 }
  0xfb   :  { %v176_v32 = vmax.f32 %v238_v29, -32768.0 }
  0xfc   :  { %v177_v33 = vmin.f32 %v175_v31, 32767.0 }
  0xfd   :  { %v178_v35 = vmin.f32 %v176_v32, 32767.0 }
  0xfe   :  { %v179_v37 = vmul.f32 0.0009765625, %v177_v33 }
  0xff   :  { %v180_v38 = vmul.f32 0.0009765625, %v178_v35 }
 0x100   :  { %v193_v39 = vadd.f32 %v186_v34, %v179_v37 }
 0x101   :  { %v194_v40 = vadd.f32 %v190_v36, %v180_v38 }
 0x102   :  { %v196_v41 = vmul.f32 16.0, %v193_v39 }
 0x103   :  { %v197_v42 = vmul.f32 16.0, %v194_v40 }
 0x104   :  { %v239_v43 = vround.rtne.f32 %v196_v41 }
 0x105   :  { %v240_v44 = vround.rtne.f32 %v197_v42 }
 0x106   :  { %v200_v45 = vmax.f32 %v239_v43, -128.0 }
 0x107   :  { %v201_v46 = vmax.f32 %v240_v44, -128.0 }
 0x108   :  { %v202_v47 = vmin.f32 %v200_v45, 127.0 }
 0x109   :  { %v203_v48 = vmin.f32 %v201_v46, 127.0 }
 0x10a   :  { %v204_v49 = vmul.f32 0.0625, %v202_v47 }
 0x10b   :  { %v205_v50 = vmul.f32 0.0625, %v203_v48 }
 0x10d   :  { %v236_v51 = vpack.c.bf16 %v205_v50, %v204_v49 }
 0x10f   :  { %214 = vst [vmem:[%s347_s3] sm:$0xff] %v236_v51 }

// kernel: _lambda_.33
= control target key start
LH: loop header
LB: loop body
LE: loop exit
PB: predicated region body
PF: predicated region fallthrough
CT: control target
= control target key end

     0   :  { %s1286_s21 = smov 0   ;;  %s1288_s22 = smov 0   ;;  %s1410_s0 = inlined_call_operand.vmem [shape: bf16[8,2560], index: 0, kind: input, shape index: {}]   ;;  %s1411_s1 = inlined_call_operand.vmem [shape: bf16[2560,256], index: 1, kind: input, shape index: {}]   ;;  %s1412_s2 = inlined_call_operand.vmem [shape: f32[1,256], index: 2, kind: input, shape index: {}]   ;;  %s1413_s3 = inlined_call_operand.vmem [shape: bf16[8,256], index: 3, kind: input, shape index: {}]   ;;  %s1414_s4 = inlined_call_operand.vmem [shape: f32[1,256], index: 4, kind: input, shape index: {}]   ;;  %s1415_s5 = inlined_call_operand.vmem [shape: f32[1,256], index: 5, kind: input, shape index: {}]   ;;  %s1416_s6 = inlined_call_operand.vmem [shape: bf16[8,256], index: 6, kind: output, shape index: {}]  }
   0x1   :  { %s1290_s23 = smov 0  }
   0x2 LB: > { %s25_s24 = sadd.s32 1, %s1244_s22  ;;  %p1013_p0 = scmp.ge.s32.totalorder %s1248_s23, 1  ;;  %s1248_s23 = sphi %s1290_s23, %s16_s23   ;;  %s1244_s22 = sphi %s1288_s22, %s1418_s22   ;;  %s1240_s21 = sphi %s1286_s21, %s1417_s21  }
   0x3   : > { %p26_p1 = scmp.ge.s32.totalorder %s25_s24, 5  ;;  %p253_p2 = scmp.lt.s32.totalorder %s1248_s23, 6 }
   0x5   : > { %s1420_s24 = smov (%p26_p1, %s25_s24), 0  ;;  %p254_p3 = pnand %p1013_p0, %p253_p2 }
   0x6   : > { %s1014_s25 = sshll.u32 (!%p254_p3), %s1240_s21, 2  ;;  %s1016_s26 = sshll.u32 (!%p254_p3), %s1240_s21, 6 }
   0x7   : > { %257 = sbr.rel (%p254_p3) target bundleno = 356 (0x164), region = 44  ;;  %p301_p4 = scmp.lt.s32.totalorder (!%p254_p3), %s1014_s25, 19 }
   0x8   : > { %p309_p5 = scmp.lt.s32.totalorder (!%p254_p3), %s1016_s26, 319  ;;  %p1019_p6 = scmp.ne.s32.totalorder (!%p254_p3), %s1240_s21, 0 }
   0xe   : > { %s1422_s25 = smov (!%p301_p4, %s1014_s25), 19  ;;  %s1424_s26 = smov (!%p309_p5, %s1016_s26), 319 }
   0xf   : > { %s1015_s27 = sshll.u32 %s1422_s25, 2  ;;  %s1093_s7 = sshll.u32 %s1424_s26, 3  ;;  %v1250_v0 = vmov (!%p1019_p6), 0.0  }
  0x10   : > { %s1311_s30 = scalar_lea.vmem %s1410_s0, %s1015_s27  ;;  %s1316_s10 = scalar_lea.vmem %s1411_s1, %s1093_s7  ;;  %329 = vst [vmem:[#allocation2] sm:$0xff] (!%p1019_p6), %v1250_v0  ;;  %330 = vst [vmem:[#allocation2 + $0x8] sm:$0xff] (!%p1019_p6), %v1250_v0 }
  0x11   : > { %328 = sbr.rel (%p1019_p6) target bundleno = 24 (0x18), region = 48 }
  0x18 PF: > { %v1126_v1 = vld [vmem:[%s1316_s10 + $0x4] ss:$8 sps:$4 sm:$0xff]   ;;  %v1130_v3 = vld [vmem:[%s1316_s10] ss:$8 sps:$4 sm:$0xff]   ;;  %v1132_v5 = vld [vmem:[%s1316_s10 + $0x14] ss:$8 sps:$4 sm:$0xff]  }
  0x19   : > { %v1128_v2 = vld [vmem:[%s1316_s10 + $0x104] ss:$8 sps:$4 sm:$0xff]   ;;  %733 = vmatprep.subr.bf16.mxu0 %v1126_v1  ;;  %v1131_v4 = vld [vmem:[%s1316_s10 + $0x100] ss:$8 sps:$4 sm:$0xff]   ;;  %v1134_v6 = vld [vmem:[%s1316_s10 + $0x114] ss:$8 sps:$4 sm:$0xff]  }
  0x1a   : > { %774 = vmatprep.subr.bf16.mxu1 %v1128_v2  ;;  %734 = vmatpush1.bf16.msra.mxu0 %v1130_v3  ;;  %v1136_v7 = vld [vmem:[%s1316_s10 + $0x10] ss:$8 sps:$4 sm:$0xff]   ;;  %v1138_v9 = vld [vmem:[%s1316_s10 + $0x24] ss:$8 sps:$4 sm:$0xff]   ;;  %v1142_v11 = vld [vmem:[%s1316_s10 + $0x20] ss:$8 sps:$4 sm:$0xff]  }
  0x1b   : > { %775 = vmatpush1.bf16.msra.mxu1 %v1131_v4  ;;  %735 = vmatprep.subr.bf16.mxu0 %v1132_v5  ;;  %v1137_v8 = vld [vmem:[%s1316_s10 + $0x110] ss:$8 sps:$4 sm:$0xff]   ;;  %v1140_v10 = vld [vmem:[%s1316_s10 + $0x124] ss:$8 sps:$4 sm:$0xff]   ;;  %v1143_v12 = vld [vmem:[%s1316_s10 + $0x120] ss:$8 sps:$4 sm:$0xff]  }
  0x1c   : > { %776 = vmatprep.subr.bf16.mxu1 %v1134_v6  ;;  %v1144_v13 = vld [vmem:[%s1316_s10 + $0x34] ss:$8 sps:$4 sm:$0xff]   ;;  %v1148_v15 = vld [vmem:[%s1316_s10 + $0x30] ss:$8 sps:$4 sm:$0xff]   ;;  %v1150_v17 = vld [vmem:[%s1316_s10 + $0x44] ss:$8 sps:$4 sm:$0xff]  }
  0x1d   : > { %v1146_v14 = vld [vmem:[%s1316_s10 + $0x134] ss:$8 sps:$4 sm:$0xff]   ;;  %v1149_v16 = vld [vmem:[%s1316_s10 + $0x130] ss:$8 sps:$4 sm:$0xff]   ;;  %v1152_v18 = vld [vmem:[%s1316_s10 + $0x144] ss:$8 sps:$4 sm:$0xff]  }
  0x1e   : > { %736 = vmatpush1.bf16.msra.mxu0 %v1136_v7  ;;  %v1154_v19 = vld [vmem:[%s1316_s10 + $0x40] ss:$8 sps:$4 sm:$0xff]   ;;  %v1156_v21 = vld [vmem:[%s1316_s10 + $0x54] ss:$8 sps:$4 sm:$0xff]   ;;  %v1160_v23 = vld [vmem:[%s1316_s10 + $0x50] ss:$8 sps:$4 sm:$0xff]  }
  0x1f   : > { %777 = vmatpush1.bf16.msra.mxu1 %v1137_v8  ;;  %737 = vmatprep.subr.bf16.mxu0 %v1138_v9  ;;  %v1155_v20 = vld [vmem:[%s1316_s10 + $0x140] ss:$8 sps:$4 sm:$0xff]   ;;  %v1158_v22 = vld [vmem:[%s1316_s10 + $0x154] ss:$8 sps:$4 sm:$0xff]   ;;  %v1161_v24 = vld [vmem:[%s1316_s10 + $0x150] ss:$8 sps:$4 sm:$0xff]  }
  0x20   : > { %778 = vmatprep.subr.bf16.mxu1 %v1140_v10  ;;  %v1162_v25 = vld [vmem:[%s1316_s10 + $0x64] ss:$8 sps:$4 sm:$0xff]   ;;  %v1166_v27 = vld [vmem:[%s1316_s10 + $0x60] ss:$8 sps:$4 sm:$0xff]   ;;  %v1168_v29 = vld [vmem:[%s1316_s10 + $0x74] ss:$8 sps:$4 sm:$0xff]  }
  0x21   : > { %v1164_v26 = vld [vmem:[%s1316_s10 + $0x164] ss:$8 sps:$4 sm:$0xff]   ;;  %v1167_v28 = vld [vmem:[%s1316_s10 + $0x160] ss:$8 sps:$4 sm:$0xff]   ;;  %v1170_v30 = vld [vmem:[%s1316_s10 + $0x174] ss:$8 sps:$4 sm:$0xff]  }
  0x22   : > { %738 = vmatpush1.bf16.msra.mxu0 %v1142_v11  ;;  %v1172_v31 = vld [vmem:[%s1316_s10 + $0x70] ss:$8 sps:$4 sm:$0xff]   ;;  %v1174_v33 = vld [vmem:[%s1316_s10 + $0x84] ss:$8 sps:$4 sm:$0xff]   ;;  %v1178_v35 = vld [vmem:[%s1316_s10 + $0x80] ss:$8 sps:$4 sm:$0xff]  }
  0x23   : > { %779 = vmatpush1.bf16.msra.mxu1 %v1143_v12  ;;  %739 = vmatprep.subr.bf16.mxu0 %v1144_v13  ;;  %v1173_v32 = vld [vmem:[%s1316_s10 + $0x170] ss:$8 sps:$4 sm:$0xff]   ;;  %v1176_v34 = vld [vmem:[%s1316_s10 + $0x184] ss:$8 sps:$4 sm:$0xff]   ;;  %v1179_v36 = vld [vmem:[%s1316_s10 + $0x180] ss:$8 sps:$4 sm:$0xff]  }
  0x24   : > { %780 = vmatprep.subr.bf16.mxu1 %v1146_v14  ;;  %v1180_v37 = vld [vmem:[%s1316_s10 + $0x94] ss:$8 sps:$4 sm:$0xff]   ;;  %v1184_v39 = vld [vmem:[%s1316_s10 + $0x90] ss:$8 sps:$4 sm:$0xff]   ;;  %v1186_v41 = vld [vmem:[%s1316_s10 + $0xa4] ss:$8 sps:$4 sm:$0xff]  }
  0x25   : > { %v1182_v38 = vld [vmem:[%s1316_s10 + $0x194] ss:$8 sps:$4 sm:$0xff]   ;;  %v1185_v40 = vld [vmem:[%s1316_s10 + $0x190] ss:$8 sps:$4 sm:$0xff]   ;;  %v1188_v42 = vld [vmem:[%s1316_s10 + $0x1a4] ss:$8 sps:$4 sm:$0xff]  }
  0x26   : > { %740 = vmatpush1.bf16.msra.mxu0 %v1148_v15  ;;  %v1190_v43 = vld [vmem:[%s1316_s10 + $0xa0] ss:$8 sps:$4 sm:$0xff]   ;;  %v1192_v45 = vld [vmem:[%s1316_s10 + $0xb4] ss:$8 sps:$4 sm:$0xff]   ;;  %v1196_v50 = vld [vmem:[%s1316_s10 + $0xb0] ss:$8 sps:$4 sm:$0xff]  }
  0x27   : > { %781 = vmatpush1.bf16.msra.mxu1 %v1149_v16  ;;  %741 = vmatprep.subr.bf16.mxu0 %v1150_v17  ;;  %v1191_v44 = vld [vmem:[%s1316_s10 + $0x1a0] ss:$8 sps:$4 sm:$0xff]   ;;  %v1194_v46 = vld [vmem:[%s1316_s10 + $0x1b4] ss:$8 sps:$4 sm:$0xff]   ;;  %v1197_v51 = vld [vmem:[%s1316_s10 + $0x1b0] ss:$8 sps:$4 sm:$0xff]  }
  0x28   : > { %782 = vmatprep.subr.bf16.mxu1 %v1152_v18  ;;  %v333_v47 = vld [vmem:[%s1311_s30] sm:$0xff]  ;;  %v334_v49 = vld [vmem:[%s1311_s30 + $0x8] sm:$0xff]  ;;  %v1204_v57 = vld [vmem:[%s1316_s10 + $0xd4] ss:$8 sps:$4 sm:$0xff]   ;;  %p1088_p7 = scmp.ne.s32.totalorder %s1240_s21, 4 }
  0x29   : > { %v1021_v48 = vcombine.high %v333_v47, %v333_v47  ;;  %v1023_v52 = vcombine.high %v334_v49, %v334_v49  ;;  %v1198_v53 = vld [vmem:[%s1316_s10 + $0xc4] ss:$8 sps:$4 sm:$0xff]   ;;  %v1202_v55 = vld [vmem:[%s1316_s10 + $0xc0] ss:$8 sps:$4 sm:$0xff]   ;;  %v1206_v58 = vld [vmem:[%s1316_s10 + $0x1d4] ss:$8 sps:$4 sm:$0xff]   ;;  %v1020_v5 = vcombine.low %v333_v47, %v333_v47  ;;  %v1022_v6 = vcombine.low %v334_v49, %v334_v49 }
  0x2a   : > { %742 = vmatpush1.bf16.msra.mxu0 %v1154_v19  ;;  %v1200_v54 = vld [vmem:[%s1316_s10 + $0x1c4] ss:$8 sps:$4 sm:$0xff]   ;;  %v1203_v56 = vld [vmem:[%s1316_s10 + $0x1c0] ss:$8 sps:$4 sm:$0xff]   ;;  %v1208_v59 = vld [vmem:[%s1316_s10 + $0xd0] ss:$8 sps:$4 sm:$0xff]  }
  0x2b   : > { %783 = vmatpush1.bf16.msra.mxu1 %v1155_v20  ;;  %743 = vmatprep.subr.bf16.mxu0 %v1156_v21  ;;  %v1209_v60 = vld [vmem:[%s1316_s10 + $0x1d0] ss:$8 sps:$4 sm:$0xff]   ;;  %v1210_v61 = vld [vmem:[%s1316_s10 + $0xe4] ss:$8 sps:$4 sm:$0xff]   ;;  %v1214_v63 = vld [vmem:[%s1316_s10 + $0xe0] ss:$8 sps:$4 sm:$0xff]  }
  0x2c   : > { %784 = vmatprep.subr.bf16.mxu1 %v1158_v22  ;;  %765 = vmatprep.mubr.bf16.mxu0 %v1021_v48  ;;  %v1212_v62 = vld [vmem:[%s1316_s10 + $0x1e4] ss:$8 sps:$4 sm:$0xff]   ;;  %v1215_v0 = vld [vmem:[%s1316_s10 + $0x1e0] ss:$8 sps:$4 sm:$0xff]   ;;  %v1216_v1 = vld [vmem:[%s1316_s10 + $0xf4] ss:$8 sps:$4 sm:$0xff]  }
  0x2d   : > { %806 = vmatprep.mubr.bf16.mxu1 %v1023_v52  ;;  %v1218_v2 = vld [vmem:[%s1316_s10 + $0x1f4] ss:$8 sps:$4 sm:$0xff]   ;;  %v1220_v3 = vld [vmem:[%s1316_s10 + $0xf0] ss:$8 sps:$4 sm:$0xff]   ;;  %v331_v8 = vld [vmem:[#allocation2] sm:$0xff] }
  0x2e   : > { %744 = vmatpush1.bf16.msra.mxu0 %v1160_v23  ;;  %v1221_v4 = vld [vmem:[%s1316_s10 + $0x1f0] ss:$8 sps:$4 sm:$0xff]   ;;  %v332_v12 = vld [vmem:[#allocation2 + $0x8] sm:$0xff]  ;;  %v838_v23 = vlaneseq (!%p1088_p7)  ;;  %v861_v48 = vld [vmem:[%s1414_s4] sm:$0x3] (!%p1088_p7) }
  0x2f   : > { %785 = vmatpush1.bf16.msra.mxu1 %v1161_v24  ;;  %745 = vmatprep.subr.bf16.mxu0 %v1162_v25 }
  0x30   : > { %786 = vmatprep.subr.bf16.mxu1 %v1164_v26  ;;  %v839_v26 = vshrl.u32 (!%p1088_p7), %v838_v23, 7 }
  0x32   : > { %746 = vmatpush1.bf16.msra.mxu0 %v1166_v27 }
  0x33   : > { %787 = vmatpush1.bf16.msra.mxu1 %v1167_v28  ;;  %747 = vmatprep.subr.bf16.mxu0 %v1168_v29  ;;  %v836_v29 = vld [vmem:[%s1412_s2] sm:$0x3] (!%p1088_p7) }
  0x34   : > { %788 = vmatprep.subr.bf16.mxu1 %v1170_v30  ;;  %v840_v30 = vsub.s32 (!%p1088_p7), 0, %v839_v26 }
  0x36   : > { %748 = vmatpush1.bf16.msra.mxu0 %v1172_v31  ;;  %v844_v31 = vsub.s32 (!%p1088_p7), 1, %v839_v26 }
  0x37   : > { %789 = vmatpush1.bf16.msra.mxu1 %v1173_v32  ;;  %749 = vmatprep.subr.bf16.mxu0 %v1174_v33 }
  0x38   : > { %790 = vmatprep.subr.bf16.mxu1 %v1176_v34 }
  0x3a   : > { %750 = vmatpush1.bf16.msra.mxu0 %v1178_v35 }
  0x3b   : > { %791 = vmatpush1.bf16.msra.mxu1 %v1179_v36  ;;  %751 = vmatprep.subr.bf16.mxu0 %v1180_v37  ;;  %v841_v36 = vrot.slane (!%p1088_p7), %v836_v29, %v840_v30  ;;  %v845_v37 = vrot.slane (!%p1088_p7), %v836_v29, %v844_v31 }
  0x3c   : > { %792 = vmatprep.subr.bf16.mxu1 %v1182_v38 }
  0x3e   : > { %752 = vmatpush1.bf16.msra.mxu0 %v1184_v39 }
  0x3f   : > { %793 = vmatpush1.bf16.msra.mxu1 %v1185_v40  ;;  %753 = vmatprep.subr.bf16.mxu0 %v1186_v41 }
  0x40   : > { %794 = vmatprep.subr.bf16.mxu1 %v1188_v42 }
  0x42   : > { %754 = vmatpush1.bf16.msra.mxu0 %v1190_v43 }
  0x43   : > { %795 = vmatpush1.bf16.msra.mxu1 %v1191_v44  ;;  %755 = vmatprep.subr.bf16.mxu0 %v1192_v45  ;;  %v875_v44 = vld [vmem:[%s1413_s3] sm:$0xff] (!%p1088_p7) }
  0x44   : > { %796 = vmatprep.subr.bf16.mxu1 %v1194_v46  ;;  %v878_v45 = vld [vmem:[%s1415_s5] sm:$0x3] (!%p1088_p7)  ;;  %v876_v49 = vunpack.c.l.bf16 (!%p1088_p7), %v875_v44 }
  0x46   : > { %756 = vmatpush1.bf16.msra.mxu0 %v1196_v50  ;;  %v877_v50 = vunpack.c.h.bf16 (!%p1088_p7), %v875_v44 }
  0x47   : > { %797 = vmatpush1.bf16.msra.mxu1 %v1197_v51  ;;  %757 = vmatprep.subr.bf16.mxu0 %v1198_v53  ;;  %v883_v53 = vrot.slane (!%p1088_p7), %v878_v45, %v840_v30 }
  0x48   : > { %798 = vmatprep.subr.bf16.mxu1 %v1200_v54  ;;  %v887_v54 = vrot.slane (!%p1088_p7), %v878_v45, %v844_v31 }
  0x4a   : > { %758 = vmatpush1.bf16.msra.mxu0 %v1202_v55 }
  0x4b   : > { %799 = vmatpush1.bf16.msra.mxu1 %v1203_v56  ;;  %759 = vmatprep.subr.bf16.mxu0 %v1204_v57  ;;  %v866_v57 = vrot.slane (!%p1088_p7), %v861_v48, %v840_v30 }
  0x4c   : > { %800 = vmatprep.subr.bf16.mxu1 %v1206_v58  ;;  %v870_v58 = vrot.slane (!%p1088_p7), %v861_v48, %v844_v31 }
  0x4e   : > { %760 = vmatpush1.bf16.msra.mxu0 %v1208_v59 }
  0x4f   : > { %801 = vmatpush1.bf16.msra.mxu1 %v1209_v60  ;;  %761 = vmatprep.subr.bf16.mxu0 %v1210_v61  ;;  %v890_v61 = vmul.f32 (!%p1088_p7), %v883_v53, %v876_v49 }
  0x50   : > { %802 = vmatprep.subr.bf16.mxu1 %v1212_v62  ;;  %v891_v62 = vmul.f32 (!%p1088_p7), %v887_v54, %v877_v50 }
  0x52   : > { %762 = vmatpush1.bf16.msra.mxu0 %v1214_v63 }
  0x53   : > { %803 = vmatpush1.bf16.msra.mxu1 %v1215_v0  ;;  %763 = vmatprep.subr.bf16.mxu0 %v1216_v1 }
  0x54   : > { %804 = vmatprep.subr.bf16.mxu1 %v1218_v2 }
  0x56   : > { %764 = vmatpush1.bf16.msra.mxu0 %v1220_v3 }
  0x57   : > { %805 = vmatpush1.bf16.msra.mxu1 %v1221_v4 }
  0x59   : > { %766 = vmatmul.mubr.bf16.vlgmr.msra.gmra.mrb[0].mxu0 %v1020_v5 }
  0x5a   : > { %807 = vmatmul.mubr.bf16.vlgmr.msra.gmra.mrb[0].mxu1 %v1022_v6 }
 0x12c   : > { %v767_v7 = vpop.f32.mrb[0].mxu0 }
 0x12d   : > { %v808_v9 = vpop.f32.mrb[0].mxu1  ;;  %v769_v11 = vpop.f32.mrb[1].mxu0  ;;  %822 = sbr.rel (%p1088_p7) target bundleno = 356 (0x164), region = 52 }
 0x12e   : > { %v809_v10 = vadd.f32 %v808_v9, %v767_v7  ;;  %v810_v13 = vpop.f32.mrb[1].mxu1  ;;  %v771_v15 = vpop.f32.mrb[2].mxu0 }
 0x12f   : > { %v811_v14 = vadd.f32 %v810_v13, %v769_v11  ;;  %v812_v16 = vpop.f32.mrb[2].mxu1  ;;  %v772_v18 = vpop.f32.mrb[3].mxu0 }
 0x130   : > { %v815_v17 = vadd.f32 %v809_v10, %v331_v8  ;;  %v813_v19 = vpop.f32.mrb[3].mxu1 }
 0x131   : > { %v816_v20 = vadd.f32 %v811_v14, %v332_v12 }
 0x132   : > { %817 = vst [vmem:[#allocation2] sm:$0xff] %v815_v17 }
 0x133   : > { %818 = vst [vmem:[#allocation2 + $0x8] sm:$0xff] %v816_v20 }
 0x139   : > { %v823_v21 = vld [vmem:[#allocation2] sm:$0xff] }
 0x13a   : > { %v824_v22 = vld [vmem:[#allocation2 + $0x8] sm:$0xff]  ;;  %v826_v24 = vmul.f32 1024.0, %v823_v21 }
 0x13b   : > { %v827_v25 = vmul.f32 1024.0, %v824_v22 }
 0x13c   : > { %v1095_v27 = vround.rtne.f32 %v826_v24 }
 0x13d   : > { %v1096_v28 = vround.rtne.f32 %v827_v25 }
 0x13e   : > { %v830_v32 = vmax.f32 %v1095_v27, -32768.0 }
 0x13f   : > { %v831_v33 = vmax.f32 %v1096_v28, -32768.0 }
 0x140   : > { %v832_v34 = vmin.f32 %v830_v32, 32767.0 }
 0x141   : > { %v833_v35 = vmin.f32 %v831_v33, 32767.0 }
 0x142   : > { %v834_v38 = vmul.f32 0.0009765625, %v832_v34 }
 0x143   : > { %v835_v39 = vmul.f32 0.0009765625, %v833_v35 }
 0x144   : > { %v848_v40 = vadd.f32 %v841_v36, %v834_v38 }
 0x145   : > { %v849_v41 = vadd.f32 %v845_v37, %v835_v39 }
 0x146   : > { %v851_v42 = vmul.f32 16.0, %v848_v40 }
 0x147   : > { %v852_v43 = vmul.f32 16.0, %v849_v41 }
 0x148   : > { %v1097_v46 = vround.rtne.f32 %v851_v42 }
 0x149   : > { %v1098_v47 = vround.rtne.f32 %v852_v43 }
 0x14a   : > { %v855_v51 = vmax.f32 %v1097_v46, -128.0 }
 0x14b   : > { %v856_v52 = vmax.f32 %v1098_v47, -128.0 }
 0x14c   : > { %v857_v55 = vmin.f32 %v855_v51, 127.0 }
 0x14d   : > { %v858_v56 = vmin.f32 %v856_v52, 127.0 }
 0x14e   : > { %v859_v59 = vmul.f32 0.0625, %v857_v55 }
 0x14f   : > { %v860_v60 = vmul.f32 0.0625, %v858_v56 }
 0x150   : > { %v873_v63 = vmul.f32 %v866_v57, %v859_v59 }
 0x151   : > { %v874_v0 = vmul.f32 %v870_v58, %v860_v60 }
 0x152   : > { %v892_v1 = vadd.f32 %v890_v61, %v873_v63 }
 0x153   : > { %v893_v2 = vadd.f32 %v891_v62, %v874_v0 }
 0x154   : > { %v894_v3 = vmul.f32 16.0, %v892_v1 }
 0x155   : > { %v895_v4 = vmul.f32 16.0, %v893_v2 }
 0x156   : > { %v1099_v5 = vround.rtne.f32 %v894_v3 }
 0x157   : > { %v1100_v6 = vround.rtne.f32 %v895_v4 }
 0x158   : > { %v898_v7 = vmax.f32 %v1099_v5, -128.0 }
 0x159   : > { %v899_v8 = vmax.f32 %v1100_v6, -128.0 }
 0x15a   : > { %v900_v9 = vmin.f32 %v898_v7, 127.0 }
 0x15b   : > { %v901_v10 = vmin.f32 %v899_v8, 127.0 }
 0x15c   : > { %v902_v11 = vmul.f32 0.0625, %v900_v9 }
 0x15d   : > { %v903_v12 = vmul.f32 0.0625, %v901_v10 }
 0x15e   : > { %v904_v13 = vmax.f32 %v902_v11, 0.0 }
 0x15f   : > { %v905_v14 = vmax.f32 %v903_v12, 0.0 }
 0x161   : > { %v1094_v15 = vpack.c.bf16 %v905_v14, %v904_v13 }
 0x163   : > { %914 = vst [vmem:[%s1416_s6] sm:$0xff] %v1094_v15 }
 0x164 PF: > { %s16_s23 = sadd.s32 1, %s1248_s23   ;;  %s1417_s21 = smov %s1244_s22 }
 0x165   : > { %p13_p8 = scmp.ge.s32.totalorder %s16_s23, 7   ;;  %s1418_s22 = smov %s1420_s24 }
 0x167   :  { %15 = sbr.rel (!%p13_p8) target bundleno = 2 (0x2), region = 88 }

// kernel: _lambda_.34
= control target key start
LH: loop header
LB: loop body
LE: loop exit
PB: predicated region body
PF: predicated region fallthrough
CT: control target
= control target key end

     0   :  { %s1109_s12 = smov 0   ;;  %s1111_s13 = smov 0   ;;  %s1224_s0 = inlined_call_operand.vmem [shape: bf16[8,2560], index: 0, kind: input, shape index: {}]   ;;  %s1225_s1 = inlined_call_operand.vmem [shape: bf16[2560,256], index: 1, kind: input, shape index: {}]   ;;  %s1226_s2 = inlined_call_operand.vmem [shape: f32[1,256], index: 2, kind: input, shape index: {}]   ;;  %s1227_s3 = inlined_call_operand.vmem [shape: bf16[8,256], index: 3, kind: output, shape index: {}]  }
   0x1   :  { %s1113_s14 = smov 0  }
   0x2 LB: > { %s22_s15 = sadd.s32 1, %s1082_s13  ;;  %p853_p0 = scmp.ge.s32.totalorder %s1086_s14, 1  ;;  %s1086_s14 = sphi %s1113_s14, %s13_s14   ;;  %s1082_s13 = sphi %s1111_s13, %s1229_s13   ;;  %s1078_s12 = sphi %s1109_s12, %s1228_s12  }
   0x3   : > { %p23_p1 = scmp.ge.s32.totalorder %s22_s15, 5  ;;  %p168_p2 = scmp.lt.s32.totalorder %s1086_s14, 6 }
   0x5   : > { %s1231_s15 = smov (%p23_p1, %s22_s15), 0  ;;  %p169_p3 = pnand %p853_p0, %p168_p2 }
   0x6   : > { %s854_s16 = sshll.u32 (!%p169_p3), %s1078_s12, 2  ;;  %s856_s17 = sshll.u32 (!%p169_p3), %s1078_s12, 6 }
   0x7   : > { %172 = sbr.rel (%p169_p3) target bundleno = 342 (0x156), region = 32  ;;  %p205_p4 = scmp.lt.s32.totalorder (!%p169_p3), %s854_s16, 19 }
   0x8   : > { %p213_p5 = scmp.lt.s32.totalorder (!%p169_p3), %s856_s17, 319  ;;  %p859_p6 = scmp.ne.s32.totalorder (!%p169_p3), %s1078_s12, 0 }
   0xe   : > { %s1233_s16 = smov (!%p205_p4, %s854_s16), 19  ;;  %s1235_s17 = smov (!%p213_p5, %s856_s17), 319 }
   0xf   : > { %s855_s18 = sshll.u32 %s1233_s16, 2  ;;  %s933_s22 = sshll.u32 %s1235_s17, 3  ;;  %v1088_v0 = vmov (!%p859_p6), 0.0  }
  0x10   : > { %s1134_s21 = scalar_lea.vmem %s1224_s0, %s855_s18  ;;  %s1139_s25 = scalar_lea.vmem %s1225_s1, %s933_s22  ;;  %228 = vst [vmem:[#allocation2] sm:$0xff] (!%p859_p6), %v1088_v0  ;;  %229 = vst [vmem:[#allocation2 + $0x8] sm:$0xff] (!%p859_p6), %v1088_v0 }
  0x11   : > { %227 = sbr.rel (%p859_p6) target bundleno = 24 (0x18), region = 36 }
  0x18 PF: > { %v964_v1 = vld [vmem:[%s1139_s25 + $0x4] ss:$8 sps:$4 sm:$0xff]   ;;  %v968_v3 = vld [vmem:[%s1139_s25] ss:$8 sps:$4 sm:$0xff]   ;;  %v970_v5 = vld [vmem:[%s1139_s25 + $0x14] ss:$8 sps:$4 sm:$0xff]  }
  0x19   : > { %v966_v2 = vld [vmem:[%s1139_s25 + $0x104] ss:$8 sps:$4 sm:$0xff]   ;;  %632 = vmatprep.subr.bf16.mxu0 %v964_v1  ;;  %v969_v4 = vld [vmem:[%s1139_s25 + $0x100] ss:$8 sps:$4 sm:$0xff]   ;;  %v972_v6 = vld [vmem:[%s1139_s25 + $0x114] ss:$8 sps:$4 sm:$0xff]  }
  0x1a   : > { %673 = vmatprep.subr.bf16.mxu1 %v966_v2  ;;  %633 = vmatpush1.bf16.msra.mxu0 %v968_v3  ;;  %v974_v7 = vld [vmem:[%s1139_s25 + $0x10] ss:$8 sps:$4 sm:$0xff]   ;;  %v976_v9 = vld [vmem:[%s1139_s25 + $0x24] ss:$8 sps:$4 sm:$0xff]   ;;  %v980_v11 = vld [vmem:[%s1139_s25 + $0x20] ss:$8 sps:$4 sm:$0xff]  }
  0x1b   : > { %674 = vmatpush1.bf16.msra.mxu1 %v969_v4  ;;  %634 = vmatprep.subr.bf16.mxu0 %v970_v5  ;;  %v975_v8 = vld [vmem:[%s1139_s25 + $0x110] ss:$8 sps:$4 sm:$0xff]   ;;  %v978_v10 = vld [vmem:[%s1139_s25 + $0x124] ss:$8 sps:$4 sm:$0xff]   ;;  %v981_v12 = vld [vmem:[%s1139_s25 + $0x120] ss:$8 sps:$4 sm:$0xff]  }
  0x1c   : > { %675 = vmatprep.subr.bf16.mxu1 %v972_v6  ;;  %v982_v13 = vld [vmem:[%s1139_s25 + $0x34] ss:$8 sps:$4 sm:$0xff]   ;;  %v986_v15 = vld [vmem:[%s1139_s25 + $0x30] ss:$8 sps:$4 sm:$0xff]   ;;  %v988_v17 = vld [vmem:[%s1139_s25 + $0x44] ss:$8 sps:$4 sm:$0xff]  }
  0x1d   : > { %v984_v14 = vld [vmem:[%s1139_s25 + $0x134] ss:$8 sps:$4 sm:$0xff]   ;;  %v987_v16 = vld [vmem:[%s1139_s25 + $0x130] ss:$8 sps:$4 sm:$0xff]   ;;  %v990_v18 = vld [vmem:[%s1139_s25 + $0x144] ss:$8 sps:$4 sm:$0xff]  }
  0x1e   : > { %635 = vmatpush1.bf16.msra.mxu0 %v974_v7  ;;  %v992_v19 = vld [vmem:[%s1139_s25 + $0x40] ss:$8 sps:$4 sm:$0xff]   ;;  %v994_v21 = vld [vmem:[%s1139_s25 + $0x54] ss:$8 sps:$4 sm:$0xff]   ;;  %v998_v23 = vld [vmem:[%s1139_s25 + $0x50] ss:$8 sps:$4 sm:$0xff]  }
  0x1f   : > { %676 = vmatpush1.bf16.msra.mxu1 %v975_v8  ;;  %636 = vmatprep.subr.bf16.mxu0 %v976_v9  ;;  %v993_v20 = vld [vmem:[%s1139_s25 + $0x140] ss:$8 sps:$4 sm:$0xff]   ;;  %v996_v22 = vld [vmem:[%s1139_s25 + $0x154] ss:$8 sps:$4 sm:$0xff]   ;;  %v999_v24 = vld [vmem:[%s1139_s25 + $0x150] ss:$8 sps:$4 sm:$0xff]  }
  0x20   : > { %677 = vmatprep.subr.bf16.mxu1 %v978_v10  ;;  %v1000_v25 = vld [vmem:[%s1139_s25 + $0x64] ss:$8 sps:$4 sm:$0xff]   ;;  %v1004_v27 = vld [vmem:[%s1139_s25 + $0x60] ss:$8 sps:$4 sm:$0xff]   ;;  %v1006_v29 = vld [vmem:[%s1139_s25 + $0x74] ss:$8 sps:$4 sm:$0xff]  }
  0x21   : > { %v1002_v26 = vld [vmem:[%s1139_s25 + $0x164] ss:$8 sps:$4 sm:$0xff]   ;;  %v1005_v28 = vld [vmem:[%s1139_s25 + $0x160] ss:$8 sps:$4 sm:$0xff]   ;;  %v1008_v30 = vld [vmem:[%s1139_s25 + $0x174] ss:$8 sps:$4 sm:$0xff]  }
  0x22   : > { %637 = vmatpush1.bf16.msra.mxu0 %v980_v11  ;;  %v1010_v31 = vld [vmem:[%s1139_s25 + $0x70] ss:$8 sps:$4 sm:$0xff]   ;;  %v1012_v33 = vld [vmem:[%s1139_s25 + $0x84] ss:$8 sps:$4 sm:$0xff]   ;;  %v1016_v35 = vld [vmem:[%s1139_s25 + $0x80] ss:$8 sps:$4 sm:$0xff]  }
  0x23   : > { %678 = vmatpush1.bf16.msra.mxu1 %v981_v12  ;;  %638 = vmatprep.subr.bf16.mxu0 %v982_v13  ;;  %v1011_v32 = vld [vmem:[%s1139_s25 + $0x170] ss:$8 sps:$4 sm:$0xff]   ;;  %v1014_v34 = vld [vmem:[%s1139_s25 + $0x184] ss:$8 sps:$4 sm:$0xff]   ;;  %v1017_v36 = vld [vmem:[%s1139_s25 + $0x180] ss:$8 sps:$4 sm:$0xff]  }
  0x24   : > { %679 = vmatprep.subr.bf16.mxu1 %v984_v14  ;;  %v1018_v37 = vld [vmem:[%s1139_s25 + $0x94] ss:$8 sps:$4 sm:$0xff]   ;;  %v1022_v39 = vld [vmem:[%s1139_s25 + $0x90] ss:$8 sps:$4 sm:$0xff]   ;;  %v1024_v41 = vld [vmem:[%s1139_s25 + $0xa4] ss:$8 sps:$4 sm:$0xff]  }
  0x25   : > { %v1020_v38 = vld [vmem:[%s1139_s25 + $0x194] ss:$8 sps:$4 sm:$0xff]   ;;  %v1023_v40 = vld [vmem:[%s1139_s25 + $0x190] ss:$8 sps:$4 sm:$0xff]   ;;  %v1026_v42 = vld [vmem:[%s1139_s25 + $0x1a4] ss:$8 sps:$4 sm:$0xff]  }
  0x26   : > { %639 = vmatpush1.bf16.msra.mxu0 %v986_v15  ;;  %v1028_v43 = vld [vmem:[%s1139_s25 + $0xa0] ss:$8 sps:$4 sm:$0xff]   ;;  %v1030_v45 = vld [vmem:[%s1139_s25 + $0xb4] ss:$8 sps:$4 sm:$0xff]   ;;  %v1034_v50 = vld [vmem:[%s1139_s25 + $0xb0] ss:$8 sps:$4 sm:$0xff]  }
  0x27   : > { %680 = vmatpush1.bf16.msra.mxu1 %v987_v16  ;;  %640 = vmatprep.subr.bf16.mxu0 %v988_v17  ;;  %v1029_v44 = vld [vmem:[%s1139_s25 + $0x1a0] ss:$8 sps:$4 sm:$0xff]   ;;  %v1032_v46 = vld [vmem:[%s1139_s25 + $0x1b4] ss:$8 sps:$4 sm:$0xff]   ;;  %v1035_v51 = vld [vmem:[%s1139_s25 + $0x1b0] ss:$8 sps:$4 sm:$0xff]  }
  0x28   : > { %681 = vmatprep.subr.bf16.mxu1 %v990_v18  ;;  %v232_v47 = vld [vmem:[%s1134_s21] sm:$0xff]  ;;  %v233_v49 = vld [vmem:[%s1134_s21 + $0x8] sm:$0xff]  ;;  %v1042_v57 = vld [vmem:[%s1139_s25 + $0xd4] ss:$8 sps:$4 sm:$0xff]   ;;  %p928_p7 = scmp.ne.s32.totalorder %s1078_s12, 4 }
  0x29   : > { %v861_v48 = vcombine.high %v232_v47, %v232_v47  ;;  %v863_v52 = vcombine.high %v233_v49, %v233_v49  ;;  %v1036_v53 = vld [vmem:[%s1139_s25 + $0xc4] ss:$8 sps:$4 sm:$0xff]   ;;  %v1040_v55 = vld [vmem:[%s1139_s25 + $0xc0] ss:$8 sps:$4 sm:$0xff]   ;;  %v1044_v58 = vld [vmem:[%s1139_s25 + $0x1d4] ss:$8 sps:$4 sm:$0xff]   ;;  %v860_v5 = vcombine.low %v232_v47, %v232_v47  ;;  %v862_v6 = vcombine.low %v233_v49, %v233_v49 }
  0x2a   : > { %641 = vmatpush1.bf16.msra.mxu0 %v992_v19  ;;  %v1038_v54 = vld [vmem:[%s1139_s25 + $0x1c4] ss:$8 sps:$4 sm:$0xff]   ;;  %v1041_v56 = vld [vmem:[%s1139_s25 + $0x1c0] ss:$8 sps:$4 sm:$0xff]   ;;  %v1046_v59 = vld [vmem:[%s1139_s25 + $0xd0] ss:$8 sps:$4 sm:$0xff]  }
  0x2b   : > { %682 = vmatpush1.bf16.msra.mxu1 %v993_v20  ;;  %642 = vmatprep.subr.bf16.mxu0 %v994_v21  ;;  %v1047_v60 = vld [vmem:[%s1139_s25 + $0x1d0] ss:$8 sps:$4 sm:$0xff]   ;;  %v1048_v61 = vld [vmem:[%s1139_s25 + $0xe4] ss:$8 sps:$4 sm:$0xff]   ;;  %v1052_v63 = vld [vmem:[%s1139_s25 + $0xe0] ss:$8 sps:$4 sm:$0xff]  }
  0x2c   : > { %683 = vmatprep.subr.bf16.mxu1 %v996_v22  ;;  %664 = vmatprep.mubr.bf16.mxu0 %v861_v48  ;;  %v1050_v62 = vld [vmem:[%s1139_s25 + $0x1e4] ss:$8 sps:$4 sm:$0xff]   ;;  %v1053_v0 = vld [vmem:[%s1139_s25 + $0x1e0] ss:$8 sps:$4 sm:$0xff]   ;;  %v1054_v1 = vld [vmem:[%s1139_s25 + $0xf4] ss:$8 sps:$4 sm:$0xff]  }
  0x2d   : > { %705 = vmatprep.mubr.bf16.mxu1 %v863_v52  ;;  %v1056_v2 = vld [vmem:[%s1139_s25 + $0x1f4] ss:$8 sps:$4 sm:$0xff]   ;;  %v1058_v3 = vld [vmem:[%s1139_s25 + $0xf0] ss:$8 sps:$4 sm:$0xff]   ;;  %v230_v8 = vld [vmem:[#allocation2] sm:$0xff] }
  0x2e   : > { %643 = vmatpush1.bf16.msra.mxu0 %v998_v23  ;;  %v1059_v4 = vld [vmem:[%s1139_s25 + $0x1f0] ss:$8 sps:$4 sm:$0xff]   ;;  %v231_v12 = vld [vmem:[#allocation2 + $0x8] sm:$0xff]  ;;  %v737_v23 = vlaneseq (!%p928_p7) }
  0x2f   : > { %684 = vmatpush1.bf16.msra.mxu1 %v999_v24  ;;  %644 = vmatprep.subr.bf16.mxu0 %v1000_v25 }
  0x30   : > { %685 = vmatprep.subr.bf16.mxu1 %v1002_v26  ;;  %v738_v26 = vshrl.u32 (!%p928_p7), %v737_v23, 7 }
  0x32   : > { %645 = vmatpush1.bf16.msra.mxu0 %v1004_v27 }
  0x33   : > { %686 = vmatpush1.bf16.msra.mxu1 %v1005_v28  ;;  %646 = vmatprep.subr.bf16.mxu0 %v1006_v29  ;;  %v735_v29 = vld [vmem:[%s1226_s2] sm:$0x3] (!%p928_p7) }
  0x34   : > { %687 = vmatprep.subr.bf16.mxu1 %v1008_v30  ;;  %v739_v30 = vsub.s32 (!%p928_p7), 0, %v738_v26 }
  0x36   : > { %647 = vmatpush1.bf16.msra.mxu0 %v1010_v31  ;;  %v743_v31 = vsub.s32 (!%p928_p7), 1, %v738_v26 }
  0x37   : > { %688 = vmatpush1.bf16.msra.mxu1 %v1011_v32  ;;  %648 = vmatprep.subr.bf16.mxu0 %v1012_v33 }
  0x38   : > { %689 = vmatprep.subr.bf16.mxu1 %v1014_v34 }
  0x3a   : > { %649 = vmatpush1.bf16.msra.mxu0 %v1016_v35 }
  0x3b   : > { %690 = vmatpush1.bf16.msra.mxu1 %v1017_v36  ;;  %650 = vmatprep.subr.bf16.mxu0 %v1018_v37  ;;  %v740_v36 = vrot.slane (!%p928_p7), %v735_v29, %v739_v30  ;;  %v744_v37 = vrot.slane (!%p928_p7), %v735_v29, %v743_v31 }
  0x3c   : > { %691 = vmatprep.subr.bf16.mxu1 %v1020_v38 }
  0x3e   : > { %651 = vmatpush1.bf16.msra.mxu0 %v1022_v39 }
  0x3f   : > { %692 = vmatpush1.bf16.msra.mxu1 %v1023_v40  ;;  %652 = vmatprep.subr.bf16.mxu0 %v1024_v41 }
  0x40   : > { %693 = vmatprep.subr.bf16.mxu1 %v1026_v42 }
  0x42   : > { %653 = vmatpush1.bf16.msra.mxu0 %v1028_v43 }
  0x43   : > { %694 = vmatpush1.bf16.msra.mxu1 %v1029_v44  ;;  %654 = vmatprep.subr.bf16.mxu0 %v1030_v45 }
  0x44   : > { %695 = vmatprep.subr.bf16.mxu1 %v1032_v46 }
  0x46   : > { %655 = vmatpush1.bf16.msra.mxu0 %v1034_v50 }
  0x47   : > { %696 = vmatpush1.bf16.msra.mxu1 %v1035_v51  ;;  %656 = vmatprep.subr.bf16.mxu0 %v1036_v53 }
  0x48   : > { %697 = vmatprep.subr.bf16.mxu1 %v1038_v54 }
  0x4a   : > { %657 = vmatpush1.bf16.msra.mxu0 %v1040_v55 }
  0x4b   : > { %698 = vmatpush1.bf16.msra.mxu1 %v1041_v56  ;;  %658 = vmatprep.subr.bf16.mxu0 %v1042_v57 }
  0x4c   : > { %699 = vmatprep.subr.bf16.mxu1 %v1044_v58 }
  0x4e   : > { %659 = vmatpush1.bf16.msra.mxu0 %v1046_v59 }
  0x4f   : > { %700 = vmatpush1.bf16.msra.mxu1 %v1047_v60  ;;  %660 = vmatprep.subr.bf16.mxu0 %v1048_v61 }
  0x50   : > { %701 = vmatprep.subr.bf16.mxu1 %v1050_v62 }
  0x52   : > { %661 = vmatpush1.bf16.msra.mxu0 %v1052_v63 }
  0x53   : > { %702 = vmatpush1.bf16.msra.mxu1 %v1053_v0  ;;  %662 = vmatprep.subr.bf16.mxu0 %v1054_v1 }
  0x54   : > { %703 = vmatprep.subr.bf16.mxu1 %v1056_v2 }
  0x56   : > { %663 = vmatpush1.bf16.msra.mxu0 %v1058_v3 }
  0x57   : > { %704 = vmatpush1.bf16.msra.mxu1 %v1059_v4 }
  0x59   : > { %665 = vmatmul.mubr.bf16.vlgmr.msra.gmra.mrb[0].mxu0 %v860_v5 }
  0x5a   : > { %706 = vmatmul.mubr.bf16.vlgmr.msra.gmra.mrb[0].mxu1 %v862_v6 }
 0x12c   : > { %v666_v7 = vpop.f32.mrb[0].mxu0 }
 0x12d   : > { %v707_v9 = vpop.f32.mrb[0].mxu1  ;;  %v668_v11 = vpop.f32.mrb[1].mxu0  ;;  %721 = sbr.rel (%p928_p7) target bundleno = 342 (0x156), region = 40 }
 0x12e   : > { %v708_v10 = vadd.f32 %v707_v9, %v666_v7  ;;  %v709_v13 = vpop.f32.mrb[1].mxu1  ;;  %v670_v15 = vpop.f32.mrb[2].mxu0 }
 0x12f   : > { %v710_v14 = vadd.f32 %v709_v13, %v668_v11  ;;  %v711_v16 = vpop.f32.mrb[2].mxu1  ;;  %v671_v18 = vpop.f32.mrb[3].mxu0 }
 0x130   : > { %v714_v17 = vadd.f32 %v708_v10, %v230_v8  ;;  %v712_v19 = vpop.f32.mrb[3].mxu1 }
 0x131   : > { %v715_v20 = vadd.f32 %v710_v14, %v231_v12 }
 0x132   : > { %716 = vst [vmem:[#allocation2] sm:$0xff] %v714_v17 }
 0x133   : > { %717 = vst [vmem:[#allocation2 + $0x8] sm:$0xff] %v715_v20 }
 0x139   : > { %v722_v21 = vld [vmem:[#allocation2] sm:$0xff] }
 0x13a   : > { %v723_v22 = vld [vmem:[#allocation2 + $0x8] sm:$0xff]  ;;  %v725_v24 = vmul.f32 1024.0, %v722_v21 }
 0x13b   : > { %v726_v25 = vmul.f32 1024.0, %v723_v22 }
 0x13c   : > { %v935_v27 = vround.rtne.f32 %v725_v24 }
 0x13d   : > { %v936_v28 = vround.rtne.f32 %v726_v25 }
 0x13e   : > { %v729_v32 = vmax.f32 %v935_v27, -32768.0 }
 0x13f   : > { %v730_v33 = vmax.f32 %v936_v28, -32768.0 }
 0x140   : > { %v731_v34 = vmin.f32 %v729_v32, 32767.0 }
 0x141   : > { %v732_v35 = vmin.f32 %v730_v33, 32767.0 }
 0x142   : > { %v733_v38 = vmul.f32 0.0009765625, %v731_v34 }
 0x143   : > { %v734_v39 = vmul.f32 0.0009765625, %v732_v35 }
 0x144   : > { %v747_v40 = vadd.f32 %v740_v36, %v733_v38 }
 0x145   : > { %v748_v41 = vadd.f32 %v744_v37, %v734_v39 }
 0x146   : > { %v750_v42 = vmul.f32 16.0, %v747_v40 }
 0x147   : > { %v751_v43 = vmul.f32 16.0, %v748_v41 }
 0x148   : > { %v937_v44 = vround.rtne.f32 %v750_v42 }
 0x149   : > { %v938_v45 = vround.rtne.f32 %v751_v43 }
 0x14a   : > { %v754_v46 = vmax.f32 %v937_v44, -128.0 }
 0x14b   : > { %v755_v47 = vmax.f32 %v938_v45, -128.0 }
 0x14c   : > { %v756_v48 = vmin.f32 %v754_v46, 127.0 }
 0x14d   : > { %v757_v49 = vmin.f32 %v755_v47, 127.0 }
 0x14e   : > { %v758_v50 = vmul.f32 0.0625, %v756_v48 }
 0x14f   : > { %v759_v51 = vmul.f32 0.0625, %v757_v49 }
 0x150   : > { %v760_v52 = vmax.f32 %v758_v50, 0.0 }
 0x151   : > { %v761_v53 = vmax.f32 %v759_v51, 0.0 }
 0x153   : > { %v934_v54 = vpack.c.bf16 %v761_v53, %v760_v52 }
 0x155   : > { %770 = vst [vmem:[%s1227_s3] sm:$0xff] %v934_v54 }
 0x156 PF: > { %s13_s14 = sadd.s32 1, %s1086_s14   ;;  %s1228_s12 = smov %s1082_s13 }
 0x157   : > { %p10_p8 = scmp.ge.s32.totalorder %s13_s14, 7   ;;  %s1229_s13 = smov %s1231_s15 }
 0x159   :  { %12 = sbr.rel (!%p10_p8) target bundleno = 2 (0x2), region = 73 }

// kernel: _lambda_.36
= control target key start
LH: loop header
LB: loop body
LE: loop exit
PB: predicated region body
PF: predicated region fallthrough
CT: control target
= control target key end

     0   :  { %s1794_s12 = smov 0   ;;  %s1796_s13 = smov 0   ;;  %s1988_s0 = inlined_call_operand.vmem [shape: bf16[8,2560], index: 0, kind: input, shape index: {}]   ;;  %s1989_s1 = inlined_call_operand.vmem [shape: bf16[2560,512], index: 1, kind: input, shape index: {}]   ;;  %s1990_s2 = inlined_call_operand.vmem [shape: f32[1,512], index: 2, kind: input, shape index: {}]   ;;  %s1991_s3 = inlined_call_operand.vmem [shape: bf16[8,512], index: 3, kind: output, shape index: {}]  }
   0x1   :  { %s1798_s14 = smov 0  }
   0x2 LB: > { %s22_s15 = sadd.s32 1, %s1767_s13  ;;  %p1372_p0 = scmp.ge.s32.totalorder %s1771_s14, 1  ;;  %s1771_s14 = sphi %s1798_s14, %s13_s14   ;;  %s1767_s13 = sphi %s1796_s13, %s1993_s13   ;;  %s1763_s12 = sphi %s1794_s12, %s1992_s12  }
   0x3   : > { %p23_p1 = scmp.ge.s32.totalorder %s22_s15, 5  ;;  %p168_p2 = scmp.lt.s32.totalorder %s1771_s14, 6 }
   0x5   : > { %s1995_s15 = smov (%p23_p1, %s22_s15), 0  ;;  %p169_p3 = pnand %p1372_p0, %p168_p2 }
   0x6   : > { %s1373_s16 = sshll.u32 (!%p169_p3), %s1763_s12, 2  ;;  %s1375_s17 = sshll.u32 (!%p169_p3), %s1763_s12, 6 }
   0x7   : > { %172 = sbr.rel (%p169_p3) target bundleno = 406 (0x196), region = 32  ;;  %p205_p4 = scmp.lt.s32.totalorder (!%p169_p3), %s1373_s16, 19 }
   0x8   : > { %p213_p5 = scmp.lt.s32.totalorder (!%p169_p3), %s1375_s17, 319  ;;  %p1378_p6 = scmp.ne.s32.totalorder (!%p169_p3), %s1763_s12, 0 }
   0xe   : > { %s1997_s16 = smov (!%p205_p4, %s1373_s16), 19  ;;  %s1999_s17 = smov (!%p213_p5, %s1375_s17), 319 }
   0xf   : > { %s1374_s18 = sshll.u32 %s1997_s16, 2  ;;  %s1517_s22 = sshll.u32 %s1999_s17, 4  ;;  %v1773_v0 = vmov (!%p1378_p6), 0.0  }
  0x10   : > { %s1819_s21 = scalar_lea.vmem %s1988_s0, %s1374_s18  ;;  %s1824_s25 = scalar_lea.vmem %s1989_s1, %s1517_s22  ;;  %228 = vst [vmem:[#allocation2] sm:$0xff] (!%p1378_p6), %v1773_v0  ;;  %229 = vst [vmem:[#allocation2 + $0x8] sm:$0xff] (!%p1378_p6), %v1773_v0 }
  0x11   : > { %227 = sbr.rel (%p1378_p6) target bundleno = 24 (0x18), region = 36  ;;  %230 = vst [vmem:[#allocation2 + $0x10] sm:$0xff] (!%p1378_p6), %v1773_v0  ;;  %231 = vst [vmem:[#allocation2 + $0x18] sm:$0xff] (!%p1378_p6), %v1773_v0 }
  0x18 PF: > { %v1553_v1 = vld [vmem:[%s1824_s25 + $0x4] ss:$16 sps:$4 sm:$0xff]   ;;  %v1557_v3 = vld [vmem:[%s1824_s25] ss:$16 sps:$4 sm:$0xff]   ;;  %v237_v49 = vld [vmem:[%s1819_s21 + $0x8] sm:$0xff]  ;;  %p1511_p7 = scmp.ne.s32.totalorder %s1763_s12, 4 }
  0x19   : > { %v1555_v2 = vld [vmem:[%s1824_s25 + $0x204] ss:$16 sps:$4 sm:$0xff]   ;;  %1020 = vmatprep.subr.bf16.mxu0 %v1553_v1  ;;  %v1558_v4 = vld [vmem:[%s1824_s25 + $0x200] ss:$16 sps:$4 sm:$0xff]   ;;  %v1382_v52 = vcombine.high %v237_v49, %v237_v49 }
  0x1a   : > { %1061 = vmatprep.subr.bf16.mxu1 %v1555_v2  ;;  %v1559_v5 = vld [vmem:[%s1824_s25 + $0x24] ss:$16 sps:$4 sm:$0xff]   ;;  %1021 = vmatpush1.bf16.msra.mxu0 %v1557_v3  ;;  %v1563_v7 = vld [vmem:[%s1824_s25 + $0x20] ss:$16 sps:$4 sm:$0xff]  }
  0x1b   : > { %1062 = vmatpush1.bf16.msra.mxu1 %v1558_v4  ;;  %v1561_v6 = vld [vmem:[%s1824_s25 + $0x224] ss:$16 sps:$4 sm:$0xff]   ;;  %1022 = vmatprep.subr.bf16.mxu0 %v1559_v5  ;;  %v1564_v8 = vld [vmem:[%s1824_s25 + $0x220] ss:$16 sps:$4 sm:$0xff]   ;;  %v1655_v5 = vld [vmem:[%s1824_s25 + $0xc] ss:$16 sps:$4 sm:$0xff]  }
  0x1c   : > { %1063 = vmatprep.subr.bf16.mxu1 %v1561_v6  ;;  %v1565_v9 = vld [vmem:[%s1824_s25 + $0x44] ss:$16 sps:$4 sm:$0xff]   ;;  %v1569_v11 = vld [vmem:[%s1824_s25 + $0x40] ss:$16 sps:$4 sm:$0xff]   ;;  %1093 = vmatprep.mubr.bf16.mxu1 %v1382_v52  ;;  %v1658_v6 = vld [vmem:[%s1824_s25 + $0x20c] ss:$16 sps:$4 sm:$0xff]  }
  0x1d   : > { %v1567_v10 = vld [vmem:[%s1824_s25 + $0x244] ss:$16 sps:$4 sm:$0xff]   ;;  %v1570_v12 = vld [vmem:[%s1824_s25 + $0x240] ss:$16 sps:$4 sm:$0xff]  }
  0x1e   : > { %1023 = vmatpush1.bf16.msra.mxu0 %v1563_v7  ;;  %v1571_v13 = vld [vmem:[%s1824_s25 + $0x64] ss:$16 sps:$4 sm:$0xff]   ;;  %v1575_v15 = vld [vmem:[%s1824_s25 + $0x60] ss:$16 sps:$4 sm:$0xff]  }
  0x1f   : > { %1064 = vmatpush1.bf16.msra.mxu1 %v1564_v8  ;;  %1024 = vmatprep.subr.bf16.mxu0 %v1565_v9  ;;  %v1573_v14 = vld [vmem:[%s1824_s25 + $0x264] ss:$16 sps:$4 sm:$0xff]   ;;  %v1576_v16 = vld [vmem:[%s1824_s25 + $0x260] ss:$16 sps:$4 sm:$0xff]   ;;  %v1900_v8 = vcombine.low %v237_v49, %v237_v49  ;;  %v1653_v9 = vld [vmem:[%s1824_s25 + $0x8] ss:$16 sps:$4 sm:$0xff]  }
  0x20   : > { %1065 = vmatprep.subr.bf16.mxu1 %v1567_v10  ;;  %v1577_v17 = vld [vmem:[%s1824_s25 + $0x84] ss:$16 sps:$4 sm:$0xff]   ;;  %v1581_v19 = vld [vmem:[%s1824_s25 + $0x80] ss:$16 sps:$4 sm:$0xff]   ;;  %v1656_v10 = vld [vmem:[%s1824_s25 + $0x208] ss:$16 sps:$4 sm:$0xff]  }
  0x21   : > { %v1579_v18 = vld [vmem:[%s1824_s25 + $0x284] ss:$16 sps:$4 sm:$0xff]   ;;  %v1582_v20 = vld [vmem:[%s1824_s25 + $0x280] ss:$16 sps:$4 sm:$0xff]   ;;  %v1713_v49 = vld [vmem:[%s1824_s25 + $0x148] ss:$16 sps:$4 sm:$0xff]  }
  0x22   : > { %1025 = vmatpush1.bf16.msra.mxu0 %v1569_v11  ;;  %v1583_v21 = vld [vmem:[%s1824_s25 + $0xa4] ss:$16 sps:$4 sm:$0xff]   ;;  %v1587_v23 = vld [vmem:[%s1824_s25 + $0xa0] ss:$16 sps:$4 sm:$0xff]   ;;  %v1661_v11 = vld [vmem:[%s1824_s25 + $0x2c] ss:$16 sps:$4 sm:$0xff]  }
  0x23   : > { %1066 = vmatpush1.bf16.msra.mxu1 %v1570_v12  ;;  %1026 = vmatprep.subr.bf16.mxu0 %v1571_v13  ;;  %v1585_v22 = vld [vmem:[%s1824_s25 + $0x2a4] ss:$16 sps:$4 sm:$0xff]   ;;  %v1588_v24 = vld [vmem:[%s1824_s25 + $0x2a0] ss:$16 sps:$4 sm:$0xff]   ;;  %v1664_v12 = vld [vmem:[%s1824_s25 + $0x22c] ss:$16 sps:$4 sm:$0xff]  }
  0x24   : > { %1067 = vmatprep.subr.bf16.mxu1 %v1573_v14  ;;  %v1589_v25 = vld [vmem:[%s1824_s25 + $0xc4] ss:$16 sps:$4 sm:$0xff]   ;;  %v1593_v27 = vld [vmem:[%s1824_s25 + $0xc0] ss:$16 sps:$4 sm:$0xff]   ;;  %v1659_v13 = vld [vmem:[%s1824_s25 + $0x28] ss:$16 sps:$4 sm:$0xff]  }
  0x25   : > { %v1591_v26 = vld [vmem:[%s1824_s25 + $0x2c4] ss:$16 sps:$4 sm:$0xff]   ;;  %v1594_v28 = vld [vmem:[%s1824_s25 + $0x2c0] ss:$16 sps:$4 sm:$0xff]   ;;  %v1662_v14 = vld [vmem:[%s1824_s25 + $0x228] ss:$16 sps:$4 sm:$0xff]  }
  0x26   : > { %1027 = vmatpush1.bf16.msra.mxu0 %v1575_v15  ;;  %v1595_v29 = vld [vmem:[%s1824_s25 + $0xe4] ss:$16 sps:$4 sm:$0xff]   ;;  %v1599_v31 = vld [vmem:[%s1824_s25 + $0xe0] ss:$16 sps:$4 sm:$0xff]   ;;  %v1667_v15 = vld [vmem:[%s1824_s25 + $0x4c] ss:$16 sps:$4 sm:$0xff]  }
  0x27   : > { %1068 = vmatpush1.bf16.msra.mxu1 %v1576_v16  ;;  %1028 = vmatprep.subr.bf16.mxu0 %v1577_v17  ;;  %v1597_v30 = vld [vmem:[%s1824_s25 + $0x2e4] ss:$16 sps:$4 sm:$0xff]   ;;  %v1600_v32 = vld [vmem:[%s1824_s25 + $0x2e0] ss:$16 sps:$4 sm:$0xff]   ;;  %v1670_v16 = vld [vmem:[%s1824_s25 + $0x24c] ss:$16 sps:$4 sm:$0xff]  }
  0x28   : > { %1069 = vmatprep.subr.bf16.mxu1 %v1579_v18  ;;  %v1601_v33 = vld [vmem:[%s1824_s25 + $0x104] ss:$16 sps:$4 sm:$0xff]   ;;  %v1605_v35 = vld [vmem:[%s1824_s25 + $0x100] ss:$16 sps:$4 sm:$0xff]   ;;  %v1665_v17 = vld [vmem:[%s1824_s25 + $0x48] ss:$16 sps:$4 sm:$0xff]  }
  0x29   : > { %v1603_v34 = vld [vmem:[%s1824_s25 + $0x304] ss:$16 sps:$4 sm:$0xff]   ;;  %v1606_v36 = vld [vmem:[%s1824_s25 + $0x300] ss:$16 sps:$4 sm:$0xff]   ;;  %v1668_v18 = vld [vmem:[%s1824_s25 + $0x248] ss:$16 sps:$4 sm:$0xff]  }
  0x2a   : > { %1029 = vmatpush1.bf16.msra.mxu0 %v1581_v19  ;;  %v1607_v37 = vld [vmem:[%s1824_s25 + $0x124] ss:$16 sps:$4 sm:$0xff]   ;;  %v1611_v39 = vld [vmem:[%s1824_s25 + $0x120] ss:$16 sps:$4 sm:$0xff]   ;;  %v1673_v19 = vld [vmem:[%s1824_s25 + $0x6c] ss:$16 sps:$4 sm:$0xff]  }
  0x2b   : > { %1070 = vmatpush1.bf16.msra.mxu1 %v1582_v20  ;;  %1030 = vmatprep.subr.bf16.mxu0 %v1583_v21  ;;  %v1609_v38 = vld [vmem:[%s1824_s25 + $0x324] ss:$16 sps:$4 sm:$0xff]   ;;  %v1612_v40 = vld [vmem:[%s1824_s25 + $0x320] ss:$16 sps:$4 sm:$0xff]   ;;  %v1676_v20 = vld [vmem:[%s1824_s25 + $0x26c] ss:$16 sps:$4 sm:$0xff]  }
  0x2c   : > { %1071 = vmatprep.subr.bf16.mxu1 %v1585_v22  ;;  %v1613_v41 = vld [vmem:[%s1824_s25 + $0x144] ss:$16 sps:$4 sm:$0xff]   ;;  %v1617_v43 = vld [vmem:[%s1824_s25 + $0x140] ss:$16 sps:$4 sm:$0xff]   ;;  %v1671_v21 = vld [vmem:[%s1824_s25 + $0x68] ss:$16 sps:$4 sm:$0xff]  }
  0x2d   : > { %v1615_v42 = vld [vmem:[%s1824_s25 + $0x344] ss:$16 sps:$4 sm:$0xff]   ;;  %v1618_v44 = vld [vmem:[%s1824_s25 + $0x340] ss:$16 sps:$4 sm:$0xff]   ;;  %v1674_v22 = vld [vmem:[%s1824_s25 + $0x268] ss:$16 sps:$4 sm:$0xff]  }
  0x2e   : > { %1031 = vmatpush1.bf16.msra.mxu0 %v1587_v23  ;;  %v1619_v45 = vld [vmem:[%s1824_s25 + $0x164] ss:$16 sps:$4 sm:$0xff]   ;;  %v1623_v50 = vld [vmem:[%s1824_s25 + $0x160] ss:$16 sps:$4 sm:$0xff]   ;;  %v1679_v23 = vld [vmem:[%s1824_s25 + $0x8c] ss:$16 sps:$4 sm:$0xff]  }
  0x2f   : > { %1072 = vmatpush1.bf16.msra.mxu1 %v1588_v24  ;;  %1032 = vmatprep.subr.bf16.mxu0 %v1589_v25  ;;  %v1621_v46 = vld [vmem:[%s1824_s25 + $0x364] ss:$16 sps:$4 sm:$0xff]   ;;  %v1624_v51 = vld [vmem:[%s1824_s25 + $0x360] ss:$16 sps:$4 sm:$0xff]   ;;  %v1682_v24 = vld [vmem:[%s1824_s25 + $0x28c] ss:$16 sps:$4 sm:$0xff]  }
  0x30   : > { %1073 = vmatprep.subr.bf16.mxu1 %v1591_v26  ;;  %v236_v47 = vld [vmem:[%s1819_s21] sm:$0xff]  ;;  %v1677_v25 = vld [vmem:[%s1824_s25 + $0x88] ss:$16 sps:$4 sm:$0xff]  }
  0x31   : > { %v1874_v48 = vcombine.high %v236_v47, %v236_v47  ;;  %v1625_v53 = vld [vmem:[%s1824_s25 + $0x184] ss:$16 sps:$4 sm:$0xff]   ;;  %v1629_v55 = vld [vmem:[%s1824_s25 + $0x180] ss:$16 sps:$4 sm:$0xff]   ;;  %v1898_v7 = vcombine.low %v236_v47, %v236_v47  ;;  %v1680_v26 = vld [vmem:[%s1824_s25 + $0x288] ss:$16 sps:$4 sm:$0xff]  }
  0x32   : > { %1033 = vmatpush1.bf16.msra.mxu0 %v1593_v27  ;;  %v1627_v54 = vld [vmem:[%s1824_s25 + $0x384] ss:$16 sps:$4 sm:$0xff]   ;;  %v1630_v56 = vld [vmem:[%s1824_s25 + $0x380] ss:$16 sps:$4 sm:$0xff]   ;;  %v1685_v27 = vld [vmem:[%s1824_s25 + $0xac] ss:$16 sps:$4 sm:$0xff]  }
  0x33   : > { %1074 = vmatpush1.bf16.msra.mxu1 %v1594_v28  ;;  %1034 = vmatprep.subr.bf16.mxu0 %v1595_v29  ;;  %v1631_v57 = vld [vmem:[%s1824_s25 + $0x1a4] ss:$16 sps:$4 sm:$0xff]   ;;  %v1635_v59 = vld [vmem:[%s1824_s25 + $0x1a0] ss:$16 sps:$4 sm:$0xff]   ;;  %v1688_v28 = vld [vmem:[%s1824_s25 + $0x2ac] ss:$16 sps:$4 sm:$0xff]  }
  0x34   : > { %1075 = vmatprep.subr.bf16.mxu1 %v1597_v30  ;;  %1052 = vmatprep.mubr.bf16.mxu0 %v1874_v48  ;;  %v1633_v58 = vld [vmem:[%s1824_s25 + $0x3a4] ss:$16 sps:$4 sm:$0xff]   ;;  %v1636_v60 = vld [vmem:[%s1824_s25 + $0x3a0] ss:$16 sps:$4 sm:$0xff]   ;;  %v1683_v29 = vld [vmem:[%s1824_s25 + $0xa8] ss:$16 sps:$4 sm:$0xff]  }
  0x35   : > { %v1637_v61 = vld [vmem:[%s1824_s25 + $0x1c4] ss:$16 sps:$4 sm:$0xff]   ;;  %v1641_v63 = vld [vmem:[%s1824_s25 + $0x1c0] ss:$16 sps:$4 sm:$0xff]   ;;  %v1686_v30 = vld [vmem:[%s1824_s25 + $0x2a8] ss:$16 sps:$4 sm:$0xff]  }
  0x36   : > { %1035 = vmatpush1.bf16.msra.mxu0 %v1599_v31  ;;  %v1639_v62 = vld [vmem:[%s1824_s25 + $0x3c4] ss:$16 sps:$4 sm:$0xff]   ;;  %v1642_v0 = vld [vmem:[%s1824_s25 + $0x3c0] ss:$16 sps:$4 sm:$0xff]   ;;  %v1691_v31 = vld [vmem:[%s1824_s25 + $0xcc] ss:$16 sps:$4 sm:$0xff]  }
  0x37   : > { %1076 = vmatpush1.bf16.msra.mxu1 %v1600_v32  ;;  %1036 = vmatprep.subr.bf16.mxu0 %v1601_v33  ;;  %v1643_v1 = vld [vmem:[%s1824_s25 + $0x1e4] ss:$16 sps:$4 sm:$0xff]   ;;  %v1647_v3 = vld [vmem:[%s1824_s25 + $0x1e0] ss:$16 sps:$4 sm:$0xff]   ;;  %v1694_v32 = vld [vmem:[%s1824_s25 + $0x2cc] ss:$16 sps:$4 sm:$0xff]  }
  0x38   : > { %1077 = vmatprep.subr.bf16.mxu1 %v1603_v34  ;;  %v1645_v2 = vld [vmem:[%s1824_s25 + $0x3e4] ss:$16 sps:$4 sm:$0xff]   ;;  %v1648_v4 = vld [vmem:[%s1824_s25 + $0x3e0] ss:$16 sps:$4 sm:$0xff]   ;;  %v1689_v33 = vld [vmem:[%s1824_s25 + $0xc8] ss:$16 sps:$4 sm:$0xff]  }
  0x39   : > { %v1692_v34 = vld [vmem:[%s1824_s25 + $0x2c8] ss:$16 sps:$4 sm:$0xff]   ;;  %v1715_v47 = vld [vmem:[%s1824_s25 + $0x14c] ss:$16 sps:$4 sm:$0xff]  }
  0x3a   : > { %1037 = vmatpush1.bf16.msra.mxu0 %v1605_v35  ;;  %v1697_v35 = vld [vmem:[%s1824_s25 + $0xec] ss:$16 sps:$4 sm:$0xff]  }
  0x3b   : > { %1078 = vmatpush1.bf16.msra.mxu1 %v1606_v36  ;;  %1038 = vmatprep.subr.bf16.mxu0 %v1607_v37  ;;  %v1700_v36 = vld [vmem:[%s1824_s25 + $0x2ec] ss:$16 sps:$4 sm:$0xff]   ;;  %v1695_v37 = vld [vmem:[%s1824_s25 + $0xe8] ss:$16 sps:$4 sm:$0xff]  }
  0x3c   : > { %1079 = vmatprep.subr.bf16.mxu1 %v1609_v38  ;;  %v1698_v38 = vld [vmem:[%s1824_s25 + $0x2e8] ss:$16 sps:$4 sm:$0xff]  }
  0x3e   : > { %1039 = vmatpush1.bf16.msra.mxu0 %v1611_v39  ;;  %v1703_v39 = vld [vmem:[%s1824_s25 + $0x10c] ss:$16 sps:$4 sm:$0xff]  }
  0x3f   : > { %1080 = vmatpush1.bf16.msra.mxu1 %v1612_v40  ;;  %1040 = vmatprep.subr.bf16.mxu0 %v1613_v41  ;;  %v1706_v40 = vld [vmem:[%s1824_s25 + $0x30c] ss:$16 sps:$4 sm:$0xff]   ;;  %v1701_v41 = vld [vmem:[%s1824_s25 + $0x108] ss:$16 sps:$4 sm:$0xff]  }
  0x40   : > { %1081 = vmatprep.subr.bf16.mxu1 %v1615_v42  ;;  %v1704_v42 = vld [vmem:[%s1824_s25 + $0x308] ss:$16 sps:$4 sm:$0xff]  }
  0x42   : > { %1041 = vmatpush1.bf16.msra.mxu0 %v1617_v43  ;;  %v1709_v43 = vld [vmem:[%s1824_s25 + $0x12c] ss:$16 sps:$4 sm:$0xff]  }
  0x43   : > { %1082 = vmatpush1.bf16.msra.mxu1 %v1618_v44  ;;  %1042 = vmatprep.subr.bf16.mxu0 %v1619_v45  ;;  %v1712_v44 = vld [vmem:[%s1824_s25 + $0x32c] ss:$16 sps:$4 sm:$0xff]   ;;  %v1707_v45 = vld [vmem:[%s1824_s25 + $0x128] ss:$16 sps:$4 sm:$0xff]  }
  0x44   : > { %1083 = vmatprep.subr.bf16.mxu1 %v1621_v46  ;;  %v1710_v46 = vld [vmem:[%s1824_s25 + $0x328] ss:$16 sps:$4 sm:$0xff]  }
  0x46   : > { %1043 = vmatpush1.bf16.msra.mxu0 %v1623_v50  ;;  %v1716_v50 = vld [vmem:[%s1824_s25 + $0x348] ss:$16 sps:$4 sm:$0xff]  }
  0x47   : > { %1084 = vmatpush1.bf16.msra.mxu1 %v1624_v51  ;;  %1044 = vmatprep.subr.bf16.mxu0 %v1625_v53  ;;  %v1721_v51 = vld [vmem:[%s1824_s25 + $0x16c] ss:$16 sps:$4 sm:$0xff]   ;;  %v1719_v53 = vld [vmem:[%s1824_s25 + $0x168] ss:$16 sps:$4 sm:$0xff]  }
  0x48   : > { %1085 = vmatprep.subr.bf16.mxu1 %v1627_v54  ;;  %v1722_v54 = vld [vmem:[%s1824_s25 + $0x368] ss:$16 sps:$4 sm:$0xff]  }
  0x4a   : > { %1045 = vmatpush1.bf16.msra.mxu0 %v1629_v55  ;;  %v1727_v55 = vld [vmem:[%s1824_s25 + $0x18c] ss:$16 sps:$4 sm:$0xff]  }
  0x4b   : > { %1086 = vmatpush1.bf16.msra.mxu1 %v1630_v56  ;;  %1046 = vmatprep.subr.bf16.mxu0 %v1631_v57  ;;  %v1730_v56 = vld [vmem:[%s1824_s25 + $0x38c] ss:$16 sps:$4 sm:$0xff]   ;;  %v1725_v57 = vld [vmem:[%s1824_s25 + $0x188] ss:$16 sps:$4 sm:$0xff]  }
  0x4c   : > { %1087 = vmatprep.subr.bf16.mxu1 %v1633_v58  ;;  %v1728_v58 = vld [vmem:[%s1824_s25 + $0x388] ss:$16 sps:$4 sm:$0xff]  }
  0x4e   : > { %1047 = vmatpush1.bf16.msra.mxu0 %v1635_v59  ;;  %v1733_v59 = vld [vmem:[%s1824_s25 + $0x1ac] ss:$16 sps:$4 sm:$0xff]  }
  0x4f   : > { %1088 = vmatpush1.bf16.msra.mxu1 %v1636_v60  ;;  %1048 = vmatprep.subr.bf16.mxu0 %v1637_v61  ;;  %v1736_v60 = vld [vmem:[%s1824_s25 + $0x3ac] ss:$16 sps:$4 sm:$0xff]   ;;  %v1731_v61 = vld [vmem:[%s1824_s25 + $0x1a8] ss:$16 sps:$4 sm:$0xff]  }
  0x50   : > { %1089 = vmatprep.subr.bf16.mxu1 %v1639_v62  ;;  %v1734_v62 = vld [vmem:[%s1824_s25 + $0x3a8] ss:$16 sps:$4 sm:$0xff]  }
  0x52   : > { %1049 = vmatpush1.bf16.msra.mxu0 %v1641_v63  ;;  %v1739_v63 = vld [vmem:[%s1824_s25 + $0x1cc] ss:$16 sps:$4 sm:$0xff]  }
  0x53   : > { %1090 = vmatpush1.bf16.msra.mxu1 %v1642_v0  ;;  %1050 = vmatprep.subr.bf16.mxu0 %v1643_v1  ;;  %v1742_v0 = vld [vmem:[%s1824_s25 + $0x3cc] ss:$16 sps:$4 sm:$0xff]   ;;  %v1737_v1 = vld [vmem:[%s1824_s25 + $0x1c8] ss:$16 sps:$4 sm:$0xff]  }
  0x54   : > { %1091 = vmatprep.subr.bf16.mxu1 %v1645_v2  ;;  %v1740_v2 = vld [vmem:[%s1824_s25 + $0x3c8] ss:$16 sps:$4 sm:$0xff]  }
  0x56   : > { %1051 = vmatpush1.bf16.msra.mxu0 %v1647_v3  ;;  %v1745_v3 = vld [vmem:[%s1824_s25 + $0x1ec] ss:$16 sps:$4 sm:$0xff]  }
  0x57   : > { %1092 = vmatpush1.bf16.msra.mxu1 %v1648_v4  ;;  %1102 = vmatprep.subr.bf16.mxu0 %v1655_v5  ;;  %v1748_v4 = vld [vmem:[%s1824_s25 + $0x3ec] ss:$16 sps:$4 sm:$0xff]   ;;  %v1743_v5 = vld [vmem:[%s1824_s25 + $0x1e8] ss:$16 sps:$4 sm:$0xff]  }
  0x58   : > { %1143 = vmatprep.subr.bf16.mxu1 %v1658_v6  ;;  %v1746_v6 = vld [vmem:[%s1824_s25 + $0x3e8] ss:$16 sps:$4 sm:$0xff]  }
  0x59   : > { %1053 = vmatmul.mubr.bf16.vlgmr.msra.gmra.mrb[0].mxu0 %v1898_v7 }
  0x5a   : > { %1094 = vmatmul.mubr.bf16.vlgmr.msra.gmra.mrb[0].mxu1 %v1900_v8  ;;  %1103 = vmatpush1.bf16.msra.mxu0 %v1653_v9 }
  0x5b   : > { %1144 = vmatpush1.bf16.msra.mxu1 %v1656_v10  ;;  %1104 = vmatprep.subr.bf16.mxu0 %v1661_v11  ;;  %v232_v10 = vld [vmem:[#allocation2] sm:$0xff] }
  0x5c   : > { %1145 = vmatprep.subr.bf16.mxu1 %v1664_v12  ;;  %1134 = vmatprep.mubr.bf16.mxu0 %v1874_v48  ;;  %v1718_v48 = vld [vmem:[%s1824_s25 + $0x34c] ss:$16 sps:$4 sm:$0xff]  }
  0x5d   : > { %1175 = vmatprep.mubr.bf16.mxu1 %v1382_v52  ;;  %v1724_v52 = vld [vmem:[%s1824_s25 + $0x36c] ss:$16 sps:$4 sm:$0xff]  }
  0x5e   : > { %1105 = vmatpush1.bf16.msra.mxu0 %v1659_v13 }
  0x5f   : > { %1146 = vmatpush1.bf16.msra.mxu1 %v1662_v14  ;;  %1106 = vmatprep.subr.bf16.mxu0 %v1667_v15  ;;  %v233_v14 = vld [vmem:[#allocation2 + $0x8] sm:$0xff] }
  0x60   : > { %1147 = vmatprep.subr.bf16.mxu1 %v1670_v16 }
  0x62   : > { %1107 = vmatpush1.bf16.msra.mxu0 %v1665_v17 }
  0x63   : > { %1148 = vmatpush1.bf16.msra.mxu1 %v1668_v18  ;;  %1108 = vmatprep.subr.bf16.mxu0 %v1673_v19 }
  0x64   : > { %1149 = vmatprep.subr.bf16.mxu1 %v1676_v20 }
  0x66   : > { %1109 = vmatpush1.bf16.msra.mxu0 %v1671_v21 }
  0x67   : > { %1150 = vmatpush1.bf16.msra.mxu1 %v1674_v22  ;;  %1110 = vmatprep.subr.bf16.mxu0 %v1679_v23 }
  0x68   : > { %1151 = vmatprep.subr.bf16.mxu1 %v1682_v24 }
  0x6a   : > { %1111 = vmatpush1.bf16.msra.mxu0 %v1677_v25 }
  0x6b   : > { %1152 = vmatpush1.bf16.msra.mxu1 %v1680_v26  ;;  %1112 = vmatprep.subr.bf16.mxu0 %v1685_v27  ;;  %v235_v26 = vld [vmem:[#allocation2 + $0x18] sm:$0xff] }
  0x6c   : > { %1153 = vmatprep.subr.bf16.mxu1 %v1688_v28 }
  0x6e   : > { %1113 = vmatpush1.bf16.msra.mxu0 %v1683_v29 }
  0x6f   : > { %1154 = vmatpush1.bf16.msra.mxu1 %v1686_v30  ;;  %1114 = vmatprep.subr.bf16.mxu0 %v1691_v31 }
  0x70   : > { %1155 = vmatprep.subr.bf16.mxu1 %v1694_v32 }
  0x72   : > { %1115 = vmatpush1.bf16.msra.mxu0 %v1689_v33 }
  0x73   : > { %1156 = vmatpush1.bf16.msra.mxu1 %v1692_v34  ;;  %1116 = vmatprep.subr.bf16.mxu0 %v1697_v35 }
  0x74   : > { %1157 = vmatprep.subr.bf16.mxu1 %v1700_v36 }
  0x76   : > { %1117 = vmatpush1.bf16.msra.mxu0 %v1695_v37  ;;  %v1223_v37 = vlaneseq (!%p1511_p7) }
  0x77   : > { %1158 = vmatpush1.bf16.msra.mxu1 %v1698_v38  ;;  %1118 = vmatprep.subr.bf16.mxu0 %v1703_v39 }
  0x78   : > { %1159 = vmatprep.subr.bf16.mxu1 %v1706_v40 }
  0x7a   : > { %1119 = vmatpush1.bf16.msra.mxu0 %v1701_v41 }
  0x7b   : > { %1160 = vmatpush1.bf16.msra.mxu1 %v1704_v42  ;;  %1120 = vmatprep.subr.bf16.mxu0 %v1709_v43  ;;  %v1224_v42 = vshrl.u32 (!%p1511_p7), %v1223_v37, 7 }
  0x7c   : > { %1161 = vmatprep.subr.bf16.mxu1 %v1712_v44 }
  0x7e   : > { %1121 = vmatpush1.bf16.msra.mxu0 %v1707_v45 }
  0x7f   : > { %1162 = vmatpush1.bf16.msra.mxu1 %v1710_v46  ;;  %1122 = vmatprep.subr.bf16.mxu0 %v1715_v47  ;;  %v1221_v47 = vld [vmem:[%s1990_s2] sm:$0xf] (!%p1511_p7) }
  0x80   : > { %1163 = vmatprep.subr.bf16.mxu1 %v1718_v48  ;;  %v1225_v48 = vsub.s32 (!%p1511_p7), 0, %v1224_v42 }
  0x82   : > { %1123 = vmatpush1.bf16.msra.mxu0 %v1713_v49  ;;  %v1229_v49 = vsub.s32 (!%p1511_p7), 1, %v1224_v42 }
  0x83   : > { %1164 = vmatpush1.bf16.msra.mxu1 %v1716_v50  ;;  %1124 = vmatprep.subr.bf16.mxu0 %v1721_v51 }
  0x84   : > { %1165 = vmatprep.subr.bf16.mxu1 %v1724_v52 }
  0x86   : > { %1125 = vmatpush1.bf16.msra.mxu0 %v1719_v53 }
  0x87   : > { %1166 = vmatpush1.bf16.msra.mxu1 %v1722_v54  ;;  %1126 = vmatprep.subr.bf16.mxu0 %v1727_v55  ;;  %v1233_v54 = vsub.s32 (!%p1511_p7), 2, %v1224_v42  ;;  %v1237_v55 = vsub.s32 (!%p1511_p7), 3, %v1224_v42 }
  0x88   : > { %1167 = vmatprep.subr.bf16.mxu1 %v1730_v56 }
  0x8a   : > { %1127 = vmatpush1.bf16.msra.mxu0 %v1725_v57 }
  0x8b   : > { %1168 = vmatpush1.bf16.msra.mxu1 %v1728_v58  ;;  %1128 = vmatprep.subr.bf16.mxu0 %v1733_v59 }
  0x8c   : > { %1169 = vmatprep.subr.bf16.mxu1 %v1736_v60  ;;  %v1226_v60 = vrot.slane (!%p1511_p7), %v1221_v47, %v1225_v48 }
  0x8e   : > { %1129 = vmatpush1.bf16.msra.mxu0 %v1731_v61  ;;  %v1230_v61 = vrot.slane (!%p1511_p7), %v1221_v47, %v1229_v49 }
  0x8f   : > { %1170 = vmatpush1.bf16.msra.mxu1 %v1734_v62  ;;  %1130 = vmatprep.subr.bf16.mxu0 %v1739_v63 }
  0x90   : > { %1171 = vmatprep.subr.bf16.mxu1 %v1742_v0  ;;  %v1234_v0 = vrot.slane (!%p1511_p7), %v1221_v47, %v1233_v54 }
  0x92   : > { %1131 = vmatpush1.bf16.msra.mxu0 %v1737_v1  ;;  %v1238_v1 = vrot.slane (!%p1511_p7), %v1221_v47, %v1237_v55 }
  0x93   : > { %1172 = vmatpush1.bf16.msra.mxu1 %v1740_v2  ;;  %1132 = vmatprep.subr.bf16.mxu0 %v1745_v3 }
  0x94   : > { %1173 = vmatprep.subr.bf16.mxu1 %v1748_v4 }
  0x96   : > { %1133 = vmatpush1.bf16.msra.mxu0 %v1743_v5 }
  0x97   : > { %1174 = vmatpush1.bf16.msra.mxu1 %v1746_v6 }
  0x99   : > { %1135 = vmatmul.mubr.bf16.vlgmr.msra.gmra.mrb[4].mxu0 %v1898_v7  ;;  %v234_v7 = vld [vmem:[#allocation2 + $0x10] sm:$0xff] }
  0x9a   : > { %1176 = vmatmul.mubr.bf16.vlgmr.msra.gmra.mrb[4].mxu1 %v1900_v8 }
 0x12c   : > { %v1054_v9 = vpop.f32.mrb[0].mxu0 }
 0x12d   : > { %v1095_v11 = vpop.f32.mrb[0].mxu1  ;;  %v1056_v13 = vpop.f32.mrb[1].mxu0 }
 0x12e   : > { %v1096_v12 = vadd.f32 %v1095_v11, %v1054_v9  ;;  %v1097_v15 = vpop.f32.mrb[1].mxu1  ;;  %v1058_v17 = vpop.f32.mrb[2].mxu0 }
 0x12f   : > { %v1098_v16 = vadd.f32 %v1097_v15, %v1056_v13  ;;  %v1099_v18 = vpop.f32.mrb[2].mxu1  ;;  %v1059_v20 = vpop.f32.mrb[3].mxu0 }
 0x130   : > { %v1184_v19 = vadd.f32 %v1096_v12, %v232_v10  ;;  %v1100_v21 = vpop.f32.mrb[3].mxu1 }
 0x131   : > { %v1185_v22 = vadd.f32 %v1098_v16, %v233_v14 }
 0x132   : > { %1188 = vst [vmem:[#allocation2] sm:$0xff] %v1184_v19 }
 0x133   : > { %1189 = vst [vmem:[#allocation2 + $0x8] sm:$0xff] %v1185_v22 }
 0x139   : > { %v1196_v35 = vld [vmem:[#allocation2] sm:$0xff] (!%p1511_p7) }
 0x13a   : > { %v1197_v36 = vld [vmem:[#allocation2 + $0x8] sm:$0xff] (!%p1511_p7)  ;;  %v1201_v38 = vmul.f32 (!%p1511_p7), 1024.0, %v1196_v35 }
 0x13b   : > { %v1202_v39 = vmul.f32 (!%p1511_p7), 1024.0, %v1197_v36 }
 0x13c   : > { %v1520_v45 = vround.rtne.f32 (!%p1511_p7), %v1201_v38 }
 0x13d   : > { %v1521_v46 = vround.rtne.f32 (!%p1511_p7), %v1202_v39 }
 0x13e   : > { %v1209_v52 = vmax.f32 (!%p1511_p7), %v1520_v45, -32768.0 }
 0x13f   : > { %v1210_v53 = vmax.f32 (!%p1511_p7), %v1521_v46, -32768.0 }
 0x140   : > { %v1213_v58 = vmin.f32 (!%p1511_p7), %v1209_v52, 32767.0 }
 0x141   : > { %v1214_v59 = vmin.f32 (!%p1511_p7), %v1210_v53, 32767.0 }
 0x142   : > { %v1217_v2 = vmul.f32 (!%p1511_p7), 0.0009765625, %v1213_v58 }
 0x143   : > { %v1218_v3 = vmul.f32 (!%p1511_p7), 0.0009765625, %v1214_v59 }
 0x144   : > { %v1243_v6 = vadd.f32 (!%p1511_p7), %v1226_v60, %v1217_v2 }
 0x145   : > { %v1244_v9 = vadd.f32 (!%p1511_p7), %v1230_v61, %v1218_v3 }
 0x146   : > { %v1248_v12 = vmul.f32 (!%p1511_p7), 16.0, %v1243_v6 }
 0x147   : > { %v1249_v13 = vmul.f32 (!%p1511_p7), 16.0, %v1244_v9 }
 0x148   : > { %v1524_v16 = vround.rtne.f32 (!%p1511_p7), %v1248_v12 }
 0x149   : > { %v1525_v17 = vround.rtne.f32 (!%p1511_p7), %v1249_v13 }
 0x14a   : > { %v1256_v20 = vmax.f32 (!%p1511_p7), %v1524_v16, -128.0 }
 0x14b   : > { %v1257_v21 = vmax.f32 (!%p1511_p7), %v1525_v17, -128.0 }
 0x16c   : > { %v1136_v23 = vpop.f32.mrb[4].mxu0 }
 0x16d   : > { %v1177_v24 = vpop.f32.mrb[4].mxu1  ;;  %v1138_v25 = vpop.f32.mrb[5].mxu0  ;;  %1195 = sbr.rel (%p1511_p7) target bundleno = 406 (0x196), region = 40 }
 0x16e   : > { %v1178_v8 = vadd.f32 %v1177_v24, %v1136_v23  ;;  %v1179_v27 = vpop.f32.mrb[5].mxu1  ;;  %v1140_v29 = vpop.f32.mrb[6].mxu0  ;;  %v1261_v24 = vmin.f32 (!%p1511_p7), %v1257_v21, 127.0 }
 0x16f   : > { %v1180_v28 = vadd.f32 %v1179_v27, %v1138_v25  ;;  %v1181_v30 = vpop.f32.mrb[6].mxu1  ;;  %v1141_v32 = vpop.f32.mrb[7].mxu0 }
 0x170   : > { %v1186_v31 = vadd.f32 %v1178_v8, %v234_v7  ;;  %v1182_v33 = vpop.f32.mrb[7].mxu1  ;;  %v1260_v7 = vmin.f32 (!%p1511_p7), %v1256_v20, 127.0  ;;  %v1265_v27 = vmul.f32 (!%p1511_p7), 0.0625, %v1261_v24 }
 0x171   : > { %v1187_v34 = vadd.f32 %v1180_v28, %v235_v26 }
 0x172   : > { %1190 = vst [vmem:[#allocation2 + $0x10] sm:$0xff] %v1186_v31  ;;  %v1264_v26 = vmul.f32 (!%p1511_p7), 0.0625, %v1260_v7  ;;  %v1269_v31 = vmax.f32 (!%p1511_p7), %v1265_v27, 0.0 }
 0x173   : > { %1191 = vst [vmem:[#allocation2 + $0x18] sm:$0xff] %v1187_v34 }
 0x174   : > { %v1268_v30 = vmax.f32 %v1264_v26, 0.0 }
 0x176   : > { %v1518_v34 = vpack.c.bf16 %v1269_v31, %v1268_v30 }
 0x178   : > { %1288 = vst [vmem:[%s1991_s3] sm:$0xff] %v1518_v34 }
 0x179   : > { %v1198_v40 = vld [vmem:[#allocation2 + $0x10] sm:$0xff] }
 0x17a   : > { %v1199_v41 = vld [vmem:[#allocation2 + $0x18] sm:$0xff]  ;;  %v1203_v43 = vmul.f32 1024.0, %v1198_v40 }
 0x17b   : > { %v1204_v44 = vmul.f32 1024.0, %v1199_v41 }
 0x17c   : > { %v1522_v50 = vround.rtne.f32 %v1203_v43 }
 0x17d   : > { %v1523_v51 = vround.rtne.f32 %v1204_v44 }
 0x17e   : > { %v1211_v56 = vmax.f32 %v1522_v50, -32768.0 }
 0x17f   : > { %v1212_v57 = vmax.f32 %v1523_v51, -32768.0 }
 0x180   : > { %v1215_v62 = vmin.f32 %v1211_v56, 32767.0 }
 0x181   : > { %v1216_v63 = vmin.f32 %v1212_v57, 32767.0 }
 0x182   : > { %v1219_v4 = vmul.f32 0.0009765625, %v1215_v62 }
 0x183   : > { %v1220_v5 = vmul.f32 0.0009765625, %v1216_v63 }
 0x184   : > { %v1245_v10 = vadd.f32 %v1234_v0, %v1219_v4 }
 0x185   : > { %v1246_v11 = vadd.f32 %v1238_v1, %v1220_v5 }
 0x186   : > { %v1250_v14 = vmul.f32 16.0, %v1245_v10 }
 0x187   : > { %v1251_v15 = vmul.f32 16.0, %v1246_v11 }
 0x188   : > { %v1526_v18 = vround.rtne.f32 %v1250_v14 }
 0x189   : > { %v1527_v19 = vround.rtne.f32 %v1251_v15 }
 0x18a   : > { %v1258_v22 = vmax.f32 %v1526_v18, -128.0 }
 0x18b   : > { %v1259_v23 = vmax.f32 %v1527_v19, -128.0 }
 0x18c   : > { %v1262_v8 = vmin.f32 %v1258_v22, 127.0 }
 0x18d   : > { %v1263_v25 = vmin.f32 %v1259_v23, 127.0 }
 0x18e   : > { %v1266_v28 = vmul.f32 0.0625, %v1262_v8 }
 0x18f   : > { %v1267_v29 = vmul.f32 0.0625, %v1263_v25 }
 0x190   : > { %v1270_v32 = vmax.f32 %v1266_v28, 0.0 }
 0x191   : > { %v1271_v33 = vmax.f32 %v1267_v29, 0.0 }
 0x193   : > { %v1519_v35 = vpack.c.bf16 %v1271_v33, %v1270_v32 }
 0x195   : > { %1289 = vst [vmem:[%s1991_s3 + $0x8] sm:$0xff] %v1519_v35 }
 0x196 PF: > { %s13_s14 = sadd.s32 1, %s1771_s14   ;;  %s1992_s12 = smov %s1767_s13 }
 0x197   : > { %p10_p8 = scmp.ge.s32.totalorder %s13_s14, 7   ;;  %s1993_s13 = smov %s1995_s15 }
 0x199   :  { %12 = sbr.rel (!%p10_p8) target bundleno = 2 (0x2), region = 73 }

// kernel: _lambda_.37
= control target key start
LH: loop header
LB: loop body
LE: loop exit
PB: predicated region body
PF: predicated region fallthrough
CT: control target
= control target key end

     0   :  { %s1005_s1 = inlined_call_operand.vmem [shape: bf16[256,512], index: 1, kind: input, shape index: {}]   ;;  %s1006_s0 = inlined_call_operand.vmem [shape: bf16[8,256], index: 0, kind: input, shape index: {}]   ;;  %s1007_s2 = inlined_call_operand.vmem [shape: f32[1,512], index: 2, kind: input, shape index: {}]   ;;  %s1008_s3 = inlined_call_operand.vmem [shape: bf16[8,512], index: 3, kind: output, shape index: {}]  }
   0x1   :  { %v683_v0 = vld [vmem:[%s1005_s1 + $0x4] ss:$16 sps:$4 sm:$0xff]   ;;  %v685_v1 = vld [vmem:[%s1005_s1 + $0xc] ss:$16 sps:$4 sm:$0xff]   ;;  %v687_v2 = vld [vmem:[%s1005_s1] ss:$16 sps:$4 sm:$0xff]  }
   0x2   :  { %418 = vmatprep.subr.bf16.mxu0 %v683_v0  ;;  %v688_v3 = vld [vmem:[%s1005_s1 + $0x8] ss:$16 sps:$4 sm:$0xff]   ;;  %459 = vmatprep.subr.bf16.mxu1 %v685_v1  ;;  %v689_v4 = vld [vmem:[%s1005_s1 + $0x24] ss:$16 sps:$4 sm:$0xff]   ;;  %v691_v5 = vld [vmem:[%s1005_s1 + $0x2c] ss:$16 sps:$4 sm:$0xff]  }
   0x3   :  { %419 = vmatpush1.bf16.msra.mxu0 %v687_v2  ;;  %460 = vmatpush1.bf16.msra.mxu1 %v688_v3  ;;  %v693_v6 = vld [vmem:[%s1005_s1 + $0x20] ss:$16 sps:$4 sm:$0xff]   ;;  %v694_v7 = vld [vmem:[%s1005_s1 + $0x28] ss:$16 sps:$4 sm:$0xff]   ;;  %v695_v8 = vld [vmem:[%s1005_s1 + $0x44] ss:$16 sps:$4 sm:$0xff]   ;;  %v538_v3 = vlaneseq }
   0x4   :  { %420 = vmatprep.subr.bf16.mxu0 %v689_v4  ;;  %461 = vmatprep.subr.bf16.mxu1 %v691_v5  ;;  %v697_v9 = vld [vmem:[%s1005_s1 + $0x4c] ss:$16 sps:$4 sm:$0xff]   ;;  %v699_v10 = vld [vmem:[%s1005_s1 + $0x40] ss:$16 sps:$4 sm:$0xff]   ;;  %v700_v11 = vld [vmem:[%s1005_s1 + $0x48] ss:$16 sps:$4 sm:$0xff]  }
   0x5   :  { %v701_v12 = vld [vmem:[%s1005_s1 + $0x64] ss:$16 sps:$4 sm:$0xff]   ;;  %v703_v13 = vld [vmem:[%s1005_s1 + $0x6c] ss:$16 sps:$4 sm:$0xff]   ;;  %v705_v14 = vld [vmem:[%s1005_s1 + $0x60] ss:$16 sps:$4 sm:$0xff]  }
   0x6   :  { %v706_v15 = vld [vmem:[%s1005_s1 + $0x68] ss:$16 sps:$4 sm:$0xff]   ;;  %v707_v16 = vld [vmem:[%s1005_s1 + $0x84] ss:$16 sps:$4 sm:$0xff]   ;;  %v709_v17 = vld [vmem:[%s1005_s1 + $0x8c] ss:$16 sps:$4 sm:$0xff]  }
   0x7   :  { %421 = vmatpush1.bf16.msra.mxu0 %v693_v6  ;;  %462 = vmatpush1.bf16.msra.mxu1 %v694_v7  ;;  %v711_v18 = vld [vmem:[%s1005_s1 + $0x80] ss:$16 sps:$4 sm:$0xff]   ;;  %v712_v19 = vld [vmem:[%s1005_s1 + $0x88] ss:$16 sps:$4 sm:$0xff]   ;;  %v713_v20 = vld [vmem:[%s1005_s1 + $0xa4] ss:$16 sps:$4 sm:$0xff]  }
   0x8   :  { %422 = vmatprep.subr.bf16.mxu0 %v695_v8  ;;  %463 = vmatprep.subr.bf16.mxu1 %v697_v9  ;;  %v715_v21 = vld [vmem:[%s1005_s1 + $0xac] ss:$16 sps:$4 sm:$0xff]   ;;  %v717_v22 = vld [vmem:[%s1005_s1 + $0xa0] ss:$16 sps:$4 sm:$0xff]   ;;  %v718_v23 = vld [vmem:[%s1005_s1 + $0xa8] ss:$16 sps:$4 sm:$0xff]  }
   0x9   :  { %v719_v24 = vld [vmem:[%s1005_s1 + $0xc4] ss:$16 sps:$4 sm:$0xff]   ;;  %v721_v25 = vld [vmem:[%s1005_s1 + $0xcc] ss:$16 sps:$4 sm:$0xff]   ;;  %v723_v26 = vld [vmem:[%s1005_s1 + $0xc0] ss:$16 sps:$4 sm:$0xff]  }
   0xa   :  { %v724_v27 = vld [vmem:[%s1005_s1 + $0xc8] ss:$16 sps:$4 sm:$0xff]   ;;  %v725_v28 = vld [vmem:[%s1005_s1 + $0xe4] ss:$16 sps:$4 sm:$0xff]   ;;  %v727_v29 = vld [vmem:[%s1005_s1 + $0xec] ss:$16 sps:$4 sm:$0xff]  }
   0xb   :  { %423 = vmatpush1.bf16.msra.mxu0 %v699_v10  ;;  %464 = vmatpush1.bf16.msra.mxu1 %v700_v11  ;;  %v729_v30 = vld [vmem:[%s1005_s1 + $0xe0] ss:$16 sps:$4 sm:$0xff]   ;;  %v730_v31 = vld [vmem:[%s1005_s1 + $0xe8] ss:$16 sps:$4 sm:$0xff]   ;;  %v731_v32 = vld [vmem:[%s1005_s1 + $0x104] ss:$16 sps:$4 sm:$0xff]  }
   0xc   :  { %424 = vmatprep.subr.bf16.mxu0 %v701_v12  ;;  %465 = vmatprep.subr.bf16.mxu1 %v703_v13  ;;  %v733_v33 = vld [vmem:[%s1005_s1 + $0x10c] ss:$16 sps:$4 sm:$0xff]   ;;  %v735_v34 = vld [vmem:[%s1005_s1 + $0x100] ss:$16 sps:$4 sm:$0xff]   ;;  %v736_v35 = vld [vmem:[%s1005_s1 + $0x108] ss:$16 sps:$4 sm:$0xff]  }
   0xd   :  { %v737_v36 = vld [vmem:[%s1005_s1 + $0x124] ss:$16 sps:$4 sm:$0xff]   ;;  %v739_v37 = vld [vmem:[%s1005_s1 + $0x12c] ss:$16 sps:$4 sm:$0xff]   ;;  %v741_v38 = vld [vmem:[%s1005_s1 + $0x120] ss:$16 sps:$4 sm:$0xff]  }
   0xe   :  { %v742_v39 = vld [vmem:[%s1005_s1 + $0x128] ss:$16 sps:$4 sm:$0xff]   ;;  %v743_v40 = vld [vmem:[%s1005_s1 + $0x144] ss:$16 sps:$4 sm:$0xff]   ;;  %v745_v41 = vld [vmem:[%s1005_s1 + $0x14c] ss:$16 sps:$4 sm:$0xff]  }
   0xf   :  { %425 = vmatpush1.bf16.msra.mxu0 %v705_v14  ;;  %466 = vmatpush1.bf16.msra.mxu1 %v706_v15  ;;  %v747_v42 = vld [vmem:[%s1005_s1 + $0x140] ss:$16 sps:$4 sm:$0xff]   ;;  %v748_v43 = vld [vmem:[%s1005_s1 + $0x148] ss:$16 sps:$4 sm:$0xff]   ;;  %v749_v44 = vld [vmem:[%s1005_s1 + $0x164] ss:$16 sps:$4 sm:$0xff]  }
  0x10   :  { %426 = vmatprep.subr.bf16.mxu0 %v707_v16  ;;  %467 = vmatprep.subr.bf16.mxu1 %v709_v17  ;;  %v751_v45 = vld [vmem:[%s1005_s1 + $0x16c] ss:$16 sps:$4 sm:$0xff]   ;;  %v26_v46 = vld [vmem:[%s1006_s0] sm:$0xff]  ;;  %v754_v49 = vld [vmem:[%s1005_s1 + $0x168] ss:$16 sps:$4 sm:$0xff]   ;;  %v539_v4 = vshrl.u32 %v538_v3, 7 }
  0x11   :  { %v606_v47 = vcombine.high %v26_v46, %v26_v46  ;;  %v753_v48 = vld [vmem:[%s1005_s1 + $0x160] ss:$16 sps:$4 sm:$0xff]   ;;  %v755_v50 = vld [vmem:[%s1005_s1 + $0x184] ss:$16 sps:$4 sm:$0xff]   ;;  %v757_v51 = vld [vmem:[%s1005_s1 + $0x18c] ss:$16 sps:$4 sm:$0xff]   ;;  %v605_v2 = vcombine.low %v26_v46, %v26_v46 }
  0x12   :  { %v759_v52 = vld [vmem:[%s1005_s1 + $0x180] ss:$16 sps:$4 sm:$0xff]   ;;  %v760_v53 = vld [vmem:[%s1005_s1 + $0x188] ss:$16 sps:$4 sm:$0xff]   ;;  %v761_v54 = vld [vmem:[%s1005_s1 + $0x1a4] ss:$16 sps:$4 sm:$0xff]  }
  0x13   :  { %427 = vmatpush1.bf16.msra.mxu0 %v711_v18  ;;  %468 = vmatpush1.bf16.msra.mxu1 %v712_v19  ;;  %v763_v55 = vld [vmem:[%s1005_s1 + $0x1ac] ss:$16 sps:$4 sm:$0xff]   ;;  %v765_v56 = vld [vmem:[%s1005_s1 + $0x1a0] ss:$16 sps:$4 sm:$0xff]   ;;  %v766_v57 = vld [vmem:[%s1005_s1 + $0x1a8] ss:$16 sps:$4 sm:$0xff]  }
  0x14   :  { %428 = vmatprep.subr.bf16.mxu0 %v713_v20  ;;  %469 = vmatprep.subr.bf16.mxu1 %v715_v21  ;;  %v767_v58 = vld [vmem:[%s1005_s1 + $0x1c4] ss:$16 sps:$4 sm:$0xff]   ;;  %v769_v59 = vld [vmem:[%s1005_s1 + $0x1cc] ss:$16 sps:$4 sm:$0xff]   ;;  %v771_v60 = vld [vmem:[%s1005_s1 + $0x1c0] ss:$16 sps:$4 sm:$0xff]  }
  0x15   :  { %450 = vmatprep.mubr.bf16.mxu0 %v606_v47  ;;  %491 = vmatprep.mubr.bf16.mxu1 %v606_v47  ;;  %v772_v61 = vld [vmem:[%s1005_s1 + $0x1c8] ss:$16 sps:$4 sm:$0xff]   ;;  %v773_v62 = vld [vmem:[%s1005_s1 + $0x1e4] ss:$16 sps:$4 sm:$0xff]   ;;  %v775_v63 = vld [vmem:[%s1005_s1 + $0x1ec] ss:$16 sps:$4 sm:$0xff]  }
  0x16   :  { %v777_v0 = vld [vmem:[%s1005_s1 + $0x1e0] ss:$16 sps:$4 sm:$0xff]   ;;  %v778_v1 = vld [vmem:[%s1005_s1 + $0x1e8] ss:$16 sps:$4 sm:$0xff]   ;;  %v540_v16 = vsub.s32 0, %v539_v4  ;;  %v548_v18 = vsub.s32 2, %v539_v4 }
  0x17   :  { %429 = vmatpush1.bf16.msra.mxu0 %v717_v22  ;;  %470 = vmatpush1.bf16.msra.mxu1 %v718_v23  ;;  %v536_v21 = vld [vmem:[%s1007_s2] sm:$0xf]  ;;  %v544_v23 = vsub.s32 1, %v539_v4 }
  0x18   :  { %430 = vmatprep.subr.bf16.mxu0 %v719_v24  ;;  %471 = vmatprep.subr.bf16.mxu1 %v721_v25  ;;  %v552_v25 = vsub.s32 3, %v539_v4 }
  0x1b   :  { %431 = vmatpush1.bf16.msra.mxu0 %v723_v26  ;;  %472 = vmatpush1.bf16.msra.mxu1 %v724_v27 }
  0x1c   :  { %432 = vmatprep.subr.bf16.mxu0 %v725_v28  ;;  %473 = vmatprep.subr.bf16.mxu1 %v727_v29 }
  0x1f   :  { %433 = vmatpush1.bf16.msra.mxu0 %v729_v30  ;;  %474 = vmatpush1.bf16.msra.mxu1 %v730_v31  ;;  %v541_v31 = vrot.slane %v536_v21, %v540_v16 }
  0x20   :  { %434 = vmatprep.subr.bf16.mxu0 %v731_v32  ;;  %475 = vmatprep.subr.bf16.mxu1 %v733_v33  ;;  %v549_v33 = vrot.slane %v536_v21, %v548_v18 }
  0x23   :  { %435 = vmatpush1.bf16.msra.mxu0 %v735_v34  ;;  %476 = vmatpush1.bf16.msra.mxu1 %v736_v35  ;;  %v545_v35 = vrot.slane %v536_v21, %v544_v23 }
  0x24   :  { %436 = vmatprep.subr.bf16.mxu0 %v737_v36  ;;  %477 = vmatprep.subr.bf16.mxu1 %v739_v37  ;;  %v553_v37 = vrot.slane %v536_v21, %v552_v25 }
  0x27   :  { %437 = vmatpush1.bf16.msra.mxu0 %v741_v38  ;;  %478 = vmatpush1.bf16.msra.mxu1 %v742_v39 }
  0x28   :  { %438 = vmatprep.subr.bf16.mxu0 %v743_v40  ;;  %479 = vmatprep.subr.bf16.mxu1 %v745_v41 }
  0x2b   :  { %439 = vmatpush1.bf16.msra.mxu0 %v747_v42  ;;  %480 = vmatpush1.bf16.msra.mxu1 %v748_v43 }
  0x2c   :  { %440 = vmatprep.subr.bf16.mxu0 %v749_v44  ;;  %481 = vmatprep.subr.bf16.mxu1 %v751_v45 }
  0x2f   :  { %441 = vmatpush1.bf16.msra.mxu0 %v753_v48  ;;  %482 = vmatpush1.bf16.msra.mxu1 %v754_v49 }
  0x30   :  { %442 = vmatprep.subr.bf16.mxu0 %v755_v50  ;;  %483 = vmatprep.subr.bf16.mxu1 %v757_v51 }
  0x33   :  { %443 = vmatpush1.bf16.msra.mxu0 %v759_v52  ;;  %484 = vmatpush1.bf16.msra.mxu1 %v760_v53 }
  0x34   :  { %444 = vmatprep.subr.bf16.mxu0 %v761_v54  ;;  %485 = vmatprep.subr.bf16.mxu1 %v763_v55 }
  0x37   :  { %445 = vmatpush1.bf16.msra.mxu0 %v765_v56  ;;  %486 = vmatpush1.bf16.msra.mxu1 %v766_v57 }
  0x38   :  { %446 = vmatprep.subr.bf16.mxu0 %v767_v58  ;;  %487 = vmatprep.subr.bf16.mxu1 %v769_v59 }
  0x3b   :  { %447 = vmatpush1.bf16.msra.mxu0 %v771_v60  ;;  %488 = vmatpush1.bf16.msra.mxu1 %v772_v61 }
  0x3c   :  { %448 = vmatprep.subr.bf16.mxu0 %v773_v62  ;;  %489 = vmatprep.subr.bf16.mxu1 %v775_v63 }
  0x3f   :  { %449 = vmatpush1.bf16.msra.mxu0 %v777_v0  ;;  %490 = vmatpush1.bf16.msra.mxu1 %v778_v1 }
  0x42   :  { %451 = vmatmul.mubr.bf16.vlgmr.msra.gmra.mrb[0].mxu0 %v605_v2  ;;  %492 = vmatmul.mubr.bf16.vlgmr.msra.gmra.mrb[0].mxu1 %v605_v2 }
 0x115   :  { %v452_v5 = vpop.f32.mrb[0].mxu0  ;;  %v493_v6 = vpop.f32.mrb[0].mxu1 }
 0x116   :  { %v516_v7 = vmul.f32 1024.0, %v452_v5  ;;  %v518_v8 = vmul.f32 1024.0, %v493_v6  ;;  %v454_v9 = vpop.f32.mrb[1].mxu0  ;;  %v495_v10 = vpop.f32.mrb[1].mxu1 }
 0x117   :  { %v517_v11 = vmul.f32 1024.0, %v454_v9  ;;  %v519_v12 = vmul.f32 1024.0, %v495_v10  ;;  %v456_v13 = vpop.f32.mrb[2].mxu0  ;;  %v497_v14 = vpop.f32.mrb[2].mxu1 }
 0x118   :  { %v675_v15 = vround.rtne.f32 %v516_v7  ;;  %v677_v17 = vround.rtne.f32 %v518_v8  ;;  %v457_v19 = vpop.f32.mrb[3].mxu0  ;;  %v498_v20 = vpop.f32.mrb[3].mxu1 }
 0x119   :  { %v676_v22 = vround.rtne.f32 %v517_v11  ;;  %v678_v24 = vround.rtne.f32 %v519_v12 }
 0x11a   :  { %v524_v26 = vmax.f32 %v675_v15, -32768.0  ;;  %v526_v27 = vmax.f32 %v677_v17, -32768.0 }
 0x11b   :  { %v525_v28 = vmax.f32 %v676_v22, -32768.0  ;;  %v527_v29 = vmax.f32 %v678_v24, -32768.0 }
 0x11c   :  { %v528_v30 = vmin.f32 %v524_v26, 32767.0  ;;  %v530_v32 = vmin.f32 %v526_v27, 32767.0 }
 0x11d   :  { %v529_v34 = vmin.f32 %v525_v28, 32767.0  ;;  %v531_v36 = vmin.f32 %v527_v29, 32767.0 }
 0x11e   :  { %v532_v38 = vmul.f32 0.0009765625, %v528_v30  ;;  %v534_v39 = vmul.f32 0.0009765625, %v530_v32 }
 0x11f   :  { %v533_v40 = vmul.f32 0.0009765625, %v529_v34  ;;  %v535_v41 = vmul.f32 0.0009765625, %v531_v36 }
 0x120   :  { %v558_v42 = vadd.f32 %v541_v31, %v532_v38  ;;  %v560_v43 = vadd.f32 %v549_v33, %v534_v39 }
 0x121   :  { %v559_v44 = vadd.f32 %v545_v35, %v533_v40  ;;  %v561_v45 = vadd.f32 %v553_v37, %v535_v41 }
 0x122   :  { %v563_v46 = vmul.f32 16.0, %v558_v42  ;;  %v565_v47 = vmul.f32 16.0, %v560_v43 }
 0x123   :  { %v564_v48 = vmul.f32 16.0, %v559_v44  ;;  %v566_v49 = vmul.f32 16.0, %v561_v45 }
 0x124   :  { %v679_v50 = vround.rtne.f32 %v563_v46  ;;  %v681_v51 = vround.rtne.f32 %v565_v47 }
 0x125   :  { %v680_v52 = vround.rtne.f32 %v564_v48  ;;  %v682_v53 = vround.rtne.f32 %v566_v49 }
 0x126   :  { %v571_v54 = vmax.f32 %v679_v50, -128.0  ;;  %v573_v55 = vmax.f32 %v681_v51, -128.0 }
 0x127   :  { %v572_v56 = vmax.f32 %v680_v52, -128.0  ;;  %v574_v57 = vmax.f32 %v682_v53, -128.0 }
 0x128   :  { %v575_v58 = vmin.f32 %v571_v54, 127.0  ;;  %v577_v59 = vmin.f32 %v573_v55, 127.0 }
 0x129   :  { %v576_v60 = vmin.f32 %v572_v56, 127.0  ;;  %v578_v61 = vmin.f32 %v574_v57, 127.0 }
 0x12a   :  { %v579_v62 = vmul.f32 0.0625, %v575_v58  ;;  %v581_v63 = vmul.f32 0.0625, %v577_v59 }
 0x12b   :  { %v580_v0 = vmul.f32 0.0625, %v576_v60  ;;  %v582_v1 = vmul.f32 0.0625, %v578_v61 }
 0x12d   :  { %v673_v2 = vpack.c.bf16 %v580_v0, %v579_v62  ;;  %v674_v3 = vpack.c.bf16 %v582_v1, %v581_v63 }
 0x12f   :  { %599 = vst [vmem:[%s1008_s3] sm:$0xff] %v673_v2  ;;  %600 = vst [vmem:[%s1008_s3 + $0x8] sm:$0xff] %v674_v3 }

// kernel: _lambda_.38
= control target key start
LH: loop header
LB: loop body
LE: loop exit
PB: predicated region body
PF: predicated region fallthrough
CT: control target
= control target key end

     0   :  { %s2012_s21 = smov 0   ;;  %s2014_s22 = smov 0   ;;  %s2238_s0 = inlined_call_operand.vmem [shape: bf16[8,4608], index: 0, kind: input, shape index: {}]   ;;  %s2239_s1 = inlined_call_operand.vmem [shape: bf16[4608,512], index: 1, kind: input, shape index: {}]   ;;  %s2240_s2 = inlined_call_operand.vmem [shape: f32[1,512], index: 2, kind: input, shape index: {}]   ;;  %s2241_s3 = inlined_call_operand.vmem [shape: bf16[8,512], index: 3, kind: input, shape index: {}]   ;;  %s2242_s4 = inlined_call_operand.vmem [shape: f32[1,512], index: 4, kind: input, shape index: {}]   ;;  %s2243_s5 = inlined_call_operand.vmem [shape: f32[1,512], index: 5, kind: input, shape index: {}]   ;;  %s2244_s6 = inlined_call_operand.vmem [shape: bf16[8,512], index: 6, kind: output, shape index: {}]  }
   0x1   :  { %s2016_s23 = smov 0  }
   0x2 LB: > { %s25_s24 = sadd.s32 1, %s1970_s22  ;;  %p1571_p0 = scmp.ge.s32.totalorder %s1974_s23, 1  ;;  %s1974_s23 = sphi %s2016_s23, %s16_s23   ;;  %s1970_s22 = sphi %s2014_s22, %s2246_s22   ;;  %s1966_s21 = sphi %s2012_s21, %s2245_s21  }
   0x3   : > { %p26_p1 = scmp.ge.s32.totalorder %s25_s24, 9  ;;  %p253_p2 = scmp.lt.s32.totalorder %s1974_s23, 10 }
   0x5   : > { %s2248_s24 = smov (%p26_p1, %s25_s24), 0  ;;  %p254_p3 = pnand %p1571_p0, %p253_p2 }
   0x6   : > { %s1572_s25 = sshll.u32 (!%p254_p3), %s1966_s21, 2  ;;  %s1574_s26 = sshll.u32 (!%p254_p3), %s1966_s21, 6 }
   0x7   : > { %257 = sbr.rel (%p254_p3) target bundleno = 420 (0x1a4), region = 44  ;;  %p301_p4 = scmp.lt.s32.totalorder (!%p254_p3), %s1572_s25, 35 }
   0x8   : > { %p309_p5 = scmp.lt.s32.totalorder (!%p254_p3), %s1574_s26, 575  ;;  %p1577_p6 = scmp.ne.s32.totalorder (!%p254_p3), %s1966_s21, 0 }
   0xe   : > { %s2250_s25 = smov (!%p301_p4, %s1572_s25), 35  ;;  %s2252_s26 = smov (!%p309_p5, %s1574_s26), 575 }
   0xf   : > { %s1573_s27 = sshll.u32 %s2250_s25, 2  ;;  %s1716_s7 = sshll.u32 %s2252_s26, 4  ;;  %v1976_v0 = vmov (!%p1577_p6), 0.0  }
  0x10   : > { %s2037_s30 = scalar_lea.vmem %s2238_s0, %s1573_s27  ;;  %s2042_s10 = scalar_lea.vmem %s2239_s1, %s1716_s7  ;;  %329 = vst [vmem:[#allocation2] sm:$0xff] (!%p1577_p6), %v1976_v0  ;;  %330 = vst [vmem:[#allocation2 + $0x8] sm:$0xff] (!%p1577_p6), %v1976_v0 }
  0x11   : > { %328 = sbr.rel (%p1577_p6) target bundleno = 24 (0x18), region = 48  ;;  %331 = vst [vmem:[#allocation2 + $0x10] sm:$0xff] (!%p1577_p6), %v1976_v0  ;;  %332 = vst [vmem:[#allocation2 + $0x18] sm:$0xff] (!%p1577_p6), %v1976_v0 }
  0x18 PF: > { %v1756_v1 = vld [vmem:[%s2042_s10 + $0x4] ss:$16 sps:$4 sm:$0xff]   ;;  %v1760_v3 = vld [vmem:[%s2042_s10] ss:$16 sps:$4 sm:$0xff]   ;;  %v338_v49 = vld [vmem:[%s2037_s30 + $0x8] sm:$0xff]  ;;  %p1710_p7 = scmp.ne.s32.totalorder %s1966_s21, 8 }
  0x19   : > { %v1758_v2 = vld [vmem:[%s2042_s10 + $0x204] ss:$16 sps:$4 sm:$0xff]   ;;  %1121 = vmatprep.subr.bf16.mxu0 %v1756_v1  ;;  %v1761_v4 = vld [vmem:[%s2042_s10 + $0x200] ss:$16 sps:$4 sm:$0xff]   ;;  %v1581_v52 = vcombine.high %v338_v49, %v338_v49 }
  0x1a   : > { %1162 = vmatprep.subr.bf16.mxu1 %v1758_v2  ;;  %v1762_v5 = vld [vmem:[%s2042_s10 + $0x24] ss:$16 sps:$4 sm:$0xff]   ;;  %1122 = vmatpush1.bf16.msra.mxu0 %v1760_v3  ;;  %v1766_v7 = vld [vmem:[%s2042_s10 + $0x20] ss:$16 sps:$4 sm:$0xff]  }
  0x1b   : > { %1163 = vmatpush1.bf16.msra.mxu1 %v1761_v4  ;;  %v1764_v6 = vld [vmem:[%s2042_s10 + $0x224] ss:$16 sps:$4 sm:$0xff]   ;;  %1123 = vmatprep.subr.bf16.mxu0 %v1762_v5  ;;  %v1767_v8 = vld [vmem:[%s2042_s10 + $0x220] ss:$16 sps:$4 sm:$0xff]   ;;  %v1858_v5 = vld [vmem:[%s2042_s10 + $0xc] ss:$16 sps:$4 sm:$0xff]  }
  0x1c   : > { %1164 = vmatprep.subr.bf16.mxu1 %v1764_v6  ;;  %v1768_v9 = vld [vmem:[%s2042_s10 + $0x44] ss:$16 sps:$4 sm:$0xff]   ;;  %v1772_v11 = vld [vmem:[%s2042_s10 + $0x40] ss:$16 sps:$4 sm:$0xff]   ;;  %1194 = vmatprep.mubr.bf16.mxu1 %v1581_v52  ;;  %v1861_v6 = vld [vmem:[%s2042_s10 + $0x20c] ss:$16 sps:$4 sm:$0xff]  }
  0x1d   : > { %v1770_v10 = vld [vmem:[%s2042_s10 + $0x244] ss:$16 sps:$4 sm:$0xff]   ;;  %v1773_v12 = vld [vmem:[%s2042_s10 + $0x240] ss:$16 sps:$4 sm:$0xff]  }
  0x1e   : > { %1124 = vmatpush1.bf16.msra.mxu0 %v1766_v7  ;;  %v1774_v13 = vld [vmem:[%s2042_s10 + $0x64] ss:$16 sps:$4 sm:$0xff]   ;;  %v1778_v15 = vld [vmem:[%s2042_s10 + $0x60] ss:$16 sps:$4 sm:$0xff]  }
  0x1f   : > { %1165 = vmatpush1.bf16.msra.mxu1 %v1767_v8  ;;  %1125 = vmatprep.subr.bf16.mxu0 %v1768_v9  ;;  %v1776_v14 = vld [vmem:[%s2042_s10 + $0x264] ss:$16 sps:$4 sm:$0xff]   ;;  %v1779_v16 = vld [vmem:[%s2042_s10 + $0x260] ss:$16 sps:$4 sm:$0xff]   ;;  %v2118_v8 = vcombine.low %v338_v49, %v338_v49  ;;  %v1856_v9 = vld [vmem:[%s2042_s10 + $0x8] ss:$16 sps:$4 sm:$0xff]  }
  0x20   : > { %1166 = vmatprep.subr.bf16.mxu1 %v1770_v10  ;;  %v1780_v17 = vld [vmem:[%s2042_s10 + $0x84] ss:$16 sps:$4 sm:$0xff]   ;;  %v1784_v19 = vld [vmem:[%s2042_s10 + $0x80] ss:$16 sps:$4 sm:$0xff]   ;;  %v1859_v10 = vld [vmem:[%s2042_s10 + $0x208] ss:$16 sps:$4 sm:$0xff]  }
  0x21   : > { %v1782_v18 = vld [vmem:[%s2042_s10 + $0x284] ss:$16 sps:$4 sm:$0xff]   ;;  %v1785_v20 = vld [vmem:[%s2042_s10 + $0x280] ss:$16 sps:$4 sm:$0xff]   ;;  %v1916_v49 = vld [vmem:[%s2042_s10 + $0x148] ss:$16 sps:$4 sm:$0xff]  }
  0x22   : > { %1126 = vmatpush1.bf16.msra.mxu0 %v1772_v11  ;;  %v1786_v21 = vld [vmem:[%s2042_s10 + $0xa4] ss:$16 sps:$4 sm:$0xff]   ;;  %v1790_v23 = vld [vmem:[%s2042_s10 + $0xa0] ss:$16 sps:$4 sm:$0xff]   ;;  %v1864_v11 = vld [vmem:[%s2042_s10 + $0x2c] ss:$16 sps:$4 sm:$0xff]  }
  0x23   : > { %1167 = vmatpush1.bf16.msra.mxu1 %v1773_v12  ;;  %1127 = vmatprep.subr.bf16.mxu0 %v1774_v13  ;;  %v1788_v22 = vld [vmem:[%s2042_s10 + $0x2a4] ss:$16 sps:$4 sm:$0xff]   ;;  %v1791_v24 = vld [vmem:[%s2042_s10 + $0x2a0] ss:$16 sps:$4 sm:$0xff]   ;;  %v1867_v12 = vld [vmem:[%s2042_s10 + $0x22c] ss:$16 sps:$4 sm:$0xff]  }
  0x24   : > { %1168 = vmatprep.subr.bf16.mxu1 %v1776_v14  ;;  %v1792_v25 = vld [vmem:[%s2042_s10 + $0xc4] ss:$16 sps:$4 sm:$0xff]   ;;  %v1796_v27 = vld [vmem:[%s2042_s10 + $0xc0] ss:$16 sps:$4 sm:$0xff]   ;;  %v1862_v13 = vld [vmem:[%s2042_s10 + $0x28] ss:$16 sps:$4 sm:$0xff]  }
  0x25   : > { %v1794_v26 = vld [vmem:[%s2042_s10 + $0x2c4] ss:$16 sps:$4 sm:$0xff]   ;;  %v1797_v28 = vld [vmem:[%s2042_s10 + $0x2c0] ss:$16 sps:$4 sm:$0xff]   ;;  %v1865_v14 = vld [vmem:[%s2042_s10 + $0x228] ss:$16 sps:$4 sm:$0xff]  }
  0x26   : > { %1128 = vmatpush1.bf16.msra.mxu0 %v1778_v15  ;;  %v1798_v29 = vld [vmem:[%s2042_s10 + $0xe4] ss:$16 sps:$4 sm:$0xff]   ;;  %v1802_v31 = vld [vmem:[%s2042_s10 + $0xe0] ss:$16 sps:$4 sm:$0xff]   ;;  %v1870_v15 = vld [vmem:[%s2042_s10 + $0x4c] ss:$16 sps:$4 sm:$0xff]  }
  0x27   : > { %1169 = vmatpush1.bf16.msra.mxu1 %v1779_v16  ;;  %1129 = vmatprep.subr.bf16.mxu0 %v1780_v17  ;;  %v1800_v30 = vld [vmem:[%s2042_s10 + $0x2e4] ss:$16 sps:$4 sm:$0xff]   ;;  %v1803_v32 = vld [vmem:[%s2042_s10 + $0x2e0] ss:$16 sps:$4 sm:$0xff]   ;;  %v1873_v16 = vld [vmem:[%s2042_s10 + $0x24c] ss:$16 sps:$4 sm:$0xff]  }
  0x28   : > { %1170 = vmatprep.subr.bf16.mxu1 %v1782_v18  ;;  %v1804_v33 = vld [vmem:[%s2042_s10 + $0x104] ss:$16 sps:$4 sm:$0xff]   ;;  %v1808_v35 = vld [vmem:[%s2042_s10 + $0x100] ss:$16 sps:$4 sm:$0xff]   ;;  %v1868_v17 = vld [vmem:[%s2042_s10 + $0x48] ss:$16 sps:$4 sm:$0xff]  }
  0x29   : > { %v1806_v34 = vld [vmem:[%s2042_s10 + $0x304] ss:$16 sps:$4 sm:$0xff]   ;;  %v1809_v36 = vld [vmem:[%s2042_s10 + $0x300] ss:$16 sps:$4 sm:$0xff]   ;;  %v1871_v18 = vld [vmem:[%s2042_s10 + $0x248] ss:$16 sps:$4 sm:$0xff]  }
  0x2a   : > { %1130 = vmatpush1.bf16.msra.mxu0 %v1784_v19  ;;  %v1810_v37 = vld [vmem:[%s2042_s10 + $0x124] ss:$16 sps:$4 sm:$0xff]   ;;  %v1814_v39 = vld [vmem:[%s2042_s10 + $0x120] ss:$16 sps:$4 sm:$0xff]   ;;  %v1876_v19 = vld [vmem:[%s2042_s10 + $0x6c] ss:$16 sps:$4 sm:$0xff]  }
  0x2b   : > { %1171 = vmatpush1.bf16.msra.mxu1 %v1785_v20  ;;  %1131 = vmatprep.subr.bf16.mxu0 %v1786_v21  ;;  %v1812_v38 = vld [vmem:[%s2042_s10 + $0x324] ss:$16 sps:$4 sm:$0xff]   ;;  %v1815_v40 = vld [vmem:[%s2042_s10 + $0x320] ss:$16 sps:$4 sm:$0xff]   ;;  %v1879_v20 = vld [vmem:[%s2042_s10 + $0x26c] ss:$16 sps:$4 sm:$0xff]  }
  0x2c   : > { %1172 = vmatprep.subr.bf16.mxu1 %v1788_v22  ;;  %v1816_v41 = vld [vmem:[%s2042_s10 + $0x144] ss:$16 sps:$4 sm:$0xff]   ;;  %v1820_v43 = vld [vmem:[%s2042_s10 + $0x140] ss:$16 sps:$4 sm:$0xff]   ;;  %v1874_v21 = vld [vmem:[%s2042_s10 + $0x68] ss:$16 sps:$4 sm:$0xff]  }
  0x2d   : > { %v1818_v42 = vld [vmem:[%s2042_s10 + $0x344] ss:$16 sps:$4 sm:$0xff]   ;;  %v1821_v44 = vld [vmem:[%s2042_s10 + $0x340] ss:$16 sps:$4 sm:$0xff]   ;;  %v1877_v22 = vld [vmem:[%s2042_s10 + $0x268] ss:$16 sps:$4 sm:$0xff]  }
  0x2e   : > { %1132 = vmatpush1.bf16.msra.mxu0 %v1790_v23  ;;  %v1822_v45 = vld [vmem:[%s2042_s10 + $0x164] ss:$16 sps:$4 sm:$0xff]   ;;  %v1826_v50 = vld [vmem:[%s2042_s10 + $0x160] ss:$16 sps:$4 sm:$0xff]   ;;  %v1882_v23 = vld [vmem:[%s2042_s10 + $0x8c] ss:$16 sps:$4 sm:$0xff]  }
  0x2f   : > { %1173 = vmatpush1.bf16.msra.mxu1 %v1791_v24  ;;  %1133 = vmatprep.subr.bf16.mxu0 %v1792_v25  ;;  %v1824_v46 = vld [vmem:[%s2042_s10 + $0x364] ss:$16 sps:$4 sm:$0xff]   ;;  %v1827_v51 = vld [vmem:[%s2042_s10 + $0x360] ss:$16 sps:$4 sm:$0xff]   ;;  %v1885_v24 = vld [vmem:[%s2042_s10 + $0x28c] ss:$16 sps:$4 sm:$0xff]  }
  0x30   : > { %1174 = vmatprep.subr.bf16.mxu1 %v1794_v26  ;;  %v337_v47 = vld [vmem:[%s2037_s30] sm:$0xff]  ;;  %v1880_v25 = vld [vmem:[%s2042_s10 + $0x88] ss:$16 sps:$4 sm:$0xff]  }
  0x31   : > { %v2092_v48 = vcombine.high %v337_v47, %v337_v47  ;;  %v1828_v53 = vld [vmem:[%s2042_s10 + $0x184] ss:$16 sps:$4 sm:$0xff]   ;;  %v1832_v55 = vld [vmem:[%s2042_s10 + $0x180] ss:$16 sps:$4 sm:$0xff]   ;;  %v2116_v7 = vcombine.low %v337_v47, %v337_v47  ;;  %v1883_v26 = vld [vmem:[%s2042_s10 + $0x288] ss:$16 sps:$4 sm:$0xff]  }
  0x32   : > { %1134 = vmatpush1.bf16.msra.mxu0 %v1796_v27  ;;  %v1830_v54 = vld [vmem:[%s2042_s10 + $0x384] ss:$16 sps:$4 sm:$0xff]   ;;  %v1833_v56 = vld [vmem:[%s2042_s10 + $0x380] ss:$16 sps:$4 sm:$0xff]   ;;  %v1888_v27 = vld [vmem:[%s2042_s10 + $0xac] ss:$16 sps:$4 sm:$0xff]  }
  0x33   : > { %1175 = vmatpush1.bf16.msra.mxu1 %v1797_v28  ;;  %1135 = vmatprep.subr.bf16.mxu0 %v1798_v29  ;;  %v1834_v57 = vld [vmem:[%s2042_s10 + $0x1a4] ss:$16 sps:$4 sm:$0xff]   ;;  %v1838_v59 = vld [vmem:[%s2042_s10 + $0x1a0] ss:$16 sps:$4 sm:$0xff]   ;;  %v1891_v28 = vld [vmem:[%s2042_s10 + $0x2ac] ss:$16 sps:$4 sm:$0xff]  }
  0x34   : > { %1176 = vmatprep.subr.bf16.mxu1 %v1800_v30  ;;  %1153 = vmatprep.mubr.bf16.mxu0 %v2092_v48  ;;  %v1836_v58 = vld [vmem:[%s2042_s10 + $0x3a4] ss:$16 sps:$4 sm:$0xff]   ;;  %v1839_v60 = vld [vmem:[%s2042_s10 + $0x3a0] ss:$16 sps:$4 sm:$0xff]   ;;  %v1886_v29 = vld [vmem:[%s2042_s10 + $0xa8] ss:$16 sps:$4 sm:$0xff]  }
  0x35   : > { %v1840_v61 = vld [vmem:[%s2042_s10 + $0x1c4] ss:$16 sps:$4 sm:$0xff]   ;;  %v1844_v63 = vld [vmem:[%s2042_s10 + $0x1c0] ss:$16 sps:$4 sm:$0xff]   ;;  %v1889_v30 = vld [vmem:[%s2042_s10 + $0x2a8] ss:$16 sps:$4 sm:$0xff]  }
  0x36   : > { %1136 = vmatpush1.bf16.msra.mxu0 %v1802_v31  ;;  %v1842_v62 = vld [vmem:[%s2042_s10 + $0x3c4] ss:$16 sps:$4 sm:$0xff]   ;;  %v1845_v0 = vld [vmem:[%s2042_s10 + $0x3c0] ss:$16 sps:$4 sm:$0xff]   ;;  %v1894_v31 = vld [vmem:[%s2042_s10 + $0xcc] ss:$16 sps:$4 sm:$0xff]  }
  0x37   : > { %1177 = vmatpush1.bf16.msra.mxu1 %v1803_v32  ;;  %1137 = vmatprep.subr.bf16.mxu0 %v1804_v33  ;;  %v1846_v1 = vld [vmem:[%s2042_s10 + $0x1e4] ss:$16 sps:$4 sm:$0xff]   ;;  %v1850_v3 = vld [vmem:[%s2042_s10 + $0x1e0] ss:$16 sps:$4 sm:$0xff]   ;;  %v1897_v32 = vld [vmem:[%s2042_s10 + $0x2cc] ss:$16 sps:$4 sm:$0xff]  }
  0x38   : > { %1178 = vmatprep.subr.bf16.mxu1 %v1806_v34  ;;  %v1848_v2 = vld [vmem:[%s2042_s10 + $0x3e4] ss:$16 sps:$4 sm:$0xff]   ;;  %v1851_v4 = vld [vmem:[%s2042_s10 + $0x3e0] ss:$16 sps:$4 sm:$0xff]   ;;  %v1892_v33 = vld [vmem:[%s2042_s10 + $0xc8] ss:$16 sps:$4 sm:$0xff]  }
  0x39   : > { %v1895_v34 = vld [vmem:[%s2042_s10 + $0x2c8] ss:$16 sps:$4 sm:$0xff]   ;;  %v1918_v47 = vld [vmem:[%s2042_s10 + $0x14c] ss:$16 sps:$4 sm:$0xff]  }
  0x3a   : > { %1138 = vmatpush1.bf16.msra.mxu0 %v1808_v35  ;;  %v1900_v35 = vld [vmem:[%s2042_s10 + $0xec] ss:$16 sps:$4 sm:$0xff]  }
  0x3b   : > { %1179 = vmatpush1.bf16.msra.mxu1 %v1809_v36  ;;  %1139 = vmatprep.subr.bf16.mxu0 %v1810_v37  ;;  %v1903_v36 = vld [vmem:[%s2042_s10 + $0x2ec] ss:$16 sps:$4 sm:$0xff]   ;;  %v1898_v37 = vld [vmem:[%s2042_s10 + $0xe8] ss:$16 sps:$4 sm:$0xff]  }
  0x3c   : > { %1180 = vmatprep.subr.bf16.mxu1 %v1812_v38  ;;  %v1901_v38 = vld [vmem:[%s2042_s10 + $0x2e8] ss:$16 sps:$4 sm:$0xff]  }
  0x3e   : > { %1140 = vmatpush1.bf16.msra.mxu0 %v1814_v39  ;;  %v1906_v39 = vld [vmem:[%s2042_s10 + $0x10c] ss:$16 sps:$4 sm:$0xff]  }
  0x3f   : > { %1181 = vmatpush1.bf16.msra.mxu1 %v1815_v40  ;;  %1141 = vmatprep.subr.bf16.mxu0 %v1816_v41  ;;  %v1909_v40 = vld [vmem:[%s2042_s10 + $0x30c] ss:$16 sps:$4 sm:$0xff]   ;;  %v1904_v41 = vld [vmem:[%s2042_s10 + $0x108] ss:$16 sps:$4 sm:$0xff]  }
  0x40   : > { %1182 = vmatprep.subr.bf16.mxu1 %v1818_v42  ;;  %v1907_v42 = vld [vmem:[%s2042_s10 + $0x308] ss:$16 sps:$4 sm:$0xff]  }
  0x42   : > { %1142 = vmatpush1.bf16.msra.mxu0 %v1820_v43  ;;  %v1912_v43 = vld [vmem:[%s2042_s10 + $0x12c] ss:$16 sps:$4 sm:$0xff]  }
  0x43   : > { %1183 = vmatpush1.bf16.msra.mxu1 %v1821_v44  ;;  %1143 = vmatprep.subr.bf16.mxu0 %v1822_v45  ;;  %v1915_v44 = vld [vmem:[%s2042_s10 + $0x32c] ss:$16 sps:$4 sm:$0xff]   ;;  %v1910_v45 = vld [vmem:[%s2042_s10 + $0x128] ss:$16 sps:$4 sm:$0xff]  }
  0x44   : > { %1184 = vmatprep.subr.bf16.mxu1 %v1824_v46  ;;  %v1913_v46 = vld [vmem:[%s2042_s10 + $0x328] ss:$16 sps:$4 sm:$0xff]  }
  0x46   : > { %1144 = vmatpush1.bf16.msra.mxu0 %v1826_v50  ;;  %v1919_v50 = vld [vmem:[%s2042_s10 + $0x348] ss:$16 sps:$4 sm:$0xff]  }
  0x47   : > { %1185 = vmatpush1.bf16.msra.mxu1 %v1827_v51  ;;  %1145 = vmatprep.subr.bf16.mxu0 %v1828_v53  ;;  %v1924_v51 = vld [vmem:[%s2042_s10 + $0x16c] ss:$16 sps:$4 sm:$0xff]   ;;  %v1922_v53 = vld [vmem:[%s2042_s10 + $0x168] ss:$16 sps:$4 sm:$0xff]  }
  0x48   : > { %1186 = vmatprep.subr.bf16.mxu1 %v1830_v54  ;;  %v1925_v54 = vld [vmem:[%s2042_s10 + $0x368] ss:$16 sps:$4 sm:$0xff]  }
  0x4a   : > { %1146 = vmatpush1.bf16.msra.mxu0 %v1832_v55  ;;  %v1930_v55 = vld [vmem:[%s2042_s10 + $0x18c] ss:$16 sps:$4 sm:$0xff]  }
  0x4b   : > { %1187 = vmatpush1.bf16.msra.mxu1 %v1833_v56  ;;  %1147 = vmatprep.subr.bf16.mxu0 %v1834_v57  ;;  %v1933_v56 = vld [vmem:[%s2042_s10 + $0x38c] ss:$16 sps:$4 sm:$0xff]   ;;  %v1928_v57 = vld [vmem:[%s2042_s10 + $0x188] ss:$16 sps:$4 sm:$0xff]  }
  0x4c   : > { %1188 = vmatprep.subr.bf16.mxu1 %v1836_v58  ;;  %v1931_v58 = vld [vmem:[%s2042_s10 + $0x388] ss:$16 sps:$4 sm:$0xff]  }
  0x4e   : > { %1148 = vmatpush1.bf16.msra.mxu0 %v1838_v59  ;;  %v1936_v59 = vld [vmem:[%s2042_s10 + $0x1ac] ss:$16 sps:$4 sm:$0xff]  }
  0x4f   : > { %1189 = vmatpush1.bf16.msra.mxu1 %v1839_v60  ;;  %1149 = vmatprep.subr.bf16.mxu0 %v1840_v61  ;;  %v1939_v60 = vld [vmem:[%s2042_s10 + $0x3ac] ss:$16 sps:$4 sm:$0xff]   ;;  %v1934_v61 = vld [vmem:[%s2042_s10 + $0x1a8] ss:$16 sps:$4 sm:$0xff]  }
  0x50   : > { %1190 = vmatprep.subr.bf16.mxu1 %v1842_v62  ;;  %v1937_v62 = vld [vmem:[%s2042_s10 + $0x3a8] ss:$16 sps:$4 sm:$0xff]  }
  0x52   : > { %1150 = vmatpush1.bf16.msra.mxu0 %v1844_v63  ;;  %v1942_v63 = vld [vmem:[%s2042_s10 + $0x1cc] ss:$16 sps:$4 sm:$0xff]  }
  0x53   : > { %1191 = vmatpush1.bf16.msra.mxu1 %v1845_v0  ;;  %1151 = vmatprep.subr.bf16.mxu0 %v1846_v1  ;;  %v1945_v0 = vld [vmem:[%s2042_s10 + $0x3cc] ss:$16 sps:$4 sm:$0xff]   ;;  %v1940_v1 = vld [vmem:[%s2042_s10 + $0x1c8] ss:$16 sps:$4 sm:$0xff]  }
  0x54   : > { %1192 = vmatprep.subr.bf16.mxu1 %v1848_v2  ;;  %v1943_v2 = vld [vmem:[%s2042_s10 + $0x3c8] ss:$16 sps:$4 sm:$0xff]  }
  0x56   : > { %1152 = vmatpush1.bf16.msra.mxu0 %v1850_v3  ;;  %v1948_v3 = vld [vmem:[%s2042_s10 + $0x1ec] ss:$16 sps:$4 sm:$0xff]  }
  0x57   : > { %1193 = vmatpush1.bf16.msra.mxu1 %v1851_v4  ;;  %1203 = vmatprep.subr.bf16.mxu0 %v1858_v5  ;;  %v1951_v4 = vld [vmem:[%s2042_s10 + $0x3ec] ss:$16 sps:$4 sm:$0xff]   ;;  %v1946_v5 = vld [vmem:[%s2042_s10 + $0x1e8] ss:$16 sps:$4 sm:$0xff]  }
  0x58   : > { %1244 = vmatprep.subr.bf16.mxu1 %v1861_v6  ;;  %v1949_v6 = vld [vmem:[%s2042_s10 + $0x3e8] ss:$16 sps:$4 sm:$0xff]  }
  0x59   : > { %1154 = vmatmul.mubr.bf16.vlgmr.msra.gmra.mrb[0].mxu0 %v2116_v7 }
  0x5a   : > { %1195 = vmatmul.mubr.bf16.vlgmr.msra.gmra.mrb[0].mxu1 %v2118_v8  ;;  %1204 = vmatpush1.bf16.msra.mxu0 %v1856_v9 }
  0x5b   : > { %1245 = vmatpush1.bf16.msra.mxu1 %v1859_v10  ;;  %1205 = vmatprep.subr.bf16.mxu0 %v1864_v11  ;;  %v333_v10 = vld [vmem:[#allocation2] sm:$0xff] }
  0x5c   : > { %1246 = vmatprep.subr.bf16.mxu1 %v1867_v12  ;;  %1235 = vmatprep.mubr.bf16.mxu0 %v2092_v48  ;;  %v1921_v48 = vld [vmem:[%s2042_s10 + $0x34c] ss:$16 sps:$4 sm:$0xff]  }
  0x5d   : > { %1276 = vmatprep.mubr.bf16.mxu1 %v1581_v52  ;;  %v1927_v52 = vld [vmem:[%s2042_s10 + $0x36c] ss:$16 sps:$4 sm:$0xff]  }
  0x5e   : > { %1206 = vmatpush1.bf16.msra.mxu0 %v1862_v13 }
  0x5f   : > { %1247 = vmatpush1.bf16.msra.mxu1 %v1865_v14  ;;  %1207 = vmatprep.subr.bf16.mxu0 %v1870_v15  ;;  %v334_v14 = vld [vmem:[#allocation2 + $0x8] sm:$0xff] }
  0x60   : > { %1248 = vmatprep.subr.bf16.mxu1 %v1873_v16 }
  0x62   : > { %1208 = vmatpush1.bf16.msra.mxu0 %v1868_v17 }
  0x63   : > { %1249 = vmatpush1.bf16.msra.mxu1 %v1871_v18  ;;  %1209 = vmatprep.subr.bf16.mxu0 %v1876_v19 }
  0x64   : > { %1250 = vmatprep.subr.bf16.mxu1 %v1879_v20 }
  0x66   : > { %1210 = vmatpush1.bf16.msra.mxu0 %v1874_v21 }
  0x67   : > { %1251 = vmatpush1.bf16.msra.mxu1 %v1877_v22  ;;  %1211 = vmatprep.subr.bf16.mxu0 %v1882_v23 }
  0x68   : > { %1252 = vmatprep.subr.bf16.mxu1 %v1885_v24 }
  0x6a   : > { %1212 = vmatpush1.bf16.msra.mxu0 %v1880_v25 }
  0x6b   : > { %1253 = vmatpush1.bf16.msra.mxu1 %v1883_v26  ;;  %1213 = vmatprep.subr.bf16.mxu0 %v1888_v27  ;;  %v336_v26 = vld [vmem:[#allocation2 + $0x18] sm:$0xff] }
  0x6c   : > { %1254 = vmatprep.subr.bf16.mxu1 %v1891_v28 }
  0x6e   : > { %1214 = vmatpush1.bf16.msra.mxu0 %v1886_v29 }
  0x6f   : > { %1255 = vmatpush1.bf16.msra.mxu1 %v1889_v30  ;;  %1215 = vmatprep.subr.bf16.mxu0 %v1894_v31 }
  0x70   : > { %1256 = vmatprep.subr.bf16.mxu1 %v1897_v32 }
  0x72   : > { %1216 = vmatpush1.bf16.msra.mxu0 %v1892_v33 }
  0x73   : > { %1257 = vmatpush1.bf16.msra.mxu1 %v1895_v34  ;;  %1217 = vmatprep.subr.bf16.mxu0 %v1900_v35 }
  0x74   : > { %1258 = vmatprep.subr.bf16.mxu1 %v1903_v36 }
  0x76   : > { %1218 = vmatpush1.bf16.msra.mxu0 %v1898_v37  ;;  %v1324_v37 = vlaneseq (!%p1710_p7) }
  0x77   : > { %1259 = vmatpush1.bf16.msra.mxu1 %v1901_v38  ;;  %1219 = vmatprep.subr.bf16.mxu0 %v1906_v39 }
  0x78   : > { %1260 = vmatprep.subr.bf16.mxu1 %v1909_v40 }
  0x7a   : > { %1220 = vmatpush1.bf16.msra.mxu0 %v1904_v41  ;;  %v1325_v41 = vshrl.u32 (!%p1710_p7), %v1324_v37, 7 }
  0x7b   : > { %1261 = vmatpush1.bf16.msra.mxu1 %v1907_v42  ;;  %1221 = vmatprep.subr.bf16.mxu0 %v1912_v43 }
  0x7c   : > { %1262 = vmatprep.subr.bf16.mxu1 %v1915_v44 }
  0x7e   : > { %1222 = vmatpush1.bf16.msra.mxu0 %v1910_v45 }
  0x7f   : > { %1263 = vmatpush1.bf16.msra.mxu1 %v1913_v46  ;;  %1223 = vmatprep.subr.bf16.mxu0 %v1918_v47  ;;  %v1322_v47 = vld [vmem:[%s2240_s2] sm:$0xf] (!%p1710_p7) }
  0x80   : > { %1264 = vmatprep.subr.bf16.mxu1 %v1921_v48  ;;  %v2191_v48 = vsub.s32 (!%p1710_p7), 0, %v1325_v41 }
  0x82   : > { %1224 = vmatpush1.bf16.msra.mxu0 %v1916_v49  ;;  %v2193_v49 = vsub.s32 (!%p1710_p7), 1, %v1325_v41 }
  0x83   : > { %1265 = vmatpush1.bf16.msra.mxu1 %v1919_v50  ;;  %1225 = vmatprep.subr.bf16.mxu0 %v1924_v51 }
  0x84   : > { %1266 = vmatprep.subr.bf16.mxu1 %v1927_v52 }
  0x86   : > { %1226 = vmatpush1.bf16.msra.mxu0 %v1922_v53 }
  0x87   : > { %1267 = vmatpush1.bf16.msra.mxu1 %v1925_v54  ;;  %1227 = vmatprep.subr.bf16.mxu0 %v1930_v55  ;;  %v2195_v54 = vsub.s32 (!%p1710_p7), 2, %v1325_v41  ;;  %v2197_v55 = vsub.s32 (!%p1710_p7), 3, %v1325_v41 }
  0x88   : > { %1268 = vmatprep.subr.bf16.mxu1 %v1933_v56 }
  0x8a   : > { %1228 = vmatpush1.bf16.msra.mxu0 %v1928_v57 }
  0x8b   : > { %1269 = vmatpush1.bf16.msra.mxu1 %v1931_v58  ;;  %1229 = vmatprep.subr.bf16.mxu0 %v1936_v59  ;;  %v1327_v58 = vrot.slane (!%p1710_p7), %v1322_v47, %v2191_v48  ;;  %v1331_v59 = vrot.slane (!%p1710_p7), %v1322_v47, %v2193_v49 }
  0x8c   : > { %1270 = vmatprep.subr.bf16.mxu1 %v1939_v60 }
  0x8e   : > { %1230 = vmatpush1.bf16.msra.mxu0 %v1934_v61 }
  0x8f   : > { %1271 = vmatpush1.bf16.msra.mxu1 %v1937_v62  ;;  %1231 = vmatprep.subr.bf16.mxu0 %v1942_v63 }
  0x90   : > { %1272 = vmatprep.subr.bf16.mxu1 %v1945_v0 }
  0x92   : > { %1232 = vmatpush1.bf16.msra.mxu0 %v1940_v1 }
  0x93   : > { %1273 = vmatpush1.bf16.msra.mxu1 %v1943_v2  ;;  %1233 = vmatprep.subr.bf16.mxu0 %v1948_v3  ;;  %v1335_v2 = vrot.slane (!%p1710_p7), %v1322_v47, %v2195_v54  ;;  %v1339_v3 = vrot.slane (!%p1710_p7), %v1322_v47, %v2197_v55 }
  0x94   : > { %1274 = vmatprep.subr.bf16.mxu1 %v1951_v4 }
  0x96   : > { %1234 = vmatpush1.bf16.msra.mxu0 %v1946_v5 }
  0x97   : > { %1275 = vmatpush1.bf16.msra.mxu1 %v1949_v6 }
  0x99   : > { %1236 = vmatmul.mubr.bf16.vlgmr.msra.gmra.mrb[4].mxu0 %v2116_v7  ;;  %v335_v7 = vld [vmem:[#allocation2 + $0x10] sm:$0xff] }
  0x9a   : > { %1277 = vmatmul.mubr.bf16.vlgmr.msra.gmra.mrb[4].mxu1 %v2118_v8 }
 0x12c   : > { %v1155_v9 = vpop.f32.mrb[0].mxu0 }
 0x12d   : > { %v1196_v11 = vpop.f32.mrb[0].mxu1  ;;  %v1157_v13 = vpop.f32.mrb[1].mxu0 }
 0x12e   : > { %v1197_v12 = vadd.f32 %v1196_v11, %v1155_v9  ;;  %v1198_v15 = vpop.f32.mrb[1].mxu1  ;;  %v1159_v17 = vpop.f32.mrb[2].mxu0 }
 0x12f   : > { %v1199_v16 = vadd.f32 %v1198_v15, %v1157_v13  ;;  %v1200_v18 = vpop.f32.mrb[2].mxu1  ;;  %v1160_v20 = vpop.f32.mrb[3].mxu0  ;;  %v1401_v13 = vld [vmem:[%s2243_s5] sm:$0xf] (!%p1710_p7) }
 0x130   : > { %v1285_v19 = vadd.f32 %v1197_v12, %v333_v10  ;;  %v1201_v21 = vpop.f32.mrb[3].mxu1  ;;  %v1395_v12 = vld [vmem:[%s2241_s3] sm:$0xff] (!%p1710_p7)  ;;  %v1418_v37 = vrot.slane (!%p1710_p7), %v1401_v13, %v2197_v55 }
 0x131   : > { %v1286_v22 = vadd.f32 %v1199_v16, %v334_v14  ;;  %v1369_v18 = vld [vmem:[%s2242_s4] sm:$0xf] (!%p1710_p7)  ;;  %v1397_v20 = vunpack.c.l.bf16 (!%p1710_p7), %v1395_v12  ;;  %v1398_v21 = vunpack.c.h.bf16 (!%p1710_p7), %v1395_v12 }
 0x132   : > { %1289 = vst [vmem:[#allocation2] sm:$0xff] %v1285_v19  ;;  %v1396_v19 = vld [vmem:[%s2241_s3 + $0x8] sm:$0xff] (!%p1710_p7) }
 0x133   : > { %1290 = vst [vmem:[#allocation2 + $0x8] sm:$0xff] %v1286_v22 }
 0x139   : > { %v1297_v35 = vld [vmem:[#allocation2] sm:$0xff] (!%p1710_p7) }
 0x13a   : > { %v1298_v36 = vld [vmem:[#allocation2 + $0x8] sm:$0xff] (!%p1710_p7)  ;;  %v1302_v38 = vmul.f32 (!%p1710_p7), 1024.0, %v1297_v35 }
 0x13b   : > { %v1303_v39 = vmul.f32 (!%p1710_p7), 1024.0, %v1298_v36  ;;  %v1414_v36 = vrot.slane (!%p1710_p7), %v1401_v13, %v2195_v54 }
 0x13c   : > { %v1719_v44 = vround.rtne.f32 (!%p1710_p7), %v1302_v38 }
 0x13d   : > { %v1720_v45 = vround.rtne.f32 (!%p1710_p7), %v1303_v39 }
 0x13e   : > { %v1310_v51 = vmax.f32 (!%p1710_p7), %v1719_v44, -32768.0  ;;  %v1382_v44 = vrot.slane (!%p1710_p7), %v1369_v18, %v2195_v54 }
 0x13f   : > { %v1311_v52 = vmax.f32 (!%p1710_p7), %v1720_v45, -32768.0  ;;  %v1386_v45 = vrot.slane (!%p1710_p7), %v1369_v18, %v2197_v55 }
 0x140   : > { %v1314_v56 = vmin.f32 (!%p1710_p7), %v1310_v51, 32767.0 }
 0x141   : > { %v1315_v57 = vmin.f32 (!%p1710_p7), %v1311_v52, 32767.0 }
 0x142   : > { %v1318_v62 = vmul.f32 (!%p1710_p7), 0.0009765625, %v1314_v56 }
 0x143   : > { %v1319_v63 = vmul.f32 (!%p1710_p7), 0.0009765625, %v1315_v57 }
 0x144   : > { %v1344_v4 = vadd.f32 (!%p1710_p7), %v1327_v58, %v1318_v62 }
 0x145   : > { %v1345_v5 = vadd.f32 (!%p1710_p7), %v1331_v59, %v1319_v63 }
 0x146   : > { %v1349_v10 = vmul.f32 (!%p1710_p7), 16.0, %v1344_v4 }
 0x147   : > { %v1350_v11 = vmul.f32 (!%p1710_p7), 16.0, %v1345_v5 }
 0x148   : > { %v1723_v16 = vround.rtne.f32 (!%p1710_p7), %v1349_v10 }
 0x149   : > { %v1724_v17 = vround.rtne.f32 (!%p1710_p7), %v1350_v11 }
 0x16c   : > { %v1237_v23 = vpop.f32.mrb[4].mxu0 }
 0x16d   : > { %v1278_v24 = vpop.f32.mrb[4].mxu1  ;;  %v1239_v25 = vpop.f32.mrb[5].mxu0  ;;  %1296 = sbr.rel (%p1710_p7) target bundleno = 420 (0x1a4), region = 52 }
 0x16e   : > { %v1279_v8 = vadd.f32 %v1278_v24, %v1237_v23  ;;  %v1280_v27 = vpop.f32.mrb[5].mxu1  ;;  %v1241_v29 = vpop.f32.mrb[6].mxu0  ;;  %v1358_v24 = vmax.f32 (!%p1710_p7), %v1724_v17, -128.0 }
 0x16f   : > { %v1281_v28 = vadd.f32 %v1280_v27, %v1239_v25  ;;  %v1282_v30 = vpop.f32.mrb[6].mxu1  ;;  %v1242_v32 = vpop.f32.mrb[7].mxu0  ;;  %v1410_v25 = vrot.slane (!%p1710_p7), %v1401_v13, %v2193_v49  ;;  %v1399_v29 = vunpack.c.l.bf16 (!%p1710_p7), %v1396_v19 }
 0x170   : > { %v1287_v31 = vadd.f32 %v1279_v8, %v335_v7  ;;  %v1283_v33 = vpop.f32.mrb[7].mxu1  ;;  %v1357_v7 = vmax.f32 (!%p1710_p7), %v1723_v16, -128.0  ;;  %v1406_v8 = vrot.slane (!%p1710_p7), %v1401_v13, %v2191_v48  ;;  %v1378_v32 = vrot.slane (!%p1710_p7), %v1369_v18, %v2193_v49 }
 0x171   : > { %v1288_v34 = vadd.f32 %v1281_v28, %v336_v26  ;;  %v1374_v26 = vrot.slane (!%p1710_p7), %v1369_v18, %v2191_v48  ;;  %v1400_v33 = vunpack.c.h.bf16 (!%p1710_p7), %v1396_v19  ;;  %v1424_v41 = vmul.f32 (!%p1710_p7), %v1410_v25, %v1398_v21 }
 0x172   : > { %1291 = vst [vmem:[#allocation2 + $0x10] sm:$0xff] %v1287_v31  ;;  %v1361_v30 = vmin.f32 (!%p1710_p7), %v1357_v7, 127.0  ;;  %v1362_v31 = vmin.f32 (!%p1710_p7), %v1358_v24, 127.0 }
 0x173   : > { %1292 = vst [vmem:[#allocation2 + $0x18] sm:$0xff] %v1288_v34  ;;  %v1426_v51 = vmul.f32 (!%p1710_p7), %v1418_v37, %v1400_v33 }
 0x174   : > { %v1365_v38 = vmul.f32 0.0625, %v1361_v30  ;;  %v1366_v39 = vmul.f32 0.0625, %v1362_v31 }
 0x176   : > { %v1392_v47 = vmul.f32 %v1378_v32, %v1366_v39 }
 0x179   : > { %v1299_v40 = vld [vmem:[#allocation2 + $0x10] sm:$0xff] }
 0x17a   : > { %v1300_v42 = vld [vmem:[#allocation2 + $0x18] sm:$0xff]  ;;  %v1304_v43 = vmul.f32 1024.0, %v1299_v40  ;;  %v1423_v40 = vmul.f32 %v1406_v8, %v1397_v20 }
 0x17b   : > { %v1305_v46 = vmul.f32 1024.0, %v1300_v42 }
 0x17c   : > { %v1721_v50 = vround.rtne.f32 %v1304_v43 }
 0x17d   : > { %v1722_v53 = vround.rtne.f32 %v1305_v46  ;;  %v1391_v46 = vmul.f32 %v1374_v26, %v1365_v38 }
 0x17e   : > { %v1312_v60 = vmax.f32 %v1721_v50, -32768.0  ;;  %v1425_v50 = vmul.f32 %v1414_v36, %v1399_v29 }
 0x17f   : > { %v1313_v61 = vmax.f32 %v1722_v53, -32768.0  ;;  %v1427_v52 = vadd.f32 %v1423_v40, %v1391_v46  ;;  %v1428_v53 = vadd.f32 %v1424_v41, %v1392_v47 }
 0x180   : > { %v1316_v0 = vmin.f32 %v1312_v60, 32767.0 }
 0x181   : > { %v1317_v1 = vmin.f32 %v1313_v61, 32767.0  ;;  %v1431_v58 = vmul.f32 16.0, %v1427_v52  ;;  %v1432_v59 = vmul.f32 16.0, %v1428_v53 }
 0x182   : > { %v1320_v6 = vmul.f32 0.0009765625, %v1316_v0 }
 0x183   : > { %v1321_v9 = vmul.f32 0.0009765625, %v1317_v1  ;;  %v1727_v62 = vround.rtne.f32 %v1431_v58  ;;  %v1728_v63 = vround.rtne.f32 %v1432_v59 }
 0x184   : > { %v1346_v14 = vadd.f32 %v1335_v2, %v1320_v6 }
 0x185   : > { %v1347_v15 = vadd.f32 %v1339_v3, %v1321_v9  ;;  %v1439_v1 = vmax.f32 %v1727_v62, -128.0  ;;  %v1440_v55 = vmax.f32 %v1728_v63, -128.0 }
 0x186   : > { %v1351_v22 = vmul.f32 16.0, %v1346_v14 }
 0x187   : > { %v1352_v23 = vmul.f32 16.0, %v1347_v15  ;;  %v1443_v4 = vmin.f32 %v1439_v1, 127.0  ;;  %v1444_v5 = vmin.f32 %v1440_v55, 127.0 }
 0x188   : > { %v1725_v27 = vround.rtne.f32 %v1351_v22 }
 0x189   : > { %v1726_v28 = vround.rtne.f32 %v1352_v23  ;;  %v1447_v10 = vmul.f32 0.0625, %v1443_v4  ;;  %v1448_v11 = vmul.f32 0.0625, %v1444_v5 }
 0x18a   : > { %v1359_v34 = vmax.f32 %v1725_v27, -128.0 }
 0x18b   : > { %v1360_v35 = vmax.f32 %v1726_v28, -128.0  ;;  %v1451_v14 = vmax.f32 %v1447_v10, 0.0  ;;  %v1452_v15 = vmax.f32 %v1448_v11, 0.0 }
 0x18c   : > { %v1363_v42 = vmin.f32 %v1359_v34, 127.0 }
 0x18d   : > { %v1364_v43 = vmin.f32 %v1360_v35, 127.0  ;;  %v1717_v18 = vpack.c.bf16 %v1452_v15, %v1451_v14 }
 0x18e   : > { %v1367_v48 = vmul.f32 0.0625, %v1363_v42 }
 0x18f   : > { %v1368_v49 = vmul.f32 0.0625, %v1364_v43  ;;  %1471 = vst [vmem:[%s2244_s6] sm:$0xff] %v1717_v18 }
 0x190   : > { %v1393_v56 = vmul.f32 %v1382_v44, %v1367_v48 }
 0x191   : > { %v1394_v57 = vmul.f32 %v1386_v45, %v1368_v49 }
 0x192   : > { %v1429_v60 = vadd.f32 %v1425_v50, %v1393_v56 }
 0x193   : > { %v1430_v61 = vadd.f32 %v1426_v51, %v1394_v57 }
 0x194   : > { %v1433_v0 = vmul.f32 16.0, %v1429_v60 }
 0x195   : > { %v1434_v54 = vmul.f32 16.0, %v1430_v61 }
 0x196   : > { %v1729_v2 = vround.rtne.f32 %v1433_v0 }
 0x197   : > { %v1730_v3 = vround.rtne.f32 %v1434_v54 }
 0x198   : > { %v1441_v6 = vmax.f32 %v1729_v2, -128.0 }
 0x199   : > { %v1442_v9 = vmax.f32 %v1730_v3, -128.0 }
 0x19a   : > { %v1445_v12 = vmin.f32 %v1441_v6, 127.0 }
 0x19b   : > { %v1446_v13 = vmin.f32 %v1442_v9, 127.0 }
 0x19c   : > { %v1449_v16 = vmul.f32 0.0625, %v1445_v12 }
 0x19d   : > { %v1450_v17 = vmul.f32 0.0625, %v1446_v13 }
 0x19e   : > { %v1453_v19 = vmax.f32 %v1449_v16, 0.0 }
 0x19f   : > { %v1454_v20 = vmax.f32 %v1450_v17, 0.0 }
 0x1a1   : > { %v1718_v21 = vpack.c.bf16 %v1454_v20, %v1453_v19 }
 0x1a3   : > { %1472 = vst [vmem:[%s2244_s6 + $0x8] sm:$0xff] %v1718_v21 }
 0x1a4 PF: > { %s16_s23 = sadd.s32 1, %s1974_s23   ;;  %s2245_s21 = smov %s1970_s22 }
 0x1a5   : > { %p13_p8 = scmp.ge.s32.totalorder %s16_s23, 11   ;;  %s2246_s22 = smov %s2248_s24 }
 0x1a7   :  { %15 = sbr.rel (!%p13_p8) target bundleno = 2 (0x2), region = 88 }

// kernel: _lambda_.39
= control target key start
LH: loop header
LB: loop body
LE: loop exit
PB: predicated region body
PF: predicated region fallthrough
CT: control target
= control target key end

     0   :  { %s1794_s12 = smov 0   ;;  %s1796_s13 = smov 0   ;;  %s1988_s0 = inlined_call_operand.vmem [shape: bf16[8,4608], index: 0, kind: input, shape index: {}]   ;;  %s1989_s1 = inlined_call_operand.vmem [shape: bf16[4608,512], index: 1, kind: input, shape index: {}]   ;;  %s1990_s2 = inlined_call_operand.vmem [shape: f32[1,512], index: 2, kind: input, shape index: {}]   ;;  %s1991_s3 = inlined_call_operand.vmem [shape: bf16[8,512], index: 3, kind: output, shape index: {}]  }
   0x1   :  { %s1798_s14 = smov 0  }
   0x2 LB: > { %s22_s15 = sadd.s32 1, %s1767_s13  ;;  %p1372_p0 = scmp.ge.s32.totalorder %s1771_s14, 1  ;;  %s1771_s14 = sphi %s1798_s14, %s13_s14   ;;  %s1767_s13 = sphi %s1796_s13, %s1993_s13   ;;  %s1763_s12 = sphi %s1794_s12, %s1992_s12  }
   0x3   : > { %p23_p1 = scmp.ge.s32.totalorder %s22_s15, 9  ;;  %p168_p2 = scmp.lt.s32.totalorder %s1771_s14, 10 }
   0x5   : > { %s1995_s15 = smov (%p23_p1, %s22_s15), 0  ;;  %p169_p3 = pnand %p1372_p0, %p168_p2 }
   0x6   : > { %s1373_s16 = sshll.u32 (!%p169_p3), %s1763_s12, 2  ;;  %s1375_s17 = sshll.u32 (!%p169_p3), %s1763_s12, 6 }
   0x7   : > { %172 = sbr.rel (%p169_p3) target bundleno = 406 (0x196), region = 32  ;;  %p205_p4 = scmp.lt.s32.totalorder (!%p169_p3), %s1373_s16, 35 }
   0x8   : > { %p213_p5 = scmp.lt.s32.totalorder (!%p169_p3), %s1375_s17, 575  ;;  %p1378_p6 = scmp.ne.s32.totalorder (!%p169_p3), %s1763_s12, 0 }
   0xe   : > { %s1997_s16 = smov (!%p205_p4, %s1373_s16), 35  ;;  %s1999_s17 = smov (!%p213_p5, %s1375_s17), 575 }
   0xf   : > { %s1374_s18 = sshll.u32 %s1997_s16, 2  ;;  %s1517_s22 = sshll.u32 %s1999_s17, 4  ;;  %v1773_v0 = vmov (!%p1378_p6), 0.0  }
  0x10   : > { %s1819_s21 = scalar_lea.vmem %s1988_s0, %s1374_s18  ;;  %s1824_s25 = scalar_lea.vmem %s1989_s1, %s1517_s22  ;;  %228 = vst [vmem:[#allocation2] sm:$0xff] (!%p1378_p6), %v1773_v0  ;;  %229 = vst [vmem:[#allocation2 + $0x8] sm:$0xff] (!%p1378_p6), %v1773_v0 }
  0x11   : > { %227 = sbr.rel (%p1378_p6) target bundleno = 24 (0x18), region = 36  ;;  %230 = vst [vmem:[#allocation2 + $0x10] sm:$0xff] (!%p1378_p6), %v1773_v0  ;;  %231 = vst [vmem:[#allocation2 + $0x18] sm:$0xff] (!%p1378_p6), %v1773_v0 }
  0x18 PF: > { %v1553_v1 = vld [vmem:[%s1824_s25 + $0x4] ss:$16 sps:$4 sm:$0xff]   ;;  %v1557_v3 = vld [vmem:[%s1824_s25] ss:$16 sps:$4 sm:$0xff]   ;;  %v237_v49 = vld [vmem:[%s1819_s21 + $0x8] sm:$0xff]  ;;  %p1511_p7 = scmp.ne.s32.totalorder %s1763_s12, 8 }
  0x19   : > { %v1555_v2 = vld [vmem:[%s1824_s25 + $0x204] ss:$16 sps:$4 sm:$0xff]   ;;  %1020 = vmatprep.subr.bf16.mxu0 %v1553_v1  ;;  %v1558_v4 = vld [vmem:[%s1824_s25 + $0x200] ss:$16 sps:$4 sm:$0xff]   ;;  %v1382_v52 = vcombine.high %v237_v49, %v237_v49 }
  0x1a   : > { %1061 = vmatprep.subr.bf16.mxu1 %v1555_v2  ;;  %v1559_v5 = vld [vmem:[%s1824_s25 + $0x24] ss:$16 sps:$4 sm:$0xff]   ;;  %1021 = vmatpush1.bf16.msra.mxu0 %v1557_v3  ;;  %v1563_v7 = vld [vmem:[%s1824_s25 + $0x20] ss:$16 sps:$4 sm:$0xff]  }
  0x1b   : > { %1062 = vmatpush1.bf16.msra.mxu1 %v1558_v4  ;;  %v1561_v6 = vld [vmem:[%s1824_s25 + $0x224] ss:$16 sps:$4 sm:$0xff]   ;;  %1022 = vmatprep.subr.bf16.mxu0 %v1559_v5  ;;  %v1564_v8 = vld [vmem:[%s1824_s25 + $0x220] ss:$16 sps:$4 sm:$0xff]   ;;  %v1655_v5 = vld [vmem:[%s1824_s25 + $0xc] ss:$16 sps:$4 sm:$0xff]  }
  0x1c   : > { %1063 = vmatprep.subr.bf16.mxu1 %v1561_v6  ;;  %v1565_v9 = vld [vmem:[%s1824_s25 + $0x44] ss:$16 sps:$4 sm:$0xff]   ;;  %v1569_v11 = vld [vmem:[%s1824_s25 + $0x40] ss:$16 sps:$4 sm:$0xff]   ;;  %1093 = vmatprep.mubr.bf16.mxu1 %v1382_v52  ;;  %v1658_v6 = vld [vmem:[%s1824_s25 + $0x20c] ss:$16 sps:$4 sm:$0xff]  }
  0x1d   : > { %v1567_v10 = vld [vmem:[%s1824_s25 + $0x244] ss:$16 sps:$4 sm:$0xff]   ;;  %v1570_v12 = vld [vmem:[%s1824_s25 + $0x240] ss:$16 sps:$4 sm:$0xff]  }
  0x1e   : > { %1023 = vmatpush1.bf16.msra.mxu0 %v1563_v7  ;;  %v1571_v13 = vld [vmem:[%s1824_s25 + $0x64] ss:$16 sps:$4 sm:$0xff]   ;;  %v1575_v15 = vld [vmem:[%s1824_s25 + $0x60] ss:$16 sps:$4 sm:$0xff]  }
  0x1f   : > { %1064 = vmatpush1.bf16.msra.mxu1 %v1564_v8  ;;  %1024 = vmatprep.subr.bf16.mxu0 %v1565_v9  ;;  %v1573_v14 = vld [vmem:[%s1824_s25 + $0x264] ss:$16 sps:$4 sm:$0xff]   ;;  %v1576_v16 = vld [vmem:[%s1824_s25 + $0x260] ss:$16 sps:$4 sm:$0xff]   ;;  %v1900_v8 = vcombine.low %v237_v49, %v237_v49  ;;  %v1653_v9 = vld [vmem:[%s1824_s25 + $0x8] ss:$16 sps:$4 sm:$0xff]  }
  0x20   : > { %1065 = vmatprep.subr.bf16.mxu1 %v1567_v10  ;;  %v1577_v17 = vld [vmem:[%s1824_s25 + $0x84] ss:$16 sps:$4 sm:$0xff]   ;;  %v1581_v19 = vld [vmem:[%s1824_s25 + $0x80] ss:$16 sps:$4 sm:$0xff]   ;;  %v1656_v10 = vld [vmem:[%s1824_s25 + $0x208] ss:$16 sps:$4 sm:$0xff]  }
  0x21   : > { %v1579_v18 = vld [vmem:[%s1824_s25 + $0x284] ss:$16 sps:$4 sm:$0xff]   ;;  %v1582_v20 = vld [vmem:[%s1824_s25 + $0x280] ss:$16 sps:$4 sm:$0xff]   ;;  %v1713_v49 = vld [vmem:[%s1824_s25 + $0x148] ss:$16 sps:$4 sm:$0xff]  }
  0x22   : > { %1025 = vmatpush1.bf16.msra.mxu0 %v1569_v11  ;;  %v1583_v21 = vld [vmem:[%s1824_s25 + $0xa4] ss:$16 sps:$4 sm:$0xff]   ;;  %v1587_v23 = vld [vmem:[%s1824_s25 + $0xa0] ss:$16 sps:$4 sm:$0xff]   ;;  %v1661_v11 = vld [vmem:[%s1824_s25 + $0x2c] ss:$16 sps:$4 sm:$0xff]  }
  0x23   : > { %1066 = vmatpush1.bf16.msra.mxu1 %v1570_v12  ;;  %1026 = vmatprep.subr.bf16.mxu0 %v1571_v13  ;;  %v1585_v22 = vld [vmem:[%s1824_s25 + $0x2a4] ss:$16 sps:$4 sm:$0xff]   ;;  %v1588_v24 = vld [vmem:[%s1824_s25 + $0x2a0] ss:$16 sps:$4 sm:$0xff]   ;;  %v1664_v12 = vld [vmem:[%s1824_s25 + $0x22c] ss:$16 sps:$4 sm:$0xff]  }
  0x24   : > { %1067 = vmatprep.subr.bf16.mxu1 %v1573_v14  ;;  %v1589_v25 = vld [vmem:[%s1824_s25 + $0xc4] ss:$16 sps:$4 sm:$0xff]   ;;  %v1593_v27 = vld [vmem:[%s1824_s25 + $0xc0] ss:$16 sps:$4 sm:$0xff]   ;;  %v1659_v13 = vld [vmem:[%s1824_s25 + $0x28] ss:$16 sps:$4 sm:$0xff]  }
  0x25   : > { %v1591_v26 = vld [vmem:[%s1824_s25 + $0x2c4] ss:$16 sps:$4 sm:$0xff]   ;;  %v1594_v28 = vld [vmem:[%s1824_s25 + $0x2c0] ss:$16 sps:$4 sm:$0xff]   ;;  %v1662_v14 = vld [vmem:[%s1824_s25 + $0x228] ss:$16 sps:$4 sm:$0xff]  }
  0x26   : > { %1027 = vmatpush1.bf16.msra.mxu0 %v1575_v15  ;;  %v1595_v29 = vld [vmem:[%s1824_s25 + $0xe4] ss:$16 sps:$4 sm:$0xff]   ;;  %v1599_v31 = vld [vmem:[%s1824_s25 + $0xe0] ss:$16 sps:$4 sm:$0xff]   ;;  %v1667_v15 = vld [vmem:[%s1824_s25 + $0x4c] ss:$16 sps:$4 sm:$0xff]  }
  0x27   : > { %1068 = vmatpush1.bf16.msra.mxu1 %v1576_v16  ;;  %1028 = vmatprep.subr.bf16.mxu0 %v1577_v17  ;;  %v1597_v30 = vld [vmem:[%s1824_s25 + $0x2e4] ss:$16 sps:$4 sm:$0xff]   ;;  %v1600_v32 = vld [vmem:[%s1824_s25 + $0x2e0] ss:$16 sps:$4 sm:$0xff]   ;;  %v1670_v16 = vld [vmem:[%s1824_s25 + $0x24c] ss:$16 sps:$4 sm:$0xff]  }
  0x28   : > { %1069 = vmatprep.subr.bf16.mxu1 %v1579_v18  ;;  %v1601_v33 = vld [vmem:[%s1824_s25 + $0x104] ss:$16 sps:$4 sm:$0xff]   ;;  %v1605_v35 = vld [vmem:[%s1824_s25 + $0x100] ss:$16 sps:$4 sm:$0xff]   ;;  %v1665_v17 = vld [vmem:[%s1824_s25 + $0x48] ss:$16 sps:$4 sm:$0xff]  }
  0x29   : > { %v1603_v34 = vld [vmem:[%s1824_s25 + $0x304] ss:$16 sps:$4 sm:$0xff]   ;;  %v1606_v36 = vld [vmem:[%s1824_s25 + $0x300] ss:$16 sps:$4 sm:$0xff]   ;;  %v1668_v18 = vld [vmem:[%s1824_s25 + $0x248] ss:$16 sps:$4 sm:$0xff]  }
  0x2a   : > { %1029 = vmatpush1.bf16.msra.mxu0 %v1581_v19  ;;  %v1607_v37 = vld [vmem:[%s1824_s25 + $0x124] ss:$16 sps:$4 sm:$0xff]   ;;  %v1611_v39 = vld [vmem:[%s1824_s25 + $0x120] ss:$16 sps:$4 sm:$0xff]   ;;  %v1673_v19 = vld [vmem:[%s1824_s25 + $0x6c] ss:$16 sps:$4 sm:$0xff]  }
  0x2b   : > { %1070 = vmatpush1.bf16.msra.mxu1 %v1582_v20  ;;  %1030 = vmatprep.subr.bf16.mxu0 %v1583_v21  ;;  %v1609_v38 = vld [vmem:[%s1824_s25 + $0x324] ss:$16 sps:$4 sm:$0xff]   ;;  %v1612_v40 = vld [vmem:[%s1824_s25 + $0x320] ss:$16 sps:$4 sm:$0xff]   ;;  %v1676_v20 = vld [vmem:[%s1824_s25 + $0x26c] ss:$16 sps:$4 sm:$0xff]  }
  0x2c   : > { %1071 = vmatprep.subr.bf16.mxu1 %v1585_v22  ;;  %v1613_v41 = vld [vmem:[%s1824_s25 + $0x144] ss:$16 sps:$4 sm:$0xff]   ;;  %v1617_v43 = vld [vmem:[%s1824_s25 + $0x140] ss:$16 sps:$4 sm:$0xff]   ;;  %v1671_v21 = vld [vmem:[%s1824_s25 + $0x68] ss:$16 sps:$4 sm:$0xff]  }
  0x2d   : > { %v1615_v42 = vld [vmem:[%s1824_s25 + $0x344] ss:$16 sps:$4 sm:$0xff]   ;;  %v1618_v44 = vld [vmem:[%s1824_s25 + $0x340] ss:$16 sps:$4 sm:$0xff]   ;;  %v1674_v22 = vld [vmem:[%s1824_s25 + $0x268] ss:$16 sps:$4 sm:$0xff]  }
  0x2e   : > { %1031 = vmatpush1.bf16.msra.mxu0 %v1587_v23  ;;  %v1619_v45 = vld [vmem:[%s1824_s25 + $0x164] ss:$16 sps:$4 sm:$0xff]   ;;  %v1623_v50 = vld [vmem:[%s1824_s25 + $0x160] ss:$16 sps:$4 sm:$0xff]   ;;  %v1679_v23 = vld [vmem:[%s1824_s25 + $0x8c] ss:$16 sps:$4 sm:$0xff]  }
  0x2f   : > { %1072 = vmatpush1.bf16.msra.mxu1 %v1588_v24  ;;  %1032 = vmatprep.subr.bf16.mxu0 %v1589_v25  ;;  %v1621_v46 = vld [vmem:[%s1824_s25 + $0x364] ss:$16 sps:$4 sm:$0xff]   ;;  %v1624_v51 = vld [vmem:[%s1824_s25 + $0x360] ss:$16 sps:$4 sm:$0xff]   ;;  %v1682_v24 = vld [vmem:[%s1824_s25 + $0x28c] ss:$16 sps:$4 sm:$0xff]  }
  0x30   : > { %1073 = vmatprep.subr.bf16.mxu1 %v1591_v26  ;;  %v236_v47 = vld [vmem:[%s1819_s21] sm:$0xff]  ;;  %v1677_v25 = vld [vmem:[%s1824_s25 + $0x88] ss:$16 sps:$4 sm:$0xff]  }
  0x31   : > { %v1874_v48 = vcombine.high %v236_v47, %v236_v47  ;;  %v1625_v53 = vld [vmem:[%s1824_s25 + $0x184] ss:$16 sps:$4 sm:$0xff]   ;;  %v1629_v55 = vld [vmem:[%s1824_s25 + $0x180] ss:$16 sps:$4 sm:$0xff]   ;;  %v1898_v7 = vcombine.low %v236_v47, %v236_v47  ;;  %v1680_v26 = vld [vmem:[%s1824_s25 + $0x288] ss:$16 sps:$4 sm:$0xff]  }
  0x32   : > { %1033 = vmatpush1.bf16.msra.mxu0 %v1593_v27  ;;  %v1627_v54 = vld [vmem:[%s1824_s25 + $0x384] ss:$16 sps:$4 sm:$0xff]   ;;  %v1630_v56 = vld [vmem:[%s1824_s25 + $0x380] ss:$16 sps:$4 sm:$0xff]   ;;  %v1685_v27 = vld [vmem:[%s1824_s25 + $0xac] ss:$16 sps:$4 sm:$0xff]  }
  0x33   : > { %1074 = vmatpush1.bf16.msra.mxu1 %v1594_v28  ;;  %1034 = vmatprep.subr.bf16.mxu0 %v1595_v29  ;;  %v1631_v57 = vld [vmem:[%s1824_s25 + $0x1a4] ss:$16 sps:$4 sm:$0xff]   ;;  %v1635_v59 = vld [vmem:[%s1824_s25 + $0x1a0] ss:$16 sps:$4 sm:$0xff]   ;;  %v1688_v28 = vld [vmem:[%s1824_s25 + $0x2ac] ss:$16 sps:$4 sm:$0xff]  }
  0x34   : > { %1075 = vmatprep.subr.bf16.mxu1 %v1597_v30  ;;  %1052 = vmatprep.mubr.bf16.mxu0 %v1874_v48  ;;  %v1633_v58 = vld [vmem:[%s1824_s25 + $0x3a4] ss:$16 sps:$4 sm:$0xff]   ;;  %v1636_v60 = vld [vmem:[%s1824_s25 + $0x3a0] ss:$16 sps:$4 sm:$0xff]   ;;  %v1683_v29 = vld [vmem:[%s1824_s25 + $0xa8] ss:$16 sps:$4 sm:$0xff]  }
  0x35   : > { %v1637_v61 = vld [vmem:[%s1824_s25 + $0x1c4] ss:$16 sps:$4 sm:$0xff]   ;;  %v1641_v63 = vld [vmem:[%s1824_s25 + $0x1c0] ss:$16 sps:$4 sm:$0xff]   ;;  %v1686_v30 = vld [vmem:[%s1824_s25 + $0x2a8] ss:$16 sps:$4 sm:$0xff]  }
  0x36   : > { %1035 = vmatpush1.bf16.msra.mxu0 %v1599_v31  ;;  %v1639_v62 = vld [vmem:[%s1824_s25 + $0x3c4] ss:$16 sps:$4 sm:$0xff]   ;;  %v1642_v0 = vld [vmem:[%s1824_s25 + $0x3c0] ss:$16 sps:$4 sm:$0xff]   ;;  %v1691_v31 = vld [vmem:[%s1824_s25 + $0xcc] ss:$16 sps:$4 sm:$0xff]  }
  0x37   : > { %1076 = vmatpush1.bf16.msra.mxu1 %v1600_v32  ;;  %1036 = vmatprep.subr.bf16.mxu0 %v1601_v33  ;;  %v1643_v1 = vld [vmem:[%s1824_s25 + $0x1e4] ss:$16 sps:$4 sm:$0xff]   ;;  %v1647_v3 = vld [vmem:[%s1824_s25 + $0x1e0] ss:$16 sps:$4 sm:$0xff]   ;;  %v1694_v32 = vld [vmem:[%s1824_s25 + $0x2cc] ss:$16 sps:$4 sm:$0xff]  }
  0x38   : > { %1077 = vmatprep.subr.bf16.mxu1 %v1603_v34  ;;  %v1645_v2 = vld [vmem:[%s1824_s25 + $0x3e4] ss:$16 sps:$4 sm:$0xff]   ;;  %v1648_v4 = vld [vmem:[%s1824_s25 + $0x3e0] ss:$16 sps:$4 sm:$0xff]   ;;  %v1689_v33 = vld [vmem:[%s1824_s25 + $0xc8] ss:$16 sps:$4 sm:$0xff]  }
  0x39   : > { %v1692_v34 = vld [vmem:[%s1824_s25 + $0x2c8] ss:$16 sps:$4 sm:$0xff]   ;;  %v1715_v47 = vld [vmem:[%s1824_s25 + $0x14c] ss:$16 sps:$4 sm:$0xff]  }
  0x3a   : > { %1037 = vmatpush1.bf16.msra.mxu0 %v1605_v35  ;;  %v1697_v35 = vld [vmem:[%s1824_s25 + $0xec] ss:$16 sps:$4 sm:$0xff]  }
  0x3b   : > { %1078 = vmatpush1.bf16.msra.mxu1 %v1606_v36  ;;  %1038 = vmatprep.subr.bf16.mxu0 %v1607_v37  ;;  %v1700_v36 = vld [vmem:[%s1824_s25 + $0x2ec] ss:$16 sps:$4 sm:$0xff]   ;;  %v1695_v37 = vld [vmem:[%s1824_s25 + $0xe8] ss:$16 sps:$4 sm:$0xff]  }
  0x3c   : > { %1079 = vmatprep.subr.bf16.mxu1 %v1609_v38  ;;  %v1698_v38 = vld [vmem:[%s1824_s25 + $0x2e8] ss:$16 sps:$4 sm:$0xff]  }
  0x3e   : > { %1039 = vmatpush1.bf16.msra.mxu0 %v1611_v39  ;;  %v1703_v39 = vld [vmem:[%s1824_s25 + $0x10c] ss:$16 sps:$4 sm:$0xff]  }
  0x3f   : > { %1080 = vmatpush1.bf16.msra.mxu1 %v1612_v40  ;;  %1040 = vmatprep.subr.bf16.mxu0 %v1613_v41  ;;  %v1706_v40 = vld [vmem:[%s1824_s25 + $0x30c] ss:$16 sps:$4 sm:$0xff]   ;;  %v1701_v41 = vld [vmem:[%s1824_s25 + $0x108] ss:$16 sps:$4 sm:$0xff]  }
  0x40   : > { %1081 = vmatprep.subr.bf16.mxu1 %v1615_v42  ;;  %v1704_v42 = vld [vmem:[%s1824_s25 + $0x308] ss:$16 sps:$4 sm:$0xff]  }
  0x42   : > { %1041 = vmatpush1.bf16.msra.mxu0 %v1617_v43  ;;  %v1709_v43 = vld [vmem:[%s1824_s25 + $0x12c] ss:$16 sps:$4 sm:$0xff]  }
  0x43   : > { %1082 = vmatpush1.bf16.msra.mxu1 %v1618_v44  ;;  %1042 = vmatprep.subr.bf16.mxu0 %v1619_v45  ;;  %v1712_v44 = vld [vmem:[%s1824_s25 + $0x32c] ss:$16 sps:$4 sm:$0xff]   ;;  %v1707_v45 = vld [vmem:[%s1824_s25 + $0x128] ss:$16 sps:$4 sm:$0xff]  }
  0x44   : > { %1083 = vmatprep.subr.bf16.mxu1 %v1621_v46  ;;  %v1710_v46 = vld [vmem:[%s1824_s25 + $0x328] ss:$16 sps:$4 sm:$0xff]  }
  0x46   : > { %1043 = vmatpush1.bf16.msra.mxu0 %v1623_v50  ;;  %v1716_v50 = vld [vmem:[%s1824_s25 + $0x348] ss:$16 sps:$4 sm:$0xff]  }
  0x47   : > { %1084 = vmatpush1.bf16.msra.mxu1 %v1624_v51  ;;  %1044 = vmatprep.subr.bf16.mxu0 %v1625_v53  ;;  %v1721_v51 = vld [vmem:[%s1824_s25 + $0x16c] ss:$16 sps:$4 sm:$0xff]   ;;  %v1719_v53 = vld [vmem:[%s1824_s25 + $0x168] ss:$16 sps:$4 sm:$0xff]  }
  0x48   : > { %1085 = vmatprep.subr.bf16.mxu1 %v1627_v54  ;;  %v1722_v54 = vld [vmem:[%s1824_s25 + $0x368] ss:$16 sps:$4 sm:$0xff]  }
  0x4a   : > { %1045 = vmatpush1.bf16.msra.mxu0 %v1629_v55  ;;  %v1727_v55 = vld [vmem:[%s1824_s25 + $0x18c] ss:$16 sps:$4 sm:$0xff]  }
  0x4b   : > { %1086 = vmatpush1.bf16.msra.mxu1 %v1630_v56  ;;  %1046 = vmatprep.subr.bf16.mxu0 %v1631_v57  ;;  %v1730_v56 = vld [vmem:[%s1824_s25 + $0x38c] ss:$16 sps:$4 sm:$0xff]   ;;  %v1725_v57 = vld [vmem:[%s1824_s25 + $0x188] ss:$16 sps:$4 sm:$0xff]  }
  0x4c   : > { %1087 = vmatprep.subr.bf16.mxu1 %v1633_v58  ;;  %v1728_v58 = vld [vmem:[%s1824_s25 + $0x388] ss:$16 sps:$4 sm:$0xff]  }
  0x4e   : > { %1047 = vmatpush1.bf16.msra.mxu0 %v1635_v59  ;;  %v1733_v59 = vld [vmem:[%s1824_s25 + $0x1ac] ss:$16 sps:$4 sm:$0xff]  }
  0x4f   : > { %1088 = vmatpush1.bf16.msra.mxu1 %v1636_v60  ;;  %1048 = vmatprep.subr.bf16.mxu0 %v1637_v61  ;;  %v1736_v60 = vld [vmem:[%s1824_s25 + $0x3ac] ss:$16 sps:$4 sm:$0xff]   ;;  %v1731_v61 = vld [vmem:[%s1824_s25 + $0x1a8] ss:$16 sps:$4 sm:$0xff]  }
  0x50   : > { %1089 = vmatprep.subr.bf16.mxu1 %v1639_v62  ;;  %v1734_v62 = vld [vmem:[%s1824_s25 + $0x3a8] ss:$16 sps:$4 sm:$0xff]  }
  0x52   : > { %1049 = vmatpush1.bf16.msra.mxu0 %v1641_v63  ;;  %v1739_v63 = vld [vmem:[%s1824_s25 + $0x1cc] ss:$16 sps:$4 sm:$0xff]  }
  0x53   : > { %1090 = vmatpush1.bf16.msra.mxu1 %v1642_v0  ;;  %1050 = vmatprep.subr.bf16.mxu0 %v1643_v1  ;;  %v1742_v0 = vld [vmem:[%s1824_s25 + $0x3cc] ss:$16 sps:$4 sm:$0xff]   ;;  %v1737_v1 = vld [vmem:[%s1824_s25 + $0x1c8] ss:$16 sps:$4 sm:$0xff]  }
  0x54   : > { %1091 = vmatprep.subr.bf16.mxu1 %v1645_v2  ;;  %v1740_v2 = vld [vmem:[%s1824_s25 + $0x3c8] ss:$16 sps:$4 sm:$0xff]  }
  0x56   : > { %1051 = vmatpush1.bf16.msra.mxu0 %v1647_v3  ;;  %v1745_v3 = vld [vmem:[%s1824_s25 + $0x1ec] ss:$16 sps:$4 sm:$0xff]  }
  0x57   : > { %1092 = vmatpush1.bf16.msra.mxu1 %v1648_v4  ;;  %1102 = vmatprep.subr.bf16.mxu0 %v1655_v5  ;;  %v1748_v4 = vld [vmem:[%s1824_s25 + $0x3ec] ss:$16 sps:$4 sm:$0xff]   ;;  %v1743_v5 = vld [vmem:[%s1824_s25 + $0x1e8] ss:$16 sps:$4 sm:$0xff]  }
  0x58   : > { %1143 = vmatprep.subr.bf16.mxu1 %v1658_v6  ;;  %v1746_v6 = vld [vmem:[%s1824_s25 + $0x3e8] ss:$16 sps:$4 sm:$0xff]  }
  0x59   : > { %1053 = vmatmul.mubr.bf16.vlgmr.msra.gmra.mrb[0].mxu0 %v1898_v7 }
  0x5a   : > { %1094 = vmatmul.mubr.bf16.vlgmr.msra.gmra.mrb[0].mxu1 %v1900_v8  ;;  %1103 = vmatpush1.bf16.msra.mxu0 %v1653_v9 }
  0x5b   : > { %1144 = vmatpush1.bf16.msra.mxu1 %v1656_v10  ;;  %1104 = vmatprep.subr.bf16.mxu0 %v1661_v11  ;;  %v232_v10 = vld [vmem:[#allocation2] sm:$0xff] }
  0x5c   : > { %1145 = vmatprep.subr.bf16.mxu1 %v1664_v12  ;;  %1134 = vmatprep.mubr.bf16.mxu0 %v1874_v48  ;;  %v1718_v48 = vld [vmem:[%s1824_s25 + $0x34c] ss:$16 sps:$4 sm:$0xff]  }
  0x5d   : > { %1175 = vmatprep.mubr.bf16.mxu1 %v1382_v52  ;;  %v1724_v52 = vld [vmem:[%s1824_s25 + $0x36c] ss:$16 sps:$4 sm:$0xff]  }
  0x5e   : > { %1105 = vmatpush1.bf16.msra.mxu0 %v1659_v13 }
  0x5f   : > { %1146 = vmatpush1.bf16.msra.mxu1 %v1662_v14  ;;  %1106 = vmatprep.subr.bf16.mxu0 %v1667_v15  ;;  %v233_v14 = vld [vmem:[#allocation2 + $0x8] sm:$0xff] }
  0x60   : > { %1147 = vmatprep.subr.bf16.mxu1 %v1670_v16 }
  0x62   : > { %1107 = vmatpush1.bf16.msra.mxu0 %v1665_v17 }
  0x63   : > { %1148 = vmatpush1.bf16.msra.mxu1 %v1668_v18  ;;  %1108 = vmatprep.subr.bf16.mxu0 %v1673_v19 }
  0x64   : > { %1149 = vmatprep.subr.bf16.mxu1 %v1676_v20 }
  0x66   : > { %1109 = vmatpush1.bf16.msra.mxu0 %v1671_v21 }
  0x67   : > { %1150 = vmatpush1.bf16.msra.mxu1 %v1674_v22  ;;  %1110 = vmatprep.subr.bf16.mxu0 %v1679_v23 }
  0x68   : > { %1151 = vmatprep.subr.bf16.mxu1 %v1682_v24 }
  0x6a   : > { %1111 = vmatpush1.bf16.msra.mxu0 %v1677_v25 }
  0x6b   : > { %1152 = vmatpush1.bf16.msra.mxu1 %v1680_v26  ;;  %1112 = vmatprep.subr.bf16.mxu0 %v1685_v27  ;;  %v235_v26 = vld [vmem:[#allocation2 + $0x18] sm:$0xff] }
  0x6c   : > { %1153 = vmatprep.subr.bf16.mxu1 %v1688_v28 }
  0x6e   : > { %1113 = vmatpush1.bf16.msra.mxu0 %v1683_v29 }
  0x6f   : > { %1154 = vmatpush1.bf16.msra.mxu1 %v1686_v30  ;;  %1114 = vmatprep.subr.bf16.mxu0 %v1691_v31 }
  0x70   : > { %1155 = vmatprep.subr.bf16.mxu1 %v1694_v32 }
  0x72   : > { %1115 = vmatpush1.bf16.msra.mxu0 %v1689_v33 }
  0x73   : > { %1156 = vmatpush1.bf16.msra.mxu1 %v1692_v34  ;;  %1116 = vmatprep.subr.bf16.mxu0 %v1697_v35 }
  0x74   : > { %1157 = vmatprep.subr.bf16.mxu1 %v1700_v36 }
  0x76   : > { %1117 = vmatpush1.bf16.msra.mxu0 %v1695_v37  ;;  %v1223_v37 = vlaneseq (!%p1511_p7) }
  0x77   : > { %1158 = vmatpush1.bf16.msra.mxu1 %v1698_v38  ;;  %1118 = vmatprep.subr.bf16.mxu0 %v1703_v39 }
  0x78   : > { %1159 = vmatprep.subr.bf16.mxu1 %v1706_v40 }
  0x7a   : > { %1119 = vmatpush1.bf16.msra.mxu0 %v1701_v41 }
  0x7b   : > { %1160 = vmatpush1.bf16.msra.mxu1 %v1704_v42  ;;  %1120 = vmatprep.subr.bf16.mxu0 %v1709_v43  ;;  %v1224_v42 = vshrl.u32 (!%p1511_p7), %v1223_v37, 7 }
  0x7c   : > { %1161 = vmatprep.subr.bf16.mxu1 %v1712_v44 }
  0x7e   : > { %1121 = vmatpush1.bf16.msra.mxu0 %v1707_v45 }
  0x7f   : > { %1162 = vmatpush1.bf16.msra.mxu1 %v1710_v46  ;;  %1122 = vmatprep.subr.bf16.mxu0 %v1715_v47  ;;  %v1221_v47 = vld [vmem:[%s1990_s2] sm:$0xf] (!%p1511_p7) }
  0x80   : > { %1163 = vmatprep.subr.bf16.mxu1 %v1718_v48  ;;  %v1225_v48 = vsub.s32 (!%p1511_p7), 0, %v1224_v42 }
  0x82   : > { %1123 = vmatpush1.bf16.msra.mxu0 %v1713_v49  ;;  %v1229_v49 = vsub.s32 (!%p1511_p7), 1, %v1224_v42 }
  0x83   : > { %1164 = vmatpush1.bf16.msra.mxu1 %v1716_v50  ;;  %1124 = vmatprep.subr.bf16.mxu0 %v1721_v51 }
  0x84   : > { %1165 = vmatprep.subr.bf16.mxu1 %v1724_v52 }
  0x86   : > { %1125 = vmatpush1.bf16.msra.mxu0 %v1719_v53 }
  0x87   : > { %1166 = vmatpush1.bf16.msra.mxu1 %v1722_v54  ;;  %1126 = vmatprep.subr.bf16.mxu0 %v1727_v55  ;;  %v1233_v54 = vsub.s32 (!%p1511_p7), 2, %v1224_v42  ;;  %v1237_v55 = vsub.s32 (!%p1511_p7), 3, %v1224_v42 }
  0x88   : > { %1167 = vmatprep.subr.bf16.mxu1 %v1730_v56 }
  0x8a   : > { %1127 = vmatpush1.bf16.msra.mxu0 %v1725_v57 }
  0x8b   : > { %1168 = vmatpush1.bf16.msra.mxu1 %v1728_v58  ;;  %1128 = vmatprep.subr.bf16.mxu0 %v1733_v59 }
  0x8c   : > { %1169 = vmatprep.subr.bf16.mxu1 %v1736_v60  ;;  %v1226_v60 = vrot.slane (!%p1511_p7), %v1221_v47, %v1225_v48 }
  0x8e   : > { %1129 = vmatpush1.bf16.msra.mxu0 %v1731_v61  ;;  %v1230_v61 = vrot.slane (!%p1511_p7), %v1221_v47, %v1229_v49 }
  0x8f   : > { %1170 = vmatpush1.bf16.msra.mxu1 %v1734_v62  ;;  %1130 = vmatprep.subr.bf16.mxu0 %v1739_v63 }
  0x90   : > { %1171 = vmatprep.subr.bf16.mxu1 %v1742_v0  ;;  %v1234_v0 = vrot.slane (!%p1511_p7), %v1221_v47, %v1233_v54 }
  0x92   : > { %1131 = vmatpush1.bf16.msra.mxu0 %v1737_v1  ;;  %v1238_v1 = vrot.slane (!%p1511_p7), %v1221_v47, %v1237_v55 }
  0x93   : > { %1172 = vmatpush1.bf16.msra.mxu1 %v1740_v2  ;;  %1132 = vmatprep.subr.bf16.mxu0 %v1745_v3 }
  0x94   : > { %1173 = vmatprep.subr.bf16.mxu1 %v1748_v4 }
  0x96   : > { %1133 = vmatpush1.bf16.msra.mxu0 %v1743_v5 }
  0x97   : > { %1174 = vmatpush1.bf16.msra.mxu1 %v1746_v6 }
  0x99   : > { %1135 = vmatmul.mubr.bf16.vlgmr.msra.gmra.mrb[4].mxu0 %v1898_v7  ;;  %v234_v7 = vld [vmem:[#allocation2 + $0x10] sm:$0xff] }
  0x9a   : > { %1176 = vmatmul.mubr.bf16.vlgmr.msra.gmra.mrb[4].mxu1 %v1900_v8 }
 0x12c   : > { %v1054_v9 = vpop.f32.mrb[0].mxu0 }
 0x12d   : > { %v1095_v11 = vpop.f32.mrb[0].mxu1  ;;  %v1056_v13 = vpop.f32.mrb[1].mxu0 }
 0x12e   : > { %v1096_v12 = vadd.f32 %v1095_v11, %v1054_v9  ;;  %v1097_v15 = vpop.f32.mrb[1].mxu1  ;;  %v1058_v17 = vpop.f32.mrb[2].mxu0 }
 0x12f   : > { %v1098_v16 = vadd.f32 %v1097_v15, %v1056_v13  ;;  %v1099_v18 = vpop.f32.mrb[2].mxu1  ;;  %v1059_v20 = vpop.f32.mrb[3].mxu0 }
 0x130   : > { %v1184_v19 = vadd.f32 %v1096_v12, %v232_v10  ;;  %v1100_v21 = vpop.f32.mrb[3].mxu1 }
 0x131   : > { %v1185_v22 = vadd.f32 %v1098_v16, %v233_v14 }
 0x132   : > { %1188 = vst [vmem:[#allocation2] sm:$0xff] %v1184_v19 }
 0x133   : > { %1189 = vst [vmem:[#allocation2 + $0x8] sm:$0xff] %v1185_v22 }
 0x139   : > { %v1196_v35 = vld [vmem:[#allocation2] sm:$0xff] (!%p1511_p7) }
 0x13a   : > { %v1197_v36 = vld [vmem:[#allocation2 + $0x8] sm:$0xff] (!%p1511_p7)  ;;  %v1201_v38 = vmul.f32 (!%p1511_p7), 1024.0, %v1196_v35 }
 0x13b   : > { %v1202_v39 = vmul.f32 (!%p1511_p7), 1024.0, %v1197_v36 }
 0x13c   : > { %v1520_v45 = vround.rtne.f32 (!%p1511_p7), %v1201_v38 }
 0x13d   : > { %v1521_v46 = vround.rtne.f32 (!%p1511_p7), %v1202_v39 }
 0x13e   : > { %v1209_v52 = vmax.f32 (!%p1511_p7), %v1520_v45, -32768.0 }
 0x13f   : > { %v1210_v53 = vmax.f32 (!%p1511_p7), %v1521_v46, -32768.0 }
 0x140   : > { %v1213_v58 = vmin.f32 (!%p1511_p7), %v1209_v52, 32767.0 }
 0x141   : > { %v1214_v59 = vmin.f32 (!%p1511_p7), %v1210_v53, 32767.0 }
 0x142   : > { %v1217_v2 = vmul.f32 (!%p1511_p7), 0.0009765625, %v1213_v58 }
 0x143   : > { %v1218_v3 = vmul.f32 (!%p1511_p7), 0.0009765625, %v1214_v59 }
 0x144   : > { %v1243_v6 = vadd.f32 (!%p1511_p7), %v1226_v60, %v1217_v2 }
 0x145   : > { %v1244_v9 = vadd.f32 (!%p1511_p7), %v1230_v61, %v1218_v3 }
 0x146   : > { %v1248_v12 = vmul.f32 (!%p1511_p7), 16.0, %v1243_v6 }
 0x147   : > { %v1249_v13 = vmul.f32 (!%p1511_p7), 16.0, %v1244_v9 }
 0x148   : > { %v1524_v16 = vround.rtne.f32 (!%p1511_p7), %v1248_v12 }
 0x149   : > { %v1525_v17 = vround.rtne.f32 (!%p1511_p7), %v1249_v13 }
 0x14a   : > { %v1256_v20 = vmax.f32 (!%p1511_p7), %v1524_v16, -128.0 }
 0x14b   : > { %v1257_v21 = vmax.f32 (!%p1511_p7), %v1525_v17, -128.0 }
 0x16c   : > { %v1136_v23 = vpop.f32.mrb[4].mxu0 }
 0x16d   : > { %v1177_v24 = vpop.f32.mrb[4].mxu1  ;;  %v1138_v25 = vpop.f32.mrb[5].mxu0  ;;  %1195 = sbr.rel (%p1511_p7) target bundleno = 406 (0x196), region = 40 }
 0x16e   : > { %v1178_v8 = vadd.f32 %v1177_v24, %v1136_v23  ;;  %v1179_v27 = vpop.f32.mrb[5].mxu1  ;;  %v1140_v29 = vpop.f32.mrb[6].mxu0  ;;  %v1261_v24 = vmin.f32 (!%p1511_p7), %v1257_v21, 127.0 }
 0x16f   : > { %v1180_v28 = vadd.f32 %v1179_v27, %v1138_v25  ;;  %v1181_v30 = vpop.f32.mrb[6].mxu1  ;;  %v1141_v32 = vpop.f32.mrb[7].mxu0 }
 0x170   : > { %v1186_v31 = vadd.f32 %v1178_v8, %v234_v7  ;;  %v1182_v33 = vpop.f32.mrb[7].mxu1  ;;  %v1260_v7 = vmin.f32 (!%p1511_p7), %v1256_v20, 127.0  ;;  %v1265_v27 = vmul.f32 (!%p1511_p7), 0.0625, %v1261_v24 }
 0x171   : > { %v1187_v34 = vadd.f32 %v1180_v28, %v235_v26 }
 0x172   : > { %1190 = vst [vmem:[#allocation2 + $0x10] sm:$0xff] %v1186_v31  ;;  %v1264_v26 = vmul.f32 (!%p1511_p7), 0.0625, %v1260_v7  ;;  %v1269_v31 = vmax.f32 (!%p1511_p7), %v1265_v27, 0.0 }
 0x173   : > { %1191 = vst [vmem:[#allocation2 + $0x18] sm:$0xff] %v1187_v34 }
 0x174   : > { %v1268_v30 = vmax.f32 %v1264_v26, 0.0 }
 0x176   : > { %v1518_v34 = vpack.c.bf16 %v1269_v31, %v1268_v30 }
 0x178   : > { %1288 = vst [vmem:[%s1991_s3] sm:$0xff] %v1518_v34 }
 0x179   : > { %v1198_v40 = vld [vmem:[#allocation2 + $0x10] sm:$0xff] }
 0x17a   : > { %v1199_v41 = vld [vmem:[#allocation2 + $0x18] sm:$0xff]  ;;  %v1203_v43 = vmul.f32 1024.0, %v1198_v40 }
 0x17b   : > { %v1204_v44 = vmul.f32 1024.0, %v1199_v41 }
 0x17c   : > { %v1522_v50 = vround.rtne.f32 %v1203_v43 }
 0x17d   : > { %v1523_v51 = vround.rtne.f32 %v1204_v44 }
 0x17e   : > { %v1211_v56 = vmax.f32 %v1522_v50, -32768.0 }
 0x17f   : > { %v1212_v57 = vmax.f32 %v1523_v51, -32768.0 }
 0x180   : > { %v1215_v62 = vmin.f32 %v1211_v56, 32767.0 }
 0x181   : > { %v1216_v63 = vmin.f32 %v1212_v57, 32767.0 }
 0x182   : > { %v1219_v4 = vmul.f32 0.0009765625, %v1215_v62 }
 0x183   : > { %v1220_v5 = vmul.f32 0.0009765625, %v1216_v63 }
 0x184   : > { %v1245_v10 = vadd.f32 %v1234_v0, %v1219_v4 }
 0x185   : > { %v1246_v11 = vadd.f32 %v1238_v1, %v1220_v5 }
 0x186   : > { %v1250_v14 = vmul.f32 16.0, %v1245_v10 }
 0x187   : > { %v1251_v15 = vmul.f32 16.0, %v1246_v11 }
 0x188   : > { %v1526_v18 = vround.rtne.f32 %v1250_v14 }
 0x189   : > { %v1527_v19 = vround.rtne.f32 %v1251_v15 }
 0x18a   : > { %v1258_v22 = vmax.f32 %v1526_v18, -128.0 }
 0x18b   : > { %v1259_v23 = vmax.f32 %v1527_v19, -128.0 }
 0x18c   : > { %v1262_v8 = vmin.f32 %v1258_v22, 127.0 }
 0x18d   : > { %v1263_v25 = vmin.f32 %v1259_v23, 127.0 }
 0x18e   : > { %v1266_v28 = vmul.f32 0.0625, %v1262_v8 }
 0x18f   : > { %v1267_v29 = vmul.f32 0.0625, %v1263_v25 }
 0x190   : > { %v1270_v32 = vmax.f32 %v1266_v28, 0.0 }
 0x191   : > { %v1271_v33 = vmax.f32 %v1267_v29, 0.0 }
 0x193   : > { %v1519_v35 = vpack.c.bf16 %v1271_v33, %v1270_v32 }
 0x195   : > { %1289 = vst [vmem:[%s1991_s3 + $0x8] sm:$0xff] %v1519_v35 }
 0x196 PF: > { %s13_s14 = sadd.s32 1, %s1771_s14   ;;  %s1992_s12 = smov %s1767_s13 }
 0x197   : > { %p10_p8 = scmp.ge.s32.totalorder %s13_s14, 11   ;;  %s1993_s13 = smov %s1995_s15 }
 0x199   :  { %12 = sbr.rel (!%p10_p8) target bundleno = 2 (0x2), region = 73 }

// kernel: _lambda_.41
= control target key start
LH: loop header
LB: loop body
LE: loop exit
PB: predicated region body
PF: predicated region fallthrough
CT: control target
= control target key end

     0   :  { %s651_s1 = inlined_call_operand.vmem [shape: bf16[512,128], index: 1, kind: input, shape index: {}]   ;;  %s652_s0 = inlined_call_operand.vmem [shape: bf16[8,512], index: 0, kind: input, shape index: {}]   ;;  %s653_s2 = inlined_call_operand.vmem [shape: f32[1,128], index: 2, kind: input, shape index: {}]   ;;  %s654_s3 = inlined_call_operand.vmem [shape: f32[8,128], index: 3, kind: output, shape index: {}]  }
   0x1   :  { %v487_v0 = vld [vmem:[%s651_s1 + $0x40] sm:$0xff]   ;;  %v491_v4 = vld [vmem:[%s651_s1 + $0x48] sm:$0xff]   ;;  %v495_v8 = vld [vmem:[%s651_s1 + $0x50] sm:$0xff]  }
   0x2   :  { %v488_v1 = vld [vmem:[%s651_s1 + $0xc0] sm:$0xff]   ;;  %441 = vmatprep.subr.bf16.mxu0 %v487_v0  ;;  %v492_v5 = vld [vmem:[%s651_s1 + $0xc8] sm:$0xff]   ;;  %v496_v9 = vld [vmem:[%s651_s1 + $0xd0] sm:$0xff]  }
   0x3   :  { %v489_v2 = vld [vmem:[%s651_s1] sm:$0xff]   ;;  %463 = vmatprep.subr.bf16.mxu1 %v488_v1  ;;  %v493_v6 = vld [vmem:[%s651_s1 + $0x8] sm:$0xff]   ;;  %v497_v10 = vld [vmem:[%s651_s1 + $0x10] sm:$0xff]  }
   0x4   :  { %v490_v3 = vld [vmem:[%s651_s1 + $0x80] sm:$0xff]   ;;  %442 = vmatpush3.bf16.msra.mxu0 %v489_v2  ;;  %v494_v7 = vld [vmem:[%s651_s1 + $0x88] sm:$0xff]   ;;  %v498_v11 = vld [vmem:[%s651_s1 + $0x90] sm:$0xff]  }
   0x5   :  { %464 = vmatpush3.bf16.msra.mxu1 %v490_v3  ;;  %443 = vmatprep.subr.bf16.mxu0 %v491_v4  ;;  %v499_v12 = vld [vmem:[%s651_s1 + $0x58] sm:$0xff]   ;;  %v503_v16 = vld [vmem:[%s651_s1 + $0x60] sm:$0xff]   ;;  %v507_v20 = vld [vmem:[%s651_s1 + $0x68] sm:$0xff]  }
   0x6   :  { %465 = vmatprep.subr.bf16.mxu1 %v492_v5  ;;  %v500_v13 = vld [vmem:[%s651_s1 + $0xd8] sm:$0xff]   ;;  %v504_v17 = vld [vmem:[%s651_s1 + $0xe0] sm:$0xff]   ;;  %v508_v21 = vld [vmem:[%s651_s1 + $0xe8] sm:$0xff]  }
   0x7   :  { %v501_v14 = vld [vmem:[%s651_s1 + $0x18] sm:$0xff]   ;;  %v505_v18 = vld [vmem:[%s651_s1 + $0x20] sm:$0xff]   ;;  %v509_v22 = vld [vmem:[%s651_s1 + $0x28] sm:$0xff]  }
   0x8   :  { %444 = vmatpush3.bf16.msra.mxu0 %v493_v6  ;;  %v502_v15 = vld [vmem:[%s651_s1 + $0x98] sm:$0xff]   ;;  %v506_v19 = vld [vmem:[%s651_s1 + $0xa0] sm:$0xff]   ;;  %v510_v23 = vld [vmem:[%s651_s1 + $0xa8] sm:$0xff]  }
   0x9   :  { %466 = vmatpush3.bf16.msra.mxu1 %v494_v7  ;;  %445 = vmatprep.subr.bf16.mxu0 %v495_v8  ;;  %v511_v24 = vld [vmem:[%s651_s1 + $0x70] sm:$0xff]   ;;  %v515_v28 = vld [vmem:[%s651_s1 + $0x78] sm:$0xff]   ;;  %v21_v32 = vld [vmem:[%s652_s0] sm:$0xff] }
   0xa   :  { %467 = vmatprep.subr.bf16.mxu1 %v496_v9  ;;  %v512_v25 = vld [vmem:[%s651_s1 + $0xf0] sm:$0xff]   ;;  %v516_v29 = vld [vmem:[%s651_s1 + $0xf8] sm:$0xff]   ;;  %v22_v33 = vld [vmem:[%s652_s0 + $0x8] sm:$0xff]  ;;  %v404_v34 = vcombine.low %v21_v32, %v21_v32  ;;  %v405_v35 = vcombine.high %v21_v32, %v21_v32 }
   0xb   :  { %v513_v26 = vld [vmem:[%s651_s1 + $0x30] sm:$0xff]   ;;  %v517_v30 = vld [vmem:[%s651_s1 + $0x38] sm:$0xff]   ;;  %v406_v36 = vcombine.low %v22_v33, %v22_v33  ;;  %v407_v37 = vcombine.high %v22_v33, %v22_v33  ;;  %v440_v53 = vld [vmem:[%s653_s2] ss:$0 sm:$0xff] }
   0xc   :  { %446 = vmatpush3.bf16.msra.mxu0 %v497_v10  ;;  %v514_v27 = vld [vmem:[%s651_s1 + $0xb0] sm:$0xff]   ;;  %v518_v31 = vld [vmem:[%s651_s1 + $0xb8] sm:$0xff]   ;;  %325 = vmatprep.mubr.bf16.mxu0 %v405_v35 }
   0xd   :  { %468 = vmatpush3.bf16.msra.mxu1 %v498_v11  ;;  %447 = vmatprep.subr.bf16.mxu0 %v499_v12 }
   0xe   :  { %469 = vmatprep.subr.bf16.mxu1 %v500_v13  ;;  %365 = vmatprep.mubr.bf16.mxu1 %v407_v37 }
  0x10   :  { %448 = vmatpush3.bf16.msra.mxu0 %v501_v14 }
  0x11   :  { %470 = vmatpush3.bf16.msra.mxu1 %v502_v15  ;;  %449 = vmatprep.subr.bf16.mxu0 %v503_v16 }
  0x12   :  { %471 = vmatprep.subr.bf16.mxu1 %v504_v17 }
  0x14   :  { %450 = vmatpush3.bf16.msra.mxu0 %v505_v18 }
  0x15   :  { %472 = vmatpush3.bf16.msra.mxu1 %v506_v19  ;;  %451 = vmatprep.subr.bf16.mxu0 %v507_v20 }
  0x16   :  { %473 = vmatprep.subr.bf16.mxu1 %v508_v21 }
  0x18   :  { %452 = vmatpush3.bf16.msra.mxu0 %v509_v22 }
  0x19   :  { %474 = vmatpush3.bf16.msra.mxu1 %v510_v23  ;;  %453 = vmatprep.subr.bf16.mxu0 %v511_v24 }
  0x1a   :  { %475 = vmatprep.subr.bf16.mxu1 %v512_v25 }
  0x1c   :  { %454 = vmatpush3.bf16.msra.mxu0 %v513_v26 }
  0x1d   :  { %476 = vmatpush3.bf16.msra.mxu1 %v514_v27  ;;  %455 = vmatprep.subr.bf16.mxu0 %v515_v28 }
  0x1e   :  { %477 = vmatprep.subr.bf16.mxu1 %v516_v29 }
  0x20   :  { %456 = vmatpush3.bf16.msra.mxu0 %v517_v30 }
  0x21   :  { %478 = vmatpush3.bf16.msra.mxu1 %v518_v31 }
  0x23   :  { %326 = vmatmul.mubr.bf16.vlgmr.msra.gmra.mrb[0].mxu0 %v404_v34 }
  0x24   :  { %366 = vmatmul.mubr.bf16.vlgmr.msra.gmra.mrb[0].mxu1 %v406_v36 }
  0xf6   :  { %v457_v38 = vpop.f32.mrb[0].mxu0 }
  0xf7   :  { %v479_v39 = vpop.f32.mrb[0].mxu1  ;;  %v458_v40 = vpop.f32.mrb[1].mxu0 }
  0xf8   :  { %v480_v41 = vpop.f32.mrb[1].mxu1  ;;  %v459_v42 = vadd.f32 %v458_v40, %v457_v38  ;;  %v460_v44 = vpop.f32.mrb[2].mxu0 }
  0xf9   :  { %v481_v43 = vadd.f32 %v480_v41, %v479_v39  ;;  %v482_v45 = vpop.f32.mrb[2].mxu1  ;;  %v461_v46 = vpop.f32.mrb[3].mxu0 }
  0xfa   :  { %v483_v47 = vpop.f32.mrb[3].mxu1 }
  0xfb   :  { %v368_v48 = vadd.f32 %v481_v43, %v459_v42 }
  0xfd   :  { %v380_v49 = vmul.f32 1024.0, %v368_v48 }
  0xff   :  { %v485_v50 = vround.rtne.f32 %v380_v49 }
 0x101   :  { %v382_v51 = vmax.f32 %v485_v50, -32768.0 }
 0x103   :  { %v383_v52 = vmin.f32 %v382_v51, 32767.0 }
 0x105   :  { %v384_v54 = vmul.f32 0.0009765625, %v383_v52 }
 0x107   :  { %v392_v55 = vadd.f32 %v440_v53, %v384_v54 }
 0x109   :  { %v394_v56 = vmul.f32 64.0, %v392_v55 }
 0x10b   :  { %v486_v57 = vround.rtne.f32 %v394_v56 }
 0x10d   :  { %v396_v58 = vmax.f32 %v486_v57, -128.0 }
 0x10f   :  { %v397_v59 = vmin.f32 %v396_v58, 127.0 }
 0x111   :  { %v398_v60 = vmul.f32 0.015625, %v397_v59 }
 0x113   :  { %399 = vst [vmem:[%s654_s3] sm:$0xff] %v398_v60 }

</bundles_post_ra>
